<compile_context>
chip_gen: v5e
topology: v5e:2x2
jax: 0.10.0
libtpu: 0.0.40
codegen_flags: <defaults>
</compile_context>

<pallas_src>
import math

import jax
import jax.numpy as jnp
import numpy as np
from jax import lax
from jax.experimental import pallas as pl
from jax.experimental.pallas import tpu as pltpu

_NUM_CONV = 4                # conv tower depth (Conv2dNormActivation x4)
_HALO = _NUM_CONV + 1        # 5 stacked 3x3 convs -> 5-row halo per side


def _round_up(x, m):
    return ((x + m - 1) // m) * m


def _choose_tile_h(H, W, C, Kpad, vmem_budget_bytes=24 * 1024 * 1024):
    """Output-tile height so the fused working set fits a conservative VMEM
    budget (headroom for v7x's 64 MiB VMEM; v5e/v6e have 128 MiB)."""
    per_row = (((W + 2) * C * 2) * 3            # bf16 input tile (x2 buf) + scratch
               + (W * Kpad * 4) * 2             # f32 output tile, double-buffered
               + (W * max(C, Kpad) * 4) * 2)    # f32 accumulator / tap temps
    th = vmem_budget_bytes // max(per_row, 1) - 2 * _HALO
    th = int(max(8, th))
    if th >= H:
        return H
    return max(8, (th // 8) * 8)


def _make_fused_head_kernel(H, W, C, Kpad, TH):
    """Fused kernel for one (batch-element, H-tile) grid step.

    Refs:
      x_ref : (1, 1, TH+2*HALO, W+2, C)  bf16 halo-extended, width-padded tile
      wc_ref: (4, 3, 3, C, C)            bf16 stacked conv-tower weights (HWIO)
      bc_ref: (4, 1, C)                  f32  conv-tower biases
      wk_ref: (3, 3, C, Kpad)            bf16 cls weights, Cout padded to 128k
      bk_ref: (1, Kpad)                  f32  cls bias (padded)
      o_ref : (1, 1, TH, W, Kpad)        f32  logits tile (lane-dense Kpad)
      buf_ref: VMEM (TH+2*HALO, W+2, C)  bf16 working activations
    """
    R0 = TH + 2 * _HALO

    def kernel(x_ref, wc_ref, bc_ref, wk_ref, bk_ref, o_ref, buf_ref):
        t = pl.program_id(1)

        # The two width-padding columns stay zero for every fused layer
        # (layers only ever write columns [1, W+1)).
        zcol = jnp.zeros((R0, 1, C), buf_ref.dtype)
        buf_ref[:, 0:1, :] = zcol
        buf_ref[:, W + 1:W + 2, :] = zcol

        def conv3x3(load, weight, bias, rows_out, cout):
            # 9-tap accumulation: each tap is a bf16 2-D MXU matmul with f32
            # accumulation; accumulator starts from the broadcast bias.
            acc = None
            for dy in range(3):
                for dx in range(3):
                    lhs = load(dy, dx).reshape(rows_out * W, C)
                    tap = jnp.dot(lhs, weight(dy, dx),
                                  preferred_element_type=jnp.float32)
                    acc = tap + bias if acc is None else acc + tap
            return acc  # (rows_out * W, cout) float32

        # ---- 4 x (3x3 conv + bias + ReLU), chained entirely in VMEM ----
        for l in range(1, _NUM_CONV + 1):
            rows_out = R0 - 2 * l
            r0 = l - 1
            if l == 1:
                load = (lambda dy, dx, r0=r0, ro=rows_out:
                        x_ref[0, 0, r0 + dy:r0 + dy + ro, dx:dx + W, :])
            else:
                load = (lambda dy, dx, r0=r0, ro=rows_out:
                        buf_ref[r0 + dy:r0 + dy + ro, dx:dx + W, :])
            weight = lambda dy, dx, li=l - 1: wc_ref[li, dy, dx]
            acc = conv3x3(load, weight, bc_ref[l - 1], rows_out, C)
            acc = jnp.maximum(acc, 0.0)
            out = acc.reshape(rows_out, W, C)
            # Per-layer zero "same"-padding semantics: rows outside the real
            # image must be zero at the next layer's input.
            g = (t * TH - _HALO + l
                 + lax.broadcasted_iota(jnp.int32, (rows_out, 1, 1), 0))
            out = jnp.where((g >= 0) & (g < H), out, 0.0)
            buf_ref[l:l + rows_out, 1:1 + W, :] = out.astype(buf_ref.dtype)

        # ---- cls_logits 3x3 conv (no ReLU), lane-dense padded Cout ----
        r0 = _NUM_CONV
        load = lambda dy, dx, r0=r0: buf_ref[r0 + dy:r0 + dy + TH, dx:dx + W, :]
        weight = lambda dy, dx: wk_ref[dy, dx]
        acc = conv3x3(load, weight, bk_ref[...], TH, Kpad)
        o_ref[0, 0] = acc.reshape(TH, W, Kpad).astype(o_ref.dtype)

    return kernel


def _fused_level_call(x_nhwc_bf16, wc, bc, wk, bk, *, H, W, C, Kpad, TH):
    """Run the fused 5-conv head on one FPN level.  Returns (N, nT, TH, W, Kpad) f32."""
    N = x_nhwc_bf16.shape[0]
    nT = -(-H // TH)
    R0 = TH + 2 * _HALO

    # Pad once per level: HALO rows each side (+ bottom fill to nT*TH) and one
    # zero column each side.  Halo-extended, overlapping H-tiles are
    # materialized host-side (overlap is only 2*HALO/TH of the input, and the
    # input is read exactly once by the fused kernel).
    xp = jnp.pad(x_nhwc_bf16,
                 ((0, 0), (_HALO, _HALO + nT * TH - H), (1, 1), (0, 0)))
    if nT == 1:
        tiles = xp[:, None]
    else:
        tiles = jnp.stack([xp[:, t * TH:t * TH + R0] for t in range(nT)], axis=1)

    kernel = _make_fused_head_kernel(H, W, C, Kpad, TH)
    return pl.pallas_call(
        kernel,
        out_shape=jax.ShapeDtypeStruct((N, nT, TH, W, Kpad), jnp.float32),
        grid_spec=pltpu.PrefetchScalarGridSpec(
            num_scalar_prefetch=0,
            grid=(N, nT),
            in_specs=[
                pl.BlockSpec((1, 1, R0, W + 2, C), lambda n, t: (n, t, 0, 0, 0)),
                # Constant index_map => DMA'd once, not per grid step.
                pl.BlockSpec((_NUM_CONV, 3, 3, C, C), lambda n, t: (0, 0, 0, 0, 0)),
                pl.BlockSpec((_NUM_CONV, 1, C), lambda n, t: (0, 0, 0)),
                pl.BlockSpec((3, 3, C, Kpad), lambda n, t: (0, 0, 0, 0)),
                pl.BlockSpec((1, Kpad), lambda n, t: (0, 0)),
            ],
            out_specs=pl.BlockSpec((1, 1, TH, W, Kpad),
                                   lambda n, t: (n, t, 0, 0, 0)),
            scratch_shapes=[pltpu.VMEM((R0, W + 2, C), jnp.bfloat16)],
        ),
        compiler_params=pltpu.CompilerParams(
            dimension_semantics=("parallel", "parallel"),
            vmem_limit_bytes=48 * 1024 * 1024),
    )(tiles, wc, bc, wk, bk)


def init_params(key, in_channels, num_anchors, num_classes,
                prior_probability=0.01, weight_std=0.01):
    """Synthetic init matching the PyTorch module's __init__ (weight_std=0.01,
    zero conv biases, prior-probability cls bias)."""
    params = {}
    keys = jax.random.split(key, 5)
    for i in range(_NUM_CONV):
        params[f"conv{i}_w"] = weight_std * jax.random.normal(
            keys[i], (3, 3, in_channels, in_channels), jnp.float32)
        params[f"conv{i}_b"] = jnp.zeros((in_channels,), jnp.float32)
    cls_out = num_anchors * num_classes
    params["cls_w"] = weight_std * jax.random.normal(
        keys[4], (3, 3, in_channels, cls_out), jnp.float32)
    params["cls_b"] = jnp.full(
        (cls_out,),
        -math.log((1.0 - prior_probability) / prior_probability),
        jnp.float32)
    return params


def retinanet_classification_head(xs_nchw, params, num_anchors, num_classes):
    """Forward over a list of NCHW feature maps; returns (N, sum H*W*A, K)."""
    C = params["conv0_w"].shape[2]
    Ko = num_anchors * num_classes
    Kpad = max(128, _round_up(Ko, 128))

    # Pack weights once: bf16 matmul operands, f32 biases, cls Cout padded to
    # a multiple of 128 for lane-dense stores.
    wc = jnp.stack([params[f"conv{i}_w"] for i in range(_NUM_CONV)]
                   ).astype(jnp.bfloat16)                        # (4,3,3,C,C)
    bc = jnp.stack([params[f"conv{i}_b"] for i in range(_NUM_CONV)]
                   ).astype(jnp.float32)[:, None, :]             # (4,1,C)
    wk = jnp.pad(params["cls_w"],
                 ((0, 0), (0, 0), (0, 0), (0, Kpad - Ko))).astype(jnp.bfloat16)
    bk = jnp.pad(params["cls_b"], ((0, Kpad - Ko),)
                 ).astype(jnp.float32)[None, :]                  # (1,Kpad)

    outs = []
    for x in xs_nchw:
        N, Cx, H, W = x.shape
        if Cx != C:
            raise ValueError(f"expected {C} channels, got {Cx}")
        xh = jnp.transpose(x, (0, 2, 3, 1)).astype(jnp.bfloat16)  # NCHW->NHWC
        TH = _choose_tile_h(H, W, C, Kpad)
        o = _fused_level_call(xh, wc, bc, wk, bk,
                              H=H, W=W, C=C, Kpad=Kpad, TH=TH)
        nT = o.shape[1]
        o = o.reshape(N, nT * TH, W, Kpad)[:, :H, :, :Ko]
        # NHWC channel index c = a*K + k, so this reshape matches PyTorch's
        # view(N,A,K,H,W).permute(0,3,4,1,2).reshape(N,-1,K) exactly.
        outs.append(o.reshape(N, H * W * num_anchors, num_classes))
    return jnp.concatenate(outs, axis=1)


# ----------------------------- f32 reference ------------------------------ #

def _reference_conv3x3(x_nhwc, w_hwio, bias, apply_relu):
    out = jax.lax.conv_general_dilated(
        x_nhwc, w_hwio, window_strides=(1, 1), padding="SAME",
        dimension_numbers=("NHWC", "HWIO", "NHWC"),
        precision=jax.lax.Precision.HIGHEST)
    out = out + bias[None, None, None, :]
    if apply_relu:
        out = jnp.maximum(out, 0.0)
    return out


def _reference_head(xs_nchw, params, num_anchors, num_classes):
    outs = []
    for x in xs_nchw:
        h = jnp.transpose(x, (0, 2, 3, 1))
        for i in range(_NUM_CONV):
            h = _reference_conv3x3(h, params[f"conv{i}_w"],
                                   params[f"conv{i}_b"], True)
        logits = _reference_conv3x3(h, params["cls_w"], params["cls_b"], False)
        N, H, W, _ = logits.shape
        outs.append(logits.reshape(N, H * W * num_anchors, num_classes))
    return jnp.concatenate(outs, axis=1)


if __name__ == "__main__":
    key = jax.random.PRNGKey(0)
    k_params, k_bias, k_x1, k_x2 = jax.random.split(key, 4)

    in_channels = 16
    num_anchors = 2
    num_classes = 4

    # PyTorch init (std=0.01, zero biases) makes every output ~= the cls prior
    # bias, which hides bugs; the forward is parameter-independent, so the
    # numerical check uses larger weights and nonzero conv biases (these also
    # exercise the in-kernel halo re-zeroing path).
    params = init_params(k_params, in_channels, num_anchors, num_classes,
                         weight_std=0.1)
    bkeys = jax.random.split(k_bias, _NUM_CONV)
    for i in range(_NUM_CONV):
        params[f"conv{i}_b"] = 0.1 * jax.random.normal(
            bkeys[i], (in_channels,), jnp.float32)

    # Two FPN levels (NCHW, like the PyTorch inputs).
    x1 = jax.random.normal(k_x1, (2, in_channels, 8, 8), jnp.float32)
    x2 = jax.random.normal(k_x2, (2, in_channels, 4, 4), jnp.float32)

    # Round-trip inputs/params through bf16 so the kernel's bf16 casts are
    # exact and the f32 reference sees identical values; the remaining delta
    # is only from bf16 intermediate activations.
    rt = lambda a: a.astype(jnp.bfloat16).astype(jnp.float32)
    params = {k: rt(v) for k, v in params.items()}
    xs = [rt(x1), rt(x2)]

    out = jax.block_until_ready(
        retinanet_classification_head(xs, params, num_anchors, num_classes))

    expected_rows = 8 * 8 * num_anchors + 4 * 4 * num_anchors
    assert out.shape == (2, expected_rows, num_classes), out.shape

    ref = jax.block_until_ready(
        _reference_head(xs, params, num_anchors, num_classes))
    np.testing.assert_allclose(np.asarray(out), np.asarray(ref),
                               rtol=2e-2, atol=2e-2)

    print("KERNEL_OK")
</pallas_src>

<mosaic_0001>
module attributes {stable_mosaic.version = 11 : i64} {
  func.func @kernel(%arg0: i32, %arg1: i32, %arg2: memref<1x1x18x10x16xbf16, #tpu.memory_space<vmem>>, %arg3: memref<4x3x3x16x16xbf16, #tpu.memory_space<vmem>>, %arg4: memref<4x1x16xf32, #tpu.memory_space<vmem>>, %arg5: memref<3x3x16x128xbf16, #tpu.memory_space<vmem>>, %arg6: memref<1x128xf32, #tpu.memory_space<vmem>>, %arg7: memref<1x1x8x8x128xf32, #tpu.memory_space<vmem>>, %arg8: memref<18x10x16xbf16, #tpu.memory_space<vmem>>) attributes {dimension_semantics = [#tpu.dimension_semantics<parallel>, #tpu.dimension_semantics<parallel>], iteration_bounds = array<i64: 2, 1>, scalar_prefetch = 0 : i64, scratch_operands = 1 : i64, tpu.core_type = #tpu.core_type<tc>, window_params = [{transform_indices = @transform_0, window_bounds = array<i64: 1, 1, 18, 10, 16>}, {pipeline_mode = #tpu.pipeline_mode<synchronous>, transform_indices = @transform_1, window_bounds = array<i64: 4, 3, 3, 16, 16>}, {pipeline_mode = #tpu.pipeline_mode<synchronous>, transform_indices = @transform_2, window_bounds = array<i64: 4, 1, 16>}, {pipeline_mode = #tpu.pipeline_mode<synchronous>, transform_indices = @transform_3, window_bounds = array<i64: 3, 3, 16, 128>}, {pipeline_mode = #tpu.pipeline_mode<synchronous>, transform_indices = @transform_4, window_bounds = array<i64: 1, 128>}, {transform_indices = @transform_5, window_bounds = array<i64: 1, 1, 8, 8, 128>}]} {
    %cst = arith.constant 0.000000e+00 : bf16
    %0 = vector.broadcast %cst : bf16 to vector<18x1x16xbf16>
    %c0 = arith.constant 0 : index
    %c0_0 = arith.constant 0 : index
    %c0_1 = arith.constant 0 : index
    %1 = vector.load %arg8[%c0, %c0_0, %c0_1] : memref<18x10x16xbf16, #tpu.memory_space<vmem>>, vector<18x1x16xbf16>
    tpu.vector_store %arg8[%c0, %c0_0, %c0_1], %0 {strides = array<i32>} : memref<18x10x16xbf16, #tpu.memory_space<vmem>>, vector<18x1x16xbf16>,
    %c0_2 = arith.constant 0 : index
    %c9 = arith.constant 9 : index
    %c0_3 = arith.constant 0 : index
    %2 = vector.load %arg8[%c0_2, %c9, %c0_3] : memref<18x10x16xbf16, #tpu.memory_space<vmem>>, vector<18x1x16xbf16>
    tpu.vector_store %arg8[%c0_2, %c9, %c0_3], %0 {strides = array<i32>} : memref<18x10x16xbf16, #tpu.memory_space<vmem>>, vector<18x1x16xbf16>,
    %c0_4 = arith.constant 0 : index
    %c0_5 = arith.constant 0 : index
    %c0_6 = arith.constant 0 : index
    %3 = vector.load %arg4[%c0_4, %c0_5, %c0_6] : memref<4x1x16xf32, #tpu.memory_space<vmem>>, vector<1x1x16xf32>
    %4 = vector.shape_cast %3 : vector<1x1x16xf32> to vector<1x16xf32>
    %c0_7 = arith.constant 0 : index
    %c0_8 = arith.constant 0 : index
    %c0_9 = arith.constant 0 : index
    %c0_10 = arith.constant 0 : index
    %c0_11 = arith.constant 0 : index
    %5 = vector.load %arg2[%c0_7, %c0_8, %c0_9, %c0_10, %c0_11] : memref<1x1x18x10x16xbf16, #tpu.memory_space<vmem>>, vector<1x1x16x8x16xbf16>
    %6 = vector.shape_cast %5 : vector<1x1x16x8x16xbf16> to vector<16x8x16xbf16>
    %7 = vector.shape_cast %6 : vector<16x8x16xbf16> to vector<128x16xbf16>
    %c0_12 = arith.constant 0 : index
    %c0_13 = arith.constant 0 : index
    %c0_14 = arith.constant 0 : index
    %c0_15 = arith.constant 0 : index
    %c0_16 = arith.constant 0 : index
    %8 = vector.load %arg3[%c0_12, %c0_13, %c0_14, %c0_15, %c0_16] : memref<4x3x3x16x16xbf16, #tpu.memory_space<vmem>>, vector<1x1x1x16x16xbf16>
    %9 = vector.shape_cast %8 : vector<1x1x1x16x16xbf16> to vector<16x16xbf16>
    %cst_17 = arith.constant dense<0.000000e+00> : vector<128x16xf32>
    %10 = tpu.matmul %7, %9, %cst_17 {dimension_numbers = #tpu.dot_dimension_numbers<[1], [0], [0], [1], [0, 0, 1, 1], [], []>} : vector<128x16xbf16>, vector<16x16xbf16>, vector<128x16xf32> -> vector<128x16xf32>
    %11 = vector.broadcast %4 : vector<1x16xf32> to vector<128x16xf32>
    %12 = arith.addf %10, %11 : vector<128x16xf32>
    %c0_18 = arith.constant 0 : index
    %c0_19 = arith.constant 0 : index
    %c0_20 = arith.constant 0 : index
    %c1 = arith.constant 1 : index
    %c0_21 = arith.constant 0 : index
    %13 = vector.load %arg2[%c0_18, %c0_19, %c0_20, %c1, %c0_21] : memref<1x1x18x10x16xbf16, #tpu.memory_space<vmem>>, vector<1x1x16x8x16xbf16>
    %14 = vector.shape_cast %13 : vector<1x1x16x8x16xbf16> to vector<16x8x16xbf16>
    %15 = vector.shape_cast %14 : vector<16x8x16xbf16> to vector<128x16xbf16>
    %c0_22 = arith.constant 0 : index
    %c0_23 = arith.constant 0 : index
    %c1_24 = arith.constant 1 : index
    %c0_25 = arith.constant 0 : index
    %c0_26 = arith.constant 0 : index
    %16 = vector.load %arg3[%c0_22, %c0_23, %c1_24, %c0_25, %c0_26] : memref<4x3x3x16x16xbf16, #tpu.memory_space<vmem>>, vector<1x1x1x16x16xbf16>
    %17 = vector.shape_cast %16 : vector<1x1x1x16x16xbf16> to vector<16x16xbf16>
    %cst_27 = arith.constant dense<0.000000e+00> : vector<128x16xf32>
    %18 = tpu.matmul %15, %17, %cst_27 {dimension_numbers = #tpu.dot_dimension_numbers<[1], [0], [0], [1], [0, 0, 1, 1], [], []>} : vector<128x16xbf16>, vector<16x16xbf16>, vector<128x16xf32> -> vector<128x16xf32>
    %19 = arith.addf %12, %18 : vector<128x16xf32>
    %c0_28 = arith.constant 0 : index
    %c0_29 = arith.constant 0 : index
    %c0_30 = arith.constant 0 : index
    %c2 = arith.constant 2 : index
    %c0_31 = arith.constant 0 : index
    %20 = vector.load %arg2[%c0_28, %c0_29, %c0_30, %c2, %c0_31] : memref<1x1x18x10x16xbf16, #tpu.memory_space<vmem>>, vector<1x1x16x8x16xbf16>
    %21 = vector.shape_cast %20 : vector<1x1x16x8x16xbf16> to vector<16x8x16xbf16>
    %22 = vector.shape_cast %21 : vector<16x8x16xbf16> to vector<128x16xbf16>
    %c0_32 = arith.constant 0 : index
    %c0_33 = arith.constant 0 : index
    %c2_34 = arith.constant 2 : index
    %c0_35 = arith.constant 0 : index
    %c0_36 = arith.constant 0 : index
    %23 = vector.load %arg3[%c0_32, %c0_33, %c2_34, %c0_35, %c0_36] : memref<4x3x3x16x16xbf16, #tpu.memory_space<vmem>>, vector<1x1x1x16x16xbf16>
    %24 = vector.shape_cast %23 : vector<1x1x1x16x16xbf16> to vector<16x16xbf16>
    %cst_37 = arith.constant dense<0.000000e+00> : vector<128x16xf32>
    %25 = tpu.matmul %22, %24, %cst_37 {dimension_numbers = #tpu.dot_dimension_numbers<[1], [0], [0], [1], [0, 0, 1, 1], [], []>} : vector<128x16xbf16>, vector<16x16xbf16>, vector<128x16xf32> -> vector<128x16xf32>
    %26 = arith.addf %19, %25 : vector<128x16xf32>
    %c0_38 = arith.constant 0 : index
    %c0_39 = arith.constant 0 : index
    %c1_40 = arith.constant 1 : index
    %c0_41 = arith.constant 0 : index
    %c0_42 = arith.constant 0 : index
    %27 = vector.load %arg2[%c0_38, %c0_39, %c1_40, %c0_41, %c0_42] : memref<1x1x18x10x16xbf16, #tpu.memory_space<vmem>>, vector<1x1x16x8x16xbf16>
    %28 = vector.shape_cast %27 : vector<1x1x16x8x16xbf16> to vector<16x8x16xbf16>
    %29 = vector.shape_cast %28 : vector<16x8x16xbf16> to vector<128x16xbf16>
    %c0_43 = arith.constant 0 : index
    %c1_44 = arith.constant 1 : index
    %c0_45 = arith.constant 0 : index
    %c0_46 = arith.constant 0 : index
    %c0_47 = arith.constant 0 : index
    %30 = vector.load %arg3[%c0_43, %c1_44, %c0_45, %c0_46, %c0_47] : memref<4x3x3x16x16xbf16, #tpu.memory_space<vmem>>, vector<1x1x1x16x16xbf16>
    %31 = vector.shape_cast %30 : vector<1x1x1x16x16xbf16> to vector<16x16xbf16>
    %cst_48 = arith.constant dense<0.000000e+00> : vector<128x16xf32>
    %32 = tpu.matmul %29, %31, %cst_48 {dimension_numbers = #tpu.dot_dimension_numbers<[1], [0], [0], [1], [0, 0, 1, 1], [], []>} : vector<128x16xbf16>, vector<16x16xbf16>, vector<128x16xf32> -> vector<128x16xf32>
    %33 = arith.addf %26, %32 : vector<128x16xf32>
    %c0_49 = arith.constant 0 : index
    %c0_50 = arith.constant 0 : index
    %c1_51 = arith.constant 1 : index
    %c1_52 = arith.constant 1 : index
    %c0_53 = arith.constant 0 : index
    %34 = vector.load %arg2[%c0_49, %c0_50, %c1_51, %c1_52, %c0_53] : memref<1x1x18x10x16xbf16, #tpu.memory_space<vmem>>, vector<1x1x16x8x16xbf16>
    %35 = vector.shape_cast %34 : vector<1x1x16x8x16xbf16> to vector<16x8x16xbf16>
    %36 = vector.shape_cast %35 : vector<16x8x16xbf16> to vector<128x16xbf16>
    %c0_54 = arith.constant 0 : index
    %c1_55 = arith.constant 1 : index
    %c1_56 = arith.constant 1 : index
    %c0_57 = arith.constant 0 : index
    %c0_58 = arith.constant 0 : index
    %37 = vector.load %arg3[%c0_54, %c1_55, %c1_56, %c0_57, %c0_58] : memref<4x3x3x16x16xbf16, #tpu.memory_space<vmem>>, vector<1x1x1x16x16xbf16>
    %38 = vector.shape_cast %37 : vector<1x1x1x16x16xbf16> to vector<16x16xbf16>
    %cst_59 = arith.constant dense<0.000000e+00> : vector<128x16xf32>
    %39 = tpu.matmul %36, %38, %cst_59 {dimension_numbers = #tpu.dot_dimension_numbers<[1], [0], [0], [1], [0, 0, 1, 1], [], []>} : vector<128x16xbf16>, vector<16x16xbf16>, vector<128x16xf32> -> vector<128x16xf32>
    %40 = arith.addf %33, %39 : vector<128x16xf32>
    %c0_60 = arith.constant 0 : index
    %c0_61 = arith.constant 0 : index
    %c1_62 = arith.constant 1 : index
    %c2_63 = arith.constant 2 : index
    %c0_64 = arith.constant 0 : index
    %41 = vector.load %arg2[%c0_60, %c0_61, %c1_62, %c2_63, %c0_64] : memref<1x1x18x10x16xbf16, #tpu.memory_space<vmem>>, vector<1x1x16x8x16xbf16>
    %42 = vector.shape_cast %41 : vector<1x1x16x8x16xbf16> to vector<16x8x16xbf16>
    %43 = vector.shape_cast %42 : vector<16x8x16xbf16> to vector<128x16xbf16>
    %c0_65 = arith.constant 0 : index
    %c1_66 = arith.constant 1 : index
    %c2_67 = arith.constant 2 : index
    %c0_68 = arith.constant 0 : index
    %c0_69 = arith.constant 0 : index
    %44 = vector.load %arg3[%c0_65, %c1_66, %c2_67, %c0_68, %c0_69] : memref<4x3x3x16x16xbf16, #tpu.memory_space<vmem>>, vector<1x1x1x16x16xbf16>
    %45 = vector.shape_cast %44 : vector<1x1x1x16x16xbf16> to vector<16x16xbf16>
    %cst_70 = arith.constant dense<0.000000e+00> : vector<128x16xf32>
    %46 = tpu.matmul %43, %45, %cst_70 {dimension_numbers = #tpu.dot_dimension_numbers<[1], [0], [0], [1], [0, 0, 1, 1], [], []>} : vector<128x16xbf16>, vector<16x16xbf16>, vector<128x16xf32> -> vector<128x16xf32>
    %47 = arith.addf %40, %46 : vector<128x16xf32>
    %c0_71 = arith.constant 0 : index
    %c0_72 = arith.constant 0 : index
    %c2_73 = arith.constant 2 : index
    %c0_74 = arith.constant 0 : index
    %c0_75 = arith.constant 0 : index
    %48 = vector.load %arg2[%c0_71, %c0_72, %c2_73, %c0_74, %c0_75] : memref<1x1x18x10x16xbf16, #tpu.memory_space<vmem>>, vector<1x1x16x8x16xbf16>
    %49 = vector.shape_cast %48 : vector<1x1x16x8x16xbf16> to vector<16x8x16xbf16>
    %50 = vector.shape_cast %49 : vector<16x8x16xbf16> to vector<128x16xbf16>
    %c0_76 = arith.constant 0 : index
    %c2_77 = arith.constant 2 : index
    %c0_78 = arith.constant 0 : index
    %c0_79 = arith.constant 0 : index
    %c0_80 = arith.constant 0 : index
    %51 = vector.load %arg3[%c0_76, %c2_77, %c0_78, %c0_79, %c0_80] : memref<4x3x3x16x16xbf16, #tpu.memory_space<vmem>>, vector<1x1x1x16x16xbf16>
    %52 = vector.shape_cast %51 : vector<1x1x1x16x16xbf16> to vector<16x16xbf16>
    %cst_81 = arith.constant dense<0.000000e+00> : vector<128x16xf32>
    %53 = tpu.matmul %50, %52, %cst_81 {dimension_numbers = #tpu.dot_dimension_numbers<[1], [0], [0], [1], [0, 0, 1, 1], [], []>} : vector<128x16xbf16>, vector<16x16xbf16>, vector<128x16xf32> -> vector<128x16xf32>
    %54 = arith.addf %47, %53 : vector<128x16xf32>
    %c0_82 = arith.constant 0 : index
    %c0_83 = arith.constant 0 : index
    %c2_84 = arith.constant 2 : index
    %c1_85 = arith.constant 1 : index
    %c0_86 = arith.constant 0 : index
    %55 = vector.load %arg2[%c0_82, %c0_83, %c2_84, %c1_85, %c0_86] : memref<1x1x18x10x16xbf16, #tpu.memory_space<vmem>>, vector<1x1x16x8x16xbf16>
    %56 = vector.shape_cast %55 : vector<1x1x16x8x16xbf16> to vector<16x8x16xbf16>
    %57 = vector.shape_cast %56 : vector<16x8x16xbf16> to vector<128x16xbf16>
    %c0_87 = arith.constant 0 : index
    %c2_88 = arith.constant 2 : index
    %c1_89 = arith.constant 1 : index
    %c0_90 = arith.constant 0 : index
    %c0_91 = arith.constant 0 : index
    %58 = vector.load %arg3[%c0_87, %c2_88, %c1_89, %c0_90, %c0_91] : memref<4x3x3x16x16xbf16, #tpu.memory_space<vmem>>, vector<1x1x1x16x16xbf16>
    %59 = vector.shape_cast %58 : vector<1x1x1x16x16xbf16> to vector<16x16xbf16>
    %cst_92 = arith.constant dense<0.000000e+00> : vector<128x16xf32>
    %60 = tpu.matmul %57, %59, %cst_92 {dimension_numbers = #tpu.dot_dimension_numbers<[1], [0], [0], [1], [0, 0, 1, 1], [], []>} : vector<128x16xbf16>, vector<16x16xbf16>, vector<128x16xf32> -> vector<128x16xf32>
    %61 = arith.addf %54, %60 : vector<128x16xf32>
    %c0_93 = arith.constant 0 : index
    %c0_94 = arith.constant 0 : index
    %c2_95 = arith.constant 2 : index
    %c2_96 = arith.constant 2 : index
    %c0_97 = arith.constant 0 : index
    %62 = vector.load %arg2[%c0_93, %c0_94, %c2_95, %c2_96, %c0_97] : memref<1x1x18x10x16xbf16, #tpu.memory_space<vmem>>, vector<1x1x16x8x16xbf16>
    %63 = vector.shape_cast %62 : vector<1x1x16x8x16xbf16> to vector<16x8x16xbf16>
    %64 = vector.shape_cast %63 : vector<16x8x16xbf16> to vector<128x16xbf16>
    %c0_98 = arith.constant 0 : index
    %c2_99 = arith.constant 2 : index
    %c2_100 = arith.constant 2 : index
    %c0_101 = arith.constant 0 : index
    %c0_102 = arith.constant 0 : index
    %65 = vector.load %arg3[%c0_98, %c2_99, %c2_100, %c0_101, %c0_102] : memref<4x3x3x16x16xbf16, #tpu.memory_space<vmem>>, vector<1x1x1x16x16xbf16>
    %66 = vector.shape_cast %65 : vector<1x1x1x16x16xbf16> to vector<16x16xbf16>
    %cst_103 = arith.constant dense<0.000000e+00> : vector<128x16xf32>
    %67 = tpu.matmul %64, %66, %cst_103 {dimension_numbers = #tpu.dot_dimension_numbers<[1], [0], [0], [1], [0, 0, 1, 1], [], []>} : vector<128x16xbf16>, vector<16x16xbf16>, vector<128x16xf32> -> vector<128x16xf32>
    %68 = arith.addf %61, %67 : vector<128x16xf32>
    %cst_104 = arith.constant 0.000000e+00 : f32
    %69 = vector.broadcast %cst_104 : f32 to vector<128x16xf32>
    %70 = arith.maximumf %68, %69 : vector<128x16xf32>
    %71 = vector.shape_cast %70 : vector<128x16xf32> to vector<16x8x16xf32>
    %c8_i32 = arith.constant 8 : i32
    %72 = arith.muli %arg1, %c8_i32 : i32
    %c5_i32 = arith.constant 5 : i32
    %73 = arith.subi %72, %c5_i32 : i32
    %c1_i32 = arith.constant 1 : i32
    %74 = arith.addi %73, %c1_i32 : i32
    %75 = tpu.iota {dimensions = array<i32: 0>} : vector<16x1x1xi32>
    %76 = vector.broadcast %74 : i32 to vector<16x1x1xi32>
    %77 = arith.addi %76, %75 : vector<16x1x1xi32>
    %c0_i32 = arith.constant 0 : i32
    %78 = vector.broadcast %c0_i32 : i32 to vector<16x1x1xi32>
    %79 = arith.cmpi sge, %77, %78 : vector<16x1x1xi32>
    %c8_i32_105 = arith.constant 8 : i32
    %80 = vector.broadcast %c8_i32_105 : i32 to vector<16x1x1xi32>
    %81 = arith.cmpi slt, %77, %80 : vector<16x1x1xi32>
    %82 = arith.andi %79, %81 : vector<16x1x1xi1>
    %cst_106 = arith.constant 0.000000e+00 : f32
    %83 = vector.shape_cast %82 : vector<16x1x1xi1> to vector<16x1x1xi1>
    %84 = vector.broadcast %83 : vector<16x1x1xi1> to vector<16x8x16xi1>
    %85 = vector.broadcast %cst_106 : f32 to vector<16x8x16xf32>
    %86 = arith.select %84, %71, %85 : vector<16x8x16xi1>, vector<16x8x16xf32>
    %87 = arith.truncf %86 : vector<16x8x16xf32> to vector<16x8x16xbf16>
    %c1_107 = arith.constant 1 : index
    %c1_108 = arith.constant 1 : index
    %c0_109 = arith.constant 0 : index
    %88 = vector.load %arg8[%c1_107, %c1_108, %c0_109] : memref<18x10x16xbf16, #tpu.memory_space<vmem>>, vector<16x8x16xbf16>
    tpu.vector_store %arg8[%c1_107, %c1_108, %c0_109], %87 {strides = array<i32>} : memref<18x10x16xbf16, #tpu.memory_space<vmem>>, vector<16x8x16xbf16>,
    %c1_110 = arith.constant 1 : index
    %c0_111 = arith.constant 0 : index
    %c0_112 = arith.constant 0 : index
    %89 = vector.load %arg4[%c1_110, %c0_111, %c0_112] : memref<4x1x16xf32, #tpu.memory_space<vmem>>, vector<1x1x16xf32>
    %90 = vector.shape_cast %89 : vector<1x1x16xf32> to vector<1x16xf32>
    %c1_113 = arith.constant 1 : index
    %c0_114 = arith.constant 0 : index
    %c0_115 = arith.constant 0 : index
    %91 = vector.load %arg8[%c1_113, %c0_114, %c0_115] : memref<18x10x16xbf16, #tpu.memory_space<vmem>>, vector<14x8x16xbf16>
    %92 = vector.shape_cast %91 : vector<14x8x16xbf16> to vector<112x16xbf16>
    %c1_116 = arith.constant 1 : index
    %c0_117 = arith.constant 0 : index
    %c0_118 = arith.constant 0 : index
    %c0_119 = arith.constant 0 : index
    %c0_120 = arith.constant 0 : index
    %93 = vector.load %arg3[%c1_116, %c0_117, %c0_118, %c0_119, %c0_120] : memref<4x3x3x16x16xbf16, #tpu.memory_space<vmem>>, vector<1x1x1x16x16xbf16>
    %94 = vector.shape_cast %93 : vector<1x1x1x16x16xbf16> to vector<16x16xbf16>
    %cst_121 = arith.constant dense<0.000000e+00> : vector<112x16xf32>
    %95 = tpu.matmul %92, %94, %cst_121 {dimension_numbers = #tpu.dot_dimension_numbers<[1], [0], [0], [1], [0, 0, 1, 1], [], []>} : vector<112x16xbf16>, vector<16x16xbf16>, vector<112x16xf32> -> vector<112x16xf32>
    %96 = vector.broadcast %90 : vector<1x16xf32> to vector<112x16xf32>
    %97 = arith.addf %95, %96 : vector<112x16xf32>
    %c1_122 = arith.constant 1 : index
    %c1_123 = arith.constant 1 : index
    %c0_124 = arith.constant 0 : index
    %98 = vector.load %arg8[%c1_122, %c1_123, %c0_124] : memref<18x10x16xbf16, #tpu.memory_space<vmem>>, vector<14x8x16xbf16>
    %99 = vector.shape_cast %98 : vector<14x8x16xbf16> to vector<112x16xbf16>
    %c1_125 = arith.constant 1 : index
    %c0_126 = arith.constant 0 : index
    %c1_127 = arith.constant 1 : index
    %c0_128 = arith.constant 0 : index
    %c0_129 = arith.constant 0 : index
    %100 = vector.load %arg3[%c1_125, %c0_126, %c1_127, %c0_128, %c0_129] : memref<4x3x3x16x16xbf16, #tpu.memory_space<vmem>>, vector<1x1x1x16x16xbf16>
    %101 = vector.shape_cast %100 : vector<1x1x1x16x16xbf16> to vector<16x16xbf16>
    %cst_130 = arith.constant dense<0.000000e+00> : vector<112x16xf32>
    %102 = tpu.matmul %99, %101, %cst_130 {dimension_numbers = #tpu.dot_dimension_numbers<[1], [0], [0], [1], [0, 0, 1, 1], [], []>} : vector<112x16xbf16>, vector<16x16xbf16>, vector<112x16xf32> -> vector<112x16xf32>
    %103 = arith.addf %97, %102 : vector<112x16xf32>
    %c1_131 = arith.constant 1 : index
    %c2_132 = arith.constant 2 : index
    %c0_133 = arith.constant 0 : index
    %104 = vector.load %arg8[%c1_131, %c2_132, %c0_133] : memref<18x10x16xbf16, #tpu.memory_space<vmem>>, vector<14x8x16xbf16>
    %105 = vector.shape_cast %104 : vector<14x8x16xbf16> to vector<112x16xbf16>
    %c1_134 = arith.constant 1 : index
    %c0_135 = arith.constant 0 : index
    %c2_136 = arith.constant 2 : index
    %c0_137 = arith.constant 0 : index
    %c0_138 = arith.constant 0 : index
    %106 = vector.load %arg3[%c1_134, %c0_135, %c2_136, %c0_137, %c0_138] : memref<4x3x3x16x16xbf16, #tpu.memory_space<vmem>>, vector<1x1x1x16x16xbf16>
    %107 = vector.shape_cast %106 : vector<1x1x1x16x16xbf16> to vector<16x16xbf16>
    %cst_139 = arith.constant dense<0.000000e+00> : vector<112x16xf32>
    %108 = tpu.matmul %105, %107, %cst_139 {dimension_numbers = #tpu.dot_dimension_numbers<[1], [0], [0], [1], [0, 0, 1, 1], [], []>} : vector<112x16xbf16>, vector<16x16xbf16>, vector<112x16xf32> -> vector<112x16xf32>
    %109 = arith.addf %103, %108 : vector<112x16xf32>
    %c2_140 = arith.constant 2 : index
    %c0_141 = arith.constant 0 : index
    %c0_142 = arith.constant 0 : index
    %110 = vector.load %arg8[%c2_140, %c0_141, %c0_142] : memref<18x10x16xbf16, #tpu.memory_space<vmem>>, vector<14x8x16xbf16>
    %111 = vector.shape_cast %110 : vector<14x8x16xbf16> to vector<112x16xbf16>
    %c1_143 = arith.constant 1 : index
    %c1_144 = arith.constant 1 : index
    %c0_145 = arith.constant 0 : index
    %c0_146 = arith.constant 0 : index
    %c0_147 = arith.constant 0 : index
    %112 = vector.load %arg3[%c1_143, %c1_144, %c0_145, %c0_146, %c0_147] : memref<4x3x3x16x16xbf16, #tpu.memory_space<vmem>>, vector<1x1x1x16x16xbf16>
    %113 = vector.shape_cast %112 : vector<1x1x1x16x16xbf16> to vector<16x16xbf16>
    %cst_148 = arith.constant dense<0.000000e+00> : vector<112x16xf32>
    %114 = tpu.matmul %111, %113, %cst_148 {dimension_numbers = #tpu.dot_dimension_numbers<[1], [0], [0], [1], [0, 0, 1, 1], [], []>} : vector<112x16xbf16>, vector<16x16xbf16>, vector<112x16xf32> -> vector<112x16xf32>
    %115 = arith.addf %109, %114 : vector<112x16xf32>
    %c2_149 = arith.constant 2 : index
    %c1_150 = arith.constant 1 : index
    %c0_151 = arith.constant 0 : index
    %116 = vector.load %arg8[%c2_149, %c1_150, %c0_151] : memref<18x10x16xbf16, #tpu.memory_space<vmem>>, vector<14x8x16xbf16>
    %117 = vector.shape_cast %116 : vector<14x8x16xbf16> to vector<112x16xbf16>
    %c1_152 = arith.constant 1 : index
    %c1_153 = arith.constant 1 : index
    %c1_154 = arith.constant 1 : index
    %c0_155 = arith.constant 0 : index
    %c0_156 = arith.constant 0 : index
    %118 = vector.load %arg3[%c1_152, %c1_153, %c1_154, %c0_155, %c0_156] : memref<4x3x3x16x16xbf16, #tpu.memory_space<vmem>>, vector<1x1x1x16x16xbf16>
    %119 = vector.shape_cast %118 : vector<1x1x1x16x16xbf16> to vector<16x16xbf16>
    %cst_157 = arith.constant dense<0.000000e+00> : vector<112x16xf32>
    %120 = tpu.matmul %117, %119, %cst_157 {dimension_numbers = #tpu.dot_dimension_numbers<[1], [0], [0], [1], [0, 0, 1, 1], [], []>} : vector<112x16xbf16>, vector<16x16xbf16>, vector<112x16xf32> -> vector<112x16xf32>
    %121 = arith.addf %115, %120 : vector<112x16xf32>
    %c2_158 = arith.constant 2 : index
    %c2_159 = arith.constant 2 : index
    %c0_160 = arith.constant 0 : index
    %122 = vector.load %arg8[%c2_158, %c2_159, %c0_160] : memref<18x10x16xbf16, #tpu.memory_space<vmem>>, vector<14x8x16xbf16>
    %123 = vector.shape_cast %122 : vector<14x8x16xbf16> to vector<112x16xbf16>
    %c1_161 = arith.constant 1 : index
    %c1_162 = arith.constant 1 : index
    %c2_163 = arith.constant 2 : index
    %c0_164 = arith.constant 0 : index
    %c0_165 = arith.constant 0 : index
    %124 = vector.load %arg3[%c1_161, %c1_162, %c2_163, %c0_164, %c0_165] : memref<4x3x3x16x16xbf16, #tpu.memory_space<vmem>>, vector<1x1x1x16x16xbf16>
    %125 = vector.shape_cast %124 : vector<1x1x1x16x16xbf16> to vector<16x16xbf16>
    %cst_166 = arith.constant dense<0.000000e+00> : vector<112x16xf32>
    %126 = tpu.matmul %123, %125, %cst_166 {dimension_numbers = #tpu.dot_dimension_numbers<[1], [0], [0], [1], [0, 0, 1, 1], [], []>} : vector<112x16xbf16>, vector<16x16xbf16>, vector<112x16xf32> -> vector<112x16xf32>
    %127 = arith.addf %121, %126 : vector<112x16xf32>
    %c3 = arith.constant 3 : index
    %c0_167 = arith.constant 0 : index
    %c0_168 = arith.constant 0 : index
    %128 = vector.load %arg8[%c3, %c0_167, %c0_168] : memref<18x10x16xbf16, #tpu.memory_space<vmem>>, vector<14x8x16xbf16>
    %129 = vector.shape_cast %128 : vector<14x8x16xbf16> to vector<112x16xbf16>
    %c1_169 = arith.constant 1 : index
    %c2_170 = arith.constant 2 : index
    %c0_171 = arith.constant 0 : index
    %c0_172 = arith.constant 0 : index
    %c0_173 = arith.constant 0 : index
    %130 = vector.load %arg3[%c1_169, %c2_170, %c0_171, %c0_172, %c0_173] : memref<4x3x3x16x16xbf16, #tpu.memory_space<vmem>>, vector<1x1x1x16x16xbf16>
    %131 = vector.shape_cast %130 : vector<1x1x1x16x16xbf16> to vector<16x16xbf16>
    %cst_174 = arith.constant dense<0.000000e+00> : vector<112x16xf32>
    %132 = tpu.matmul %129, %131, %cst_174 {dimension_numbers = #tpu.dot_dimension_numbers<[1], [0], [0], [1], [0, 0, 1, 1], [], []>} : vector<112x16xbf16>, vector<16x16xbf16>, vector<112x16xf32> -> vector<112x16xf32>
    %133 = arith.addf %127, %132 : vector<112x16xf32>
    %c3_175 = arith.constant 3 : index
    %c1_176 = arith.constant 1 : index
    %c0_177 = arith.constant 0 : index
    %134 = vector.load %arg8[%c3_175, %c1_176, %c0_177] : memref<18x10x16xbf16, #tpu.memory_space<vmem>>, vector<14x8x16xbf16>
    %135 = vector.shape_cast %134 : vector<14x8x16xbf16> to vector<112x16xbf16>
    %c1_178 = arith.constant 1 : index
    %c2_179 = arith.constant 2 : index
    %c1_180 = arith.constant 1 : index
    %c0_181 = arith.constant 0 : index
    %c0_182 = arith.constant 0 : index
    %136 = vector.load %arg3[%c1_178, %c2_179, %c1_180, %c0_181, %c0_182] : memref<4x3x3x16x16xbf16, #tpu.memory_space<vmem>>, vector<1x1x1x16x16xbf16>
    %137 = vector.shape_cast %136 : vector<1x1x1x16x16xbf16> to vector<16x16xbf16>
    %cst_183 = arith.constant dense<0.000000e+00> : vector<112x16xf32>
    %138 = tpu.matmul %135, %137, %cst_183 {dimension_numbers = #tpu.dot_dimension_numbers<[1], [0], [0], [1], [0, 0, 1, 1], [], []>} : vector<112x16xbf16>, vector<16x16xbf16>, vector<112x16xf32> -> vector<112x16xf32>
    %139 = arith.addf %133, %138 : vector<112x16xf32>
    %c3_184 = arith.constant 3 : index
    %c2_185 = arith.constant 2 : index
    %c0_186 = arith.constant 0 : index
    %140 = vector.load %arg8[%c3_184, %c2_185, %c0_186] : memref<18x10x16xbf16, #tpu.memory_space<vmem>>, vector<14x8x16xbf16>
    %141 = vector.shape_cast %140 : vector<14x8x16xbf16> to vector<112x16xbf16>
    %c1_187 = arith.constant 1 : index
    %c2_188 = arith.constant 2 : index
    %c2_189 = arith.constant 2 : index
    %c0_190 = arith.constant 0 : index
    %c0_191 = arith.constant 0 : index
    %142 = vector.load %arg3[%c1_187, %c2_188, %c2_189, %c0_190, %c0_191] : memref<4x3x3x16x16xbf16, #tpu.memory_space<vmem>>, vector<1x1x1x16x16xbf16>
    %143 = vector.shape_cast %142 : vector<1x1x1x16x16xbf16> to vector<16x16xbf16>
    %cst_192 = arith.constant dense<0.000000e+00> : vector<112x16xf32>
    %144 = tpu.matmul %141, %143, %cst_192 {dimension_numbers = #tpu.dot_dimension_numbers<[1], [0], [0], [1], [0, 0, 1, 1], [], []>} : vector<112x16xbf16>, vector<16x16xbf16>, vector<112x16xf32> -> vector<112x16xf32>
    %145 = arith.addf %139, %144 : vector<112x16xf32>
    %cst_193 = arith.constant 0.000000e+00 : f32
    %146 = vector.broadcast %cst_193 : f32 to vector<112x16xf32>
    %147 = arith.maximumf %145, %146 : vector<112x16xf32>
    %148 = vector.shape_cast %147 : vector<112x16xf32> to vector<14x8x16xf32>
    %c8_i32_194 = arith.constant 8 : i32
    %149 = arith.muli %arg1, %c8_i32_194 : i32
    %c5_i32_195 = arith.constant 5 : i32
    %150 = arith.subi %149, %c5_i32_195 : i32
    %c2_i32 = arith.constant 2 : i32
    %151 = arith.addi %150, %c2_i32 : i32
    %152 = tpu.iota {dimensions = array<i32: 0>} : vector<14x1x1xi32>
    %153 = vector.broadcast %151 : i32 to vector<14x1x1xi32>
    %154 = arith.addi %153, %152 : vector<14x1x1xi32>
    %c0_i32_196 = arith.constant 0 : i32
    %155 = vector.broadcast %c0_i32_196 : i32 to vector<14x1x1xi32>
    %156 = arith.cmpi sge, %154, %155 : vector<14x1x1xi32>
    %c8_i32_197 = arith.constant 8 : i32
    %157 = vector.broadcast %c8_i32_197 : i32 to vector<14x1x1xi32>
    %158 = arith.cmpi slt, %154, %157 : vector<14x1x1xi32>
    %159 = arith.andi %156, %158 : vector<14x1x1xi1>
    %cst_198 = arith.constant 0.000000e+00 : f32
    %160 = vector.shape_cast %159 : vector<14x1x1xi1> to vector<14x1x1xi1>
    %161 = vector.broadcast %160 : vector<14x1x1xi1> to vector<14x8x16xi1>
    %162 = vector.broadcast %cst_198 : f32 to vector<14x8x16xf32>
    %163 = arith.select %161, %148, %162 : vector<14x8x16xi1>, vector<14x8x16xf32>
    %164 = arith.truncf %163 : vector<14x8x16xf32> to vector<14x8x16xbf16>
    %c2_199 = arith.constant 2 : index
    %c1_200 = arith.constant 1 : index
    %c0_201 = arith.constant 0 : index
    %165 = vector.load %arg8[%c2_199, %c1_200, %c0_201] : memref<18x10x16xbf16, #tpu.memory_space<vmem>>, vector<14x8x16xbf16>
    tpu.vector_store %arg8[%c2_199, %c1_200, %c0_201], %164 {strides = array<i32>} : memref<18x10x16xbf16, #tpu.memory_space<vmem>>, vector<14x8x16xbf16>,
    %c2_202 = arith.constant 2 : index
    %c0_203 = arith.constant 0 : index
    %c0_204 = arith.constant 0 : index
    %166 = vector.load %arg4[%c2_202, %c0_203, %c0_204] : memref<4x1x16xf32, #tpu.memory_space<vmem>>, vector<1x1x16xf32>
    %167 = vector.shape_cast %166 : vector<1x1x16xf32> to vector<1x16xf32>
    %c2_205 = arith.constant 2 : index
    %c0_206 = arith.constant 0 : index
    %c0_207 = arith.constant 0 : index
    %168 = vector.load %arg8[%c2_205, %c0_206, %c0_207] : memref<18x10x16xbf16, #tpu.memory_space<vmem>>, vector<12x8x16xbf16>
    %169 = vector.shape_cast %168 : vector<12x8x16xbf16> to vector<96x16xbf16>
    %c2_208 = arith.constant 2 : index
    %c0_209 = arith.constant 0 : index
    %c0_210 = arith.constant 0 : index
    %c0_211 = arith.constant 0 : index
    %c0_212 = arith.constant 0 : index
    %170 = vector.load %arg3[%c2_208, %c0_209, %c0_210, %c0_211, %c0_212] : memref<4x3x3x16x16xbf16, #tpu.memory_space<vmem>>, vector<1x1x1x16x16xbf16>
    %171 = vector.shape_cast %170 : vector<1x1x1x16x16xbf16> to vector<16x16xbf16>
    %cst_213 = arith.constant dense<0.000000e+00> : vector<96x16xf32>
    %172 = tpu.matmul %169, %171, %cst_213 {dimension_numbers = #tpu.dot_dimension_numbers<[1], [0], [0], [1], [0, 0, 1, 1], [], []>} : vector<96x16xbf16>, vector<16x16xbf16>, vector<96x16xf32> -> vector<96x16xf32>
    %173 = vector.broadcast %167 : vector<1x16xf32> to vector<96x16xf32>
    %174 = arith.addf %172, %173 : vector<96x16xf32>
    %c2_214 = arith.constant 2 : index
    %c1_215 = arith.constant 1 : index
    %c0_216 = arith.constant 0 : index
    %175 = vector.load %arg8[%c2_214, %c1_215, %c0_216] : memref<18x10x16xbf16, #tpu.memory_space<vmem>>, vector<12x8x16xbf16>
    %176 = vector.shape_cast %175 : vector<12x8x16xbf16> to vector<96x16xbf16>
    %c2_217 = arith.constant 2 : index
    %c0_218 = arith.constant 0 : index
    %c1_219 = arith.constant 1 : index
    %c0_220 = arith.constant 0 : index
    %c0_221 = arith.constant 0 : index
    %177 = vector.load %arg3[%c2_217, %c0_218, %c1_219, %c0_220, %c0_221] : memref<4x3x3x16x16xbf16, #tpu.memory_space<vmem>>, vector<1x1x1x16x16xbf16>
    %178 = vector.shape_cast %177 : vector<1x1x1x16x16xbf16> to vector<16x16xbf16>
    %cst_222 = arith.constant dense<0.000000e+00> : vector<96x16xf32>
    %179 = tpu.matmul %176, %178, %cst_222 {dimension_numbers = #tpu.dot_dimension_numbers<[1], [0], [0], [1], [0, 0, 1, 1], [], []>} : vector<96x16xbf16>, vector<16x16xbf16>, vector<96x16xf32> -> vector<96x16xf32>
    %180 = arith.addf %174, %179 : vector<96x16xf32>
    %c2_223 = arith.constant 2 : index
    %c2_224 = arith.constant 2 : index
    %c0_225 = arith.constant 0 : index
    %181 = vector.load %arg8[%c2_223, %c2_224, %c0_225] : memref<18x10x16xbf16, #tpu.memory_space<vmem>>, vector<12x8x16xbf16>
    %182 = vector.shape_cast %181 : vector<12x8x16xbf16> to vector<96x16xbf16>
    %c2_226 = arith.constant 2 : index
    %c0_227 = arith.constant 0 : index
    %c2_228 = arith.constant 2 : index
    %c0_229 = arith.constant 0 : index
    %c0_230 = arith.constant 0 : index
    %183 = vector.load %arg3[%c2_226, %c0_227, %c2_228, %c0_229, %c0_230] : memref<4x3x3x16x16xbf16, #tpu.memory_space<vmem>>, vector<1x1x1x16x16xbf16>
    %184 = vector.shape_cast %183 : vector<1x1x1x16x16xbf16> to vector<16x16xbf16>
    %cst_231 = arith.constant dense<0.000000e+00> : vector<96x16xf32>
    %185 = tpu.matmul %182, %184, %cst_231 {dimension_numbers = #tpu.dot_dimension_numbers<[1], [0], [0], [1], [0, 0, 1, 1], [], []>} : vector<96x16xbf16>, vector<16x16xbf16>, vector<96x16xf32> -> vector<96x16xf32>
    %186 = arith.addf %180, %185 : vector<96x16xf32>
    %c3_232 = arith.constant 3 : index
    %c0_233 = arith.constant 0 : index
    %c0_234 = arith.constant 0 : index
    %187 = vector.load %arg8[%c3_232, %c0_233, %c0_234] : memref<18x10x16xbf16, #tpu.memory_space<vmem>>, vector<12x8x16xbf16>
    %188 = vector.shape_cast %187 : vector<12x8x16xbf16> to vector<96x16xbf16>
    %c2_235 = arith.constant 2 : index
    %c1_236 = arith.constant 1 : index
    %c0_237 = arith.constant 0 : index
    %c0_238 = arith.constant 0 : index
    %c0_239 = arith.constant 0 : index
    %189 = vector.load %arg3[%c2_235, %c1_236, %c0_237, %c0_238, %c0_239] : memref<4x3x3x16x16xbf16, #tpu.memory_space<vmem>>, vector<1x1x1x16x16xbf16>
    %190 = vector.shape_cast %189 : vector<1x1x1x16x16xbf16> to vector<16x16xbf16>
    %cst_240 = arith.constant dense<0.000000e+00> : vector<96x16xf32>
    %191 = tpu.matmul %188, %190, %cst_240 {dimension_numbers = #tpu.dot_dimension_numbers<[1], [0], [0], [1], [0, 0, 1, 1], [], []>} : vector<96x16xbf16>, vector<16x16xbf16>, vector<96x16xf32> -> vector<96x16xf32>
    %192 = arith.addf %186, %191 : vector<96x16xf32>
    %c3_241 = arith.constant 3 : index
    %c1_242 = arith.constant 1 : index
    %c0_243 = arith.constant 0 : index
    %193 = vector.load %arg8[%c3_241, %c1_242, %c0_243] : memref<18x10x16xbf16, #tpu.memory_space<vmem>>, vector<12x8x16xbf16>
    %194 = vector.shape_cast %193 : vector<12x8x16xbf16> to vector<96x16xbf16>
    %c2_244 = arith.constant 2 : index
    %c1_245 = arith.constant 1 : index
    %c1_246 = arith.constant 1 : index
    %c0_247 = arith.constant 0 : index
    %c0_248 = arith.constant 0 : index
    %195 = vector.load %arg3[%c2_244, %c1_245, %c1_246, %c0_247, %c0_248] : memref<4x3x3x16x16xbf16, #tpu.memory_space<vmem>>, vector<1x1x1x16x16xbf16>
    %196 = vector.shape_cast %195 : vector<1x1x1x16x16xbf16> to vector<16x16xbf16>
    %cst_249 = arith.constant dense<0.000000e+00> : vector<96x16xf32>
    %197 = tpu.matmul %194, %196, %cst_249 {dimension_numbers = #tpu.dot_dimension_numbers<[1], [0], [0], [1], [0, 0, 1, 1], [], []>} : vector<96x16xbf16>, vector<16x16xbf16>, vector<96x16xf32> -> vector<96x16xf32>
    %198 = arith.addf %192, %197 : vector<96x16xf32>
    %c3_250 = arith.constant 3 : index
    %c2_251 = arith.constant 2 : index
    %c0_252 = arith.constant 0 : index
    %199 = vector.load %arg8[%c3_250, %c2_251, %c0_252] : memref<18x10x16xbf16, #tpu.memory_space<vmem>>, vector<12x8x16xbf16>
    %200 = vector.shape_cast %199 : vector<12x8x16xbf16> to vector<96x16xbf16>
    %c2_253 = arith.constant 2 : index
    %c1_254 = arith.constant 1 : index
    %c2_255 = arith.constant 2 : index
    %c0_256 = arith.constant 0 : index
    %c0_257 = arith.constant 0 : index
    %201 = vector.load %arg3[%c2_253, %c1_254, %c2_255, %c0_256, %c0_257] : memref<4x3x3x16x16xbf16, #tpu.memory_space<vmem>>, vector<1x1x1x16x16xbf16>
    %202 = vector.shape_cast %201 : vector<1x1x1x16x16xbf16> to vector<16x16xbf16>
    %cst_258 = arith.constant dense<0.000000e+00> : vector<96x16xf32>
    %203 = tpu.matmul %200, %202, %cst_258 {dimension_numbers = #tpu.dot_dimension_numbers<[1], [0], [0], [1], [0, 0, 1, 1], [], []>} : vector<96x16xbf16>, vector<16x16xbf16>, vector<96x16xf32> -> vector<96x16xf32>
    %204 = arith.addf %198, %203 : vector<96x16xf32>
    %c4 = arith.constant 4 : index
    %c0_259 = arith.constant 0 : index
    %c0_260 = arith.constant 0 : index
    %205 = vector.load %arg8[%c4, %c0_259, %c0_260] : memref<18x10x16xbf16, #tpu.memory_space<vmem>>, vector<12x8x16xbf16>
    %206 = vector.shape_cast %205 : vector<12x8x16xbf16> to vector<96x16xbf16>
    %c2_261 = arith.constant 2 : index
    %c2_262 = arith.constant 2 : index
    %c0_263 = arith.constant 0 : index
    %c0_264 = arith.constant 0 : index
    %c0_265 = arith.constant 0 : index
    %207 = vector.load %arg3[%c2_261, %c2_262, %c0_263, %c0_264, %c0_265] : memref<4x3x3x16x16xbf16, #tpu.memory_space<vmem>>, vector<1x1x1x16x16xbf16>
    %208 = vector.shape_cast %207 : vector<1x1x1x16x16xbf16> to vector<16x16xbf16>
    %cst_266 = arith.constant dense<0.000000e+00> : vector<96x16xf32>
    %209 = tpu.matmul %206, %208, %cst_266 {dimension_numbers = #tpu.dot_dimension_numbers<[1], [0], [0], [1], [0, 0, 1, 1], [], []>} : vector<96x16xbf16>, vector<16x16xbf16>, vector<96x16xf32> -> vector<96x16xf32>
    %210 = arith.addf %204, %209 : vector<96x16xf32>
    %c4_267 = arith.constant 4 : index
    %c1_268 = arith.constant 1 : index
    %c0_269 = arith.constant 0 : index
    %211 = vector.load %arg8[%c4_267, %c1_268, %c0_269] : memref<18x10x16xbf16, #tpu.memory_space<vmem>>, vector<12x8x16xbf16>
    %212 = vector.shape_cast %211 : vector<12x8x16xbf16> to vector<96x16xbf16>
    %c2_270 = arith.constant 2 : index
    %c2_271 = arith.constant 2 : index
    %c1_272 = arith.constant 1 : index
    %c0_273 = arith.constant 0 : index
    %c0_274 = arith.constant 0 : index
    %213 = vector.load %arg3[%c2_270, %c2_271, %c1_272, %c0_273, %c0_274] : memref<4x3x3x16x16xbf16, #tpu.memory_space<vmem>>, vector<1x1x1x16x16xbf16>
    %214 = vector.shape_cast %213 : vector<1x1x1x16x16xbf16> to vector<16x16xbf16>
    %cst_275 = arith.constant dense<0.000000e+00> : vector<96x16xf32>
    %215 = tpu.matmul %212, %214, %cst_275 {dimension_numbers = #tpu.dot_dimension_numbers<[1], [0], [0], [1], [0, 0, 1, 1], [], []>} : vector<96x16xbf16>, vector<16x16xbf16>, vector<96x16xf32> -> vector<96x16xf32>
    %216 = arith.addf %210, %215 : vector<96x16xf32>
    %c4_276 = arith.constant 4 : index
    %c2_277 = arith.constant 2 : index
    %c0_278 = arith.constant 0 : index
    %217 = vector.load %arg8[%c4_276, %c2_277, %c0_278] : memref<18x10x16xbf16, #tpu.memory_space<vmem>>, vector<12x8x16xbf16>
    %218 = vector.shape_cast %217 : vector<12x8x16xbf16> to vector<96x16xbf16>
    %c2_279 = arith.constant 2 : index
    %c2_280 = arith.constant 2 : index
    %c2_281 = arith.constant 2 : index
    %c0_282 = arith.constant 0 : index
    %c0_283 = arith.constant 0 : index
    %219 = vector.load %arg3[%c2_279, %c2_280, %c2_281, %c0_282, %c0_283] : memref<4x3x3x16x16xbf16, #tpu.memory_space<vmem>>, vector<1x1x1x16x16xbf16>
    %220 = vector.shape_cast %219 : vector<1x1x1x16x16xbf16> to vector<16x16xbf16>
    %cst_284 = arith.constant dense<0.000000e+00> : vector<96x16xf32>
    %221 = tpu.matmul %218, %220, %cst_284 {dimension_numbers = #tpu.dot_dimension_numbers<[1], [0], [0], [1], [0, 0, 1, 1], [], []>} : vector<96x16xbf16>, vector<16x16xbf16>, vector<96x16xf32> -> vector<96x16xf32>
    %222 = arith.addf %216, %221 : vector<96x16xf32>
    %cst_285 = arith.constant 0.000000e+00 : f32
    %223 = vector.broadcast %cst_285 : f32 to vector<96x16xf32>
    %224 = arith.maximumf %222, %223 : vector<96x16xf32>
    %225 = vector.shape_cast %224 : vector<96x16xf32> to vector<12x8x16xf32>
    %c8_i32_286 = arith.constant 8 : i32
    %226 = arith.muli %arg1, %c8_i32_286 : i32
    %c5_i32_287 = arith.constant 5 : i32
    %227 = arith.subi %226, %c5_i32_287 : i32
    %c3_i32 = arith.constant 3 : i32
    %228 = arith.addi %227, %c3_i32 : i32
    %229 = tpu.iota {dimensions = array<i32: 0>} : vector<12x1x1xi32>
    %230 = vector.broadcast %228 : i32 to vector<12x1x1xi32>
    %231 = arith.addi %230, %229 : vector<12x1x1xi32>
    %c0_i32_288 = arith.constant 0 : i32
    %232 = vector.broadcast %c0_i32_288 : i32 to vector<12x1x1xi32>
    %233 = arith.cmpi sge, %231, %232 : vector<12x1x1xi32>
    %c8_i32_289 = arith.constant 8 : i32
    %234 = vector.broadcast %c8_i32_289 : i32 to vector<12x1x1xi32>
    %235 = arith.cmpi slt, %231, %234 : vector<12x1x1xi32>
    %236 = arith.andi %233, %235 : vector<12x1x1xi1>
    %cst_290 = arith.constant 0.000000e+00 : f32
    %237 = vector.shape_cast %236 : vector<12x1x1xi1> to vector<12x1x1xi1>
    %238 = vector.broadcast %237 : vector<12x1x1xi1> to vector<12x8x16xi1>
    %239 = vector.broadcast %cst_290 : f32 to vector<12x8x16xf32>
    %240 = arith.select %238, %225, %239 : vector<12x8x16xi1>, vector<12x8x16xf32>
    %241 = arith.truncf %240 : vector<12x8x16xf32> to vector<12x8x16xbf16>
    %c3_291 = arith.constant 3 : index
    %c1_292 = arith.constant 1 : index
    %c0_293 = arith.constant 0 : index
    %242 = vector.load %arg8[%c3_291, %c1_292, %c0_293] : memref<18x10x16xbf16, #tpu.memory_space<vmem>>, vector<12x8x16xbf16>
    tpu.vector_store %arg8[%c3_291, %c1_292, %c0_293], %241 {strides = array<i32>} : memref<18x10x16xbf16, #tpu.memory_space<vmem>>, vector<12x8x16xbf16>,
    %c3_294 = arith.constant 3 : index
    %c0_295 = arith.constant 0 : index
    %c0_296 = arith.constant 0 : index
    %243 = vector.load %arg4[%c3_294, %c0_295, %c0_296] : memref<4x1x16xf32, #tpu.memory_space<vmem>>, vector<1x1x16xf32>
    %244 = vector.shape_cast %243 : vector<1x1x16xf32> to vector<1x16xf32>
    %c3_297 = arith.constant 3 : index
    %c0_298 = arith.constant 0 : index
    %c0_299 = arith.constant 0 : index
    %245 = vector.load %arg8[%c3_297, %c0_298, %c0_299] : memref<18x10x16xbf16, #tpu.memory_space<vmem>>, vector<10x8x16xbf16>
    %246 = vector.shape_cast %245 : vector<10x8x16xbf16> to vector<80x16xbf16>
    %c3_300 = arith.constant 3 : index
    %c0_301 = arith.constant 0 : index
    %c0_302 = arith.constant 0 : index
    %c0_303 = arith.constant 0 : index
    %c0_304 = arith.constant 0 : index
    %247 = vector.load %arg3[%c3_300, %c0_301, %c0_302, %c0_303, %c0_304] : memref<4x3x3x16x16xbf16, #tpu.memory_space<vmem>>, vector<1x1x1x16x16xbf16>
    %248 = vector.shape_cast %247 : vector<1x1x1x16x16xbf16> to vector<16x16xbf16>
    %cst_305 = arith.constant dense<0.000000e+00> : vector<80x16xf32>
    %249 = tpu.matmul %246, %248, %cst_305 {dimension_numbers = #tpu.dot_dimension_numbers<[1], [0], [0], [1], [0, 0, 1, 1], [], []>} : vector<80x16xbf16>, vector<16x16xbf16>, vector<80x16xf32> -> vector<80x16xf32>
    %250 = vector.broadcast %244 : vector<1x16xf32> to vector<80x16xf32>
    %251 = arith.addf %249, %250 : vector<80x16xf32>
    %c3_306 = arith.constant 3 : index
    %c1_307 = arith.constant 1 : index
    %c0_308 = arith.constant 0 : index
    %252 = vector.load %arg8[%c3_306, %c1_307, %c0_308] : memref<18x10x16xbf16, #tpu.memory_space<vmem>>, vector<10x8x16xbf16>
    %253 = vector.shape_cast %252 : vector<10x8x16xbf16> to vector<80x16xbf16>
    %c3_309 = arith.constant 3 : index
    %c0_310 = arith.constant 0 : index
    %c1_311 = arith.constant 1 : index
    %c0_312 = arith.constant 0 : index
    %c0_313 = arith.constant 0 : index
    %254 = vector.load %arg3[%c3_309, %c0_310, %c1_311, %c0_312, %c0_313] : memref<4x3x3x16x16xbf16, #tpu.memory_space<vmem>>, vector<1x1x1x16x16xbf16>
    %255 = vector.shape_cast %254 : vector<1x1x1x16x16xbf16> to vector<16x16xbf16>
    %cst_314 = arith.constant dense<0.000000e+00> : vector<80x16xf32>
    %256 = tpu.matmul %253, %255, %cst_314 {dimension_numbers = #tpu.dot_dimension_numbers<[1], [0], [0], [1], [0, 0, 1, 1], [], []>} : vector<80x16xbf16>, vector<16x16xbf16>, vector<80x16xf32> -> vector<80x16xf32>
    %257 = arith.addf %251, %256 : vector<80x16xf32>
    %c3_315 = arith.constant 3 : index
    %c2_316 = arith.constant 2 : index
    %c0_317 = arith.constant 0 : index
    %258 = vector.load %arg8[%c3_315, %c2_316, %c0_317] : memref<18x10x16xbf16, #tpu.memory_space<vmem>>, vector<10x8x16xbf16>
    %259 = vector.shape_cast %258 : vector<10x8x16xbf16> to vector<80x16xbf16>
    %c3_318 = arith.constant 3 : index
    %c0_319 = arith.constant 0 : index
    %c2_320 = arith.constant 2 : index
    %c0_321 = arith.constant 0 : index
    %c0_322 = arith.constant 0 : index
    %260 = vector.load %arg3[%c3_318, %c0_319, %c2_320, %c0_321, %c0_322] : memref<4x3x3x16x16xbf16, #tpu.memory_space<vmem>>, vector<1x1x1x16x16xbf16>
    %261 = vector.shape_cast %260 : vector<1x1x1x16x16xbf16> to vector<16x16xbf16>
    %cst_323 = arith.constant dense<0.000000e+00> : vector<80x16xf32>
    %262 = tpu.matmul %259, %261, %cst_323 {dimension_numbers = #tpu.dot_dimension_numbers<[1], [0], [0], [1], [0, 0, 1, 1], [], []>} : vector<80x16xbf16>, vector<16x16xbf16>, vector<80x16xf32> -> vector<80x16xf32>
    %263 = arith.addf %257, %262 : vector<80x16xf32>
    %c4_324 = arith.constant 4 : index
    %c0_325 = arith.constant 0 : index
    %c0_326 = arith.constant 0 : index
    %264 = vector.load %arg8[%c4_324, %c0_325, %c0_326] : memref<18x10x16xbf16, #tpu.memory_space<vmem>>, vector<10x8x16xbf16>
    %265 = vector.shape_cast %264 : vector<10x8x16xbf16> to vector<80x16xbf16>
    %c3_327 = arith.constant 3 : index
    %c1_328 = arith.constant 1 : index
    %c0_329 = arith.constant 0 : index
    %c0_330 = arith.constant 0 : index
    %c0_331 = arith.constant 0 : index
    %266 = vector.load %arg3[%c3_327, %c1_328, %c0_329, %c0_330, %c0_331] : memref<4x3x3x16x16xbf16, #tpu.memory_space<vmem>>, vector<1x1x1x16x16xbf16>
    %267 = vector.shape_cast %266 : vector<1x1x1x16x16xbf16> to vector<16x16xbf16>
    %cst_332 = arith.constant dense<0.000000e+00> : vector<80x16xf32>
    %268 = tpu.matmul %265, %267, %cst_332 {dimension_numbers = #tpu.dot_dimension_numbers<[1], [0], [0], [1], [0, 0, 1, 1], [], []>} : vector<80x16xbf16>, vector<16x16xbf16>, vector<80x16xf32> -> vector<80x16xf32>
    %269 = arith.addf %263, %268 : vector<80x16xf32>
    %c4_333 = arith.constant 4 : index
    %c1_334 = arith.constant 1 : index
    %c0_335 = arith.constant 0 : index
    %270 = vector.load %arg8[%c4_333, %c1_334, %c0_335] : memref<18x10x16xbf16, #tpu.memory_space<vmem>>, vector<10x8x16xbf16>
    %271 = vector.shape_cast %270 : vector<10x8x16xbf16> to vector<80x16xbf16>
    %c3_336 = arith.constant 3 : index
    %c1_337 = arith.constant 1 : index
    %c1_338 = arith.constant 1 : index
    %c0_339 = arith.constant 0 : index
    %c0_340 = arith.constant 0 : index
    %272 = vector.load %arg3[%c3_336, %c1_337, %c1_338, %c0_339, %c0_340] : memref<4x3x3x16x16xbf16, #tpu.memory_space<vmem>>, vector<1x1x1x16x16xbf16>
    %273 = vector.shape_cast %272 : vector<1x1x1x16x16xbf16> to vector<16x16xbf16>
    %cst_341 = arith.constant dense<0.000000e+00> : vector<80x16xf32>
    %274 = tpu.matmul %271, %273, %cst_341 {dimension_numbers = #tpu.dot_dimension_numbers<[1], [0], [0], [1], [0, 0, 1, 1], [], []>} : vector<80x16xbf16>, vector<16x16xbf16>, vector<80x16xf32> -> vector<80x16xf32>
    %275 = arith.addf %269, %274 : vector<80x16xf32>
    %c4_342 = arith.constant 4 : index
    %c2_343 = arith.constant 2 : index
    %c0_344 = arith.constant 0 : index
    %276 = vector.load %arg8[%c4_342, %c2_343, %c0_344] : memref<18x10x16xbf16, #tpu.memory_space<vmem>>, vector<10x8x16xbf16>
    %277 = vector.shape_cast %276 : vector<10x8x16xbf16> to vector<80x16xbf16>
    %c3_345 = arith.constant 3 : index
    %c1_346 = arith.constant 1 : index
    %c2_347 = arith.constant 2 : index
    %c0_348 = arith.constant 0 : index
    %c0_349 = arith.constant 0 : index
    %278 = vector.load %arg3[%c3_345, %c1_346, %c2_347, %c0_348, %c0_349] : memref<4x3x3x16x16xbf16, #tpu.memory_space<vmem>>, vector<1x1x1x16x16xbf16>
    %279 = vector.shape_cast %278 : vector<1x1x1x16x16xbf16> to vector<16x16xbf16>
    %cst_350 = arith.constant dense<0.000000e+00> : vector<80x16xf32>
    %280 = tpu.matmul %277, %279, %cst_350 {dimension_numbers = #tpu.dot_dimension_numbers<[1], [0], [0], [1], [0, 0, 1, 1], [], []>} : vector<80x16xbf16>, vector<16x16xbf16>, vector<80x16xf32> -> vector<80x16xf32>
    %281 = arith.addf %275, %280 : vector<80x16xf32>
    %c5 = arith.constant 5 : index
    %c0_351 = arith.constant 0 : index
    %c0_352 = arith.constant 0 : index
    %282 = vector.load %arg8[%c5, %c0_351, %c0_352] : memref<18x10x16xbf16, #tpu.memory_space<vmem>>, vector<10x8x16xbf16>
    %283 = vector.shape_cast %282 : vector<10x8x16xbf16> to vector<80x16xbf16>
    %c3_353 = arith.constant 3 : index
    %c2_354 = arith.constant 2 : index
    %c0_355 = arith.constant 0 : index
    %c0_356 = arith.constant 0 : index
    %c0_357 = arith.constant 0 : index
    %284 = vector.load %arg3[%c3_353, %c2_354, %c0_355, %c0_356, %c0_357] : memref<4x3x3x16x16xbf16, #tpu.memory_space<vmem>>, vector<1x1x1x16x16xbf16>
    %285 = vector.shape_cast %284 : vector<1x1x1x16x16xbf16> to vector<16x16xbf16>
    %cst_358 = arith.constant dense<0.000000e+00> : vector<80x16xf32>
    %286 = tpu.matmul %283, %285, %cst_358 {dimension_numbers = #tpu.dot_dimension_numbers<[1], [0], [0], [1], [0, 0, 1, 1], [], []>} : vector<80x16xbf16>, vector<16x16xbf16>, vector<80x16xf32> -> vector<80x16xf32>
    %287 = arith.addf %281, %286 : vector<80x16xf32>
    %c5_359 = arith.constant 5 : index
    %c1_360 = arith.constant 1 : index
    %c0_361 = arith.constant 0 : index
    %288 = vector.load %arg8[%c5_359, %c1_360, %c0_361] : memref<18x10x16xbf16, #tpu.memory_space<vmem>>, vector<10x8x16xbf16>
    %289 = vector.shape_cast %288 : vector<10x8x16xbf16> to vector<80x16xbf16>
    %c3_362 = arith.constant 3 : index
    %c2_363 = arith.constant 2 : index
    %c1_364 = arith.constant 1 : index
    %c0_365 = arith.constant 0 : index
    %c0_366 = arith.constant 0 : index
    %290 = vector.load %arg3[%c3_362, %c2_363, %c1_364, %c0_365, %c0_366] : memref<4x3x3x16x16xbf16, #tpu.memory_space<vmem>>, vector<1x1x1x16x16xbf16>
    %291 = vector.shape_cast %290 : vector<1x1x1x16x16xbf16> to vector<16x16xbf16>
    %cst_367 = arith.constant dense<0.000000e+00> : vector<80x16xf32>
    %292 = tpu.matmul %289, %291, %cst_367 {dimension_numbers = #tpu.dot_dimension_numbers<[1], [0], [0], [1], [0, 0, 1, 1], [], []>} : vector<80x16xbf16>, vector<16x16xbf16>, vector<80x16xf32> -> vector<80x16xf32>
    %293 = arith.addf %287, %292 : vector<80x16xf32>
    %c5_368 = arith.constant 5 : index
    %c2_369 = arith.constant 2 : index
    %c0_370 = arith.constant 0 : index
    %294 = vector.load %arg8[%c5_368, %c2_369, %c0_370] : memref<18x10x16xbf16, #tpu.memory_space<vmem>>, vector<10x8x16xbf16>
    %295 = vector.shape_cast %294 : vector<10x8x16xbf16> to vector<80x16xbf16>
    %c3_371 = arith.constant 3 : index
    %c2_372 = arith.constant 2 : index
    %c2_373 = arith.constant 2 : index
    %c0_374 = arith.constant 0 : index
    %c0_375 = arith.constant 0 : index
    %296 = vector.load %arg3[%c3_371, %c2_372, %c2_373, %c0_374, %c0_375] : memref<4x3x3x16x16xbf16, #tpu.memory_space<vmem>>, vector<1x1x1x16x16xbf16>
    %297 = vector.shape_cast %296 : vector<1x1x1x16x16xbf16> to vector<16x16xbf16>
    %cst_376 = arith.constant dense<0.000000e+00> : vector<80x16xf32>
    %298 = tpu.matmul %295, %297, %cst_376 {dimension_numbers = #tpu.dot_dimension_numbers<[1], [0], [0], [1], [0, 0, 1, 1], [], []>} : vector<80x16xbf16>, vector<16x16xbf16>, vector<80x16xf32> -> vector<80x16xf32>
    %299 = arith.addf %293, %298 : vector<80x16xf32>
    %cst_377 = arith.constant 0.000000e+00 : f32
    %300 = vector.broadcast %cst_377 : f32 to vector<80x16xf32>
    %301 = arith.maximumf %299, %300 : vector<80x16xf32>
    %302 = vector.shape_cast %301 : vector<80x16xf32> to vector<10x8x16xf32>
    %c8_i32_378 = arith.constant 8 : i32
    %303 = arith.muli %arg1, %c8_i32_378 : i32
    %c5_i32_379 = arith.constant 5 : i32
    %304 = arith.subi %303, %c5_i32_379 : i32
    %c4_i32 = arith.constant 4 : i32
    %305 = arith.addi %304, %c4_i32 : i32
    %306 = tpu.iota {dimensions = array<i32: 0>} : vector<10x1x1xi32>
    %307 = vector.broadcast %305 : i32 to vector<10x1x1xi32>
    %308 = arith.addi %307, %306 : vector<10x1x1xi32>
    %c0_i32_380 = arith.constant 0 : i32
    %309 = vector.broadcast %c0_i32_380 : i32 to vector<10x1x1xi32>
    %310 = arith.cmpi sge, %308, %309 : vector<10x1x1xi32>
    %c8_i32_381 = arith.constant 8 : i32
    %311 = vector.broadcast %c8_i32_381 : i32 to vector<10x1x1xi32>
    %312 = arith.cmpi slt, %308, %311 : vector<10x1x1xi32>
    %313 = arith.andi %310, %312 : vector<10x1x1xi1>
    %cst_382 = arith.constant 0.000000e+00 : f32
    %314 = vector.shape_cast %313 : vector<10x1x1xi1> to vector<10x1x1xi1>
    %315 = vector.broadcast %314 : vector<10x1x1xi1> to vector<10x8x16xi1>
    %316 = vector.broadcast %cst_382 : f32 to vector<10x8x16xf32>
    %317 = arith.select %315, %302, %316 : vector<10x8x16xi1>, vector<10x8x16xf32>
    %318 = arith.truncf %317 : vector<10x8x16xf32> to vector<10x8x16xbf16>
    %c4_383 = arith.constant 4 : index
    %c1_384 = arith.constant 1 : index
    %c0_385 = arith.constant 0 : index
    %319 = vector.load %arg8[%c4_383, %c1_384, %c0_385] : memref<18x10x16xbf16, #tpu.memory_space<vmem>>, vector<10x8x16xbf16>
    tpu.vector_store %arg8[%c4_383, %c1_384, %c0_385], %318 {strides = array<i32>} : memref<18x10x16xbf16, #tpu.memory_space<vmem>>, vector<10x8x16xbf16>,
    %c0_386 = arith.constant 0 : index
    %c0_387 = arith.constant 0 : index
    %320 = vector.load %arg6[%c0_386, %c0_387] : memref<1x128xf32, #tpu.memory_space<vmem>>, vector<1x128xf32>
    %c4_388 = arith.constant 4 : index
    %c0_389 = arith.constant 0 : index
    %c0_390 = arith.constant 0 : index
    %321 = vector.load %arg8[%c4_388, %c0_389, %c0_390] : memref<18x10x16xbf16, #tpu.memory_space<vmem>>, vector<8x8x16xbf16>
    %322 = vector.shape_cast %321 : vector<8x8x16xbf16> to vector<64x16xbf16>
    %c0_391 = arith.constant 0 : index
    %c0_392 = arith.constant 0 : index
    %c0_393 = arith.constant 0 : index
    %c0_394 = arith.constant 0 : index
    %323 = vector.load %arg5[%c0_391, %c0_392, %c0_393, %c0_394] : memref<3x3x16x128xbf16, #tpu.memory_space<vmem>>, vector<1x1x16x128xbf16>
    %324 = vector.shape_cast %323 : vector<1x1x16x128xbf16> to vector<16x128xbf16>
    %cst_395 = arith.constant dense<0.000000e+00> : vector<64x128xf32>
    %325 = tpu.matmul %322, %324, %cst_395 {dimension_numbers = #tpu.dot_dimension_numbers<[1], [0], [0], [1], [0, 0, 1, 1], [], []>} : vector<64x16xbf16>, vector<16x128xbf16>, vector<64x128xf32> -> vector<64x128xf32>
    %326 = vector.broadcast %320 : vector<1x128xf32> to vector<64x128xf32>
    %327 = arith.addf %325, %326 : vector<64x128xf32>
    %c4_396 = arith.constant 4 : index
    %c1_397 = arith.constant 1 : index
    %c0_398 = arith.constant 0 : index
    %328 = vector.load %arg8[%c4_396, %c1_397, %c0_398] : memref<18x10x16xbf16, #tpu.memory_space<vmem>>, vector<8x8x16xbf16>
    %329 = vector.shape_cast %328 : vector<8x8x16xbf16> to vector<64x16xbf16>
    %c0_399 = arith.constant 0 : index
    %c1_400 = arith.constant 1 : index
    %c0_401 = arith.constant 0 : index
    %c0_402 = arith.constant 0 : index
    %330 = vector.load %arg5[%c0_399, %c1_400, %c0_401, %c0_402] : memref<3x3x16x128xbf16, #tpu.memory_space<vmem>>, vector<1x1x16x128xbf16>
    %331 = vector.shape_cast %330 : vector<1x1x16x128xbf16> to vector<16x128xbf16>
    %cst_403 = arith.constant dense<0.000000e+00> : vector<64x128xf32>
    %332 = tpu.matmul %329, %331, %cst_403 {dimension_numbers = #tpu.dot_dimension_numbers<[1], [0], [0], [1], [0, 0, 1, 1], [], []>} : vector<64x16xbf16>, vector<16x128xbf16>, vector<64x128xf32> -> vector<64x128xf32>
    %333 = arith.addf %327, %332 : vector<64x128xf32>
    %c4_404 = arith.constant 4 : index
    %c2_405 = arith.constant 2 : index
    %c0_406 = arith.constant 0 : index
    %334 = vector.load %arg8[%c4_404, %c2_405, %c0_406] : memref<18x10x16xbf16, #tpu.memory_space<vmem>>, vector<8x8x16xbf16>
    %335 = vector.shape_cast %334 : vector<8x8x16xbf16> to vector<64x16xbf16>
    %c0_407 = arith.constant 0 : index
    %c2_408 = arith.constant 2 : index
    %c0_409 = arith.constant 0 : index
    %c0_410 = arith.constant 0 : index
    %336 = vector.load %arg5[%c0_407, %c2_408, %c0_409, %c0_410] : memref<3x3x16x128xbf16, #tpu.memory_space<vmem>>, vector<1x1x16x128xbf16>
    %337 = vector.shape_cast %336 : vector<1x1x16x128xbf16> to vector<16x128xbf16>
    %cst_411 = arith.constant dense<0.000000e+00> : vector<64x128xf32>
    %338 = tpu.matmul %335, %337, %cst_411 {dimension_numbers = #tpu.dot_dimension_numbers<[1], [0], [0], [1], [0, 0, 1, 1], [], []>} : vector<64x16xbf16>, vector<16x128xbf16>, vector<64x128xf32> -> vector<64x128xf32>
    %339 = arith.addf %333, %338 : vector<64x128xf32>
    %c5_412 = arith.constant 5 : index
    %c0_413 = arith.constant 0 : index
    %c0_414 = arith.constant 0 : index
    %340 = vector.load %arg8[%c5_412, %c0_413, %c0_414] : memref<18x10x16xbf16, #tpu.memory_space<vmem>>, vector<8x8x16xbf16>
    %341 = vector.shape_cast %340 : vector<8x8x16xbf16> to vector<64x16xbf16>
    %c1_415 = arith.constant 1 : index
    %c0_416 = arith.constant 0 : index
    %c0_417 = arith.constant 0 : index
    %c0_418 = arith.constant 0 : index
    %342 = vector.load %arg5[%c1_415, %c0_416, %c0_417, %c0_418] : memref<3x3x16x128xbf16, #tpu.memory_space<vmem>>, vector<1x1x16x128xbf16>
    %343 = vector.shape_cast %342 : vector<1x1x16x128xbf16> to vector<16x128xbf16>
    %cst_419 = arith.constant dense<0.000000e+00> : vector<64x128xf32>
    %344 = tpu.matmul %341, %343, %cst_419 {dimension_numbers = #tpu.dot_dimension_numbers<[1], [0], [0], [1], [0, 0, 1, 1], [], []>} : vector<64x16xbf16>, vector<16x128xbf16>, vector<64x128xf32> -> vector<64x128xf32>
    %345 = arith.addf %339, %344 : vector<64x128xf32>
    %c5_420 = arith.constant 5 : index
    %c1_421 = arith.constant 1 : index
    %c0_422 = arith.constant 0 : index
    %346 = vector.load %arg8[%c5_420, %c1_421, %c0_422] : memref<18x10x16xbf16, #tpu.memory_space<vmem>>, vector<8x8x16xbf16>
    %347 = vector.shape_cast %346 : vector<8x8x16xbf16> to vector<64x16xbf16>
    %c1_423 = arith.constant 1 : index
    %c1_424 = arith.constant 1 : index
    %c0_425 = arith.constant 0 : index
    %c0_426 = arith.constant 0 : index
    %348 = vector.load %arg5[%c1_423, %c1_424, %c0_425, %c0_426] : memref<3x3x16x128xbf16, #tpu.memory_space<vmem>>, vector<1x1x16x128xbf16>
    %349 = vector.shape_cast %348 : vector<1x1x16x128xbf16> to vector<16x128xbf16>
    %cst_427 = arith.constant dense<0.000000e+00> : vector<64x128xf32>
    %350 = tpu.matmul %347, %349, %cst_427 {dimension_numbers = #tpu.dot_dimension_numbers<[1], [0], [0], [1], [0, 0, 1, 1], [], []>} : vector<64x16xbf16>, vector<16x128xbf16>, vector<64x128xf32> -> vector<64x128xf32>
    %351 = arith.addf %345, %350 : vector<64x128xf32>
    %c5_428 = arith.constant 5 : index
    %c2_429 = arith.constant 2 : index
    %c0_430 = arith.constant 0 : index
    %352 = vector.load %arg8[%c5_428, %c2_429, %c0_430] : memref<18x10x16xbf16, #tpu.memory_space<vmem>>, vector<8x8x16xbf16>
    %353 = vector.shape_cast %352 : vector<8x8x16xbf16> to vector<64x16xbf16>
    %c1_431 = arith.constant 1 : index
    %c2_432 = arith.constant 2 : index
    %c0_433 = arith.constant 0 : index
    %c0_434 = arith.constant 0 : index
    %354 = vector.load %arg5[%c1_431, %c2_432, %c0_433, %c0_434] : memref<3x3x16x128xbf16, #tpu.memory_space<vmem>>, vector<1x1x16x128xbf16>
    %355 = vector.shape_cast %354 : vector<1x1x16x128xbf16> to vector<16x128xbf16>
    %cst_435 = arith.constant dense<0.000000e+00> : vector<64x128xf32>
    %356 = tpu.matmul %353, %355, %cst_435 {dimension_numbers = #tpu.dot_dimension_numbers<[1], [0], [0], [1], [0, 0, 1, 1], [], []>} : vector<64x16xbf16>, vector<16x128xbf16>, vector<64x128xf32> -> vector<64x128xf32>
    %357 = arith.addf %351, %356 : vector<64x128xf32>
    %c6 = arith.constant 6 : index
    %c0_436 = arith.constant 0 : index
    %c0_437 = arith.constant 0 : index
    %358 = vector.load %arg8[%c6, %c0_436, %c0_437] : memref<18x10x16xbf16, #tpu.memory_space<vmem>>, vector<8x8x16xbf16>
    %359 = vector.shape_cast %358 : vector<8x8x16xbf16> to vector<64x16xbf16>
    %c2_438 = arith.constant 2 : index
    %c0_439 = arith.constant 0 : index
    %c0_440 = arith.constant 0 : index
    %c0_441 = arith.constant 0 : index
    %360 = vector.load %arg5[%c2_438, %c0_439, %c0_440, %c0_441] : memref<3x3x16x128xbf16, #tpu.memory_space<vmem>>, vector<1x1x16x128xbf16>
    %361 = vector.shape_cast %360 : vector<1x1x16x128xbf16> to vector<16x128xbf16>
    %cst_442 = arith.constant dense<0.000000e+00> : vector<64x128xf32>
    %362 = tpu.matmul %359, %361, %cst_442 {dimension_numbers = #tpu.dot_dimension_numbers<[1], [0], [0], [1], [0, 0, 1, 1], [], []>} : vector<64x16xbf16>, vector<16x128xbf16>, vector<64x128xf32> -> vector<64x128xf32>
    %363 = arith.addf %357, %362 : vector<64x128xf32>
    %c6_443 = arith.constant 6 : index
    %c1_444 = arith.constant 1 : index
    %c0_445 = arith.constant 0 : index
    %364 = vector.load %arg8[%c6_443, %c1_444, %c0_445] : memref<18x10x16xbf16, #tpu.memory_space<vmem>>, vector<8x8x16xbf16>
    %365 = vector.shape_cast %364 : vector<8x8x16xbf16> to vector<64x16xbf16>
    %c2_446 = arith.constant 2 : index
    %c1_447 = arith.constant 1 : index
    %c0_448 = arith.constant 0 : index
    %c0_449 = arith.constant 0 : index
    %366 = vector.load %arg5[%c2_446, %c1_447, %c0_448, %c0_449] : memref<3x3x16x128xbf16, #tpu.memory_space<vmem>>, vector<1x1x16x128xbf16>
    %367 = vector.shape_cast %366 : vector<1x1x16x128xbf16> to vector<16x128xbf16>
    %cst_450 = arith.constant dense<0.000000e+00> : vector<64x128xf32>
    %368 = tpu.matmul %365, %367, %cst_450 {dimension_numbers = #tpu.dot_dimension_numbers<[1], [0], [0], [1], [0, 0, 1, 1], [], []>} : vector<64x16xbf16>, vector<16x128xbf16>, vector<64x128xf32> -> vector<64x128xf32>
    %369 = arith.addf %363, %368 : vector<64x128xf32>
    %c6_451 = arith.constant 6 : index
    %c2_452 = arith.constant 2 : index
    %c0_453 = arith.constant 0 : index
    %370 = vector.load %arg8[%c6_451, %c2_452, %c0_453] : memref<18x10x16xbf16, #tpu.memory_space<vmem>>, vector<8x8x16xbf16>
    %371 = vector.shape_cast %370 : vector<8x8x16xbf16> to vector<64x16xbf16>
    %c2_454 = arith.constant 2 : index
    %c2_455 = arith.constant 2 : index
    %c0_456 = arith.constant 0 : index
    %c0_457 = arith.constant 0 : index
    %372 = vector.load %arg5[%c2_454, %c2_455, %c0_456, %c0_457] : memref<3x3x16x128xbf16, #tpu.memory_space<vmem>>, vector<1x1x16x128xbf16>
    %373 = vector.shape_cast %372 : vector<1x1x16x128xbf16> to vector<16x128xbf16>
    %cst_458 = arith.constant dense<0.000000e+00> : vector<64x128xf32>
    %374 = tpu.matmul %371, %373, %cst_458 {dimension_numbers = #tpu.dot_dimension_numbers<[1], [0], [0], [1], [0, 0, 1, 1], [], []>} : vector<64x16xbf16>, vector<16x128xbf16>, vector<64x128xf32> -> vector<64x128xf32>
    %375 = arith.addf %369, %374 : vector<64x128xf32>
    %376 = vector.shape_cast %375 : vector<64x128xf32> to vector<8x8x128xf32>
    %c0_459 = arith.constant 0 : index
    %c0_460 = arith.constant 0 : index
    %c0_461 = arith.constant 0 : index
    %c0_462 = arith.constant 0 : index
    %c0_463 = arith.constant 0 : index
    %377 = vector.load %arg7[%c0_459, %c0_460, %c0_461, %c0_462, %c0_463] : memref<1x1x8x8x128xf32, #tpu.memory_space<vmem>>, vector<1x1x8x8x128xf32>
    %378 = vector.shape_cast %377 : vector<1x1x8x8x128xf32> to vector<8x8x128xf32>
    %379 = vector.shape_cast %376 : vector<8x8x128xf32> to vector<1x1x8x8x128xf32>
    tpu.vector_store %arg7[%c0_459, %c0_460, %c0_461, %c0_462, %c0_463], %379 {strides = array<i32>} : memref<1x1x8x8x128xf32, #tpu.memory_space<vmem>>, vector<1x1x8x8x128xf32>,
    return
  }
  func.func @transform_0(%arg0: i32, %arg1: i32) -> (i32, i32, i32, i32, i32) {
    %c0_i32 = arith.constant 0 : i32
    %c0_i32_0 = arith.constant 0 : i32
    %c0_i32_1 = arith.constant 0 : i32
    %c0_i32_2 = arith.constant 0 : i32
    return %arg0, %arg1, %c0_i32, %c0_i32_0, %c0_i32_1 : i32, i32, i32, i32, i32
  }
  func.func @transform_1(%arg0: i32, %arg1: i32) -> (i32, i32, i32, i32, i32) {
    %c0_i32 = arith.constant 0 : i32
    %c0_i32_0 = arith.constant 0 : i32
    %c0_i32_1 = arith.constant 0 : i32
    %c0_i32_2 = arith.constant 0 : i32
    %c0_i32_3 = arith.constant 0 : i32
    %c0_i32_4 = arith.constant 0 : i32
    return %c0_i32, %c0_i32_0, %c0_i32_1, %c0_i32_2, %c0_i32_3 : i32, i32, i32, i32, i32
  }
  func.func @transform_2(%arg0: i32, %arg1: i32) -> (i32, i32, i32) {
    %c0_i32 = arith.constant 0 : i32
    %c0_i32_0 = arith.constant 0 : i32
    %c0_i32_1 = arith.constant 0 : i32
    %c0_i32_2 = arith.constant 0 : i32
    return %c0_i32, %c0_i32_0, %c0_i32_1 : i32, i32, i32
  }
  func.func @transform_3(%arg0: i32, %arg1: i32) -> (i32, i32, i32, i32) {
    %c0_i32 = arith.constant 0 : i32
    %c0_i32_0 = arith.constant 0 : i32
    %c0_i32_1 = arith.constant 0 : i32
    %c0_i32_2 = arith.constant 0 : i32
    %c0_i32_3 = arith.constant 0 : i32
    return %c0_i32, %c0_i32_0, %c0_i32_1, %c0_i32_2 : i32, i32, i32, i32
  }
  func.func @transform_4(%arg0: i32, %arg1: i32) -> (i32, i32) {
    %c0_i32 = arith.constant 0 : i32
    %c0_i32_0 = arith.constant 0 : i32
    %c0_i32_1 = arith.constant 0 : i32
    return %c0_i32, %c0_i32_0 : i32, i32
  }
  func.func @transform_5(%arg0: i32, %arg1: i32) -> (i32, i32, i32, i32, i32) {
    %c0_i32 = arith.constant 0 : i32
    %c0_i32_0 = arith.constant 0 : i32
    %c0_i32_1 = arith.constant 0 : i32
    %c0_i32_2 = arith.constant 0 : i32
    return %arg0, %arg1, %c0_i32, %c0_i32_0, %c0_i32_1 : i32, i32, i32, i32, i32
  }
}

</mosaic_0001>

<bundles_post_ra>
// kernel: tpu_custom_call.1
= control target key start
LH: loop header
LB: loop body
LE: loop exit
PB: predicated region body
PF: predicated region fallthrough
CT: control target
= control target key end

     0   :  { %10 = vsyncpa [#allocation4], 0  ;;  %s15173_s0 = inlined_call_operand.vmem [shape: bf16[2,1,18,10,16], index: 0, kind: input, shape index: {}]   ;;  %s15174_s1 = inlined_call_operand.vmem [shape: bf16[4,3,3,16,16], index: 1, kind: input, shape index: {}]   ;;  %s15175_s2 = inlined_call_operand.vmem [shape: f32[4,1,16], index: 2, kind: input, shape index: {}]   ;;  %s15176_s3 = inlined_call_operand.vmem [shape: bf16[3,3,16,128], index: 3, kind: input, shape index: {}]   ;;  %s15177_s4 = inlined_call_operand.vmem [shape: f32[1,128], index: 4, kind: input, shape index: {}]   ;;  %s15178_s5 = inlined_call_operand.hbm [shape: f32[2,1,8,8,128], index: 5, kind: output, shape index: {}]  }
   0x1   :  { %12 = vsyncpa [#allocation4 + $0x1], 0  ;;  %s12112_s18 = smov 0   ;;  %s12114_s19 = smov 0  }
   0x2   :  { %s12116_s20 = smov 0   ;;  %s12118_s21 = smov 0  }
   0x3   :  { %s12120_s22 = smov 0   ;;  %s12122_s23 = smov 0  }
   0x4 LB: > { %s10573_s24 = sadd.s32 4294967295, %s12077_s23   ;;  %s10574_s25 = sadd.s32 4294967294, %s12077_s23   ;;  %s12077_s23 = sphi %s12122_s23, %s18_s23   ;;  %s12073_s22 = sphi %s12120_s22, %s15203_s22   ;;  %s12069_s21 = sphi %s12118_s21, %s15202_s21   ;;  %s12065_s20 = sphi %s12116_s20, %s15201_s20   ;;  %s12061_s19 = sphi %s12114_s19, %s15200_s19   ;;  %s12057_s18 = sphi %s12112_s18, %s15199_s18  }
   0x5   : > { %s30_s26 = sadd.s32 1, %s12073_s22  ;;  %s151_s27 = sadd.s32 1, %s12065_s20 }
   0x6   : > { %p32_p0 = scmp.ge.s32.totalorder %s30_s26, 2  ;;  %p161_p1 = scmp.ne.s32.totalorder %s12065_s20, %s12061_s19 }
   0x7   : > { %p162_p2 = scmp.eq.s32.totalorder %s10573_s24, 1  ;;  %p167_p3 = scmp.ne.s32.totalorder %s12061_s19, %s12057_s18 }
   0x8   : > { %s15205_s26 = smov (%p32_p0, %s30_s26), 0  ;;  %p168_p5 = scmp.eq.s32.totalorder %s10574_s25, 1 }
   0x9   : > { %p12152_p4 = por %p162_p2, %p161_p1  ;;  %s146_s29 = ssub.s32 %s12073_s22, %s15205_s26 }
   0xa   : > { %p10577_p6 = scmp.ge.s32.totalorder %s12077_s23, 1  ;;  %p149_p7 = scmp.eq.s32.totalorder %s146_s29, 0 }
   0xb   : > { %p12159_p8 = por %p168_p5, %p167_p3  ;;  %p210_p9 = scmp.lt.s32.totalorder %s12077_s23, 3 }
   0xc   : > { %s12165_s6 = scalar_select %p149_p7, %s12065_s20, %s151_s27  }
   0xd   : > { %p211_p10 = pnand %p10577_p6, %p210_p9 }
   0xf   : > { %214 = sbr.rel (%p211_p10) target bundleno = 1867 (0x74b), region = 40 }
  0x14   : > { %v11800_v0 = vld [vmem:[%s15174_s1] sm:$0xff]  ;;  %p242_p11 = scmp.lt.s32.totalorder %s12069_s21, 1  ;;  %v11802_v2 = vld [vmem:[%s15174_s1 + $0x10] sm:$0xff]  ;;  %v11801_v3 = vld [vmem:[%s15174_s1 + $0x8] sm:$0xff]  ;;  %vm936_vm0 = vcmask 1042432   ;;  %vm937_vm1 = vcmask 1046532  }
  0x15   : > { %v11812_v1 = vld [vmem:[%s15174_s1 + $0x20] sm:$0xff]  ;;  %465 = vmatpush.bf16.msra.mxu0 %v11800_v0  ;;  %11928 = vmatpush.bf16.msra.mxu3 %v11802_v2  ;;  %vm433_vm2 = vcmask 130048   ;;  %vm12186_vm3 = vmor %vm936_vm0, %vm937_vm1  ;;  %vm539_vm4 = vsmask.f32 3328  ;;  %vm540_vm5 = vsmask.f32 7440 }
  0x16   : > { %s243_s15 = scalar_select %p242_p11, %s12069_s21, 1  ;;  %1067 = vmatpush.bf16.msra.mxu2 %v11802_v2  ;;  %830 = vmatpush.bf16.msra.mxu1 %v11801_v3  ;;  %v11811_v34 = vld [vmem:[%s15174_s1 + $0x18] sm:$0xff]  ;;  %vm12237_vm6 = vmor %vm539_vm4, %vm540_vm5  ;;  %vm252_vm7 = vcmask 122880   ;;  %vm253_vm8 = vsmask.f32 256  ;;  %vm2966_vm12 = vcmask 125952  }
  0x17   : > { %vm12864_vm9 = vmand %vm252_vm7, %vm253_vm8  ;;  %vm309_vm10 = vsmask.f32 7938  ;;  %s239_s9 = sand.u32 1, %s12061_s19   ;;  %s11927_s12 = sshll.u32 %s12069_s21, 6 }
  0x18   : > { %s11929_s16 = smul.u32 144, %s243_s15  ;;  %vm12896_vm11 = vmand %vm252_vm7, %vm309_vm10  ;;  %s10578_s10 = sshll.u32 %s239_s9, 6 }
  0x19   : > { %1600 = vmatpush.bf16.msrb.mxu0 %v11812_v1  ;;  %1222 = vmatpush.bf16.msrb.mxu3 %v11811_v34  ;;  %vm12906_vm13 = vmand %vm2966_vm12, %vm309_vm10  ;;  %s15099_s11 = scalar_lea.vmem [#allocation3], %s10578_s10  ;;  %s10487_s15 = scalar_lea.hbm %s15178_s5, %s11927_s12 }
  0x1a   : > { %s12184_s25 = scalar_lea.vmem %s15173_s0, %s11929_s16  ;;  %s10488_s16 = sshll.u32 %s15099_s11, 4  ;;  %s10489_s16 = int_to_ptr.vmem [resolvable:$true] %s10488_s16 }
  0x1b   : > { %v10582_v5 = vld [vmem:[%s12184_s25] sm:$0xf]  ;;  %v11792_v6 = vld [vmem:[%s12184_s25 + $0x4] sm:$0xf0]  ;;  %v12193_v7 = vld [vmem:[%s12184_s25 + $0x64] sm:$0x1] }
  0x1c   : > { %v10583_v8 = vor.u32 %v11792_v6, %v10582_v5  ;;  %v12196_v9 = vld [vmem:[%s12184_s25 + $0x6c] sm:$0x1]  ;;  %v900_v10 = vld [vmem:[%s12184_s25 + $0x60] sm:$0xe]  ;;  %v901_v11 = vld [vmem:[%s12184_s25 + $0x68] sm:$0xe] }
  0x1d   : > { %v10650_v12 = vrot.slane %v900_v10, 9  ;;  %v989_v13 = vrot.slane %v12193_v7, 5  ;;  %v10651_v14 = vrot.slane %v901_v11, 9  ;;  %v993_v15 = vrot.slane %v12196_v9, 5  ;;  %v508_v16 = vld [vmem:[%s12184_s25 + $0x4] sm:$0x1] }
  0x1e   : > { %10616 = vmatmul.msk.bf16.vlgmr.msra.gmra.mxu0 %vm433_vm2, %v10583_v8  ;;  %v510_v17 = vld [vmem:[%s12184_s25 + $0xc] sm:$0x1]  ;;  %v888_v18 = vld [vmem:[%s12184_s25] sm:$0xe]  ;;  %v889_v19 = vld [vmem:[%s12184_s25 + $0x8] sm:$0xe] }
  0x1f   : > { %v990_v20 = vsel %vm12186_vm3, %v10650_v12, %v989_v13  ;;  %v994_v21 = vsel %vm12186_vm3, %v10651_v14, %v993_v15  ;;  %v10638_v22 = vrot.slane %v888_v18, 9  ;;  %v941_v23 = vrot.slane %v508_v16, 5  ;;  %v507_v24 = vld [vmem:[%s12184_s25] sm:$0xf]  ;;  %v509_v25 = vld [vmem:[%s12184_s25 + $0x8] sm:$0xf] }
  0x20   : > { %v1018_v26 = vunpack.c.l.b16 %v990_v20  ;;  %v1019_v27 = vunpack.c.l.b16 %v994_v21  ;;  %v10639_v28 = vrot.slane %v889_v19, 9  ;;  %v945_v29 = vrot.slane %v510_v17, 5  ;;  %v12221_v39 = vld [vmem:[%s12184_s25 + $0x74] sm:$0x1]  ;;  %v902_v40 = vld [vmem:[%s12184_s25 + $0x70] sm:$0xe] }
  0x21   : > { %v942_v30 = vsel %vm12186_vm3, %v10638_v22, %v941_v23  ;;  %v543_v31 = vshrl.u32 %v507_v24, 16  ;;  %v546_v32 = vshll.u32 %v507_v24, 16  ;;  %v552_v33 = vshll.u32 %v508_v16, 16  ;;  %v12225_v44 = vld [vmem:[%s12184_s25 + $0x7c] sm:$0x1]  ;;  %s10490_s17 = sshll.u32 %s10487_s15, 4  ;;  %s10491_s17 = int_to_ptr.hbm [resolvable:$true] %s10490_s17 }
  0x22   : > { %v1028_v35 = vpack.c.b16 %v1019_v27, %v1018_v26  ;;  %v946_v36 = vsel %vm12186_vm3, %v10639_v28, %v945_v29  ;;  %v1006_v37 = vunpack.c.l.b16 %v942_v30  ;;  %v557_v38 = vshrl.u32 %v509_v25, 16  ;;  %v903_v45 = vld [vmem:[%s12184_s25 + $0x78] sm:$0xe]  ;;  %v512_v50 = vld [vmem:[%s12184_s25 + $0x14] sm:$0x1]  ;;  %s10474_s21 = scalar_lea.sflag [#allocation4], %s239_s9 }
  0x23   : > { %v1007_v41 = vunpack.c.l.b16 %v946_v36  ;;  %v545_v42 = vrot.slane %v543_v31, 4  ;;  %v548_v43 = vrot.slane %v546_v32, 5  ;;  %v554_v46 = vrot.slane %v552_v33, 5  ;;  %v10586_v53 = vld [vmem:[%s12184_s25 + $0x10] sm:$0xf]  ;;  %s12013_s24 = sshra.s32 %s10491_s17, 4  ;;  %s12014_s24 = int_to_ptr.hbm [resolvable:$true] %s12013_s24 }
  0x24   : > { %10666 = vmatmul.msk.bf16.vlgmr.msra.gmra.mxu3 %vm433_vm2, %v1028_v35  ;;  %v559_v47 = vrot.slane %v557_v38, 4  ;;  %v560_v48 = vshll.u32 %v509_v25, 16  ;;  %v566_v49 = vshll.u32 %v510_v17, 16  ;;  %v11793_v54 = vld [vmem:[%s12184_s25 + $0x14] sm:$0xf0]  ;;  %v10652_v55 = vrot.slane %v902_v40, 9  ;;  %p12020_p1 = scmp.lt.s32.totalorder %s12014_s24, %s15178_s5 }
  0x25   : > { %v1022_v51 = vpack.c.b16 %v1007_v41, %v1006_v37  ;;  %v549_v52 = vor.u32 %v548_v43, %v545_v42  ;;  %v997_v56 = vrot.slane %v12221_v39, 5  ;;  %v514_v57 = vld [vmem:[%s12184_s25 + $0x1c] sm:$0x1]  ;;  %v890_v58 = vld [vmem:[%s12184_s25 + $0x10] sm:$0xe]  ;;  %v10653_v61 = vrot.slane %v903_v45, 9 }
  0x26   : > { %v562_v60 = vrot.slane %v560_v48, 5  ;;  %v1001_v62 = vrot.slane %v12225_v44, 5  ;;  %v891_v63 = vld [vmem:[%s12184_s25 + $0x18] sm:$0xe]  ;;  %v10640_v2 = vrot.slane %v890_v58, 9  ;;  %v949_v3 = vrot.slane %v512_v50, 5 }
  0x27   : > { %10660 = vmatmul.msk.bf16.vlgmr.msra.gmra.mxu2 %vm433_vm2, %v1022_v51  ;;  %v550_v0 = vrot.slane %v549_v52, 4  ;;  %v998_v1 = vsel %vm12186_vm3, %v10652_v55, %v997_v56  ;;  %v511_v5 = vld [vmem:[%s12184_s25 + $0x10] sm:$0xf]  ;;  %v568_v8 = vrot.slane %v566_v49, 5  ;;  %v10641_v11 = vrot.slane %v891_v63, 9  ;;  %s12015_s27 = scalar_lea.hbm %s12014_s24, 64 }
  0x28   : > { %v563_v6 = vor.u32 %v562_v60, %v559_v47  ;;  %v1002_v10 = vsel %vm12186_vm3, %v10653_v61, %v1001_v62  ;;  %v953_v13 = vrot.slane %v514_v57, 5  ;;  %v513_v14 = vld [vmem:[%s12184_s25 + $0x18] sm:$0xf]  ;;  %v10587_v16 = vor.u32 %v11793_v54, %v10586_v53  ;;  %v515_v45 = vld [vmem:[%s12184_s25 + $0x20] sm:$0xf]  ;;  %p12016_p12 = scmp.ne.s32.totalorder %s12014_s24, %s12015_s27  ;;  %s12019_s8 = scalar_lea.hbm %s15178_s5, 128 }
  0x29   : > { %v555_v12 = vsel %vm12237_vm6, %v550_v0, %v554_v46  ;;  %v1020_v17 = vunpack.c.l.b16 %v998_v1  ;;  %v571_v18 = vshrl.u32 %v511_v5, 16  ;;  %v1021_v20 = vunpack.c.l.b16 %v1002_v10  ;;  %v517_v48 = vld [vmem:[%s12184_s25 + $0x28] sm:$0xf]  ;;  %v516_v49 = vld [vmem:[%s12184_s25 + $0x24] sm:$0x1]  ;;  %p12021_p2 = scmp.lt.s32.totalorder %s12019_s8, %s12015_s27 }
  0x2a   : > { %v564_v15 = vrot.slane %v563_v6, 4  ;;  %v769_v19 = vunpack.c.l.b16 %v555_v12  ;;  %v950_v21 = vsel %vm12186_vm3, %v10640_v2, %v949_v3  ;;  %v574_v22 = vshll.u32 %v511_v5, 16  ;;  %v892_v51 = vld [vmem:[%s12184_s25 + $0x20] sm:$0xe]  ;;  %v893_v52 = vld [vmem:[%s12184_s25 + $0x28] sm:$0xe]  ;;  %p12017_p13 = pnand %p12016_p12, %p12152_p4 }
  0x2b   : > { %v954_v24 = vsel %vm12186_vm3, %v10641_v11, %v953_v13  ;;  %v573_v25 = vrot.slane %v571_v18, 4  ;;  %v585_v26 = vshrl.u32 %v513_v14, 16  ;;  %v588_v29 = vshll.u32 %v513_v14, 16  ;;  %v11794_v58 = vld [vmem:[%s12184_s25 + $0x24] sm:$0xf0]  ;;  %p12022_p3 = por %p12021_p2, %p12020_p1 }
  0x2c   : > { %v569_v23 = vsel %vm12237_vm6, %v564_v15, %v568_v8  ;;  %v576_v28 = vrot.slane %v574_v22, 5  ;;  %v1008_v30 = vunpack.c.l.b16 %v950_v21  ;;  %v580_v31 = vshll.u32 %v512_v50, 16  ;;  %v518_v50 = vld [vmem:[%s12184_s25 + $0x2c] sm:$0x1]  ;;  %v10688_v15 = vld [vmem:[%s12184_s25 + $0x8] sm:$0xf]  ;;  %p12018_p0 = pneg %p12017_p13 }
  0x2d   : > { %v770_v27 = vunpack.c.l.b16 %v569_v23  ;;  %v587_v32 = vrot.slane %v585_v26, 4  ;;  %v594_v33 = vshll.u32 %v514_v57, 16  ;;  %v1009_v35 = vunpack.c.l.b16 %v954_v24  ;;  %v10590_v57 = vld [vmem:[%s12184_s25 + $0x20] sm:$0xf]  ;;  %v519_v24 = vld [vmem:[%s12184_s25 + $0x30] sm:$0xf] }
  0x2e   : > { %10617 = vmatmul.msk.bf16.gmra.mxu0 %vm433_vm2, %v10587_v16  ;;  %v577_v36 = vor.u32 %v576_v28, %v573_v25  ;;  %v590_v37 = vrot.slane %v588_v29, 5  ;;  %v1029_v38 = vpack.c.b16 %v1021_v20, %v1020_v17  ;;  %v582_v42 = vrot.slane %v580_v31, 5  ;;  %v11803_v16 = vld [vmem:[%s12184_s25 + $0xc] sm:$0xf0]  ;;  %v521_v25 = vld [vmem:[%s12184_s25 + $0x38] sm:$0xf]  ;;  %p12023_p5 = pnand %p12022_p3, %p12018_p0 }
  0x2f   : > { %v785_v34 = vpack.c.b16 %v770_v27, %v769_v19  ;;  %v596_v43 = vrot.slane %v594_v33, 5  ;;  %v1023_v46 = vpack.c.b16 %v1009_v35, %v1008_v30  ;;  %v599_v53 = vshrl.u32 %v515_v45, 16  ;;  %v520_v31 = vld [vmem:[%s12184_s25 + $0x34] sm:$0x1]  ;;  %v894_v33 = vld [vmem:[%s12184_s25 + $0x30] sm:$0xe] }
  0x30   : > { %v591_v40 = vor.u32 %v590_v37, %v587_v32  ;;  %v578_v41 = vrot.slane %v577_v36, 4  ;;  %v602_v54 = vshll.u32 %v515_v45, 16  ;;  %v613_v60 = vshrl.u32 %v517_v48, 16  ;;  %v522_v32 = vld [vmem:[%s12184_s25 + $0x3c] sm:$0x1] }
  0x31   : > { %10630 = vmatmul.msk.bf16.vlgmr.msra.gmra.mxu1 %vm433_vm2, %v785_v34  ;;  %v616_v61 = vshll.u32 %v517_v48, 16  ;;  %v10642_v62 = vrot.slane %v892_v51, 9  ;;  %v957_v63 = vrot.slane %v516_v49, 5  ;;  %v10643_v0 = vrot.slane %v893_v52, 9  ;;  %v895_v34 = vld [vmem:[%s12184_s25 + $0x38] sm:$0xe] }
  0x32   : > { %v592_v47 = vrot.slane %v591_v40, 4  ;;  %v583_v55 = vsel %vm12237_vm6, %v578_v41, %v582_v42  ;;  %v961_v1 = vrot.slane %v518_v50, 5  ;;  %v10591_v5 = vor.u32 %v11794_v58, %v10590_v57  ;;  %v10594_v42 = vld [vmem:[%s12184_s25 + $0x30] sm:$0xf]  ;;  %v10692_v58 = vld [vmem:[%s12184_s25 + $0x18] sm:$0xf] }
  0x33   : > { %v771_v2 = vunpack.c.l.b16 %v583_v55  ;;  %v601_v6 = vrot.slane %v599_v53, 4  ;;  %v604_v8 = vrot.slane %v602_v54, 5  ;;  %v615_v10 = vrot.slane %v613_v60, 4  ;;  %v11804_v60 = vld [vmem:[%s12184_s25 + $0x1c] sm:$0xf0] }
  0x34   : > { %10667 = vmatmul.msk.bf16.gmra.mxu3 %vm433_vm2, %v1029_v38  ;;  %v597_v56 = vsel %vm12237_vm6, %v592_v47, %v596_v43  ;;  %v618_v11 = vrot.slane %v616_v61, 5  ;;  %v958_v12 = vsel %vm12186_vm3, %v10642_v62, %v957_v63  ;;  %v962_v13 = vsel %vm12186_vm3, %v10643_v0, %v961_v1  ;;  %v11795_v43 = vld [vmem:[%s12184_s25 + $0x34] sm:$0xf0] }
  0x35   : > { %v772_v3 = vunpack.c.l.b16 %v597_v56  ;;  %v605_v17 = vor.u32 %v604_v8, %v601_v6  ;;  %v608_v18 = vshll.u32 %v516_v49, 16  ;;  %v622_v20 = vshll.u32 %v518_v50, 16 }
  0x36   : > { %v619_v19 = vor.u32 %v618_v11, %v615_v10  ;;  %v1010_v21 = vunpack.c.l.b16 %v958_v12  ;;  %v1011_v22 = vunpack.c.l.b16 %v962_v13  ;;  %v10689_v23 = vor.u32 %v11803_v16, %v10688_v15  ;;  %v523_v12 = vld [vmem:[%s12184_s25 + $0x40] sm:$0xf]  ;;  %v525_v13 = vld [vmem:[%s12184_s25 + $0x48] sm:$0xf] }
  0x37   : > { %10661 = vmatmul.msk.bf16.gmra.mxu2 %vm433_vm2, %v1023_v46  ;;  %v786_v14 = vpack.c.b16 %v772_v3, %v771_v2  ;;  %v606_v26 = vrot.slane %v605_v17, 4  ;;  %v610_v27 = vrot.slane %v608_v18, 5  ;;  %v624_v29 = vrot.slane %v622_v20, 5  ;;  %v524_v17 = vld [vmem:[%s12184_s25 + $0x44] sm:$0x1] }
  0x38   : > { %v620_v28 = vrot.slane %v619_v19, 4  ;;  %v1024_v30 = vpack.c.b16 %v1011_v22, %v1010_v21  ;;  %v627_v35 = vshrl.u32 %v519_v24, 16  ;;  %v630_v36 = vshll.u32 %v519_v24, 16  ;;  %v526_v18 = vld [vmem:[%s12184_s25 + $0x4c] sm:$0x1] }
  0x39   : > { %v641_v37 = vshrl.u32 %v521_v25, 16  ;;  %v644_v38 = vshll.u32 %v521_v25, 16  ;;  %v611_v40 = vsel %vm12237_vm6, %v606_v26, %v610_v27  ;;  %v10644_v45 = vrot.slane %v894_v33, 9  ;;  %v896_v19 = vld [vmem:[%s12184_s25 + $0x40] sm:$0xe] }
  0x3a   : > { %v625_v41 = vsel %vm12237_vm6, %v620_v28, %v624_v29  ;;  %v965_v46 = vrot.slane %v520_v31, 5  ;;  %v10645_v47 = vrot.slane %v895_v34, 9  ;;  %v969_v48 = vrot.slane %v522_v32, 5  ;;  %v897_v20 = vld [vmem:[%s12184_s25 + $0x48] sm:$0xe] }
  0x3b   : > { %v629_v49 = vrot.slane %v627_v35, 4  ;;  %v632_v50 = vrot.slane %v630_v36, 5  ;;  %v643_v51 = vrot.slane %v641_v37, 4  ;;  %v646_v52 = vrot.slane %v644_v38, 5  ;;  %v10598_v26 = vld [vmem:[%s12184_s25 + $0x40] sm:$0xf] }
  0x3c   : > { %v773_v53 = vunpack.c.l.b16 %v611_v40  ;;  %v774_v54 = vunpack.c.l.b16 %v625_v41  ;;  %v10595_v55 = vor.u32 %v11795_v43, %v10594_v42  ;;  %v966_v56 = vsel %vm12186_vm3, %v10644_v45, %v965_v46  ;;  %v11796_v27 = vld [vmem:[%s12184_s25 + $0x44] sm:$0xf0]  ;;  %v11805_v45 = vld [vmem:[%s12184_s25 + $0x2c] sm:$0xf0] }
  0x3d   : > { %v636_v57 = vshll.u32 %v520_v31, 16  ;;  %v970_v61 = vsel %vm12186_vm3, %v10645_v47, %v969_v48  ;;  %v633_v62 = vor.u32 %v632_v50, %v629_v49  ;;  %v647_v63 = vor.u32 %v646_v52, %v643_v51  ;;  %v10696_v43 = vld [vmem:[%s12184_s25 + $0x28] sm:$0xf] }
  0x3e   : > { %10618 = vmatmul.msk.bf16.gmra.mxu0 %vm433_vm2, %v10591_v5  ;;  %v650_v0 = vshll.u32 %v522_v32, 16  ;;  %v787_v1 = vpack.c.b16 %v774_v54, %v773_v53  ;;  %v10693_v2 = vor.u32 %v11804_v60, %v10692_v58  ;;  %v1012_v3 = vunpack.c.l.b16 %v966_v56  ;;  %v529_v58 = vld [vmem:[%s12184_s25 + $0x58] sm:$0xf]  ;;  %v10602_v60 = vld [vmem:[%s12184_s25 + $0x50] sm:$0xf] }
  0x3f   : > { %v1013_v5 = vunpack.c.l.b16 %v970_v61  ;;  %v634_v6 = vrot.slane %v633_v62, 4  ;;  %v638_v8 = vrot.slane %v636_v57, 5  ;;  %v648_v10 = vrot.slane %v647_v63, 4  ;;  %v527_v57 = vld [vmem:[%s12184_s25 + $0x50] sm:$0xf] }
  0x40   : > { %v652_v11 = vrot.slane %v650_v0, 5  ;;  %v655_v21 = vshrl.u32 %v523_v12, 16  ;;  %v658_v22 = vshll.u32 %v523_v12, 16  ;;  %v672_v24 = vshll.u32 %v525_v13, 16  ;;  %v528_v61 = vld [vmem:[%s12184_s25 + $0x54] sm:$0x1] }
  0x41   : > { %10631 = vmatmul.msk.bf16.gmra.mxu1 %vm433_vm2, %v786_v14  ;;  %v1025_v14 = vpack.c.b16 %v1013_v5, %v1012_v3  ;;  %v639_v15 = vsel %vm12237_vm6, %v634_v6, %v638_v8  ;;  %v10646_v28 = vrot.slane %v896_v19, 9  ;;  %v10647_v31 = vrot.slane %v897_v20, 9  ;;  %v530_v0 = vld [vmem:[%s12184_s25 + $0x5c] sm:$0x1]  ;;  %v11797_v3 = vld [vmem:[%s12184_s25 + $0x54] sm:$0xf0] }
  0x42   : > { %v653_v16 = vsel %vm12237_vm6, %v648_v10, %v652_v11  ;;  %v775_v25 = vunpack.c.l.b16 %v639_v15  ;;  %v977_v32 = vrot.slane %v526_v18, 5  ;;  %v657_v33 = vrot.slane %v655_v21, 4 }
  0x43   : > { %v776_v29 = vunpack.c.l.b16 %v653_v16  ;;  %v660_v34 = vrot.slane %v658_v22, 5  ;;  %v674_v36 = vrot.slane %v672_v24, 5  ;;  %v10599_v37 = vor.u32 %v11796_v27, %v10598_v26  ;;  %v11806_v26 = vld [vmem:[%s12184_s25 + $0x3c] sm:$0xf0] }
  0x44   : > { %10722 = vmatmul.msk.bf16.vlgmr.msrb.gmra.mxu3 %vm433_vm2, %v10689_v23  ;;  %v669_v23 = vshrl.u32 %v525_v13, 16  ;;  %v978_v40 = vsel %vm12186_vm3, %v10647_v31, %v977_v32  ;;  %v664_v41 = vshll.u32 %v524_v17, 16  ;;  %v678_v48 = vshll.u32 %v526_v18, 16 }
  0x45   : > { %v788_v42 = vpack.c.b16 %v776_v29, %v775_v25  ;;  %v661_v46 = vor.u32 %v660_v34, %v657_v33  ;;  %v1015_v50 = vunpack.c.l.b16 %v978_v40  ;;  %v10697_v51 = vor.u32 %v11805_v45, %v10696_v43  ;;  %v10700_v25 = vld [vmem:[%s12184_s25 + $0x38] sm:$0xf]  ;;  %v531_v34 = vld [vmem:[%s12184_s25 + $0x60] sm:$0xf] }
  0x46   : > { %v671_v35 = vrot.slane %v669_v23, 4  ;;  %v666_v53 = vrot.slane %v664_v41, 5  ;;  %v683_v5 = vshrl.u32 %v527_v57, 16  ;;  %v686_v6 = vshll.u32 %v527_v57, 16 }
  0x47   : > { %10662 = vmatmul.msk.bf16.gmra.mxu2 %vm433_vm2, %v1024_v30  ;;  %v973_v30 = vrot.slane %v524_v17, 5  ;;  %v662_v52 = vrot.slane %v661_v46, 4  ;;  %v697_v8 = vshrl.u32 %v529_v58, 16  ;;  %v700_v10 = vshll.u32 %v529_v58, 16 }
  0x48   : > { %v675_v47 = vor.u32 %v674_v36, %v671_v35  ;;  %v981_v12 = vrot.slane %v528_v61, 5  ;;  %v10603_v17 = vor.u32 %v11797_v3, %v10602_v60  ;;  %v685_v18 = vrot.slane %v683_v5, 4  ;;  %v533_v35 = vld [vmem:[%s12184_s25 + $0x68] sm:$0xf]  ;;  %v11807_v3 = vld [vmem:[%s12184_s25 + $0x4c] sm:$0xf0] }
  0x49   : > { %v974_v38 = vsel %vm12186_vm3, %v10646_v28, %v973_v30  ;;  %v667_v62 = vsel %vm12237_vm6, %v662_v52, %v666_v53  ;;  %v688_v19 = vrot.slane %v686_v6, 5  ;;  %v699_v20 = vrot.slane %v697_v8, 4  ;;  %v11798_v52 = vld [vmem:[%s12184_s25 + $0x64] sm:$0xf0]  ;;  %v10732_v6 = vld [vmem:[%s12184_s25 + $0x10] sm:$0xf] }
  0x4a   : > { %v1014_v49 = vunpack.c.l.b16 %v974_v38  ;;  %v676_v54 = vrot.slane %v675_v47, 4  ;;  %v777_v15 = vunpack.c.l.b16 %v667_v62  ;;  %v702_v21 = vrot.slane %v700_v10, 5  ;;  %v11823_v47 = vld [vmem:[%s15174_s1 + $0x38] sm:$0xff]  ;;  %v10730_v5 = vld [vmem:[%s12184_s25 + $0x8] sm:$0xf] }
  0x4b   : > { %v689_v27 = vor.u32 %v688_v19, %v685_v18  ;;  %v692_v28 = vshll.u32 %v528_v61, 16  ;;  %v706_v30 = vshll.u32 %v530_v0, 16  ;;  %v10701_v33 = vor.u32 %v11806_v26, %v10700_v25  ;;  %2367 = vmatpush.bf16.msra.mxu3 %v11823_v47  ;;  %v11824_v18 = vld [vmem:[%s15174_s1 + $0x40] sm:$0xff]  ;;  %v11822_v19 = vld [vmem:[%s15174_s1 + $0x30] sm:$0xff] }
  0x4c   : > { %v1026_v56 = vpack.c.b16 %v1015_v50, %v1014_v49  ;;  %v703_v29 = vor.u32 %v702_v21, %v699_v20  ;;  %v714_v43 = vshll.u32 %v531_v34, 16  ;;  %v725_v45 = vshrl.u32 %v533_v35, 16  ;;  %2601 = vmatpush.bf16.msra.mxu0 %v11824_v18  ;;  %1989 = vmatpush.bf16.msrb.mxu2 %v11822_v19  ;;  %v10846_v18 = vld [vmem:[%s12184_s25 + $0x20] sm:$0xf]  ;;  %v12417_v19 = vld [vmem:[%s12184_s25 + $0x1c] sm:$0x1] }
  0x4d   : > { %v690_v36 = vrot.slane %v689_v27, 4  ;;  %v708_v40 = vrot.slane %v706_v30, 5  ;;  %v728_v46 = vshll.u32 %v533_v35, 16  ;;  %v720_v62 = vshll.u32 %v12193_v7, 16  ;;  %v10842_v27 = vld [vmem:[%s12184_s25 + $0x10] sm:$0xf] }
  0x4e   : > { %10619 = vmatmul.msk.bf16.gmra.mxu0 %vm433_vm2, %v10595_v55  ;;  %v680_v55 = vrot.slane %v678_v48, 5  ;;  %v704_v38 = vrot.slane %v703_v29, 4  ;;  %v11813_v48 = vld [vmem:[%s15174_s1 + $0x28] sm:$0xff]  ;;  %v1316_v7 = vshll.u32 %v10730_v5, 16 }
  0x4f   : > { %1834 = vmatpush.bf16.msrb.mxu1 %v11813_v48  ;;  %v722_v10 = vrot.slane %v720_v62, 5  ;;  %v10734_v62 = vld [vmem:[%s12184_s25 + $0x18] sm:$0xf] }
  0x50   : > { %v681_v63 = vsel %vm12237_vm6, %v676_v54, %v680_v55  ;;  %v709_v50 = vsel %vm12237_vm6, %v704_v38, %v708_v40  ;;  %v716_v54 = vrot.slane %v714_v43, 5  ;;  %v727_v55 = vrot.slane %v725_v45, 4  ;;  %v11799_v38 = vld [vmem:[%s12184_s25 + $0x74] sm:$0xf0] }
  0x51   : > { %10632 = vmatmul.msk.bf16.gmra.mxu1 %vm433_vm2, %v787_v1  ;;  %v898_v1 = vld [vmem:[%s12184_s25 + $0x50] sm:$0xe]  ;;  %v778_v16 = vunpack.c.l.b16 %v681_v63  ;;  %v780_v58 = vunpack.c.l.b16 %v709_v50  ;;  %v734_v63 = vshll.u32 %v12196_v9, 16  ;;  %v1327_v9 = vshrl.u32 %v10732_v6, 16 }
  0x52   : > { %v10648_v11 = vrot.slane %v898_v1, 9  ;;  %v1318_v29 = vrot.slane %v1316_v7, 5 }
  0x53   : > { %v789_v24 = vpack.c.b16 %v778_v16, %v777_v15  ;;  %v537_v15 = vld [vmem:[%s12184_s25 + $0x78] sm:$0xf]  ;;  %v1313_v16 = vshrl.u32 %v10730_v5, 16  ;;  %v1329_v30 = vrot.slane %v1327_v9, 4 }
  0x54   : > { %10723 = vmatmul.msk.bf16.gmra.mxu3 %vm433_vm2, %v10693_v2  ;;  %v899_v2 = vld [vmem:[%s12184_s25 + $0x58] sm:$0xe]  ;;  %v982_v22 = vsel %vm12186_vm3, %v10648_v11, %v981_v12  ;;  %v736_v11 = vrot.slane %v734_v63, 5  ;;  %v756_v25 = vshll.u32 %v537_v15, 16  ;;  %v10736_v63 = vld [vmem:[%s12184_s25 + $0x20] sm:$0xf] }
  0x55   : > { %v10649_v13 = vrot.slane %v899_v2, 9  ;;  %v1016_v31 = vunpack.c.l.b16 %v982_v22  ;;  %v10704_v2 = vld [vmem:[%s12184_s25 + $0x48] sm:$0xf]  ;;  %v753_v22 = vshrl.u32 %v537_v15, 16  ;;  %v1315_v26 = vrot.slane %v1313_v16, 4 }
  0x56   : > { %v10705_v12 = vor.u32 %v11807_v3, %v10704_v2  ;;  %v758_v43 = vrot.slane %v756_v25, 5 }
  0x57   : > { %10663 = vmatmul.msk.bf16.gmra.mxu2 %vm433_vm2, %v1025_v14  ;;  %v985_v14 = vrot.slane %v530_v0, 5  ;;  %v1319_v45 = vor.u32 %v1318_v29, %v1315_v26 }
  0x59   : > { %v986_v23 = vsel %vm12186_vm3, %v10649_v13, %v985_v14  ;;  %v535_v14 = vld [vmem:[%s12184_s25 + $0x70] sm:$0xf] }
  0x5a   : > { %v1017_v32 = vunpack.c.l.b16 %v986_v23  ;;  %v739_v20 = vshrl.u32 %v535_v14, 16  ;;  %v742_v21 = vshll.u32 %v535_v14, 16 }
  0x5c   : > { %v1027_v41 = vpack.c.b16 %v1017_v32, %v1016_v31  ;;  %v741_v40 = vrot.slane %v739_v20, 4  ;;  %v12420_v20 = vld [vmem:[%s12184_s25 + $0x24] sm:$0x1] }
  0x5d   : > { %v1364_v29 = vshll.u32 %v12420_v20, 16 }
  0x5e   : > { %10620 = vmatmul.msk.bf16.gmra.mxu0 %vm433_vm2, %v10599_v37  ;;  %v694_v37 = vrot.slane %v692_v28, 5  ;;  %v11814_v28 = vld [vmem:[%s12184_s25 + $0x14] sm:$0xf0] }
  0x5f   : > { %v10843_v32 = vor.u32 %v11814_v28, %v10842_v27  ;;  %v1350_v27 = vshll.u32 %v12417_v19, 16 }
  0x60   : > { %v695_v49 = vsel %vm12237_vm6, %v690_v36, %v694_v37  ;;  %v10610_v37 = vld [vmem:[%s12184_s25 + $0x70] sm:$0xf] }
  0x61   : > { %10633 = vmatmul.msk.bf16.gmra.mxu1 %vm433_vm2, %v788_v42  ;;  %v711_v42 = vshrl.u32 %v531_v34, 16  ;;  %v779_v57 = vunpack.c.l.b16 %v695_v49  ;;  %v12391_v34 = vld [vmem:[%s12184_s25 + $0x14] sm:$0x1]  ;;  %v10611_v49 = vor.u32 %v11799_v38, %v10610_v37  ;;  %v10777_v37 = vld [vmem:[%s12184_s25 + $0x10] sm:$0xe] }
  0x62   : > { %v1336_v48 = vshll.u32 %v12391_v34, 16 }
  0x63   : > { %v713_v53 = vrot.slane %v711_v42, 4  ;;  %v790_v1 = vpack.c.b16 %v780_v58, %v779_v57  ;;  %v755_v42 = vrot.slane %v753_v22, 4  ;;  %v1320_v57 = vrot.slane %v1319_v45, 4  ;;  %v10740_v45 = vld [vmem:[%s12184_s25 + $0x30] sm:$0xf] }
  0x64   : > { %10724 = vmatmul.msk.bf16.gmra.mxu3 %vm433_vm2, %v10697_v51  ;;  %v10606_v51 = vld [vmem:[%s12184_s25 + $0x60] sm:$0xf] }
  0x65   : > { %v10607_v60 = vor.u32 %v11798_v52, %v10606_v51  ;;  %v717_v61 = vor.u32 %v716_v54, %v713_v53  ;;  %v10708_v51 = vld [vmem:[%s12184_s25 + $0x58] sm:$0xf]  ;;  %v748_v53 = vshll.u32 %v12221_v39, 16  ;;  %v759_v54 = vor.u32 %v758_v43, %v755_v42  ;;  %v10738_v43 = vld [vmem:[%s12184_s25 + $0x28] sm:$0xf] }
  0x66   : > { %v1366_v42 = vrot.slane %v1364_v29, 5 }
  0x67   : > { %10664 = vmatmul.msk.bf16.gmra.mxu2 %vm433_vm2, %v1026_v56  ;;  %v730_v56 = vrot.slane %v728_v46, 5  ;;  %v718_v8 = vrot.slane %v717_v61, 4  ;;  %v1338_v61 = vrot.slane %v1336_v48, 5  ;;  %v760_v5 = vrot.slane %v759_v54, 4 }
  0x69   : > { %v731_v0 = vor.u32 %v730_v56, %v727_v55  ;;  %v723_v23 = vsel %vm12237_vm6, %v718_v8, %v722_v10  ;;  %v762_v55 = vshll.u32 %v12225_v44, 16  ;;  %v11808_v56 = vld [vmem:[%s12184_s25 + $0x5c] sm:$0xf0]  ;;  %v1344_v8 = vshll.u32 %v10734_v62, 16 }
  0x6a   : > { %v781_v35 = vunpack.c.l.b16 %v723_v23  ;;  %v1355_v10 = vshrl.u32 %v10736_v63, 16 }
  0x6b   : > { %v732_v13 = vrot.slane %v731_v0, 4  ;;  %v10709_v0 = vor.u32 %v11808_v56, %v10708_v51  ;;  %v764_v2 = vrot.slane %v762_v55, 5  ;;  %v1346_v7 = vrot.slane %v1344_v8, 5 }
  0x6c   : > { %v1357_v9 = vrot.slane %v1355_v10, 4  ;;  %v1369_v51 = vshrl.u32 %v10738_v43, 16  ;;  %v1383_v55 = vshrl.u32 %v10740_v45, 16  ;;  %v1386_v56 = vshll.u32 %v10740_v45, 16 }
  0x6e   : > { %10621 = vmatmul.msk.bf16.gmra.mxu0 %vm433_vm2, %v10603_v17  ;;  %v1330_v17 = vshll.u32 %v10732_v6, 16  ;;  %v1341_v6 = vshrl.u32 %v10734_v62, 16  ;;  %v1371_v62 = vrot.slane %v1369_v51, 4 }
  0x70   : > { %v1332_v31 = vrot.slane %v1330_v17, 5  ;;  %v1343_v16 = vrot.slane %v1341_v6, 4 }
  0x71   : > { %10634 = vmatmul.msk.bf16.gmra.mxu1 %vm433_vm2, %v789_v24  ;;  %v737_v24 = vsel %vm12237_vm6, %v732_v13, %v736_v11  ;;  %v1358_v11 = vshll.u32 %v10736_v63, 16  ;;  %v765_v13 = vsel %vm12237_vm6, %v760_v5, %v764_v2  ;;  %v12451_v2 = vld [vmem:[%s12184_s25 + $0x34] sm:$0x1]  ;;  %v1388_v5 = vrot.slane %v1386_v56, 5 }
  0x72   : > { %v782_v36 = vunpack.c.l.b16 %v737_v24  ;;  %v1333_v47 = vor.u32 %v1332_v31, %v1329_v30  ;;  %v784_v24 = vunpack.c.l.b16 %v765_v13  ;;  %v1347_v26 = vor.u32 %v1346_v7, %v1343_v16  ;;  %v10712_v31 = vld [vmem:[%s12184_s25 + $0x68] sm:$0xf]  ;;  %v10716_v7 = vld [vmem:[%s12184_s25 + $0x78] sm:$0xf] }
  0x73   : > { %v1360_v17 = vrot.slane %v1358_v11, 5 }
  0x74   : > { %10725 = vmatmul.msk.bf16.gmra.mxu3 %vm433_vm2, %v10701_v33  ;;  %v12388_v33 = vld [vmem:[%s12184_s25 + $0xc] sm:$0x1]  ;;  %v791_v50 = vpack.c.b16 %v782_v36, %v781_v35  ;;  %v11809_v35 = vld [vmem:[%s12184_s25 + $0x6c] sm:$0xf0]  ;;  %v10776_v36 = vld [vmem:[%s12184_s25 + $0x8] sm:$0xe] }
  0x75   : > { %v1322_v46 = vshll.u32 %v12388_v33, 16  ;;  %v1361_v28 = vor.u32 %v1360_v17, %v1357_v9  ;;  %v1348_v38 = vrot.slane %v1347_v26, 4  ;;  %v1708_v48 = vrot.slane %v12388_v33, 5  ;;  %v10884_v33 = vld [vmem:[%s12184_s25 + $0x10] sm:$0xf] }
  0x76   : > { %v2080_v6 = vshrl.u32 %v10884_v33, 16  ;;  %v2083_v8 = vshll.u32 %v10884_v33, 16  ;;  %v11810_v17 = vld [vmem:[%s12184_s25 + $0x7c] sm:$0xf0] }
  0x77   : > { %10665 = vmatmul.msk.bf16.gmra.mxu2 %vm433_vm2, %v1027_v41  ;;  %v744_v41 = vrot.slane %v742_v21, 5  ;;  %v1324_v58 = vrot.slane %v1322_v46, 5  ;;  %v11815_v21 = vld [vmem:[%s12184_s25 + $0x24] sm:$0xf0]  ;;  %v10713_v46 = vor.u32 %v11809_v35, %v10712_v31  ;;  %v12465_v31 = vld [vmem:[%s12184_s25 + $0x1c] sm:$0x1]  ;;  %v10717_v35 = vor.u32 %v11810_v17, %v10716_v7 }
  0x78   : > { %v10847_v22 = vor.u32 %v11815_v21, %v10846_v18  ;;  %v10778_v18 = vld [vmem:[%s12184_s25 + $0x18] sm:$0xe]  ;;  %v2082_v26 = vrot.slane %v2080_v6, 4  ;;  %v12489_v6 = vld [vmem:[%s12184_s25 + $0x44] sm:$0x1] }
  0x79   : > { %v745_v52 = vor.u32 %v744_v41, %v741_v40  ;;  %v1325_v39 = vsel %vm12237_vm6, %v1320_v57, %v1324_v58  ;;  %v1352_v40 = vrot.slane %v1350_v27, 5  ;;  %v1362_v41 = vrot.slane %v1361_v28, 4  ;;  %v10886_v58 = vld [vmem:[%s12184_s25 + $0x18] sm:$0xf] }
  0x7a   : > { %v1539_v14 = vunpack.c.l.b16 %v1325_v39  ;;  %v10850_v39 = vld [vmem:[%s12184_s25 + $0x30] sm:$0xf]  ;;  %v2094_v10 = vshrl.u32 %v10886_v58, 16  ;;  %v2097_v11 = vshll.u32 %v10886_v58, 16  ;;  %v2085_v27 = vrot.slane %v2083_v8, 5 }
  0x7b   : > { %v746_v3 = vrot.slane %v745_v52, 4  ;;  %v1372_v52 = vshll.u32 %v10738_v43, 16  ;;  %v1367_v54 = vsel %vm12237_vm6, %v1362_v41, %v1366_v42 }
  0x7c   : > { %v2096_v28 = vrot.slane %v2094_v10, 4  ;;  %v2099_v29 = vrot.slane %v2097_v11, 5  ;;  %v10888_v11 = vld [vmem:[%s12184_s25 + $0x20] sm:$0xf] }
  0x7d   : > { %v1374_v63 = vrot.slane %v1372_v52, 5  ;;  %v2103_v52 = vshll.u32 %v12465_v31, 16 }
  0x7e   : > { %10622 = vmatmul.msk.bf16.gmra.mxu0 %vm433_vm2, %v10607_v60  ;;  %v1334_v60 = vrot.slane %v1333_v47, 4  ;;  %v10792_v47 = vrot.slane %v10776_v36, 9  ;;  %v10779_v36 = vld [vmem:[%s12184_s25 + $0x20] sm:$0xe]  ;;  %v2100_v51 = vor.u32 %v2099_v29, %v2096_v28 }
  0x7f   : > { %v1375_v21 = vor.u32 %v1374_v63, %v1371_v62  ;;  %v10854_v29 = vld [vmem:[%s12184_s25 + $0x40] sm:$0xf] }
  0x80   : > { %v1339_v44 = vsel %vm12237_vm6, %v1334_v60, %v1338_v61  ;;  %v12444_v61 = vld [vmem:[%s12184_s25 + $0x2c] sm:$0x1] }
  0x81   : > { %10635 = vmatmul.msk.bf16.gmra.mxu1 %vm433_vm2, %v790_v1  ;;  %v750_v1 = vrot.slane %v748_v53, 5  ;;  %v1540_v15 = vunpack.c.l.b16 %v1339_v44  ;;  %v1353_v53 = vsel %vm12237_vm6, %v1348_v38, %v1352_v40  ;;  %v1716_v38 = vrot.slane %v12417_v19, 5  ;;  %v10742_v40 = vld [vmem:[%s12184_s25 + $0x38] sm:$0xf] }
  0x82   : > { %v1541_v60 = vunpack.c.l.b16 %v1353_v53  ;;  %v1376_v42 = vrot.slane %v1375_v21, 4  ;;  %v10795_v53 = vrot.slane %v10779_v36, 9  ;;  %v1397_v19 = vshrl.u32 %v10742_v40, 16  ;;  %v11817_v36 = vld [vmem:[%s12184_s25 + $0x44] sm:$0xf0] }
  0x83   : > { %v1555_v25 = vpack.c.b16 %v1540_v15, %v1539_v14 }
  0x84   : > { %10726 = vmatmul.msk.bf16.gmra.mxu3 %vm433_vm2, %v10705_v12  ;;  %v751_v12 = vsel %vm12237_vm6, %v746_v3, %v750_v1  ;;  %v1385_v3 = vrot.slane %v1383_v55, 4  ;;  %v1400_v55 = vshll.u32 %v10742_v40, 16 }
  0x85   : > { %v783_v23 = vunpack.c.l.b16 %v751_v12  ;;  %v11816_v12 = vld [vmem:[%s12184_s25 + $0x34] sm:$0xf0] }
  0x86   : > { %v10851_v13 = vor.u32 %v11816_v12, %v10850_v39  ;;  %v1399_v39 = vrot.slane %v1397_v19, 4 }
  0x87   : > { %10876 = vmatmul.msk.bf16.vlgmr.msrb.gmra.mxu2 %vm433_vm2, %v10843_v32  ;;  %v792_v32 = vpack.c.b16 %v784_v24, %v783_v23  ;;  %v1389_v23 = vor.u32 %v1388_v5, %v1385_v3  ;;  %v1392_v24 = vshll.u32 %v12451_v2, 16  ;;  %v12486_v5 = vld [vmem:[%s12184_s25 + $0x3c] sm:$0x1] }
  0x89   : > { %v1390_v45 = vrot.slane %v1389_v23, 4  ;;  %v1420_v23 = vshll.u32 %v12489_v6, 16 }
  0x8e   : > { %10623 = vmatmul.msk.bf16.gmra.mxu0 %vm433_vm2, %v10611_v49  ;;  %v10793_v49 = vrot.slane %v10777_v37, 9  ;;  %v10794_v37 = vrot.slane %v10778_v18, 9 }
  0x91   : > { %10636 = vmatmul.msk.bf16.gmra.mxu1 %vm433_vm2, %v791_v50  ;;  %v1712_v50 = vrot.slane %v12391_v34, 5  ;;  %v1542_v34 = vunpack.c.l.b16 %v1367_v54  ;;  %v1720_v54 = vrot.slane %v12420_v20, 5  ;;  %v2101_v20 = vrot.slane %v2100_v51, 4 }
  0x93   : > { %v1713_v1 = vsel %vm12186_vm3, %v10793_v49, %v1712_v50  ;;  %v1556_v16 = vpack.c.b16 %v1542_v34, %v1541_v60  ;;  %v2086_v49 = vor.u32 %v2085_v27, %v2082_v26  ;;  %v1721_v3 = vsel %vm12186_vm3, %v10795_v53, %v1720_v54 }
  0x94   : > { %10727 = vmatmul.msk.bf16.gmra.mxu3 %vm433_vm2, %v10709_v0  ;;  %v1709_v0 = vsel %vm12186_vm3, %v10792_v47, %v1708_v48  ;;  %v1774_v15 = vunpack.c.l.b16 %v1713_v1  ;;  %v10744_v47 = vld [vmem:[%s12184_s25 + $0x40] sm:$0xf]  ;;  %v1717_v1 = vsel %vm12186_vm3, %v10794_v37, %v1716_v38  ;;  %v2111_v26 = vshll.u32 %v10888_v11, 16 }
  0x95   : > { %v1773_v14 = vunpack.c.l.b16 %v1709_v0  ;;  %v1411_v56 = vshrl.u32 %v10744_v47, 16  ;;  %v2087_v62 = vrot.slane %v2086_v49, 4  ;;  %v2105_v0 = vrot.slane %v2103_v52, 5  ;;  %v12506_v49 = vld [vmem:[%s12184_s25 + $0x24] sm:$0x1] }
  0x96   : > { %v1775_v7 = vunpack.c.l.b16 %v1717_v1  ;;  %v12509_v52 = vld [vmem:[%s12184_s25 + $0x2c] sm:$0x1]  ;;  %v2113_v53 = vrot.slane %v2111_v26, 5 }
  0x97   : > { %10877 = vmatmul.msk.bf16.gmra.mxu2 %vm433_vm2, %v10847_v22  ;;  %v1378_v22 = vshll.u32 %v12444_v61, 16  ;;  %v1413_v8 = vrot.slane %v1411_v56, 4  ;;  %v2106_v18 = vsel %vm12237_vm6, %v2101_v20, %v2105_v0  ;;  %v2117_v20 = vshll.u32 %v12506_v49, 16 }
  0x98   : > { %v2131_v0 = vshll.u32 %v12509_v52, 16 }
  0x99   : > { %v1380_v43 = vrot.slane %v1378_v22, 5  ;;  %v1406_v22 = vshll.u32 %v12486_v5, 16 }
  0x9b   : > { %v467_v30 = vpop.f32.mrf.mxu0  ;;  %v1381_v58 = vsel %vm12237_vm6, %v1376_v42, %v1380_v43  ;;  %v10780_v42 = vld [vmem:[%s12184_s25 + $0x28] sm:$0xe]  ;;  %v10781_v43 = vld [vmem:[%s12184_s25 + $0x30] sm:$0xe] }
  0x9c   : > { %v12462_v30 = vld [vmem:[%s12184_s25 + $0x14] sm:$0x1]  ;;  %v10796_v56 = vrot.slane %v10780_v42, 9 }
  0x9d   : > { %v2089_v50 = vshll.u32 %v12462_v30, 16 }
  0x9e   : > { %10768 = vmatmul.msk.bf16.vlgmr.msrb.gmra.mxu0 %vm433_vm2, %v1555_v25 }
  0x9f   : > { %v2091_v63 = vrot.slane %v2089_v50, 5 }
  0xa1   : > { %10637 = vmatmul.msk.bf16.gmra.mxu1 %vm433_vm2, %v792_v32  ;;  %v1789_v32 = vpack.c.b16 %v1774_v15, %v1773_v14  ;;  %v10890_v15 = vld [vmem:[%s12184_s25 + $0x28] sm:$0xf]  ;;  %v2092_v17 = vsel %vm12237_vm6, %v2087_v62, %v2091_v63  ;;  %v10748_v62 = vld [vmem:[%s12184_s25 + $0x50] sm:$0xf] }
  0xa2   : > { %v2122_v27 = vshrl.u32 %v10890_v15, 16  ;;  %v2125_v28 = vshll.u32 %v10890_v15, 16  ;;  %v2306_v40 = vunpack.c.l.b16 %v2092_v17 }
  0xa3   : > { %v469_v57 = vpop.f32.mrf.mxu0 }
  0xa4   : > { %10728 = vmatmul.msk.bf16.gmra.mxu3 %vm433_vm2, %v10713_v46  ;;  %v1394_v46 = vrot.slane %v1392_v24, 5  ;;  %v1414_v57 = vshll.u32 %v10744_v47, 16  ;;  %v2108_v24 = vshrl.u32 %v10888_v11, 16  ;;  %v1408_v47 = vrot.slane %v1406_v22, 5  ;;  %v10892_v22 = vld [vmem:[%s12184_s25 + $0x30] sm:$0xf] }
  0xa5   : > { %v2124_v54 = vrot.slane %v2122_v27, 4  ;;  %v2127_v19 = vrot.slane %v2125_v28, 5  ;;  %v1442_v11 = vshll.u32 %v10748_v62, 16  ;;  %v10894_v28 = vld [vmem:[%s12184_s25 + $0x38] sm:$0xf]  ;;  %v2136_v42 = vshrl.u32 %v10892_v22, 16 }
  0xa6   : > { %v1395_v60 = vsel %vm12237_vm6, %v1390_v45, %v1394_v46  ;;  %v1416_v10 = vrot.slane %v1414_v57, 5  ;;  %v10855_v45 = vor.u32 %v11817_v36, %v10854_v29  ;;  %v2110_v50 = vrot.slane %v2108_v24, 4  ;;  %v12537_v36 = vld [vmem:[%s12184_s25 + $0x54] sm:$0x1] }
  0xa7   : > { %v1099_v44 = vpop.f32.mrf.mxu3  ;;  %10878 = vmatmul.msk.bf16.gmra.mxu2 %vm433_vm2, %v10851_v13  ;;  %v1543_v13 = vunpack.c.l.b16 %v1381_v58  ;;  %v1544_v14 = vunpack.c.l.b16 %v1395_v60  ;;  %v1724_v57 = vrot.slane %v12444_v61, 5  ;;  %v10797_v58 = vrot.slane %v10781_v43, 9 }
  0xa8   : > { %v1402_v44 = vrot.slane %v1400_v55, 5  ;;  %v1728_v60 = vrot.slane %v12451_v2, 5  ;;  %v2114_v61 = vor.u32 %v2113_v53, %v2110_v50  ;;  %v1444_v27 = vrot.slane %v1442_v11, 5  ;;  %v10858_v50 = vld [vmem:[%s12184_s25 + $0x50] sm:$0xf] }
  0xa9   : > { %v2139_v43 = vshll.u32 %v10892_v22, 16  ;;  %v10752_v22 = vld [vmem:[%s12184_s25 + $0x60] sm:$0xf] }
  0xaa   : > { %v1069_v9 = vpop.f32.mrf.mxu2  ;;  %v1403_v21 = vor.u32 %v1402_v44, %v1399_v39  ;;  %v2128_v39 = vor.u32 %v2127_v19, %v2124_v54  ;;  %v2115_v17 = vrot.slane %v2114_v61, 4 }
  0xab   : > { %v472_v25 = vpop.f32.mrf.mxu0  ;;  %v1776_v9 = vunpack.c.l.b16 %v1721_v3 }
  0xac   : > { %v1417_v25 = vor.u32 %v1416_v10, %v1413_v8  ;;  %v1404_v46 = vrot.slane %v1403_v21, 4  ;;  %v1439_v10 = vshrl.u32 %v10748_v62, 16  ;;  %v12532_v21 = vld [vmem:[%s12184_s25 + $0x4c] sm:$0x1]  ;;  %v10782_v62 = vld [vmem:[%s12184_s25 + $0x38] sm:$0xe] }
  0xad   : > { %v1790_v37 = vpack.c.b16 %v1776_v9, %v1775_v7  ;;  %v2119_v7 = vrot.slane %v2117_v20, 5  ;;  %v2133_v9 = vrot.slane %v2131_v0, 5  ;;  %v12559_v20 = vld [vmem:[%s12184_s25 + $0x34] sm:$0x1]  ;;  %v2138_v0 = vrot.slane %v2136_v42, 4 }
  0xae   : > { %v832_v41 = vpop.f32.mrf.mxu1  ;;  %10769 = vmatmul.msk.bf16.gmra.mxu0 %vm433_vm2, %v1556_v16  ;;  %v1418_v51 = vrot.slane %v1417_v25, 4  ;;  %v1409_v1 = vsel %vm12237_vm6, %v1404_v46, %v1408_v47  ;;  %v1441_v26 = vrot.slane %v1439_v10, 4  ;;  %v2150_v47 = vshrl.u32 %v10894_v28, 16  ;;  %v12564_v10 = vld [vmem:[%s12184_s25 + $0x3c] sm:$0x1] }
  0xaf   : > { %v1101_v48 = vpop.f32.mrf.mxu3  ;;  %v2307_v41 = vunpack.c.l.b16 %v2106_v18  ;;  %v1545_v15 = vunpack.c.l.b16 %v1409_v1  ;;  %v2129_v18 = vrot.slane %v2128_v39, 4  ;;  %v2141_v1 = vrot.slane %v2139_v43, 5 }
  0xb0   : > { %v1422_v48 = vrot.slane %v1420_v23, 5  ;;  %v1445_v19 = vor.u32 %v1444_v27, %v1441_v26  ;;  %v2159_v26 = vshll.u32 %v12564_v10, 16 }
  0xb1   : > { %10814 = vmatmul.msk.bf16.vlgmr.msrb.gmra.mxu1 %vm433_vm2, %v1789_v32  ;;  %v2322_v63 = vpack.c.b16 %v2307_v41, %v2306_v40  ;;  %v1434_v41 = vshll.u32 %v12532_v21, 16  ;;  %v2134_v46 = vsel %vm12237_vm6, %v2129_v18, %v2133_v9  ;;  %v1736_v9 = vrot.slane %v12489_v6, 5  ;;  %v10750_v18 = vld [vmem:[%s12184_s25 + $0x58] sm:$0xf] }
  0xb2   : > { %v1071_v33 = vpop.f32.mrf.mxu2  ;;  %v1423_v3 = vsel %vm12237_vm6, %v1418_v51, %v1422_v48  ;;  %v2153_v48 = vshll.u32 %v10894_v28, 16  ;;  %v11818_v51 = vld [vmem:[%s12184_s25 + $0x54] sm:$0xf0] }
  0xb3   : > { %v474_v34 = vpop.f32.mrf.mxu0 }
  0xb4   : > { %10729 = vmatmul.msk.bf16.gmra.mxu3 %vm433_vm2, %v10717_v35  ;;  %v1557_v35 = vpack.c.b16 %v1544_v14, %v1543_v13  ;;  %v10746_v34 = vld [vmem:[%s12184_s25 + $0x48] sm:$0xf]  ;;  %v1725_v13 = vsel %vm12186_vm3, %v10796_v56, %v1724_v57  ;;  %v1729_v14 = vsel %vm12186_vm3, %v10797_v58, %v1728_v60  ;;  %v10859_v56 = vor.u32 %v11818_v51, %v10858_v50 }
  0xb5   : > { %v1425_v2 = vshrl.u32 %v10746_v34, 16  ;;  %v1428_v8 = vshll.u32 %v10746_v34, 16  ;;  %v2309_v34 = vunpack.c.l.b16 %v2134_v46  ;;  %v2155_v61 = vrot.slane %v2153_v48, 5  ;;  %v10896_v48 = vld [vmem:[%s12184_s25 + $0x40] sm:$0xf] }
  0xb6   : > { %v834_v12 = vpop.f32.mrf.mxu1 }
  0xb7   : > { %v1104_v16 = vpop.f32.mrf.mxu3  ;;  %10879 = vmatmul.msk.bf16.gmra.mxu2 %vm433_vm2, %v10855_v45  ;;  %v1427_v24 = vrot.slane %v1425_v2, 4  ;;  %v1430_v25 = vrot.slane %v1428_v8, 5  ;;  %v2120_v45 = vsel %vm12237_vm6, %v2115_v17, %v2119_v7  ;;  %v1446_v2 = vrot.slane %v1445_v19, 4 }
  0xb8   : > { %v1546_v16 = vunpack.c.l.b16 %v1423_v3  ;;  %v2308_v60 = vunpack.c.l.b16 %v2120_v45  ;;  %v2152_v3 = vrot.slane %v2150_v47, 4  ;;  %v2145_v17 = vshll.u32 %v12559_v20, 16 }
  0xb9   : > { %v1431_v54 = vor.u32 %v1430_v25, %v1427_v24  ;;  %v2142_v24 = vor.u32 %v2141_v1, %v2138_v0  ;;  %v2161_v47 = vrot.slane %v2159_v26, 5  ;;  %v2164_v0 = vshrl.u32 %v10896_v48, 16  ;;  %v10785_v26 = vld [vmem:[%s12184_s25 + $0x50] sm:$0xe] }
  0xba   : > { %v1074_v32 = vpop.f32.mrf.mxu2  ;;  %v1558_v40 = vpack.c.b16 %v1546_v16, %v1545_v15  ;;  %v1732_v15 = vrot.slane %v12486_v5, 5  ;;  %v2323_v7 = vpack.c.b16 %v2309_v34, %v2308_v60  ;;  %v2156_v25 = vor.u32 %v2155_v61, %v2152_v3 }
  0xbb   : > { %v12501_v38 = vpop.f32.mrf.mxu0  ;;  %v1777_v32 = vunpack.c.l.b16 %v1725_v13  ;;  %v2143_v43 = vrot.slane %v2142_v24, 4  ;;  %v2147_v45 = vrot.slane %v2145_v17, 5  ;;  %v2167_v1 = vshll.u32 %v10896_v48, 16 }
  0xbc   : > { %v2157_v46 = vrot.slane %v2156_v25, 4  ;;  %v10784_v25 = vld [vmem:[%s12184_s25 + $0x48] sm:$0xe] }
  0xbd   : > { %v2148_v3 = vsel %vm12237_vm6, %v2143_v43, %v2147_v45  ;;  %v12620_v43 = vld [vmem:[%s12184_s25 + $0x4c] sm:$0x1] }
  0xbe   : > { %v837_v55 = vpop.f32.mrf.mxu1  ;;  %10770 = vmatmul.msk.bf16.gmra.mxu0 %vm433_vm2, %v1557_v35  ;;  %v1778_v35 = vunpack.c.l.b16 %v1729_v14  ;;  %v10798_v14 = vrot.slane %v10782_v62, 9  ;;  %v2162_v61 = vsel %vm12237_vm6, %v2157_v46, %v2161_v47 }
  0xbf   : > { %v1106_v33 = vpop.f32.mrf.mxu3  ;;  %v1448_v55 = vshll.u32 %v12537_v36, 16  ;;  %v2311_v24 = vunpack.c.l.b16 %v2162_v61 }
  0xc0   : > { %v1791_v58 = vpack.c.b16 %v1778_v35, %v1777_v32  ;;  %v1456_v32 = vshll.u32 %v10750_v18, 16  ;;  %v1467_v35 = vshrl.u32 %v10752_v22, 16 }
  0xc1   : > { %10815 = vmatmul.msk.bf16.gmra.mxu1 %vm433_vm2, %v1790_v37  ;;  %v12542_v37 = vld [vmem:[%s15175_s2] ss:$0 sm:$0xff]  ;;  %v1450_v8 = vrot.slane %v1448_v55, 5  ;;  %v12593_v55 = vld [vmem:[%s12184_s25 + $0x5c] sm:$0x1] }
  0xc2   : > { %v1076_v44 = vpop.f32.mrf.mxu2  ;;  %v478_v33 = vadd.f32 %v12542_v37, %v12501_v38  ;;  %v1432_v38 = vrot.slane %v1431_v54, 4  ;;  %v10898_v54 = vld [vmem:[%s12184_s25 + $0x48] sm:$0xf] }
  0xc3   : > { %v12524_v12 = vpop.f32.mrf.mxu0  ;;  %v1436_v44 = vrot.slane %v1434_v41, 5  ;;  %v1451_v6 = vsel %vm12237_vm6, %v1446_v2, %v1450_v8  ;;  %v1733_v41 = vsel %vm12186_vm3, %v10798_v14, %v1732_v15  ;;  %v11819_v2 = vld [vmem:[%s12184_s25 + $0x64] sm:$0xf0] }
  0xc4   : > { %10922 = vmatmul.msk.bf16.vlgmr.msra.gmra.mxu3 %vm433_vm2, %v2322_v63  ;;  %v10783_v63 = vld [vmem:[%s12184_s25 + $0x40] sm:$0xe]  ;;  %v1779_v34 = vunpack.c.l.b16 %v1733_v41  ;;  %v1744_v41 = vrot.slane %v12537_v36, 5 }
  0xc5   : > { %v10799_v16 = vrot.slane %v10783_v63, 9  ;;  %v1437_v5 = vsel %vm12237_vm6, %v1432_v38, %v1436_v44  ;;  %v12596_v63 = vld [vmem:[%s12184_s25 + $0x64] sm:$0x1]  ;;  %v2181_v38 = vshll.u32 %v10898_v54, 16  ;;  %v10862_v44 = vld [vmem:[%s12184_s25 + $0x60] sm:$0xf] }
  0xc6   : > { %v839_v23 = vpop.f32.mrf.mxu1  ;;  %v1547_v51 = vunpack.c.l.b16 %v1437_v5  ;;  %v10863_v14 = vor.u32 %v11819_v2, %v10862_v44  ;;  %v12613_v5 = vld [vmem:[%s12184_s25 + $0x44] sm:$0x1] }
  0xc7   : > { %v1224_v29 = vpop.f32.mrf.mxu3  ;;  %10880 = vmatmul.msk.bf16.gmra.mxu2 %vm433_vm2, %v10859_v56  ;;  %v1737_v42 = vsel %vm12186_vm3, %v10799_v16, %v1736_v9  ;;  %v1476_v9 = vshll.u32 %v12596_v63, 16 }
  0xc8   : > { %v1453_v29 = vshrl.u32 %v10750_v18, 16  ;;  %v1780_v62 = vunpack.c.l.b16 %v1737_v42 }
  0xca   : > { %v1079_v53 = vpop.f32.mrf.mxu2  ;;  %v1455_v56 = vrot.slane %v1453_v29, 4  ;;  %v1792_v18 = vpack.c.b16 %v1780_v62, %v1779_v34  ;;  %v2169_v29 = vrot.slane %v2167_v1, 5  ;;  %v2187_v34 = vshll.u32 %v12620_v43, 16 }
  0xcb   : > { %v12552_v57 = vpop.f32.mrf.mxu0 }
  0xcc   : > { %v483_v17 = vadd.f32 %v12542_v37, %v12552_v57  ;;  %v1740_v57 = vrot.slane %v12532_v21, 5 }
  0xce   : > { %v842_v39 = vpop.f32.mrf.mxu1  ;;  %10771 = vmatmul.msk.bf16.gmra.mxu0 %vm433_vm2, %v1558_v40  ;;  %v1470_v40 = vshll.u32 %v10752_v22, 16  ;;  %v2310_v22 = vunpack.c.l.b16 %v2148_v3 }
  0xcf   : > { %v876_v11 = vadd.f32 %v842_v39, %v478_v33  ;;  %v1226_v13 = vpop.f32.mrf.mxu3  ;;  %v1458_v33 = vrot.slane %v1456_v32, 5  ;;  %v2178_v39 = vshrl.u32 %v10898_v54, 16 }
  0xd0   : > { %v1472_v60 = vrot.slane %v1470_v40, 5  ;;  %v1462_v13 = vshll.u32 %v12593_v55, 16  ;;  %v2324_v54 = vpack.c.b16 %v2311_v24, %v2310_v22 }
  0xd1   : > { %v12571_v23 = vadd.f32 %v1079_v53, %v876_v11  ;;  %10816 = vmatmul.msk.bf16.gmra.mxu1 %vm433_vm2, %v1791_v58  ;;  %v1548_v53 = vunpack.c.l.b16 %v1451_v6  ;;  %v1469_v58 = vrot.slane %v1467_v35, 4  ;;  %v1459_v16 = vor.u32 %v1458_v33, %v1455_v56 }
  0xd2   : > { %v12575_v27 = vpop.f32.mrf.mxu2  ;;  %v2166_v6 = vrot.slane %v2164_v0, 4  ;;  %v2180_v32 = vrot.slane %v2178_v39, 4  ;;  %v2183_v35 = vrot.slane %v2181_v38, 5  ;;  %v1464_v42 = vrot.slane %v1462_v13, 5 }
  0xd3   : > { %v12581_v28 = vpop.f32.mrf.mxu0  ;;  %v1559_v11 = vpack.c.b16 %v1548_v53, %v1547_v51  ;;  %v1460_v47 = vrot.slane %v1459_v16, 4  ;;  %v1478_v51 = vrot.slane %v1476_v9, 5  ;;  %v10754_v53 = vld [vmem:[%s12184_s25 + $0x68] sm:$0xf]  ;;  %v10801_v56 = vrot.slane %v10785_v26, 9 }
  0xd4   : > { %10923 = vmatmul.msk.bf16.gmra.mxu3 %vm433_vm2, %v2323_v7  ;;  %v1473_v7 = vor.u32 %v1472_v60, %v1469_v58  ;;  %v2173_v33 = vshll.u32 %v12613_v5, 16  ;;  %v10756_v58 = vld [vmem:[%s12184_s25 + $0x70] sm:$0xf]  ;;  %v2170_v21 = vor.u32 %v2169_v29, %v2166_v6  ;;  %v2184_v36 = vor.u32 %v2183_v35, %v2180_v32  ;;  %v12647_v6 = vld [vmem:[%s12184_s25 + $0x6c] sm:$0x1] }
  0xd5   : > { %v1481_v0 = vshrl.u32 %v10754_v53, 16  ;;  %v1484_v1 = vshll.u32 %v10754_v53, 16  ;;  %v1465_v61 = vsel %vm12237_vm6, %v1460_v47, %v1464_v42  ;;  %v1495_v38 = vshrl.u32 %v10756_v58, 16 }
  0xd6   : > { %v12589_v50 = vpop.f32.mrf.mxu1  ;;  %v1474_v48 = vrot.slane %v1473_v7, 4  ;;  %v1498_v44 = vshll.u32 %v10756_v58, 16  ;;  %v2171_v13 = vrot.slane %v2170_v21, 4  ;;  %v2185_v16 = vrot.slane %v2184_v36, 4  ;;  %v12664_v21 = vld [vmem:[%s12184_s25 + $0x54] sm:$0x1] }
  0xd7   : > { %v1229_v19 = vpop.f32.mrf.mxu3  ;;  %10881 = vmatmul.msk.bf16.gmra.mxu2 %vm433_vm2, %v10863_v14  ;;  %v2175_v14 = vrot.slane %v2173_v33, 5  ;;  %v2189_v7 = vrot.slane %v2187_v34, 5  ;;  %v1483_v22 = vrot.slane %v1481_v0, 4  ;;  %v1486_v24 = vrot.slane %v1484_v1, 5 }
  0xd8   : > { %v10800_v19 = vrot.slane %v10784_v25, 9  ;;  %v1479_v39 = vsel %vm12237_vm6, %v1474_v48, %v1478_v51  ;;  %v10902_v25 = vld [vmem:[%s12184_s25 + $0x58] sm:$0xf]  ;;  %v1497_v29 = vrot.slane %v1495_v38, 4  ;;  %v1500_v32 = vrot.slane %v1498_v44, 5 }
  0xd9   : > { %v2190_v47 = vsel %vm12237_vm6, %v2185_v16, %v2189_v7  ;;  %v2206_v48 = vshrl.u32 %v10902_v25, 16  ;;  %v2209_v51 = vshll.u32 %v10902_v25, 16  ;;  %v10786_v38 = vld [vmem:[%s12184_s25 + $0x58] sm:$0xe]  ;;  %v10787_v44 = vld [vmem:[%s12184_s25 + $0x60] sm:$0xe] }
  0xda   : > { %v1084_v8 = vpop.f32.mrf.mxu2  ;;  %v1741_v2 = vsel %vm12186_vm3, %v10800_v19, %v1740_v57  ;;  %v1487_v19 = vor.u32 %v1486_v24, %v1483_v22  ;;  %v1501_v33 = vor.u32 %v1500_v32, %v1497_v29  ;;  %v2313_v1 = vunpack.c.l.b16 %v2190_v47  ;;  %v12672_v16 = vld [vmem:[%s12184_s25 + $0x5c] sm:$0x1]  ;;  %v10758_v25 = vld [vmem:[%s12184_s25 + $0x78] sm:$0xf] }
  0xdb   : > { %v12605_v15 = vpop.f32.mrf.mxu0  ;;  %v2201_v7 = vshll.u32 %v12664_v21, 16  ;;  %v10802_v29 = vrot.slane %v10786_v38, 9  ;;  %v1748_v32 = vrot.slane %v12593_v55, 5  ;;  %v2215_v47 = vshll.u32 %v12672_v16, 16 }
  0xdc   : > { %v1509_v55 = vshrl.u32 %v10758_v25, 16 }
  0xde   : > { %v847_v40 = vpop.f32.mrf.mxu1  ;;  %10772 = vmatmul.msk.bf16.gmra.mxu0 %vm433_vm2, %v1559_v11  ;;  %v10900_v11 = vld [vmem:[%s12184_s25 + $0x50] sm:$0xf] }
  0xdf   : > { %v878_v45 = vadd.f32 %v847_v40, %v483_v17  ;;  %v1231_v46 = vpop.f32.mrf.mxu3  ;;  %v1549_v17 = vunpack.c.l.b16 %v1465_v61  ;;  %v2192_v35 = vshrl.u32 %v10900_v11, 16  ;;  %v2195_v40 = vshll.u32 %v10900_v11, 16 }
  0xe0   : > { %v2176_v46 = vsel %vm12237_vm6, %v2171_v13, %v2175_v14  ;;  %v488_v61 = vadd.f32 %v12542_v37, %v12605_v15  ;;  %v1488_v13 = vrot.slane %v1487_v19, 4  ;;  %v1502_v15 = vrot.slane %v1501_v33, 4 }
  0xe1   : > { %v12625_v60 = vadd.f32 %v1084_v8, %v878_v45  ;;  %10817 = vmatmul.msk.bf16.gmra.mxu1 %vm433_vm2, %v1792_v18  ;;  %v1745_v8 = vsel %vm12186_vm3, %v10801_v56, %v1744_v41  ;;  %v1550_v18 = vunpack.c.l.b16 %v1479_v39  ;;  %v1781_v41 = vunpack.c.l.b16 %v1741_v2  ;;  %v12653_v45 = vld [vmem:[%s12184_s25 + $0x74] sm:$0x1] }
  0xe2   : > { %v12629_v62 = vpop.f32.mrf.mxu2  ;;  %v1782_v42 = vunpack.c.l.b16 %v1745_v8  ;;  %v1504_v58 = vshll.u32 %v12653_v45, 16  ;;  %v2194_v36 = vrot.slane %v2192_v35, 4  ;;  %v2197_v34 = vrot.slane %v2195_v40, 5  ;;  %v10760_v40 = vld [vmem:[%s12184_s25 + $0x80] sm:$0xf] }
  0xe3   : > { %v12631_v3 = vpop.f32.mrf.mxu0  ;;  %v2312_v0 = vunpack.c.l.b16 %v2176_v46  ;;  %v2208_v2 = vrot.slane %v2206_v48, 4  ;;  %v2211_v8 = vrot.slane %v2209_v51, 5  ;;  %v10803_v35 = vrot.slane %v10787_v44, 9 }
  0xe4   : > { %10924 = vmatmul.msk.bf16.gmra.mxu3 %vm433_vm2, %v2324_v54  ;;  %v1560_v54 = vpack.c.b16 %v1550_v18, %v1549_v17  ;;  %v1793_v39 = vpack.c.b16 %v1782_v42, %v1781_v41  ;;  %v1506_v22 = vrot.slane %v1504_v58, 5  ;;  %v2198_v24 = vor.u32 %v2197_v34, %v2194_v36 }
  0xe5   : > { %v1752_v42 = vrot.slane %v12596_v63, 5  ;;  %v2212_v46 = vor.u32 %v2211_v8, %v2208_v2  ;;  %v1512_v19 = vshll.u32 %v10758_v25, 16  ;;  %v1523_v33 = vshrl.u32 %v10760_v40, 16 }
  0xe6   : > { %v12643_v9 = vpop.f32.mrf.mxu1  ;;  %v2199_v63 = vrot.slane %v2198_v24, 4  ;;  %v1526_v58 = vshll.u32 %v10760_v40, 16  ;;  %v1749_v36 = vsel %vm12186_vm3, %v10802_v29, %v1748_v32  ;;  %v1511_v8 = vrot.slane %v1509_v55, 4 }
  0xe7   : > { %v1234_v26 = vpop.f32.mrf.mxu3  ;;  %v1753_v34 = vsel %vm12186_vm3, %v10803_v35, %v1752_v42 }
  0xe8   : > { %v12650_v57 = vadd.f32 %v1234_v26, %v12571_v23  ;;  %v1490_v23 = vshll.u32 %v12647_v6, 16  ;;  %v2325_v26 = vpack.c.b16 %v2313_v1, %v2312_v0  ;;  %v2213_v0 = vrot.slane %v2212_v46, 4 }
  0xe9   : > { %v2217_v1 = vrot.slane %v2215_v47, 5  ;;  %v1528_v24 = vrot.slane %v1526_v58, 5  ;;  %v1784_v35 = vunpack.c.l.b16 %v1753_v34 }
  0xea   : > { %v1089_v53 = vpop.f32.mrf.mxu2  ;;  %v1492_v14 = vrot.slane %v1490_v23, 5 }
  0xeb   : > { %v12660_v56 = vpop.f32.mrf.mxu0  ;;  %v2218_v40 = vsel %vm12237_vm6, %v2213_v0, %v2217_v1 }
  0xec   : > { %v1493_v51 = vsel %vm12237_vm6, %v1488_v13, %v1492_v14  ;;  %v10906_v13 = vld [vmem:[%s12184_s25 + $0x68] sm:$0xf]  ;;  %v2315_v58 = vunpack.c.l.b16 %v2218_v40  ;;  %v493_v1 = vadd.f32 %v12542_v37, %v12660_v56 }
  0xed   : > { %v1551_v44 = vunpack.c.l.b16 %v1493_v51  ;;  %v2234_v42 = vshrl.u32 %v10906_v13, 16  ;;  %v2237_v46 = vshll.u32 %v10906_v13, 16 }
  0xee   : > { %v852_v11 = vpop.f32.mrf.mxu1  ;;  %10773 = vmatmul.msk.bf16.gmra.mxu0 %vm433_vm2, %v1560_v54  ;;  %v2203_v54 = vrot.slane %v2201_v7, 5  ;;  %v1783_v7 = vunpack.c.l.b16 %v1749_v36 }
  0xef   : > { %v880_v17 = vadd.f32 %v852_v11, %v488_v61  ;;  %v12675_v18 = vpop.f32.mrf.mxu3  ;;  %v12699_v61 = vld [vmem:[%s12184_s25 + $0x7c] sm:$0x1]  ;;  %v1514_v11 = vrot.slane %v1512_v19, 5  ;;  %v2479_v19 = vrot.slane %v12465_v31, 5 }
  0xf1   : > { %v12680_v41 = vadd.f32 %v1089_v53, %v880_v17  ;;  %10818 = vmatmul.msk.bf16.gmra.mxu1 %vm433_vm2, %v1793_v39  ;;  %v1507_v53 = vsel %vm12237_vm6, %v1502_v15, %v1506_v22  ;;  %v10904_v39 = vld [vmem:[%s12184_s25 + $0x60] sm:$0xf]  ;;  %v2204_v17 = vsel %vm12237_vm6, %v2199_v63, %v2203_v54  ;;  %v12708_v15 = vld [vmem:[%s12184_s25 + $0x84] sm:$0x1]  ;;  %v1525_v22 = vrot.slane %v1523_v33, 4 }
  0xf2   : > { %v12685_v48 = vpop.f32.mrf.mxu2  ;;  %v1552_v2 = vunpack.c.l.b16 %v1507_v53  ;;  %v2220_v29 = vshrl.u32 %v10904_v39, 16  ;;  %v2223_v32 = vshll.u32 %v10904_v39, 16  ;;  %v1515_v54 = vor.u32 %v1514_v11, %v1511_v8 }
  0xf3   : > { %v12689_v23 = vpop.f32.mrf.mxu0  ;;  %v1532_v55 = vshll.u32 %v12708_v15, 16  ;;  %v2314_v63 = vunpack.c.l.b16 %v2204_v17  ;;  %v1529_v33 = vor.u32 %v1528_v24, %v1525_v22  ;;  %v1794_v39 = vpack.c.b16 %v1784_v35, %v1783_v7  ;;  %v10931_v17 = vld [vmem:[%s12184_s25 + $0x18] sm:$0xe] }
  0xf4   : > { %10925 = vmatmul.msk.bf16.gmra.mxu3 %vm433_vm2, %v2325_v26  ;;  %v1518_v26 = vshll.u32 %v12699_v61, 16  ;;  %v1561_v51 = vpack.c.b16 %v1552_v2, %v1551_v44  ;;  %v2222_v34 = vrot.slane %v2220_v29, 4  ;;  %v2225_v0 = vrot.slane %v2223_v32, 5  ;;  %v12722_v44 = vld [vmem:[%s12184_s25 + $0x64] sm:$0x1] }
  0xf5   : > { %v12725_v2 = vld [vmem:[%s12184_s25 + $0x6c] sm:$0x1]  ;;  %v2239_v8 = vrot.slane %v2237_v46, 5  ;;  %v1516_v11 = vrot.slane %v1515_v54, 4  ;;  %v1534_v13 = vrot.slane %v1532_v55, 5  ;;  %v10947_v37 = vrot.slane %v10931_v17, 9 }
  0xf6   : > { %v12702_v38 = vpop.f32.mrf.mxu1  ;;  %v1520_v36 = vrot.slane %v1518_v26, 5  ;;  %v1530_v26 = vrot.slane %v1529_v33, 4  ;;  %v2326_v56 = vpack.c.b16 %v2315_v58, %v2314_v63  ;;  %v2226_v7 = vor.u32 %v2225_v0, %v2222_v34 }
  0xf7   : > { %v1239_v14 = vpop.f32.mrf.mxu3  ;;  %v2229_v32 = vshll.u32 %v12722_v44, 16  ;;  %v2243_v35 = vshll.u32 %v12725_v2, 16 }
  0xf8   : > { %v12711_v25 = vadd.f32 %v1239_v14, %v12625_v60  ;;  %v2475_v60 = vrot.slane %v12462_v30, 5  ;;  %v2236_v30 = vrot.slane %v2234_v42, 4  ;;  %v10930_v14 = vld [vmem:[%s12184_s25 + $0x10] sm:$0xe]  ;;  %v1521_v33 = vsel %vm12237_vm6, %v1516_v11, %v1520_v36 }
  0xf9   : > { %v10946_v29 = vrot.slane %v10930_v14, 9  ;;  %v2227_v34 = vrot.slane %v2226_v7, 4  ;;  %v2231_v0 = vrot.slane %v2229_v32, 5  ;;  %v10933_v7 = vld [vmem:[%s12184_s25 + $0x28] sm:$0xe] }
  0xfa   : > { %v1094_v47 = vpop.f32.mrf.mxu2  ;;  %v2240_v42 = vor.u32 %v2239_v8, %v2236_v30 }
  0xfb   : > { %v497_v53 = vpop.f32.mrf.mxu0  ;;  %v2476_v46 = vsel %vm12186_vm3, %v10946_v29, %v2475_v60  ;;  %v2232_v36 = vsel %vm12237_vm6, %v2227_v34, %v2231_v0  ;;  %v2483_v29 = vrot.slane %v12506_v49, 5 }
  0xfc   : > { %v2540_v55 = vunpack.c.l.b16 %v2476_v46  ;;  %v2241_v60 = vrot.slane %v2240_v42, 4  ;;  %v10949_v42 = vrot.slane %v10933_v7, 9  ;;  %v11832_v7 = vld [vmem:[%s15174_s1 + $0x48] sm:$0xff] }
  0xfd   : > { %3155 = vmatpush.bf16.msra.mxu1 %v11832_v7  ;;  %v2511_v7 = vrot.slane %v12672_v16, 5 }
  0xfe   : > { %v857_v31 = vpop.f32.mrf.mxu1  ;;  %10774 = vmatmul.msk.bf16.gmra.mxu0 %vm433_vm2, %v1561_v51  ;;  %v2480_v51 = vsel %vm12186_vm3, %v10947_v37, %v2479_v19  ;;  %v1553_v19 = vunpack.c.l.b16 %v1521_v33  ;;  %v2487_v37 = vrot.slane %v12509_v52, 5 }
  0xff   : > { %v882_v22 = vadd.f32 %v857_v31, %v493_v1  ;;  %v12730_v24 = vpop.f32.mrf.mxu3  ;;  %v2541_v53 = vunpack.c.l.b16 %v2480_v51  ;;  %v2245_v1 = vrot.slane %v2243_v35, 5 }
 0x101   : > { %v1119_v40 = vadd.f32 %v1094_v47, %v882_v22  ;;  %10819 = vmatmul.msk.bf16.gmra.mxu1 %vm433_vm2, %v1794_v39  ;;  %v1535_v47 = vsel %vm12237_vm6, %v1530_v26, %v1534_v13  ;;  %v2556_v58 = vpack.c.b16 %v2541_v53, %v2540_v55  ;;  %v2246_v11 = vsel %vm12237_vm6, %v2241_v60, %v2245_v1 }
 0x102   : > { %v12739_v54 = vpop.f32.mrf.mxu2  ;;  %v1554_v30 = vunpack.c.l.b16 %v1535_v47  ;;  %v2316_v22 = vunpack.c.l.b16 %v2232_v36  ;;  %v2317_v26 = vunpack.c.l.b16 %v2246_v11  ;;  %v2488_v55 = vsel %vm12186_vm3, %v10949_v42, %v2487_v37 }
 0x103   : > { %v499_v63 = vpop.f32.mrf.mxu0  ;;  %v2543_v49 = vunpack.c.l.b16 %v2488_v55  ;;  %v2491_v37 = vrot.slane %v12559_v20, 5 }
 0x104   : > { %10926 = vmatmul.msk.bf16.gmra.mxu3 %vm433_vm2, %v2326_v56  ;;  %v1562_v13 = vpack.c.b16 %v1554_v30, %v1553_v19  ;;  %v2327_v46 = vpack.c.b16 %v2317_v26, %v2316_v22  ;;  %v10935_v22 = vld [vmem:[%s12184_s25 + $0x38] sm:$0xe] }
 0x106   : > { %v12746_v39 = vpop.f32.mrf.mxu1 }
 0x107   : > { %v1244_v8 = vpop.f32.mrf.mxu3 }
 0x108   : > { %v12749_v31 = vadd.f32 %v1244_v8, %v12680_v41  ;;  %v10932_v41 = vld [vmem:[%s12184_s25 + $0x20] sm:$0xe] }
 0x109   : > { %v10948_v35 = vrot.slane %v10932_v41, 9  ;;  %v11833_v41 = vld [vmem:[%s15174_s1 + $0x50] sm:$0xff] }
 0x10a   : > { %v1991_v14 = vpop.f32.mrf.mxu2  ;;  %3474 = vmatpush.bf16.msra.mxu2 %v11833_v41 }
 0x10b   : > { %v502_v17 = vpop.f32.mrf.mxu0  ;;  %v2484_v51 = vsel %vm12186_vm3, %v10948_v35, %v2483_v29 }
 0x10c   : > { %v2542_v53 = vunpack.c.l.b16 %v2484_v51  ;;  %v10934_v17 = vld [vmem:[%s12184_s25 + $0x30] sm:$0xe] }
 0x10e   : > { %v862_v56 = vpop.f32.mrf.mxu1  ;;  %10775 = vmatmul.msk.bf16.gmra.mxu0 %vm433_vm2, %v1562_v13  ;;  %v2557_v33 = vpack.c.b16 %v2543_v49, %v2542_v53 }
 0x10f   : > { %v12760_v32 = vpop.f32.mrf.mxu3  ;;  %v10951_v56 = vrot.slane %v10935_v22, 9 }
 0x112   : > { %v1993_v63 = vpop.f32.mrf.mxu2 }
 0x113   : > { %v504_v52 = vpop.f32.mrf.mxu0 }
 0x114   : > { %10927 = vmatmul.msk.bf16.gmra.mxu3 %vm433_vm2, %v2327_v46  ;;  %v10936_v52 = vld [vmem:[%s12184_s25 + $0x40] sm:$0xe] }
 0x116   : > { %v864_v47 = vpop.f32.mrf.mxu1 }
 0x117   : > { %v1249_v34 = vpop.f32.mrf.mxu3 }
 0x118   : > { %v12767_v0 = vadd.f32 %v1249_v34, %v1119_v40  ;;  %v10950_v40 = vrot.slane %v10934_v17, 9 }
 0x11a   : > { %v1996_v1 = vpop.f32.mrf.mxu2  ;;  %v2492_v42 = vsel %vm12186_vm3, %v10950_v40, %v2491_v37  ;;  %v10939_v37 = vld [vmem:[%s12184_s25 + $0x58] sm:$0xe] }
 0x11b   : > { %v1602_v60 = vpop.f32.mrf.mxu0  ;;  %v2499_v1 = vrot.slane %v12613_v5, 5  ;;  %v10938_v5 = vld [vmem:[%s12184_s25 + $0x50] sm:$0xe]  ;;  %v10955_v41 = vrot.slane %v10939_v37, 9  ;;  %v10910_v37 = vld [vmem:[%s12184_s25 + $0x78] sm:$0xf] }
 0x11c   : > { %v10952_v60 = vrot.slane %v10936_v52, 9 }
 0x11e   : > { %v867_v19 = vpop.f32.mrf.mxu1  ;;  %10968 = vmatmul.msk.bf16.vlgmr.msra.gmra.mxu0 %vm433_vm2, %v2556_v58  ;;  %v2495_v58 = vrot.slane %v12564_v10, 5  ;;  %v2544_v10 = vunpack.c.l.b16 %v2492_v42 }
 0x11f   : > { %v12770_v30 = vpop.f32.mrf.mxu3 }
 0x120   : > { %v2496_v20 = vsel %vm12186_vm3, %v10951_v56, %v2495_v58  ;;  %v10954_v56 = vrot.slane %v10938_v5, 9  ;;  %v2507_v58 = vrot.slane %v12664_v21, 5  ;;  %v10940_v21 = vld [vmem:[%s12184_s25 + $0x60] sm:$0xe]  ;;  %v10908_v5 = vld [vmem:[%s12184_s25 + $0x70] sm:$0xf] }
 0x121   : > { %v2545_v51 = vunpack.c.l.b16 %v2496_v20  ;;  %v10956_v52 = vrot.slane %v10940_v21, 9  ;;  %v10909_v21 = vld [vmem:[%s12184_s25 + $0x74] sm:$0x1] }
 0x122   : > { %v1998_v36 = vpop.f32.mrf.mxu2  ;;  %v2508_v42 = vsel %vm12186_vm3, %v10954_v56, %v2507_v58  ;;  %v10866_v58 = vld [vmem:[%s12184_s25 + $0x70] sm:$0xf] }
 0x123   : > { %v1604_v8 = vpop.f32.mrf.mxu0  ;;  %v2558_v53 = vpack.c.b16 %v2545_v51, %v2544_v10  ;;  %v2548_v20 = vunpack.c.l.b16 %v2508_v42  ;;  %v2251_v42 = vshll.u32 %v10908_v5, 16 }
 0x124   : > { %v2503_v8 = vrot.slane %v12620_v43, 5 }
 0x126   : > { %v869_v11 = vpop.f32.mrf.mxu1 }
 0x127   : > { %v1254_v13 = vpop.f32.mrf.mxu3 }
 0x12b   : > { %v1607_v14 = vpop.f32.mrf.mxu0 }
 0x12e   : > { %v1836_v26 = vpop.f32.mrf.mxu1  ;;  %10969 = vmatmul.msk.bf16.gmra.mxu0 %vm433_vm2, %v2557_v33  ;;  %v10937_v33 = vld [vmem:[%s12184_s25 + $0x48] sm:$0xe] }
 0x12f   : > { %v1256_v29 = vpop.f32.mrf.mxu3  ;;  %v10953_v19 = vrot.slane %v10937_v33, 9  ;;  %v2515_v33 = vrot.slane %v12722_v44, 5 }
 0x131   : > { %v2504_v11 = vsel %vm12186_vm3, %v10953_v19, %v2503_v8 }
 0x132   : > { %v2547_v17 = vunpack.c.l.b16 %v2504_v11 }
 0x133   : > { %v1609_v35 = vpop.f32.mrf.mxu0 }
 0x136   : > { %v1838_v46 = vpop.f32.mrf.mxu1 }
 0x137   : > { %v1259_v55 = vpop.f32.mrf.mxu3 }
 0x13b   : > { %v1612_v49 = vpop.f32.mrf.mxu0 }
 0x13c   : > { %v12788_v63 = vadd.f32 %v1612_v49, %v12650_v57  ;;  %v2500_v57 = vsel %vm12186_vm3, %v10952_v60, %v2499_v1  ;;  %v10941_v49 = vld [vmem:[%s12184_s25 + $0x68] sm:$0xe] }
 0x13d   : > { %v2546_v14 = vunpack.c.l.b16 %v2500_v57 }
 0x13e   : > { %v1841_v47 = vpop.f32.mrf.mxu1  ;;  %10970 = vmatmul.msk.bf16.gmra.mxu0 %vm433_vm2, %v2558_v53 }
 0x13f   : > { %v1261_v34 = vpop.f32.mrf.mxu3  ;;  %v2559_v26 = vpack.c.b16 %v2547_v17, %v2546_v14  ;;  %v10957_v47 = vrot.slane %v10941_v49, 9  ;;  %v10789_v14 = vld [vmem:[%s12184_s25 + $0x70] sm:$0xe]  ;;  %v1756_v17 = vrot.slane %v12647_v6, 5  ;;  %v10911_v49 = vld [vmem:[%s12184_s25 + $0x7c] sm:$0x1] }
 0x140   : > { %v2519_v34 = vrot.slane %v12725_v2, 5 }
 0x142   : > { %v2520_v1 = vsel %vm12186_vm3, %v10957_v47, %v2519_v34  ;;  %v2271_v34 = vshll.u32 %v10911_v49, 16 }
 0x143   : > { %v12795_v36 = vpop.f32.mrf.mxu0  ;;  %v2551_v8 = vunpack.c.l.b16 %v2520_v1 }
 0x146   : > { %v1843_v13 = vpop.f32.mrf.mxu1 }
 0x147   : > { %v2369_v22 = vpop.f32.mrf.mxu3  ;;  %v10788_v13 = vld [vmem:[%s12184_s25 + $0x68] sm:$0xe] }
 0x148   : > { %v1760_v22 = vrot.slane %v12653_v45, 5 }
 0x14b   : > { %v1617_v29 = vpop.f32.mrf.mxu0 }
 0x14c   : > { %v12802_v40 = vadd.f32 %v1617_v29, %v12711_v25  ;;  %v2512_v25 = vsel %vm12186_vm3, %v10955_v41, %v2511_v7  ;;  %v10805_v29 = vrot.slane %v10789_v14, 9  ;;  %v11820_v41 = vld [vmem:[%s12184_s25 + $0x74] sm:$0xf0]  ;;  %v2248_v7 = vshrl.u32 %v10908_v5, 16 }
 0x14d   : > { %v2549_v46 = vunpack.c.l.b16 %v2512_v25  ;;  %v10867_v45 = vor.u32 %v11820_v41, %v10866_v58  ;;  %v10790_v14 = vld [vmem:[%s12184_s25 + $0x78] sm:$0xe]  ;;  %v261_v41 = vld [vmem:[#allocation2 + $0x10] sm:$0x1] }
 0x14e   : > { %10971 = vmatmul.msk.bf16.gmra.mxu0 %vm433_vm2, %v2559_v26  ;;  %v10804_v26 = vrot.slane %v10788_v13, 9  ;;  %v1761_v56 = vsel %vm12186_vm3, %v10805_v29, %v1760_v22  ;;  %v1764_v22 = vrot.slane %v12699_v61, 5  ;;  %v10806_v29 = vrot.slane %v10790_v14, 9 }
 0x14f   : > { %v2371_v43 = vpop.f32.mrf.mxu3  ;;  %v2560_v51 = vpack.c.b16 %v2549_v46, %v2548_v20  ;;  %v1786_v25 = vunpack.c.l.b16 %v1761_v56  ;;  %v2262_v20 = vshrl.u32 %v10910_v37, 16  ;;  %v2250_v46 = vrot.slane %v2248_v7, 4  ;;  %10882 = vmatmul.msk.bf16.gmra.mxu2 %vm433_vm2, %v10867_v45 }
 0x150   : > { %v1765_v56 = vsel %vm12186_vm3, %v10806_v29, %v1764_v22  ;;  %v262_v45 = vsel %vm12864_vm9, 0, %v261_v41  ;;  %v11834_v22 = vld [vmem:[%s15174_s1 + $0x58] sm:$0xff] }
 0x151   : > { %263 = vst [vmem:[#allocation2 + $0x10] sm:$0x1] %v262_v45  ;;  %3681 = vmatpush.bf16.msrb.mxu3 %v11834_v22 }
 0x153   : > { %v12809_v35 = vpop.f32.mrf.mxu0 }
 0x157   : > { %v2374_v10 = vpop.f32.mrf.mxu3 }
 0x158   : > { %v2253_v10 = vrot.slane %v2251_v42, 5 }
 0x15b   : > { %v1622_v55 = vpop.f32.mrf.mxu0 }
 0x15c   : > { %v12816_v53 = vadd.f32 %v1622_v55, %v12749_v31  ;;  %v2516_v31 = vsel %vm12186_vm3, %v10956_v52, %v2515_v33  ;;  %v2254_v52 = vor.u32 %v2253_v10, %v2250_v46  ;;  %v2257_v33 = vshll.u32 %v10909_v21, 16  ;;  %v10914_v46 = vld [vmem:[%s12184_s25 + $0x88] sm:$0xf] }
 0x15d   : > { %v2550_v19 = vunpack.c.l.b16 %v2516_v31 }
 0x15e   : > { %10972 = vmatmul.msk.bf16.gmra.mxu0 %vm433_vm2, %v2560_v51  ;;  %v2265_v51 = vshll.u32 %v10910_v37, 16  ;;  %v2255_v31 = vrot.slane %v2254_v52, 4  ;;  %v2259_v1 = vrot.slane %v2257_v33, 5  ;;  %v1768_v37 = vrot.slane %v12708_v15, 5  ;;  %v258_v15 = vld [vmem:[#allocation2 + $0x8] sm:$0x1] }
 0x15f   : > { %v2376_v16 = vpop.f32.mrf.mxu3  ;;  %v2561_v57 = vpack.c.b16 %v2551_v8, %v2550_v19  ;;  %v2273_v8 = vrot.slane %v2271_v34, 5  ;;  %v259_v7 = vsel %vm12864_vm9, 0, %v258_v15  ;;  %v2527_v52 = vrot.slane %v10911_v49, 5 }
 0x160   : > { %v2264_v16 = vrot.slane %v2262_v20, 4  ;;  %v2267_v47 = vrot.slane %v2265_v51, 5  ;;  %260 = vst [vmem:[#allocation2 + $0x8] sm:$0x1] %v259_v7  ;;  %v10912_v20 = vld [vmem:[%s12184_s25 + $0x80] sm:$0xf] }
 0x161   : > { %v10942_v51 = vld [vmem:[%s12184_s25 + $0x70] sm:$0xe]  ;;  %v2290_v49 = vshrl.u32 %v10914_v46, 16  ;;  %v2293_v15 = vshll.u32 %v10914_v46, 16  ;;  %v326_v46 = vld [vmem:[#allocation2 + $0x2c] sm:$0x1] }
 0x162   : > { %v2268_v19 = vor.u32 %v2267_v47, %v2264_v16  ;;  %v2523_v16 = vrot.slane %v10909_v21, 5  ;;  %v10958_v47 = vrot.slane %v10942_v51, 9 }
 0x163   : > { %v12823_v60 = vpop.f32.mrf.mxu0  ;;  %v2295_v45 = vrot.slane %v2293_v15, 5  ;;  %v323_v15 = vld [vmem:[#allocation2 + $0x24] sm:$0x1] }
 0x164   : > { %v2269_v13 = vrot.slane %v2268_v19, 4 }
 0x16b   : > { %v1627_v11 = vpop.f32.mrf.mxu0 }
 0x16c   : > { %v12830_v44 = vadd.f32 %v1627_v11, %v12767_v0  ;;  %v1757_v0 = vsel %vm12186_vm3, %v10804_v26, %v1756_v17  ;;  %v2260_v11 = vsel %vm12237_vm6, %v2255_v31, %v2259_v1  ;;  %v10791_v17 = vld [vmem:[%s12184_s25 + $0x80] sm:$0xe]  ;;  %v11821_v1 = vld [vmem:[%s12184_s25 + $0x84] sm:$0xf0] }
 0x16d   : > { %v1785_v6 = vunpack.c.l.b16 %v1757_v0  ;;  %v2318_v26 = vunpack.c.l.b16 %v2260_v11  ;;  %v10807_v5 = vrot.slane %v10791_v17, 9  ;;  %v10870_v31 = vld [vmem:[%s12184_s25 + $0x80] sm:$0xf]  ;;  %v2279_v11 = vshll.u32 %v10912_v20, 16  ;;  %v12887_v17 = vld [vmem:[%s12184_s25 + $0x8c] sm:$0x1] }
 0x16e   : > { %10973 = vmatmul.msk.bf16.gmra.mxu0 %vm433_vm2, %v2561_v57  ;;  %v10871_v19 = vor.u32 %v11821_v1, %v10870_v31  ;;  %v327_v31 = vsel %vm12896_vm11, 0, %v326_v46  ;;  %v12079_v1 = vmov 0  }
 0x16f   : > { %v1795_v55 = vpack.c.b16 %v1786_v25, %v1785_v6  ;;  %v1769_v58 = vsel %vm12186_vm3, %v10807_v5, %v1768_v37  ;;  %v1787_v6 = vunpack.c.l.b16 %v1765_v56  ;;  %v2281_v37 = vrot.slane %v2279_v11, 5  ;;  %328 = vst [vmem:[#allocation2 + $0x2c] sm:$0x1] %v327_v31 }
 0x170   : > { %v1788_v25 = vunpack.c.l.b16 %v1769_v58  ;;  %10883 = vmatmul.msk.bf16.gmra.mxu2 %vm433_vm2, %v10871_v19  ;;  %v2292_v58 = vrot.slane %v2290_v49, 4  ;;  %v12914_v19 = vrot.slane %v12079_v1, 7  ;;  %v264_v49 = vld [vmem:[#allocation2 + $0x18] sm:$0x1] }
 0x171   : > { %10820 = vmatmul.msk.bf16.gmra.mxu1 %vm433_vm2, %v1795_v55  ;;  %v10943_v55 = vld [vmem:[%s12184_s25 + $0x78] sm:$0xe] }
 0x172   : > { %v1796_v33 = vpack.c.b16 %v1788_v25, %v1787_v6  ;;  %v10959_v34 = vrot.slane %v10943_v55, 9  ;;  %v2968_v6 = vld [vmem:[#allocation2 + $0x8] sm:$0xf]  ;;  %v317_v25 = vld [vmem:[#allocation2 + $0x14] sm:$0x1] }
 0x173   : > { %v12833_v2 = vpop.f32.mrf.mxu0 }
 0x174   : > { %v2528_v14 = vsel %vm12186_vm3, %v10959_v34, %v2527_v52  ;;  %v270_v52 = vld [vmem:[#allocation2 + $0x28] sm:$0x1] }
 0x175   : > { %v2553_v29 = vunpack.c.l.b16 %v2528_v14  ;;  %v271_v34 = vsel %vm12864_vm9, 0, %v270_v52  ;;  %v12945_v52 = vpop.f32.mrf.mxu1 }
 0x176   : > { %272 = vst [vmem:[#allocation2 + $0x28] sm:$0x1] %v271_v34 }
 0x17b   : > { %v1632_v43 = vpop.f32.mrf.mxu0 }
 0x17c   : > { %v2274_v43 = vsel %vm12237_vm6, %v2269_v13, %v2273_v8  ;;  %v12880_v8 = vld [vmem:[%s12184_s25 + $0x84] sm:$0x1]  ;;  %v2524_v13 = vsel %vm12186_vm3, %v10958_v47, %v2523_v16  ;;  %v2296_v47 = vor.u32 %v2295_v45, %v2292_v58  ;;  %v320_v58 = vld [vmem:[#allocation2 + $0x1c] sm:$0x1] }
 0x17d   : > { %v2319_v0 = vunpack.c.l.b16 %v2274_v43  ;;  %v2285_v21 = vshll.u32 %v12880_v8, 16 }
 0x17e   : > { %v2297_v11 = vrot.slane %v2296_v47, 4  ;;  %v324_v47 = vsel %vm12896_vm11, 0, %v323_v15 }
 0x17f   : > { %v2328_v42 = vpack.c.b16 %v2319_v0, %v2318_v26  ;;  %v2552_v26 = vunpack.c.l.b16 %v2524_v13  ;;  %v314_v0 = vld [vmem:[#allocation2 + $0xc] sm:$0x1]  ;;  %v2287_v56 = vrot.slane %v2285_v21, 5  ;;  %v2969_v13 = vsel %vm12906_vm13, %v12914_v19, %v2968_v6  ;;  %v10945_v6 = vld [vmem:[%s12184_s25 + $0x88] sm:$0xe] }
 0x180   : > { %v318_v21 = vsel %vm12896_vm11, 0, %v317_v25  ;;  %2970 = vst [vmem:[#allocation2 + $0x8] sm:$0xf] %v2969_v13 }
 0x181   : > { %10928 = vmatmul.msk.bf16.gmra.mxu3 %vm433_vm2, %v2328_v42  ;;  %10821 = vmatmul.msk.bf16.gmra.mxu1 %vm433_vm2, %v1796_v33  ;;  %v2562_v41 = vpack.c.b16 %v2553_v29, %v2552_v26  ;;  %v2299_v42 = vshll.u32 %v12887_v17, 16  ;;  %v265_v26 = vsel %vm12864_vm9, 0, %v264_v49  ;;  %v267_v29 = vld [vmem:[#allocation2 + $0x20] sm:$0x1]  ;;  %319 = vst [vmem:[#allocation2 + $0x14] sm:$0x1] %v318_v21 }
 0x182   : > { %266 = vst [vmem:[#allocation2 + $0x18] sm:$0x1] %v265_v26 }
 0x183   : > { %v1634_v57 = vpop.f32.mrf.mxu0  ;;  %10974 = vmatmul.msk.bf16.gmra.mxu0 %vm433_vm2, %v2562_v41  ;;  %v2301_v16 = vrot.slane %v2299_v42, 5  ;;  %v10944_v42 = vld [vmem:[%s12184_s25 + $0x80] sm:$0xe]  ;;  %325 = vst [vmem:[#allocation2 + $0x24] sm:$0x1] %v324_v47 }
 0x184   : > { %v2276_v57 = vshrl.u32 %v10912_v20, 16  ;;  %v2974_v20 = vld [vmem:[#allocation2 + $0x10] sm:$0xf]  ;;  %v10960_v45 = vrot.slane %v10944_v42, 9 }
 0x185   : > { %v2975_v14 = vsel %vm12906_vm13, %v12914_v19, %v2974_v20  ;;  %v2531_v20 = vrot.slane %v12880_v8, 5 }
 0x186   : > { %v2278_v5 = vrot.slane %v2276_v57, 4  ;;  %2976 = vst [vmem:[#allocation2 + $0x10] sm:$0xf] %v2975_v14 }
 0x187   : > { %v2532_v46 = vsel %vm12186_vm3, %v10960_v45, %v2531_v20  ;;  %v10981_v13 = vld [vmem:[#allocation2 + $0x8] sm:$0xf] }
 0x188   : > { %v2282_v7 = vor.u32 %v2281_v37, %v2278_v5  ;;  %v2302_v5 = vsel %vm12237_vm6, %v2297_v11, %v2301_v16  ;;  %v321_v16 = vsel %vm12896_vm11, 0, %v320_v58  ;;  %v2554_v34 = vunpack.c.l.b16 %v2532_v46  ;;  %v2977_v21 = vld [vmem:[#allocation2 + $0x14] sm:$0x1] }
 0x189   : > { %v2321_v37 = vunpack.c.l.b16 %v2302_v5  ;;  %322 = vst [vmem:[#allocation2 + $0x1c] sm:$0x1] %v321_v16  ;;  %v3525_v5 = vld [vmem:[#allocation2 + $0x8] sm:$0xe] }
 0x18a   : > { %v2283_v55 = vrot.slane %v2282_v7, 4  ;;  %v11031_v46 = vrot.slane %v3525_v5, 9 }
 0x18b   : > { %v1637_v10 = vpop.f32.mrf.mxu0 }
 0x18c   : > { %v315_v10 = vsel %vm12896_vm11, 0, %v314_v0  ;;  %v2288_v57 = vsel %vm12237_vm6, %v2283_v55, %v2287_v56  ;;  %v12931_v0 = vrot.slane %v12914_v19, 4  ;;  %v268_v56 = vsel %vm12864_vm9, 0, %v267_v29 }
 0x18d   : > { %316 = vst [vmem:[#allocation2 + $0xc] sm:$0x1] %v315_v10  ;;  %v2320_v22 = vunpack.c.l.b16 %v2288_v57  ;;  %v10961_v10 = vrot.slane %v10945_v6, 9  ;;  %v3194_v1 = vld [vmem:[#allocation2 + $0x10] sm:$0xf] }
 0x18e   : > { %269 = vst [vmem:[#allocation2 + $0x20] sm:$0x1] %v268_v56  ;;  %v11825_v14 = vld [vmem:[#allocation2 + $0xc] sm:$0xf0]  ;;  %v2978_v26 = vsel %vm12864_vm9, %v12931_v0, %v2977_v21  ;;  %v3235_v58 = vshrl.u32 %v3194_v1, 16  ;;  %v3238_v15 = vshll.u32 %v3194_v1, 16 }
 0x18f   : > { %v2329_v7 = vpack.c.b16 %v2321_v37, %v2320_v22  ;;  %v10982_v22 = vor.u32 %v11825_v14, %v10981_v13  ;;  %v12956_v37 = vpop.f32.mrf.mxu2  ;;  %2979 = vst [vmem:[#allocation2 + $0x14] sm:$0x1] %v2978_v26  ;;  %v12968_v14 = vpop.f32.mrf.mxu1 }
 0x190   : > { %v3240_v45 = vrot.slane %v3238_v15, 5  ;;  %v2983_v47 = vld [vmem:[#allocation2 + $0x1c] sm:$0x1] }
 0x191   : > { %10929 = vmatmul.msk.bf16.gmra.mxu3 %vm433_vm2, %v2329_v7  ;;  %11011 = vmatmul.msk.bf16.vlgmr.msra.gmra.mxu1 %vm433_vm2, %v10982_v22  ;;  %v2980_v7 = vld [vmem:[#allocation2 + $0x18] sm:$0xf]  ;;  %v12976_v22 = vld [vmem:[%s15175_s2] ss:$0 sm:$0xff] }
 0x192   : > { %v2981_v20 = vsel %vm12906_vm13, %v12914_v19, %v2980_v7  ;;  %v480_v26 = vadd.f32 %v12976_v22, %v12524_v12  ;;  %v273_v12 = vld [vmem:[#allocation2 + $0x30] sm:$0x1] }
 0x193   : > { %v1639_v51 = vpop.f32.mrf.mxu0  ;;  %2982 = vst [vmem:[#allocation2 + $0x18] sm:$0xf] %v2981_v20 }
 0x194   : > { %v2971_v25 = vld [vmem:[#allocation2 + $0xc] sm:$0x1]  ;;  %v2535_v51 = vrot.slane %v12887_v17, 5  ;;  %v3192_v17 = vld [vmem:[#allocation2 + $0x8] sm:$0xf] }
 0x195   : > { %v2972_v55 = vsel %vm12864_vm9, %v12931_v0, %v2971_v25  ;;  %v3221_v57 = vshrl.u32 %v3192_v17, 16  ;;  %v3224_v11 = vshll.u32 %v3192_v17, 16  ;;  %v2986_v42 = vld [vmem:[#allocation2 + $0x20] sm:$0xf]  ;;  %v3237_v25 = vrot.slane %v3235_v58, 4 }
 0x196   : > { %v2536_v8 = vsel %vm12186_vm3, %v10961_v10, %v2535_v51  ;;  %2973 = vst [vmem:[#allocation2 + $0xc] sm:$0x1] %v2972_v55  ;;  %v255_v10 = vld [vmem:[#allocation2] sm:$0x1]  ;;  %v306_v51 = vld [vmem:[#allocation2 + $0x88] sm:$0x1] }
 0x197   : > { %v2555_v31 = vunpack.c.l.b16 %v2536_v8  ;;  %v3223_v29 = vrot.slane %v3221_v57, 4  ;;  %v3226_v56 = vrot.slane %v3224_v11, 5  ;;  %v311_v55 = vld [vmem:[#allocation2 + $0x4] sm:$0x1]  ;;  %v2987_v8 = vsel %vm12906_vm13, %v12914_v19, %v2986_v42  ;;  %v362_v17 = vld [vmem:[#allocation2 + $0x8c] sm:$0x1] }
 0x198   : > { %v3241_v1 = vor.u32 %v3240_v45, %v3237_v25  ;;  %v3526_v57 = vld [vmem:[#allocation2 + $0x10] sm:$0xe]  ;;  %2988 = vst [vmem:[#allocation2 + $0x20] sm:$0xf] %v2987_v8  ;;  %v256_v15 = vsel %vm12864_vm9, 0, %v255_v10  ;;  %v312_v7 = vsel %vm12896_vm11, 0, %v311_v55  ;;  %v877_v8 = vadd.f32 %v12589_v50, %v480_v26 }
 0x199   : > { %v2563_v49 = vpack.c.b16 %v2555_v31, %v2554_v34  ;;  %v3227_v6 = vor.u32 %v3226_v56, %v3223_v29  ;;  %v12966_v34 = vpop.f32.mrf.mxu3  ;;  %v3195_v29 = vld [vmem:[#allocation2 + $0x14] sm:$0x1]  ;;  %v11032_v58 = vrot.slane %v3526_v57, 9  ;;  %v363_v42 = vsel %vm12896_vm11, 0, %v362_v17  ;;  %257 = vst [vmem:[#allocation2] sm:$0x1] %v256_v15 }
 0x19a   : > { %v3242_v5 = vrot.slane %v3241_v1, 4  ;;  %v3244_v45 = vshll.u32 %v3195_v29, 16  ;;  %v3573_v20 = vrot.slane %v3195_v29, 5  ;;  %v274_v10 = vsel %vm12864_vm9, 0, %v273_v12  ;;  %v2989_v55 = vld [vmem:[#allocation2 + $0x24] sm:$0x1] }
 0x19b   : > { %v2603_v41 = vpop.f32.mrf.mxu0  ;;  %10975 = vmatmul.msk.bf16.gmra.mxu0 %vm433_vm2, %v2563_v49  ;;  %v3228_v13 = vrot.slane %v3227_v6, 4  ;;  %v2984_v49 = vsel %vm12864_vm9, %v12931_v0, %v2983_v47  ;;  %313 = vst [vmem:[#allocation2 + $0x4] sm:$0x1] %v312_v7  ;;  %v3196_v57 = vld [vmem:[#allocation2 + $0x18] sm:$0xf]  ;;  %v2990_v50 = vsel %vm12864_vm9, %v12931_v0, %v2989_v55 }
 0x19c   : > { %2985 = vst [vmem:[#allocation2 + $0x1c] sm:$0x1] %v2984_v49  ;;  %v3246_v17 = vrot.slane %v3244_v45, 5  ;;  %v11852_v47 = vld [vmem:[%s15174_s1 + $0x78] sm:$0xff]  ;;  %v3249_v49 = vshrl.u32 %v3196_v57, 16  ;;  %v3252_v29 = vshll.u32 %v3196_v57, 16  ;;  %v1880_v57 = vadd.f32 %v12945_v52, %v12788_v63 }
 0x19d   : > { %v3193_v16 = vld [vmem:[#allocation2 + $0xc] sm:$0x1]  ;;  %364 = vst [vmem:[#allocation2 + $0x8c] sm:$0x1] %v363_v42  ;;  %4497 = vmatpush.bf16.msrb.mxu0 %v11852_v47  ;;  %v10985_v42 = vld [vmem:[#allocation2 + $0x18] sm:$0xf] }
 0x19e   : > { %v3230_v31 = vshll.u32 %v3193_v16, 16  ;;  %v3569_v11 = vrot.slane %v3193_v16, 5  ;;  %v12994_v16 = vpop.f32.mrf.mxu2  ;;  %v3247_v26 = vsel %vm12237_vm6, %v3242_v5, %v3246_v17  ;;  %275 = vst [vmem:[#allocation2 + $0x30] sm:$0x1] %v274_v10  ;;  %v11843_v5 = vld [vmem:[%s15174_s1 + $0x68] sm:$0xff]  ;;  %v11842_v10 = vld [vmem:[%s15174_s1 + $0x60] sm:$0xff] }
 0x19f   : > { %v11826_v12 = vld [vmem:[#allocation2 + $0x1c] sm:$0xf0]  ;;  %2991 = vst [vmem:[#allocation2 + $0x24] sm:$0x1] %v2990_v50  ;;  %v3251_v17 = vrot.slane %v3249_v49, 4  ;;  %3819 = vmatpush.bf16.msrb.mxu1 %v11842_v10  ;;  %4152 = vmatpush.bf16.msrb.mxu2 %v11843_v5 }
 0x1a0   : > { %v3232_v21 = vrot.slane %v3230_v31, 5  ;;  %v3570_v56 = vsel %vm12186_vm3, %v11031_v46, %v3569_v11  ;;  %v329_v46 = vld [vmem:[#allocation2 + $0x34] sm:$0x1]  ;;  %v3574_v31 = vsel %vm12186_vm3, %v11032_v58, %v3573_v20  ;;  %v11845_v45 = vld [vmem:[#allocation2 + $0x1c] sm:$0xf0]  ;;  %v13011_v20 = vpop.f32.mrf.mxu1 }
 0x1a1   : > { %v330_v1 = vsel %vm12896_vm11, 0, %v329_v46  ;;  %v13009_v15 = vpop.f32.mrf.mxu3  ;;  %v332_v47 = vld [vmem:[#allocation2 + $0x3c] sm:$0x1]  ;;  %v3527_v52 = vld [vmem:[#allocation2 + $0x18] sm:$0xe] }
 0x1a2   : > { %v3233_v25 = vsel %vm12237_vm6, %v3228_v13, %v3232_v21  ;;  %v3627_v13 = vunpack.c.l.b16 %v3574_v31  ;;  %v3198_v21 = vld [vmem:[#allocation2 + $0x20] sm:$0xf]  ;;  %331 = vst [vmem:[#allocation2 + $0x34] sm:$0x1] %v330_v1  ;;  %v3254_v31 = vrot.slane %v3252_v29, 5  ;;  %v1114_v1 = vadd.f32 %v12575_v27, %v877_v8 }
 0x1a3   : > { %v2605_v41 = vpop.f32.mrf.mxu0  ;;  %v3419_v11 = vunpack.c.l.b16 %v3233_v25  ;;  %v3266_v58 = vshll.u32 %v3198_v21, 16  ;;  %v11143_v25 = vld [vmem:[#allocation2 + $0x18] sm:$0xf]  ;;  %v3197_v50 = vld [vmem:[#allocation2 + $0x1c] sm:$0x1]  ;;  %v333_v49 = vsel %vm12896_vm11, 0, %v332_v47 }
 0x1a4   : > { %v307_v41 = vsel %vm12864_vm9, 0, %v306_v51  ;;  %v3626_v51 = vunpack.c.l.b16 %v3570_v56  ;;  %v3263_v56 = vshrl.u32 %v3198_v21, 16  ;;  %v11144_v55 = vor.u32 %v11845_v45, %v11143_v25  ;;  %334 = vst [vmem:[#allocation2 + $0x3c] sm:$0x1] %v333_v49  ;;  %v3528_v29 = vld [vmem:[#allocation2 + $0x20] sm:$0xe] }
 0x1a5   : > { %308 = vst [vmem:[#allocation2 + $0x88] sm:$0x1] %v307_v41  ;;  %v3420_v41 = vunpack.c.l.b16 %v3247_v26  ;;  %v3255_v27 = vor.u32 %v3254_v31, %v3251_v17  ;;  %v3258_v8 = vshll.u32 %v3197_v50, 16  ;;  %v3268_v26 = vrot.slane %v3266_v58, 5 }
 0x1a6   : > { %v3640_v7 = vpack.c.b16 %v3627_v13, %v3626_v51  ;;  %v276_v51 = vld [vmem:[#allocation2 + $0x38] sm:$0x1]  ;;  %v3265_v21 = vrot.slane %v3263_v56, 4  ;;  %v1269_v63 = vadd.f32 %v12675_v18, %v1114_v1  ;;  %v11034_v25 = vrot.slane %v3528_v29, 9 }
 0x1a7   : > { %v3433_v46 = vpack.c.b16 %v3420_v41, %v3419_v11  ;;  %v277_v13 = vsel %vm12864_vm9, 0, %v276_v51  ;;  %v13031_v41 = vpop.f32.mrf.mxu2  ;;  %v3256_v56 = vrot.slane %v3255_v27, 4  ;;  %v2035_v58 = vadd.f32 %v12956_v37, %v1880_v57 }
 0x1a8   : > { %11051 = vmatmul.msk.bf16.vlgmr.msrb.gmra.mxu3 %vm433_vm2, %v3640_v7  ;;  %278 = vst [vmem:[#allocation2 + $0x38] sm:$0x1] %v277_v13  ;;  %v3260_v7 = vrot.slane %v3258_v8, 5  ;;  %v1647_v45 = vadd.f32 %v12795_v36, %v1269_v63  ;;  %v485_v29 = vadd.f32 %v12976_v22, %v12581_v28 }
 0x1a9   : > { %11024 = vmatmul.msk.bf16.vlgmr.msra.gmra.mxu2 %vm433_vm2, %v3433_v46  ;;  %v3199_v46 = vld [vmem:[#allocation2 + $0x24] sm:$0x1]  ;;  %v2413_v17 = vadd.f32 %v12966_v34, %v2035_v58  ;;  %v2384_v31 = vpop.f32.mrf.mxu3  ;;  %v282_v58 = vld [vmem:[#allocation2 + $0x48] sm:$0x1] }
 0x1aa   : > { %v3261_v18 = vsel %vm12237_vm6, %v3256_v56, %v3260_v7  ;;  %v3272_v10 = vshll.u32 %v3199_v46, 16  ;;  %v1881_v13 = vadd.f32 %v12968_v14, %v1647_v45 }
 0x1ab   : > { %v2608_v6 = vpop.f32.mrf.mxu0  ;;  %11173 = vmatmul.msk.bf16.vlgmr.msrb.gmra.mxu0 %vm433_vm2, %v11144_v55  ;;  %v3581_v55 = vrot.slane %v3199_v46, 5  ;;  %v3421_v37 = vunpack.c.l.b16 %v3261_v18  ;;  %v338_v46 = vld [vmem:[#allocation2 + $0x4c] sm:$0x1] }
 0x1ac   : > { %v10986_v6 = vor.u32 %v11826_v12, %v10985_v42  ;;  %v3269_v42 = vor.u32 %v3268_v26, %v3265_v21  ;;  %v11033_v12 = vrot.slane %v3527_v52, 9  ;;  %v3274_v47 = vrot.slane %v3272_v10, 5  ;;  %v1853_v21 = vpop.f32.mrf.mxu1 }
 0x1ad   : > { %v3582_v57 = vsel %vm12186_vm3, %v11034_v25, %v3581_v55  ;;  %v2036_v56 = vadd.f32 %v12994_v16, %v1881_v13  ;;  %v339_v28 = vsel %vm12896_vm11, 0, %v338_v46  ;;  %v1882_v16 = vadd.f32 %v13011_v20, %v12802_v40 }
 0x1ae   : > { %11012 = vmatmul.msk.bf16.gmra.mxu1 %vm433_vm2, %v10986_v6  ;;  %v3577_v6 = vrot.slane %v3197_v50, 5  ;;  %v3270_v5 = vrot.slane %v3269_v42, 4  ;;  %v335_v50 = vld [vmem:[#allocation2 + $0x44] sm:$0x1]  ;;  %v3629_v27 = vunpack.c.l.b16 %v3582_v57  ;;  %340 = vst [vmem:[#allocation2 + $0x4c] sm:$0x1] %v339_v28 }
 0x1af   : > { %v336_v34 = vsel %vm12896_vm11, 0, %v335_v50  ;;  %v2008_v7 = vpop.f32.mrf.mxu2  ;;  %v2414_v25 = vadd.f32 %v13009_v15, %v2036_v56  ;;  %v2037_v40 = vadd.f32 %v13031_v41, %v1882_v16 }
 0x1b0   : > { %v3578_v51 = vsel %vm12186_vm3, %v11033_v12, %v3577_v6  ;;  %v3275_v26 = vsel %vm12237_vm6, %v3270_v5, %v3274_v47  ;;  %337 = vst [vmem:[#allocation2 + $0x44] sm:$0x1] %v336_v34  ;;  %v879_v6 = vadd.f32 %v12643_v9, %v485_v29  ;;  %v283_v5 = vsel %vm12864_vm9, 0, %v282_v58  ;;  %v285_v34 = vld [vmem:[#allocation2 + $0x50] sm:$0x1] }
 0x1b1   : > { %v3628_v1 = vunpack.c.l.b16 %v3578_v51  ;;  %v3422_v63 = vunpack.c.l.b16 %v3275_v26  ;;  %v2386_v10 = vpop.f32.mrf.mxu3  ;;  %284 = vst [vmem:[#allocation2 + $0x48] sm:$0x1] %v283_v5 }
 0x1b2   : > { %v1116_v15 = vadd.f32 %v12629_v62, %v879_v6 }
 0x1b3   : > { %v2610_v11 = vpop.f32.mrf.mxu0  ;;  %v3641_v52 = vpack.c.b16 %v3629_v27, %v3628_v1  ;;  %v3434_v12 = vpack.c.b16 %v3422_v63, %v3421_v37  ;;  %v2995_v1 = vld [vmem:[#allocation2 + $0x2c] sm:$0x1]  ;;  %v2415_v27 = vadd.f32 %v2384_v31, %v2037_v40  ;;  %v341_v63 = vld [vmem:[#allocation2 + $0x54] sm:$0x1] }
 0x1b4   : > { %v279_v11 = vld [vmem:[#allocation2 + $0x40] sm:$0x1]  ;;  %v1271_v37 = vadd.f32 %v12730_v24, %v1116_v15  ;;  %v490_v24 = vadd.f32 %v12976_v22, %v12631_v3 }
 0x1b5   : > { %v280_v8 = vsel %vm12864_vm9, 0, %v279_v11  ;;  %v1856_v11 = vpop.f32.mrf.mxu1 }
 0x1b6   : > { %281 = vst [vmem:[#allocation2 + $0x40] sm:$0x1] %v280_v8  ;;  %v1649_v62 = vadd.f32 %v12809_v35, %v1271_v37  ;;  %v342_v35 = vsel %vm12896_vm11, 0, %v341_v63  ;;  %v881_v31 = vadd.f32 %v12702_v38, %v490_v24 }
 0x1b7   : > { %343 = vst [vmem:[#allocation2 + $0x54] sm:$0x1] %v342_v35 }
 0x1b8   : > { %11052 = vmatmul.msk.bf16.gmra.mxu3 %vm433_vm2, %v3641_v52  ;;  %v1883_v26 = vadd.f32 %v1853_v21, %v1649_v62  ;;  %v1118_v16 = vadd.f32 %v12685_v48, %v881_v31 }
 0x1b9   : > { %11025 = vmatmul.msk.bf16.gmra.mxu2 %vm433_vm2, %v3434_v12  ;;  %v3001_v12 = vld [vmem:[#allocation2 + $0x34] sm:$0x1]  ;;  %v13077_v6 = vpop.f32.mrf.mxu3 }
 0x1ba   : > { %v2038_v58 = vadd.f32 %v2008_v7, %v1883_v26  ;;  %v1884_v7 = vadd.f32 %v1856_v11, %v12816_v53 }
 0x1bb   : > { %v2613_v36 = vpop.f32.mrf.mxu0 }
 0x1bc   : > { %v2647_v49 = vadd.f32 %v2613_v36, %v2413_v17  ;;  %v2992_v17 = vld [vmem:[#allocation2 + $0x28] sm:$0xf] }
 0x1bd   : > { %v1858_v46 = vpop.f32.mrf.mxu1 }
 0x1be   : > { %v2663_v14 = vmax.f32 %v2647_v49, 0.0  ;;  %v2011_v49 = vpop.f32.mrf.mxu2 }
 0x1bf   : > { %v2039_v24 = vadd.f32 %v2011_v49, %v1884_v7 }
 0x1c0   : > { %v2793_v42 = vpack.c.bf16 %v2663_v14, %v2663_v14  ;;  %v286_v14 = vsel %vm12864_vm9, 0, %v285_v34 }
 0x1c1   : > { %287 = vst [vmem:[#allocation2 + $0x50] sm:$0x1] %v286_v14 }
 0x1c2   : > { %v2838_v45 = vshrl.u32 %v2793_v42, 16  ;;  %v2841_v9 = vshll.u32 %v2793_v42, 16  ;;  %v2998_v42 = vld [vmem:[#allocation2 + $0x30] sm:$0xf] }
 0x1c3   : > { %v2615_v18 = vpop.f32.mrf.mxu0 }
 0x1c4   : > { %v2840_v51 = vrot.slane %v2838_v45, 7  ;;  %v2648_v55 = vadd.f32 %v2615_v18, %v2414_v25  ;;  %v495_v45 = vadd.f32 %v12976_v22, %v12689_v23  ;;  %v1273_v22 = vadd.f32 %v12760_v32, %v1118_v16  ;;  %v3007_v32 = vld [vmem:[#allocation2 + $0x3c] sm:$0x1] }
 0x1c6   : > { %v2843_v13 = vor.u32 %v2841_v9, %v2840_v51  ;;  %v2844_v36 = vrot.slane %v2840_v51, 4  ;;  %v2664_v47 = vmax.f32 %v2648_v55, 0.0  ;;  %v883_v51 = vadd.f32 %v12746_v39, %v495_v45 }
 0x1c7   : > { %v2416_v55 = vadd.f32 %v2386_v10, %v2038_v58 }
 0x1c8   : > { %v2993_v20 = vsel %vm12906_vm13, %v2843_v13, %v2992_v17  ;;  %v2996_v57 = vsel %vm12864_vm9, %v2844_v36, %v2995_v1  ;;  %v2794_v50 = vpack.c.bf16 %v2664_v47, %v2664_v47  ;;  %v288_v36 = vld [vmem:[#allocation2 + $0x58] sm:$0x1]  ;;  %v2013_v47 = vpop.f32.mrf.mxu2  ;;  %v1120_v10 = vadd.f32 %v12739_v54, %v883_v51 }
 0x1c9   : > { %2994 = vst [vmem:[#allocation2 + $0x28] sm:$0xf] %v2993_v20  ;;  %v344_v20 = vld [vmem:[#allocation2 + $0x5c] sm:$0x1]  ;;  %v289_v53 = vsel %vm12864_vm9, 0, %v288_v36 }
 0x1ca   : > { %2997 = vst [vmem:[#allocation2 + $0x2c] sm:$0x1] %v2996_v57  ;;  %v2846_v8 = vshrl.u32 %v2794_v50, 16  ;;  %v2849_v29 = vshll.u32 %v2794_v50, 16  ;;  %v1651_v57 = vadd.f32 %v12823_v60, %v1273_v22  ;;  %v3004_v50 = vld [vmem:[#allocation2 + $0x38] sm:$0xf]  ;;  %v2391_v60 = vpop.f32.mrf.mxu3  ;;  %v1275_v58 = vadd.f32 %v12770_v30, %v1120_v10 }
 0x1cb   : > { %v2618_v41 = vpop.f32.mrf.mxu0  ;;  %290 = vst [vmem:[#allocation2 + $0x58] sm:$0x1] %v289_v53  ;;  %v345_v54 = vsel %vm12896_vm11, 0, %v344_v20  ;;  %v3010_v30 = vld [vmem:[#allocation2 + $0x40] sm:$0xf] }
 0x1cc   : > { %v2848_v52 = vrot.slane %v2846_v8, 7  ;;  %v2649_v56 = vadd.f32 %v2618_v41, %v2415_v27  ;;  %v1885_v26 = vadd.f32 %v1858_v46, %v1651_v57  ;;  %v1861_v46 = vpop.f32.mrf.mxu1  ;;  %346 = vst [vmem:[#allocation2 + $0x5c] sm:$0x1] %v345_v54 }
 0x1ce   : > { %v2851_v3 = vor.u32 %v2849_v29, %v2848_v52  ;;  %v2852_v21 = vrot.slane %v2848_v52, 4  ;;  %v2665_v25 = vmax.f32 %v2649_v56, 0.0 }
 0x1d0   : > { %v2999_v18 = vsel %vm12906_vm13, %v2851_v3, %v2998_v42  ;;  %v3002_v5 = vsel %vm12864_vm9, %v2852_v21, %v3001_v12  ;;  %v2795_v38 = vpack.c.bf16 %v2665_v25, %v2665_v25  ;;  %v3529_v28 = vld [vmem:[#allocation2 + $0x28] sm:$0xe] }
 0x1d1   : > { %3000 = vst [vmem:[#allocation2 + $0x30] sm:$0xf] %v2999_v18  ;;  %v13087_v9 = vld [vmem:[#allocation2 + $0x2c] sm:$0x1]  ;;  %v11035_v1 = vrot.slane %v3529_v28, 9  ;;  %v2417_v18 = vadd.f32 %v13077_v6, %v2039_v24  ;;  %v2040_v28 = vadd.f32 %v2013_v47, %v1885_v26 }
 0x1d2   : > { %3003 = vst [vmem:[#allocation2 + $0x34] sm:$0x1] %v3002_v5  ;;  %v2854_v23 = vshrl.u32 %v2795_v38, 16  ;;  %v2857_v15 = vshll.u32 %v2795_v38, 16  ;;  %v3200_v13 = vld [vmem:[#allocation2 + $0x28] sm:$0xf] }
 0x1d3   : > { %v2620_v17 = vpop.f32.mrf.mxu0  ;;  %v3585_v39 = vrot.slane %v13087_v9, 5  ;;  %v3277_v40 = vshrl.u32 %v3200_v13, 16  ;;  %v3280_v62 = vshll.u32 %v3200_v13, 16  ;;  %v10989_v41 = vld [vmem:[#allocation2 + $0x28] sm:$0xf]  ;;  %v3286_v22 = vshll.u32 %v13087_v9, 16 }
 0x1d4   : > { %v2856_v37 = vrot.slane %v2854_v23, 7  ;;  %v2650_v48 = vadd.f32 %v2620_v17, %v2416_v55  ;;  %v11147_v14 = vld [vmem:[#allocation2 + $0x28] sm:$0xf]  ;;  %v347_v9 = vld [vmem:[#allocation2 + $0x64] sm:$0x1] }
 0x1d5   : > { %v3279_v34 = vrot.slane %v3277_v40, 4  ;;  %v3282_v63 = vrot.slane %v3280_v62, 5  ;;  %v3586_v49 = vsel %vm12186_vm3, %v11035_v1, %v3585_v39  ;;  %v2016_v39 = vpop.f32.mrf.mxu2  ;;  %v3288_v62 = vrot.slane %v3286_v22, 5  ;;  %v294_v26 = vld [vmem:[#allocation2 + $0x68] sm:$0x1] }
 0x1d6   : > { %v2859_v11 = vor.u32 %v2857_v15, %v2856_v37  ;;  %v2860_v27 = vrot.slane %v2856_v37, 4  ;;  %v2666_v8 = vmax.f32 %v2650_v48, 0.0  ;;  %v3630_v55 = vunpack.c.l.b16 %v3586_v49  ;;  %v3013_v15 = vld [vmem:[#allocation2 + $0x44] sm:$0x1]  ;;  %v291_v48 = vld [vmem:[#allocation2 + $0x60] sm:$0x1] }
 0x1d7   : > { %v3283_v45 = vor.u32 %v3282_v63, %v3279_v34  ;;  %v292_v24 = vsel %vm12864_vm9, 0, %v291_v48  ;;  %v348_v54 = vsel %vm12896_vm11, 0, %v347_v9 }
 0x1d8   : > { %v3005_v52 = vsel %vm12906_vm13, %v2859_v11, %v3004_v50  ;;  %v3008_v29 = vsel %vm12864_vm9, %v2860_v27, %v3007_v32  ;;  %v2796_v56 = vpack.c.bf16 %v2666_v8, %v2666_v8  ;;  %v11827_v35 = vld [vmem:[#allocation2 + $0x2c] sm:$0xf0]  ;;  %v1886_v50 = vadd.f32 %v1861_v46, %v12830_v44  ;;  %293 = vst [vmem:[#allocation2 + $0x60] sm:$0x1] %v292_v24 }
 0x1d9   : > { %v11846_v31 = vld [vmem:[#allocation2 + $0x2c] sm:$0xf0]  ;;  %3006 = vst [vmem:[#allocation2 + $0x38] sm:$0xf] %v3005_v52  ;;  %v10990_v12 = vor.u32 %v11827_v35, %v10989_v41  ;;  %v3203_v21 = vld [vmem:[#allocation2 + $0x34] sm:$0x1]  ;;  %v2418_v41 = vadd.f32 %v2391_v60, %v2040_v28  ;;  %v2394_v52 = vpop.f32.mrf.mxu3  ;;  %v1653_v60 = vadd.f32 %v12833_v2, %v1275_v58 }
 0x1da   : > { %v3530_v42 = vld [vmem:[#allocation2 + $0x30] sm:$0xe]  ;;  %v11148_v3 = vor.u32 %v11846_v31, %v11147_v14  ;;  %3009 = vst [vmem:[#allocation2 + $0x3c] sm:$0x1] %v3008_v29  ;;  %v2862_v5 = vshrl.u32 %v2796_v56, 16  ;;  %v3589_v38 = vrot.slane %v3203_v21, 5 }
 0x1db   : > { %v11036_v25 = vrot.slane %v3530_v42, 9  ;;  %v2865_v16 = vshll.u32 %v2796_v56, 16  ;;  %v2623_v51 = vpop.f32.mrf.mxu0  ;;  %11013 = vmatmul.msk.bf16.gmra.mxu1 %vm433_vm2, %v10990_v12  ;;  %v3202_v23 = vld [vmem:[#allocation2 + $0x30] sm:$0xf]  ;;  %v3284_v36 = vrot.slane %v3283_v45, 4  ;;  %v3300_v37 = vshll.u32 %v3203_v21, 16  ;;  %v1863_v21 = vpop.f32.mrf.mxu1 }
 0x1dc   : > { %11174 = vmatmul.msk.bf16.gmra.mxu0 %vm433_vm2, %v11148_v3  ;;  %v2864_v7 = vrot.slane %v2862_v5, 7  ;;  %v2651_v17 = vadd.f32 %v2623_v51, %v2417_v18  ;;  %v3291_v1 = vshrl.u32 %v3202_v23, 16  ;;  %v3294_v47 = vshll.u32 %v3202_v23, 16  ;;  %349 = vst [vmem:[#allocation2 + $0x64] sm:$0x1] %v348_v54 }
 0x1dd   : > { %v3590_v6 = vsel %vm12186_vm3, %v11036_v25, %v3589_v38  ;;  %v3289_v44 = vsel %vm12237_vm6, %v3284_v36, %v3288_v62  ;;  %v3302_v35 = vrot.slane %v3300_v37, 5  ;;  %v2041_v5 = vadd.f32 %v2016_v39, %v1886_v50  ;;  %v3016_v38 = vld [vmem:[#allocation2 + $0x48] sm:$0xf]  ;;  %v3019_v28 = vld [vmem:[#allocation2 + $0x4c] sm:$0x1] }
 0x1de   : > { %v3631_v13 = vunpack.c.l.b16 %v3590_v6  ;;  %v2867_v40 = vor.u32 %v2865_v16, %v2864_v7  ;;  %v2868_v20 = vrot.slane %v2864_v7, 4  ;;  %v2667_v10 = vmax.f32 %v2651_v17, 0.0  ;;  %v3022_v54 = vld [vmem:[#allocation2 + $0x50] sm:$0xf] }
 0x1df   : > { %v3293_v57 = vrot.slane %v3291_v1, 4  ;;  %v3296_v53 = vrot.slane %v3294_v47, 5  ;;  %v3423_v51 = vunpack.c.l.b16 %v3289_v44  ;;  %v295_v2 = vsel %vm12864_vm9, 0, %v294_v26 }
 0x1e0   : > { %v3642_v32 = vpack.c.b16 %v3631_v13, %v3630_v55  ;;  %v3011_v11 = vsel %vm12906_vm13, %v2867_v40, %v3010_v30  ;;  %v3014_v27 = vsel %vm12864_vm9, %v2868_v20, %v3013_v15  ;;  %v2797_v8 = vpack.c.bf16 %v2667_v10, %v2667_v10  ;;  %v3531_v34 = vld [vmem:[#allocation2 + $0x38] sm:$0xe]  ;;  %296 = vst [vmem:[#allocation2 + $0x68] sm:$0x1] %v295_v2  ;;  %v2018_v13 = vpop.f32.mrf.mxu2 }
 0x1e1   : > { %3012 = vst [vmem:[#allocation2 + $0x40] sm:$0xf] %v3011_v11  ;;  %v3297_v14 = vor.u32 %v3296_v53, %v3293_v57  ;;  %v13121_v63 = vld [vmem:[#allocation2 + $0x3c] sm:$0x1]  ;;  %v11037_v31 = vrot.slane %v3531_v34, 9  ;;  %v1887_v7 = vadd.f32 %v1863_v21, %v1653_v60  ;;  %v2419_v62 = vadd.f32 %v2394_v52, %v2041_v5  ;;  %v2396_v44 = vpop.f32.mrf.mxu3 }
 0x1e2   : > { %11053 = vmatmul.msk.bf16.gmra.mxu3 %vm433_vm2, %v3642_v32  ;;  %3015 = vst [vmem:[#allocation2 + $0x44] sm:$0x1] %v3014_v27  ;;  %v2870_v29 = vshrl.u32 %v2797_v8, 16  ;;  %v2873_v56 = vshll.u32 %v2797_v8, 16  ;;  %v3593_v12 = vrot.slane %v13121_v63, 5 }
 0x1e3   : > { %v2625_v42 = vpop.f32.mrf.mxu0  ;;  %v3298_v49 = vrot.slane %v3297_v14, 4  ;;  %v3204_v3 = vld [vmem:[#allocation2 + $0x38] sm:$0xf]  ;;  %v2042_v27 = vadd.f32 %v2018_v13, %v1887_v7 }
 0x1e4   : > { %v2872_v25 = vrot.slane %v2870_v29, 7  ;;  %v2652_v45 = vadd.f32 %v2625_v42, %v2418_v41  ;;  %v3305_v46 = vshrl.u32 %v3204_v3, 16  ;;  %v3308_v18 = vshll.u32 %v3204_v3, 16  ;;  %v10993_v30 = vld [vmem:[#allocation2 + $0x38] sm:$0xf] }
 0x1e5   : > { %v3303_v16 = vsel %vm12237_vm6, %v3298_v49, %v3302_v35  ;;  %v11151_v15 = vld [vmem:[#allocation2 + $0x38] sm:$0xf]  ;;  %v3594_v17 = vsel %vm12186_vm3, %v11037_v31, %v3593_v12  ;;  %v3314_v41 = vshll.u32 %v13121_v63, 16  ;;  %v3025_v35 = vld [vmem:[#allocation2 + $0x54] sm:$0x1] }
 0x1e6   : > { %v2875_v58 = vor.u32 %v2873_v56, %v2872_v25  ;;  %v2876_v55 = vrot.slane %v2872_v25, 4  ;;  %v2668_v23 = vmax.f32 %v2652_v45, 0.0  ;;  %v3424_v22 = vunpack.c.l.b16 %v3303_v16  ;;  %v297_v25 = vld [vmem:[#allocation2 + $0x70] sm:$0x1]  ;;  %v3028_v13 = vld [vmem:[#allocation2 + $0x58] sm:$0xf] }
 0x1e7   : > { %v3307_v6 = vrot.slane %v3305_v46, 4  ;;  %v3310_v1 = vrot.slane %v3308_v18, 5  ;;  %v3632_v24 = vunpack.c.l.b16 %v3594_v17  ;;  %v3040_v45 = vld [vmem:[#allocation2 + $0x68] sm:$0xf]  ;;  %v2420_v46 = vadd.f32 %v2396_v44, %v2042_v27 }
 0x1e8   : > { %v3017_v36 = vsel %vm12906_vm13, %v2875_v58, %v3016_v38  ;;  %v3020_v47 = vsel %vm12864_vm9, %v2876_v55, %v3019_v28  ;;  %v2798_v37 = vpack.c.bf16 %v2668_v23, %v2668_v23  ;;  %v3435_v48 = vpack.c.b16 %v3424_v22, %v3423_v51  ;;  %v11828_v39 = vld [vmem:[#allocation2 + $0x3c] sm:$0xf0]  ;;  %v350_v58 = vld [vmem:[#allocation2 + $0x6c] sm:$0x1] }
 0x1e9   : > { %v11847_v40 = vld [vmem:[#allocation2 + $0x3c] sm:$0xf0]  ;;  %3018 = vst [vmem:[#allocation2 + $0x48] sm:$0xf] %v3017_v36  ;;  %v10994_v10 = vor.u32 %v11828_v39, %v10993_v30  ;;  %v3207_v9 = vld [vmem:[#allocation2 + $0x44] sm:$0x1]  ;;  %v3311_v32 = vor.u32 %v3310_v1, %v3307_v6  ;;  %v3041_v30 = vsel %vm12906_vm13, %v12914_v19, %v3040_v45 }
 0x1ea   : > { %v3532_v20 = vld [vmem:[#allocation2 + $0x40] sm:$0xe]  ;;  %v11152_v57 = vor.u32 %v11847_v40, %v11151_v15  ;;  %3021 = vst [vmem:[#allocation2 + $0x4c] sm:$0x1] %v3020_v47  ;;  %v2878_v53 = vshrl.u32 %v2798_v37, 16  ;;  %11026 = vmatmul.msk.bf16.gmra.mxu2 %vm433_vm2, %v3435_v48  ;;  %v3597_v11 = vrot.slane %v3207_v9, 5 }
 0x1eb   : > { %v11038_v50 = vrot.slane %v3532_v20, 9  ;;  %v2881_v8 = vshll.u32 %v2798_v37, 16  ;;  %v2628_v34 = vpop.f32.mrf.mxu0  ;;  %11014 = vmatmul.msk.bf16.gmra.mxu1 %vm433_vm2, %v10994_v10  ;;  %v3206_v26 = vld [vmem:[#allocation2 + $0x40] sm:$0xf]  ;;  %v3328_v56 = vshll.u32 %v3207_v9, 16  ;;  %v3312_v60 = vrot.slane %v3311_v32, 4 }
 0x1ec   : > { %11175 = vmatmul.msk.bf16.gmra.mxu0 %vm433_vm2, %v11152_v57  ;;  %v2880_v14 = vrot.slane %v2878_v53, 7  ;;  %v2653_v52 = vadd.f32 %v2628_v34, %v2419_v62  ;;  %v3319_v42 = vshrl.u32 %v3206_v26, 16  ;;  %v3322_v49 = vshll.u32 %v3206_v26, 16  ;;  %3042 = vst [vmem:[#allocation2 + $0x68] sm:$0xf] %v3041_v30 }
 0x1ed   : > { %v3598_v29 = vsel %vm12186_vm3, %v11038_v50, %v3597_v11  ;;  %v3316_v51 = vrot.slane %v3314_v41, 5  ;;  %v3330_v23 = vrot.slane %v3328_v56, 5  ;;  %v298_v7 = vsel %vm12864_vm9, 0, %v297_v25  ;;  %v3031_v57 = vld [vmem:[#allocation2 + $0x5c] sm:$0x1] }
 0x1ee   : > { %v3633_v31 = vunpack.c.l.b16 %v3598_v29  ;;  %v2883_v12 = vor.u32 %v2881_v8, %v2880_v14  ;;  %v2884_v3 = vrot.slane %v2880_v14, 4  ;;  %v2669_v21 = vmax.f32 %v2653_v52, 0.0  ;;  %299 = vst [vmem:[#allocation2 + $0x70] sm:$0x1] %v298_v7  ;;  %v353_v8 = vld [vmem:[#allocation2 + $0x74] sm:$0x1] }
 0x1ef   : > { %v3321_v18 = vrot.slane %v3319_v42, 4  ;;  %v3324_v5 = vrot.slane %v3322_v49, 5  ;;  %v3317_v17 = vsel %vm12237_vm6, %v3312_v60, %v3316_v51  ;;  %v351_v48 = vsel %vm12896_vm11, 0, %v350_v58 }
 0x1f0   : > { %v3643_v63 = vpack.c.b16 %v3633_v31, %v3632_v24  ;;  %v3023_v38 = vsel %vm12906_vm13, %v2883_v12, %v3022_v54  ;;  %v3026_v28 = vsel %vm12864_vm9, %v2884_v3, %v3025_v35  ;;  %v2799_v16 = vpack.c.bf16 %v2669_v21, %v2669_v21  ;;  %v3533_v2 = vld [vmem:[#allocation2 + $0x48] sm:$0xe]  ;;  %352 = vst [vmem:[#allocation2 + $0x6c] sm:$0x1] %v351_v48 }
 0x1f1   : > { %3024 = vst [vmem:[#allocation2 + $0x50] sm:$0xf] %v3023_v38  ;;  %v3325_v55 = vor.u32 %v3324_v5, %v3321_v18  ;;  %v13148_v22 = vld [vmem:[#allocation2 + $0x4c] sm:$0x1]  ;;  %v11039_v6 = vrot.slane %v3533_v2, 9  ;;  %v3425_v50 = vunpack.c.l.b16 %v3317_v17  ;;  %v354_v45 = vsel %vm12896_vm11, 0, %v353_v8 }
 0x1f2   : > { %11054 = vmatmul.msk.bf16.gmra.mxu3 %vm433_vm2, %v3643_v63  ;;  %3027 = vst [vmem:[#allocation2 + $0x54] sm:$0x1] %v3026_v28  ;;  %v2886_v15 = vshrl.u32 %v2799_v16, 16  ;;  %v3601_v1 = vrot.slane %v13148_v22, 5  ;;  %v3208_v37 = vld [vmem:[#allocation2 + $0x48] sm:$0xf] }
 0x1f3   : > { %v2630_v36 = vpop.f32.mrf.mxu0  ;;  %v3326_v47 = vrot.slane %v3325_v55, 4  ;;  %v2889_v40 = vshll.u32 %v2799_v16, 16  ;;  %v3333_v10 = vshrl.u32 %v3208_v37, 16  ;;  %v3336_v32 = vshll.u32 %v3208_v37, 16  ;;  %v10997_v34 = vld [vmem:[#allocation2 + $0x48] sm:$0xf] }
 0x1f4   : > { %v2888_v39 = vrot.slane %v2886_v15, 7  ;;  %v2654_v20 = vadd.f32 %v2630_v36, %v2420_v46  ;;  %v11155_v24 = vld [vmem:[#allocation2 + $0x48] sm:$0xf]  ;;  %v3602_v26 = vsel %vm12186_vm3, %v11039_v6, %v3601_v1  ;;  %v3342_v5 = vshll.u32 %v13148_v22, 16  ;;  %v3034_v16 = vld [vmem:[#allocation2 + $0x60] sm:$0xf]  ;;  %v1866_v15 = vpop.f32.mrf.mxu1 }
 0x1f5   : > { %v3331_v9 = vsel %vm12237_vm6, %v3326_v47, %v3330_v23  ;;  %v3335_v41 = vrot.slane %v3333_v10, 4  ;;  %v3338_v44 = vrot.slane %v3336_v32, 5  ;;  %v3634_v63 = vunpack.c.l.b16 %v3602_v26  ;;  %v3046_v38 = vld [vmem:[#allocation2 + $0x70] sm:$0xf]  ;;  %v3037_v55 = vld [vmem:[#allocation2 + $0x64] sm:$0x1] }
 0x1f6   : > { %v2891_v62 = vor.u32 %v2889_v40, %v2888_v39  ;;  %v2892_v53 = vrot.slane %v2888_v39, 4  ;;  %v2670_v11 = vmax.f32 %v2654_v20, 0.0  ;;  %v3426_v27 = vunpack.c.l.b16 %v3331_v9  ;;  %355 = vst [vmem:[#allocation2 + $0x74] sm:$0x1] %v354_v45 }
 0x1f7   : > { %v3339_v3 = vor.u32 %v3338_v44, %v3335_v41  ;;  %v3047_v17 = vsel %vm12906_vm13, %v12914_v19, %v3046_v38  ;;  %v3344_v47 = vrot.slane %v3342_v5, 5  ;;  %v3043_v37 = vld [vmem:[#allocation2 + $0x6c] sm:$0x1] }
 0x1f8   : > { %v3029_v14 = vsel %vm12906_vm13, %v2891_v62, %v3028_v13  ;;  %v3032_v54 = vsel %vm12864_vm9, %v2892_v53, %v3031_v57  ;;  %v2800_v52 = vpack.c.bf16 %v2670_v11, %v2670_v11  ;;  %v3436_v29 = vpack.c.b16 %v3426_v27, %v3425_v50  ;;  %v11829_v56 = vld [vmem:[#allocation2 + $0x4c] sm:$0xf0]  ;;  %3048 = vst [vmem:[#allocation2 + $0x70] sm:$0xf] %v3047_v17  ;;  %v2021_v57 = vpop.f32.mrf.mxu2 }
 0x1f9   : > { %v11848_v35 = vld [vmem:[#allocation2 + $0x4c] sm:$0xf0]  ;;  %3030 = vst [vmem:[#allocation2 + $0x58] sm:$0xf] %v3029_v14  ;;  %v10998_v60 = vor.u32 %v11829_v56, %v10997_v34  ;;  %v3211_v49 = vld [vmem:[#allocation2 + $0x54] sm:$0x1]  ;;  %v3044_v20 = vsel %vm12864_vm9, %v12931_v0, %v3043_v37 }
 0x1fa   : > { %v3534_v31 = vld [vmem:[#allocation2 + $0x50] sm:$0xe]  ;;  %v11156_v42 = vor.u32 %v11848_v35, %v11155_v24  ;;  %3033 = vst [vmem:[#allocation2 + $0x5c] sm:$0x1] %v3032_v54  ;;  %v2894_v21 = vshrl.u32 %v2800_v52, 16  ;;  %11027 = vmatmul.msk.bf16.gmra.mxu2 %vm433_vm2, %v3436_v29  ;;  %v3605_v25 = vrot.slane %v3211_v49, 5 }
 0x1fb   : > { %v11040_v12 = vrot.slane %v3534_v31, 9  ;;  %v2897_v46 = vshll.u32 %v2800_v52, 16  ;;  %11015 = vmatmul.msk.bf16.gmra.mxu1 %vm433_vm2, %v10998_v60  ;;  %v3210_v18 = vld [vmem:[#allocation2 + $0x50] sm:$0xf]  ;;  %v3340_v7 = vrot.slane %v3339_v3, 4  ;;  %v3356_v30 = vshll.u32 %v3211_v49, 16 }
 0x1fc   : > { %11176 = vmatmul.msk.bf16.gmra.mxu0 %vm433_vm2, %v11156_v42  ;;  %v2896_v28 = vrot.slane %v2894_v21, 7  ;;  %v3347_v2 = vshrl.u32 %v3210_v18, 16  ;;  %v3350_v58 = vshll.u32 %v3210_v18, 16  ;;  %3045 = vst [vmem:[#allocation2 + $0x6c] sm:$0x1] %v3044_v20  ;;  %v1868_v14 = vpop.f32.mrf.mxu1 }
 0x1fd   : > { %v3606_v51 = vsel %vm12186_vm3, %v11040_v12, %v3605_v25  ;;  %v3345_v9 = vsel %vm12237_vm6, %v3340_v7, %v3344_v47  ;;  %v3358_v32 = vrot.slane %v3356_v30, 5  ;;  %v3049_v34 = vld [vmem:[#allocation2 + $0x74] sm:$0x1] }
 0x1fe   : > { %v3635_v23 = vunpack.c.l.b16 %v3606_v51  ;;  %v2899_v6 = vor.u32 %v2897_v46, %v2896_v28  ;;  %v2900_v22 = vrot.slane %v2896_v28, 4  ;;  %v3349_v1 = vrot.slane %v3347_v2, 4  ;;  %v3216_v51 = vld [vmem:[#allocation2 + $0x68] sm:$0xf]  ;;  %v11844_v2 = vld [vmem:[%s15174_s1 + $0x70] sm:$0xff] }
 0x1ff   : > { %v3352_v13 = vrot.slane %v3350_v58, 5  ;;  %v3427_v24 = vunpack.c.l.b16 %v3345_v9  ;;  %v3050_v29 = vsel %vm12864_vm9, %v12931_v0, %v3049_v34  ;;  %v3218_v30 = vld [vmem:[#allocation2 + $0x70] sm:$0xf]  ;;  %4359 = vmatpush.bf16.msra.mxu3 %v11844_v2 }
 0x200   : > { %v3644_v36 = vpack.c.b16 %v3635_v23, %v3634_v63  ;;  %v3035_v48 = vsel %vm12906_vm13, %v2899_v6, %v3034_v16  ;;  %v3038_v39 = vsel %vm12864_vm9, %v2900_v22, %v3037_v55  ;;  %v3535_v10 = vld [vmem:[#allocation2 + $0x58] sm:$0xe]  ;;  %3051 = vst [vmem:[#allocation2 + $0x74] sm:$0x1] %v3050_v29  ;;  %v2023_v63 = vpop.f32.mrf.mxu2  ;;  %v3537_v22 = vld [vmem:[#allocation2 + $0x68] sm:$0xe] }
 0x201   : > { %v3353_v40 = vor.u32 %v3352_v13, %v3349_v1  ;;  %3036 = vst [vmem:[#allocation2 + $0x60] sm:$0xf] %v3035_v48  ;;  %v3212_v62 = vld [vmem:[#allocation2 + $0x58] sm:$0xf]  ;;  %v3213_v53 = vld [vmem:[#allocation2 + $0x5c] sm:$0x1] }
 0x202   : > { %11055 = vmatmul.msk.bf16.gmra.mxu3 %vm433_vm2, %v3644_v36  ;;  %3039 = vst [vmem:[#allocation2 + $0x64] sm:$0x1] %v3038_v39  ;;  %v3361_v11 = vshrl.u32 %v3212_v62, 16  ;;  %v3364_v27 = vshll.u32 %v3212_v62, 16  ;;  %v11041_v54 = vrot.slane %v3535_v10, 9  ;;  %v3609_v52 = vrot.slane %v3213_v53, 5  ;;  %v2633_v62 = vpop.f32.mrf.mxu0 }
 0x203   : > { %v3354_v50 = vrot.slane %v3353_v40, 4  ;;  %v11001_v35 = vld [vmem:[#allocation2 + $0x58] sm:$0xf]  ;;  %v3370_v16 = vshll.u32 %v3213_v53, 16  ;;  %v3217_v47 = vld [vmem:[#allocation2 + $0x6c] sm:$0x1] }
 0x204   : > { %v3363_v41 = vrot.slane %v3361_v11, 4  ;;  %v3366_v44 = vrot.slane %v3364_v27, 5  ;;  %v11159_v31 = vld [vmem:[#allocation2 + $0x58] sm:$0xf]  ;;  %v3610_v18 = vsel %vm12186_vm3, %v11041_v54, %v3609_v52  ;;  %v2399_v1 = vpop.f32.mrf.mxu3  ;;  %v1871_v13 = vpop.f32.mrf.mxu1  ;;  %v3538_v37 = vld [vmem:[#allocation2 + $0x70] sm:$0xe] }
 0x205   : > { %v3359_v8 = vsel %vm12237_vm6, %v3354_v50, %v3358_v32  ;;  %v3636_v15 = vunpack.c.l.b16 %v3610_v18  ;;  %v3389_v48 = vshrl.u32 %v3216_v51, 16  ;;  %v3392_v39 = vshll.u32 %v3216_v51, 16  ;;  %v11062_v51 = vld [vmem:[#allocation2 + $0x10] sm:$0xf]  ;;  %v3872_v1 = vld [vmem:[#allocation2 + $0x18] sm:$0xf] }
 0x206   : > { %v3428_v26 = vunpack.c.l.b16 %v3359_v8  ;;  %v3367_v46 = vor.u32 %v3366_v44, %v3363_v41  ;;  %v3372_v20 = vrot.slane %v3370_v16, 5  ;;  %v3403_v57 = vshrl.u32 %v3218_v30, 16  ;;  %v5357_v44 = vld [vmem:[#allocation2 + $0x14] sm:$0x1]  ;;  %v3870_v2 = vld [vmem:[#allocation2 + $0x10] sm:$0xf] }
 0x207   : > { %v3219_v10 = vld [vmem:[#allocation2 + $0x74] sm:$0x1]  ;;  %v3406_v9 = vshll.u32 %v3218_v30, 16  ;;  %v11043_v11 = vrot.slane %v3537_v22, 9  ;;  %v3617_v27 = vrot.slane %v3217_v47, 5  ;;  %v11044_v8 = vrot.slane %v3538_v37, 9 }
 0x208   : > { %v3437_v56 = vpack.c.b16 %v3428_v26, %v3427_v24  ;;  %v11830_v60 = vld [vmem:[#allocation2 + $0x5c] sm:$0xf0]  ;;  %v3368_v6 = vrot.slane %v3367_v46, 4  ;;  %v3621_v24 = vrot.slane %v3219_v10, 5  ;;  %v3391_v26 = vrot.slane %v3389_v48, 4  ;;  %v2026_v14 = vpop.f32.mrf.mxu2  ;;  %v11854_v30 = vld [vmem:[%s15174_s1 + $0x88] sm:$0xff] }
 0x209   : > { %v11849_v42 = vld [vmem:[#allocation2 + $0x5c] sm:$0xf0]  ;;  %v11002_v12 = vor.u32 %v11830_v60, %v11001_v35  ;;  %v3215_v21 = vld [vmem:[#allocation2 + $0x64] sm:$0x1]  ;;  %v3394_v41 = vrot.slane %v3392_v39, 5  ;;  %v3405_v52 = vrot.slane %v3403_v57, 4  ;;  %v3618_v60 = vsel %vm12186_vm3, %v11043_v11, %v3617_v27  ;;  %5037 = vmatpush.bf16.msra.mxu2 %v11854_v30 }
 0x20a   : > { %v3536_v49 = vld [vmem:[#allocation2 + $0x60] sm:$0xe]  ;;  %v11160_v3 = vor.u32 %v11849_v42, %v11159_v31  ;;  %11028 = vmatmul.msk.bf16.gmra.mxu2 %vm433_vm2, %v3437_v56  ;;  %v3613_v5 = vrot.slane %v3215_v21, 5  ;;  %v3384_v7 = vshll.u32 %v3215_v21, 16  ;;  %v3373_v53 = vsel %vm12237_vm6, %v3368_v6, %v3372_v20  ;;  %v11005_v35 = vld [vmem:[#allocation2 + $0x68] sm:$0xf] }
 0x20b   : > { %v11042_v25 = vrot.slane %v3536_v49, 9  ;;  %v3214_v45 = vld [vmem:[#allocation2 + $0x60] sm:$0xf]  ;;  %11016 = vmatmul.msk.bf16.gmra.mxu1 %vm433_vm2, %v11002_v12  ;;  %v3408_v29 = vrot.slane %v3406_v9, 5  ;;  %v3429_v56 = vunpack.c.l.b16 %v3373_v53  ;;  %v11831_v31 = vld [vmem:[#allocation2 + $0x6c] sm:$0xf0] }
 0x20c   : > { %v3375_v38 = vshrl.u32 %v3214_v45, 16  ;;  %v3378_v28 = vshll.u32 %v3214_v45, 16  ;;  %11177 = vmatmul.msk.bf16.gmra.mxu0 %vm433_vm2, %v11160_v3  ;;  %v3386_v32 = vrot.slane %v3384_v7, 5  ;;  %v2401_v42 = vpop.f32.mrf.mxu3  ;;  %v1873_v49 = vpop.f32.mrf.mxu1  ;;  %v13211_v12 = vld [vmem:[#allocation2 + $0x14] sm:$0x1]  ;;  %v5358_v3 = vsel %vm12864_vm9, %v12931_v0, %v5357_v44 }
 0x20d   : > { %v3614_v58 = vsel %vm12186_vm3, %v11042_v25, %v3613_v5  ;;  %v3622_v25 = vsel %vm12186_vm3, %v11044_v8, %v3621_v24  ;;  %v3395_v45 = vor.u32 %v3394_v41, %v3391_v26  ;;  %v3398_v46 = vshll.u32 %v3217_v47, 16  ;;  %5359 = vst [vmem:[#allocation2 + $0x14] sm:$0x1] %v5358_v3  ;;  %v3873_v47 = vld [vmem:[#allocation2 + $0x1c] sm:$0x1] }
 0x20e   : > { %v3377_v55 = vrot.slane %v3375_v38, 4  ;;  %v3380_v23 = vrot.slane %v3378_v28, 5  ;;  %v3637_v17 = vunpack.c.l.b16 %v3614_v58  ;;  %v11006_v63 = vor.u32 %v11831_v31, %v11005_v35  ;;  %v2635_v38 = vpop.f32.mrf.mxu0  ;;  %v4204_v39 = vld [vmem:[#allocation2 + $0x18] sm:$0xe] }
 0x20f   : > { %v3409_v18 = vor.u32 %v3408_v29, %v3405_v52  ;;  %v3412_v5 = vshll.u32 %v3219_v10, 16  ;;  %v3638_v28 = vunpack.c.l.b16 %v3618_v60  ;;  %v3639_v16 = vunpack.c.l.b16 %v3622_v25  ;;  %v3874_v38 = vld [vmem:[#allocation2 + $0x20] sm:$0xf] }
 0x210   : > { %v3381_v36 = vor.u32 %v3380_v23, %v3377_v55  ;;  %v3645_v40 = vpack.c.b16 %v3637_v17, %v3636_v15  ;;  %v3396_v58 = vrot.slane %v3395_v45, 4  ;;  %v3400_v55 = vrot.slane %v3398_v46, 5  ;;  %v4203_v23 = vld [vmem:[#allocation2 + $0x10] sm:$0xe]  ;;  %v2028_v15 = vpop.f32.mrf.mxu2  ;;  %v11853_v17 = vld [vmem:[%s15174_s1 + $0x80] sm:$0xff] }
 0x211   : > { %v5355_v7 = vsel %vm12906_vm13, %v12914_v19, %v3870_v2  ;;  %v3410_v6 = vrot.slane %v3409_v18, 4  ;;  %v3414_v22 = vrot.slane %v3412_v5, 5  ;;  %4830 = vmatpush.bf16.msra.mxu1 %v11853_v17  ;;  %v3646_v13 = vpack.c.b16 %v3639_v16, %v3638_v28  ;;  %v3876_v28 = vld [vmem:[#allocation2 + $0x28] sm:$0xf] }
 0x212   : > { %v3382_v50 = vrot.slane %v3381_v36, 4  ;;  %11056 = vmatmul.msk.bf16.gmra.mxu3 %vm433_vm2, %v3645_v40  ;;  %5356 = vst [vmem:[#allocation2 + $0x10] sm:$0xf] %v5355_v7  ;;  %v3401_v36 = vsel %vm12237_vm6, %v3396_v58, %v3400_v55  ;;  %v3899_v37 = vshrl.u32 %v3870_v2, 16  ;;  %v3902_v40 = vshll.u32 %v3870_v2, 16 }
 0x213   : > { %v3415_v48 = vsel %vm12237_vm6, %v3410_v6, %v3414_v22  ;;  %v3913_v20 = vshrl.u32 %v3872_v1, 16  ;;  %v3916_v10 = vshll.u32 %v3872_v1, 16  ;;  %v3431_v53 = vunpack.c.l.b16 %v3401_v36  ;;  %v3877_v2 = vld [vmem:[#allocation2 + $0x2c] sm:$0x1]  ;;  %v4205_v58 = vld [vmem:[#allocation2 + $0x20] sm:$0xe] }
 0x214   : > { %v3387_v34 = vsel %vm12237_vm6, %v3382_v50, %v3386_v32  ;;  %v2404_v57 = vpop.f32.mrf.mxu3  ;;  %v11112_v50 = vrot.slane %v4203_v23, 9  ;;  %v4247_v32 = vrot.slane %v13211_v12, 5  ;;  %v3157_v62 = vpop.f32.mrf.mxu1  ;;  %v3432_v11 = vunpack.c.l.b16 %v3415_v48  ;;  %v4206_v55 = vld [vmem:[#allocation2 + $0x28] sm:$0xe] }
 0x215   : > { %v3430_v54 = vunpack.c.l.b16 %v3387_v34  ;;  %v11113_v27 = vrot.slane %v4204_v39, 9  ;;  %v4251_v8 = vrot.slane %v3873_v47, 5  ;;  %v11835_v34 = vld [vmem:[#allocation2 + $0x14] sm:$0xf0]  ;;  %v3901_v24 = vrot.slane %v3899_v37, 4 }
 0x216   : > { %v3904_v26 = vrot.slane %v3902_v40, 5  ;;  %v3915_v41 = vrot.slane %v3913_v20, 4  ;;  %v3918_v44 = vrot.slane %v3916_v10, 5  ;;  %v3439_v14 = vpack.c.b16 %v3432_v11, %v3431_v53 }
 0x217   : > { %v3438_v21 = vpack.c.b16 %v3430_v54, %v3429_v56  ;;  %v11063_v54 = vor.u32 %v11835_v34, %v11062_v51  ;;  %v4248_v52 = vsel %vm12186_vm3, %v11112_v50, %v4247_v32  ;;  %v4252_v29 = vsel %vm12186_vm3, %v11113_v27, %v4251_v8  ;;  %v3875_v51 = vld [vmem:[#allocation2 + $0x24] sm:$0x1]  ;;  %v11836_v50 = vld [vmem:[#allocation2 + $0x24] sm:$0xf0] }
 0x218   : > { %v2638_v9 = vpop.f32.mrf.mxu0  ;;  %v3905_v56 = vor.u32 %v3904_v26, %v3901_v24  ;;  %v3908_v35 = vshll.u32 %v13211_v12, 16  ;;  %v3919_v31 = vor.u32 %v3918_v44, %v3915_v41  ;;  %v3922_v60 = vshll.u32 %v3873_v47, 16 }
 0x219   : > { %v4304_v3 = vunpack.c.l.b16 %v4248_v52  ;;  %v3927_v23 = vshrl.u32 %v3874_v38, 16  ;;  %v3930_v7 = vshll.u32 %v3874_v38, 16  ;;  %v3941_v30 = vshrl.u32 %v3876_v28, 16  ;;  %v11066_v9 = vld [vmem:[#allocation2 + $0x20] sm:$0xf] }
 0x21a   : > { %11029 = vmatmul.msk.bf16.gmra.mxu2 %vm433_vm2, %v3438_v21  ;;  %v4305_v21 = vunpack.c.l.b16 %v4252_v29  ;;  %v3906_v45 = vrot.slane %v3905_v56, 4  ;;  %v3910_v46 = vrot.slane %v3908_v35, 5  ;;  %v3924_v18 = vrot.slane %v3922_v60, 5  ;;  %v3880_v56 = vld [vmem:[#allocation2 + $0x38] sm:$0xf] }
 0x21b   : > { %11017 = vmatmul.msk.bf16.gmra.mxu1 %vm433_vm2, %v11006_v63  ;;  %v3920_v63 = vrot.slane %v3919_v31, 4  ;;  %v3944_v15 = vshll.u32 %v3876_v28, 16  ;;  %v4255_v36 = vrot.slane %v3875_v51, 5  ;;  %v11115_v47 = vrot.slane %v4206_v55, 9 }
 0x21c   : > { %v2406_v42 = vpop.f32.mrf.mxu3  ;;  %v3159_v25 = vpop.f32.mrf.mxu1  ;;  %v4318_v5 = vpack.c.b16 %v4305_v21, %v4304_v3  ;;  %v3911_v12 = vsel %vm12237_vm6, %v3906_v45, %v3910_v46  ;;  %v4259_v37 = vrot.slane %v3877_v2, 5  ;;  %v3929_v39 = vrot.slane %v3927_v23, 4  ;;  %v3881_v21 = vld [vmem:[#allocation2 + $0x3c] sm:$0x1]  ;;  %v11837_v23 = vld [vmem:[#allocation2 + $0x34] sm:$0xf0] }
 0x21d   : > { %v3925_v16 = vsel %vm12237_vm6, %v3920_v63, %v3924_v18  ;;  %v4097_v6 = vunpack.c.l.b16 %v3911_v12  ;;  %v3932_v40 = vrot.slane %v3930_v7, 5  ;;  %v3943_v20 = vrot.slane %v3941_v30, 4  ;;  %v3878_v42 = vld [vmem:[#allocation2 + $0x30] sm:$0xf]  ;;  %v4208_v25 = vld [vmem:[#allocation2 + $0x38] sm:$0xe] }
 0x21e   : > { %v4098_v22 = vunpack.c.l.b16 %v3925_v16  ;;  %v3946_v10 = vrot.slane %v3944_v15, 5  ;;  %v4260_v53 = vsel %vm12186_vm3, %v11115_v47, %v4259_v37  ;;  %v11067_v11 = vor.u32 %v11836_v50, %v11066_v9  ;;  %v3879_v63 = vld [vmem:[#allocation2 + $0x34] sm:$0x1]  ;;  %v4207_v18 = vld [vmem:[#allocation2 + $0x30] sm:$0xe] }
 0x21f   : > { %v3933_v27 = vor.u32 %v3932_v40, %v3929_v39  ;;  %v3936_v8 = vshll.u32 %v3875_v51, 16  ;;  %v4307_v41 = vunpack.c.l.b16 %v4260_v53  ;;  %v3950_v44 = vshll.u32 %v3877_v2, 16  ;;  %v3884_v50 = vld [vmem:[#allocation2 + $0x48] sm:$0xf] }
 0x220   : > { %v2640_v49 = vpop.f32.mrf.mxu0  ;;  %v4111_v57 = vpack.c.b16 %v4098_v22, %v4097_v6  ;;  %v3947_v34 = vor.u32 %v3946_v10, %v3943_v20  ;;  %v3969_v45 = vshrl.u32 %v3880_v56, 16  ;;  %v3972_v46 = vshll.u32 %v3880_v56, 16 }
 0x221   : > { %v3952_v31 = vrot.slane %v3950_v44, 5  ;;  %v3958_v38 = vshll.u32 %v3878_v42, 16  ;;  %v11117_v16 = vrot.slane %v4208_v25, 9  ;;  %v4267_v51 = vrot.slane %v3881_v21, 5 }
 0x222   : > { %11057 = vmatmul.msk.bf16.gmra.mxu3 %vm433_vm2, %v3646_v13  ;;  %v11114_v13 = vrot.slane %v4205_v58, 9  ;;  %v3948_v52 = vrot.slane %v3947_v34, 4  ;;  %v3971_v58 = vrot.slane %v3969_v45, 4  ;;  %v3974_v55 = vrot.slane %v3972_v46, 5 }
 0x223   : > { %v11116_v7 = vrot.slane %v4207_v18, 9  ;;  %v4263_v30 = vrot.slane %v3879_v63, 5  ;;  %v3960_v6 = vrot.slane %v3958_v38, 5  ;;  %v3978_v40 = vshll.u32 %v3881_v21, 16  ;;  %v11074_v38 = vld [vmem:[#allocation2 + $0x40] sm:$0xf] }
 0x224   : > { %v4256_v62 = vsel %vm12186_vm3, %v11114_v13, %v4255_v36  ;;  %v3953_v3 = vsel %vm12237_vm6, %v3948_v52, %v3952_v31  ;;  %v4268_v13 = vsel %vm12186_vm3, %v11117_v16, %v4267_v51  ;;  %v3975_v47 = vor.u32 %v3974_v55, %v3971_v58 }
 0x225   : > { %v4306_v26 = vunpack.c.l.b16 %v4256_v62  ;;  %v4100_v12 = vunpack.c.l.b16 %v3953_v3  ;;  %v4264_v37 = vsel %vm12186_vm3, %v11116_v7, %v4263_v30  ;;  %v3964_v10 = vshll.u32 %v3879_v63, 16  ;;  %v11838_v3 = vld [vmem:[#allocation2 + $0x44] sm:$0xf0] }
 0x226   : > { %v4308_v20 = vunpack.c.l.b16 %v4264_v37  ;;  %v3980_v53 = vrot.slane %v3978_v40, 5  ;;  %v3887_v37 = vld [vmem:[#allocation2 + $0x54] sm:$0x1] }
 0x227   : > { %v4319_v35 = vpack.c.b16 %v4307_v41, %v4306_v26  ;;  %v3997_v26 = vshrl.u32 %v3884_v50, 16  ;;  %v4000_v41 = vshll.u32 %v3884_v50, 16 }
 0x228   : > { %v4499_v1 = vpop.f32.mrf.mxu0 }
 0x229   : > { %v11070_v1 = vld [vmem:[#allocation2 + $0x30] sm:$0xf] }
 0x22a   : > { %11030 = vmatmul.msk.bf16.gmra.mxu2 %vm433_vm2, %v3439_v14  ;;  %v3934_v14 = vrot.slane %v3933_v27, 4  ;;  %v11071_v36 = vor.u32 %v11837_v23, %v11070_v1  ;;  %v3882_v27 = vld [vmem:[#allocation2 + $0x40] sm:$0xf] }
 0x22b   : > { %11092 = vmatmul.msk.bf16.vlgmr.msrb.gmra.mxu1 %vm433_vm2, %v11063_v54  ;;  %v3162_v17 = vpop.f32.mrf.mxu1  ;;  %v3683_v48 = vpop.f32.mrf.mxu3  ;;  %v3938_v54 = vrot.slane %v3936_v8, 5  ;;  %v3966_v8 = vrot.slane %v3964_v10, 5  ;;  %v3983_v52 = vshrl.u32 %v3882_v27, 16 }
 0x22c   : > { %v3476_v32 = vpop.f32.mrf.mxu2  ;;  %v4309_v48 = vunpack.c.l.b16 %v4268_v13  ;;  %v3889_v13 = vld [vmem:[#allocation2 + $0x5c] sm:$0x1] }
 0x22d   : > { %v3939_v49 = vsel %vm12237_vm6, %v3934_v14, %v3938_v54  ;;  %v3883_v14 = vld [vmem:[#allocation2 + $0x44] sm:$0x1]  ;;  %v4209_v54 = vld [vmem:[#allocation2 + $0x40] sm:$0xe]  ;;  %v3985_v45 = vrot.slane %v3983_v52, 4 }
 0x22e   : > { %v4099_v28 = vunpack.c.l.b16 %v3939_v49  ;;  %v4320_v32 = vpack.c.b16 %v4309_v48, %v4308_v20  ;;  %v11118_v21 = vrot.slane %v4209_v54, 9  ;;  %v4271_v25 = vrot.slane %v3883_v14, 5  ;;  %v3886_v48 = vld [vmem:[#allocation2 + $0x50] sm:$0xf]  ;;  %v11839_v54 = vld [vmem:[#allocation2 + $0x54] sm:$0xf0] }
 0x22f   : > { %v3992_v30 = vshll.u32 %v3883_v14, 16  ;;  %v4211_v20 = vld [vmem:[#allocation2 + $0x50] sm:$0xe] }
 0x230   : > { %v4501_v24 = vpop.f32.mrf.mxu0  ;;  %v4112_v22 = vpack.c.b16 %v4100_v12, %v4099_v28  ;;  %v11075_v12 = vor.u32 %v11838_v3, %v11074_v38 }
 0x231   : > { %v4210_v24 = vld [vmem:[#allocation2 + $0x48] sm:$0xe] }
 0x232   : > { %11132 = vmatmul.msk.bf16.vlgmr.msra.gmra.mxu3 %vm433_vm2, %v4318_v5  ;;  %v3955_v5 = vshrl.u32 %v3878_v42, 16  ;;  %v4002_v42 = vrot.slane %v4000_v41, 5 }
 0x233   : > { %v3685_v29 = vpop.f32.mrf.mxu3  ;;  %v13264_v9 = vpop.f32.mrf.mxu1 }
 0x234   : > { %v3478_v60 = vpop.f32.mrf.mxu2  ;;  %v3957_v17 = vrot.slane %v3955_v5, 4  ;;  %v3986_v29 = vshll.u32 %v3882_v27, 16 }
 0x235   : > { %v3999_v60 = vrot.slane %v3997_v26, 4 }
 0x236   : > { %v3961_v39 = vor.u32 %v3960_v6, %v3957_v17  ;;  %v3988_v46 = vrot.slane %v3986_v29, 5  ;;  %v3888_v17 = vld [vmem:[#allocation2 + $0x58] sm:$0xf] }
 0x237   : > { %v4003_v16 = vor.u32 %v4002_v42, %v3999_v60  ;;  %v4025_v10 = vshrl.u32 %v3888_v17, 16  ;;  %v11078_v42 = vld [vmem:[#allocation2 + $0x50] sm:$0xf] }
 0x238   : > { %v3962_v62 = vrot.slane %v3961_v39, 4  ;;  %v3989_v55 = vor.u32 %v3988_v46, %v3985_v45  ;;  %v3994_v39 = vrot.slane %v3992_v30, 5  ;;  %v11079_v3 = vor.u32 %v11839_v54, %v11078_v42  ;;  %v3891_v30 = vld [vmem:[#allocation2 + $0x64] sm:$0x1]  ;;  %v11082_v42 = vld [vmem:[#allocation2 + $0x60] sm:$0xf] }
 0x239   : > { %v4027_v41 = vrot.slane %v4025_v10, 4  ;;  %v4034_v45 = vshll.u32 %v3889_v13, 16  ;;  %v3893_v10 = vld [vmem:[#allocation2 + $0x6c] sm:$0x1] }
 0x23a   : > { %11105 = vmatmul.msk.bf16.vlgmr.msrb.gmra.mxu2 %vm433_vm2, %v4111_v57  ;;  %v3976_v57 = vrot.slane %v3975_v47, 4  ;;  %v3967_v44 = vsel %vm12237_vm6, %v3962_v62, %v3966_v8 }
 0x23b   : > { %11093 = vmatmul.msk.bf16.gmra.mxu1 %vm433_vm2, %v11067_v11  ;;  %v3688_v2 = vpop.f32.mrf.mxu3  ;;  %v3885_v11 = vld [vmem:[#allocation2 + $0x4c] sm:$0x1]  ;;  %v4101_v49 = vunpack.c.l.b16 %v3967_v44 }
 0x23c   : > { %v3481_v15 = vpop.f32.mrf.mxu2  ;;  %v3981_v34 = vsel %vm12237_vm6, %v3976_v57, %v3980_v53  ;;  %v4275_v31 = vrot.slane %v3885_v11, 5  ;;  %v4272_v2 = vsel %vm12186_vm3, %v11118_v21, %v4271_v25  ;;  %v4006_v23 = vshll.u32 %v3885_v11, 16 }
 0x23d   : > { %v4102_v56 = vunpack.c.l.b16 %v3981_v34  ;;  %v4310_v7 = vunpack.c.l.b16 %v4272_v2  ;;  %v4004_v15 = vrot.slane %v4003_v16, 4  ;;  %v4028_v57 = vshll.u32 %v3888_v17, 16 }
 0x23e   : > { %v4008_v1 = vrot.slane %v4006_v23, 5  ;;  %v4011_v53 = vshrl.u32 %v3886_v48, 16  ;;  %v4014_v11 = vshll.u32 %v3886_v48, 16  ;;  %v11120_v34 = vrot.slane %v4211_v20, 9 }
 0x23f   : > { %v4113_v63 = vpack.c.b16 %v4102_v56, %v4101_v49  ;;  %v4030_v44 = vrot.slane %v4028_v57, 5  ;;  %v4214_v57 = vld [vmem:[#allocation2 + $0x68] sm:$0xe] }
 0x240   : > { %v4009_v40 = vsel %vm12237_vm6, %v4004_v15, %v4008_v1  ;;  %v4013_v29 = vrot.slane %v4011_v53, 4  ;;  %v4016_v56 = vrot.slane %v4014_v11, 5  ;;  %v4213_v1 = vld [vmem:[#allocation2 + $0x60] sm:$0xe]  ;;  %v11123_v54 = vrot.slane %v4214_v57, 9 }
 0x241   : > { %v4104_v8 = vunpack.c.l.b16 %v4009_v40  ;;  %v4031_v25 = vor.u32 %v4030_v44, %v4027_v41  ;;  %v4550_v57 = vld [vmem:[#allocation2 + $0x20] sm:$0xf] }
 0x242   : > { %11133 = vmatmul.msk.bf16.gmra.mxu3 %vm433_vm2, %v4319_v35  ;;  %v11119_v35 = vrot.slane %v4210_v24, 9  ;;  %v4279_v24 = vrot.slane %v3887_v37, 5 }
 0x243   : > { %v13274_v51 = vpop.f32.mrf.mxu3 }
 0x244   : > { %v4276_v28 = vsel %vm12186_vm3, %v11119_v35, %v4275_v31  ;;  %v13288_v26 = vpop.f32.mrf.mxu2  ;;  %v13295_v35 = vld [vmem:[%s15175_s2 + $0x1] ss:$0 sm:$0xff]  ;;  %v4280_v49 = vsel %vm12186_vm3, %v11120_v34, %v4279_v24 }
 0x245   : > { %v4311_v58 = vunpack.c.l.b16 %v4276_v28  ;;  %v4312_v46 = vunpack.c.l.b16 %v4280_v49  ;;  %v11840_v49 = vld [vmem:[#allocation2 + $0x64] sm:$0xf0] }
 0x247   : > { %v4321_v6 = vpack.c.b16 %v4311_v58, %v4310_v7  ;;  %v4020_v58 = vshll.u32 %v3887_v37, 16  ;;  %v4036_v7 = vrot.slane %v4034_v45, 5  ;;  %v11850_v37 = vld [vmem:[#allocation2 + $0x6c] sm:$0xf0] }
 0x249   : > { %v4022_v40 = vrot.slane %v4020_v58, 5  ;;  %v11083_v58 = vor.u32 %v11840_v49, %v11082_v42 }
 0x24a   : > { %11106 = vmatmul.msk.bf16.gmra.mxu2 %vm433_vm2, %v4112_v22  ;;  %v3990_v22 = vrot.slane %v3989_v55, 4  ;;  %v4032_v55 = vrot.slane %v4031_v25, 4 }
 0x24b   : > { %11094 = vmatmul.msk.bf16.gmra.mxu1 %vm433_vm2, %v11071_v36  ;;  %v4212_v36 = vld [vmem:[#allocation2 + $0x58] sm:$0xe] }
 0x24c   : > { %v11121_v50 = vrot.slane %v4212_v36, 9  ;;  %v3995_v62 = vsel %vm12237_vm6, %v3990_v22, %v3994_v39  ;;  %v11163_v39 = vld [vmem:[#allocation2 + $0x68] sm:$0xf]  ;;  %v4037_v20 = vsel %vm12237_vm6, %v4032_v55, %v4036_v7 }
 0x24d   : > { %v4103_v14 = vunpack.c.l.b16 %v3995_v62 }
 0x24f   : > { %v4114_v31 = vpack.c.b16 %v4104_v8, %v4103_v14  ;;  %v4287_v8 = vrot.slane %v3891_v30, 5  ;;  %v4106_v14 = vunpack.c.l.b16 %v4037_v20 }
 0x252   : > { %11134 = vmatmul.msk.bf16.gmra.mxu3 %vm433_vm2, %v4320_v32  ;;  %v4283_v32 = vrot.slane %v3889_v13, 5 }
 0x254   : > { %v4284_v52 = vsel %vm12186_vm3, %v11121_v50, %v4283_v32  ;;  %v11164_v50 = vor.u32 %v11850_v37, %v11163_v39  ;;  %v11122_v32 = vrot.slane %v4213_v1, 9 }
 0x255   : > { %v4313_v21 = vunpack.c.l.b16 %v4284_v52  ;;  %v4291_v52 = vrot.slane %v3893_v10, 5 }
 0x256   : > { %11178 = vmatmul.msk.bf16.gmra.mxu0 %vm433_vm2, %v11164_v50  ;;  %v4288_v25 = vsel %vm12186_vm3, %v11122_v32, %v4287_v8 }
 0x257   : > { %v4322_v2 = vpack.c.b16 %v4313_v21, %v4312_v46  ;;  %v356_v21 = vld [vmem:[#allocation2 + $0x7c] sm:$0x1]  ;;  %v4062_v46 = vshll.u32 %v3893_v10, 16  ;;  %v4314_v7 = vunpack.c.l.b16 %v4288_v25  ;;  %v4548_v10 = vld [vmem:[#allocation2 + $0x18] sm:$0xf] }
 0x258   : > { %v3167_v18 = vpop.f32.mrf.mxu1 }
 0x259   : > { %v4504_v5 = vpop.f32.mrf.mxu0  ;;  %v3168_v38 = vadd.f32 %v13295_v35, %v3167_v18 }
 0x25a   : > { %11107 = vmatmul.msk.bf16.gmra.mxu2 %vm433_vm2, %v4113_v63  ;;  %v4017_v63 = vor.u32 %v4016_v56, %v4013_v29  ;;  %v3890_v5 = vld [vmem:[#allocation2 + $0x60] sm:$0xf] }
 0x25b   : > { %11095 = vmatmul.msk.bf16.gmra.mxu1 %vm433_vm2, %v11075_v12  ;;  %v3892_v12 = vld [vmem:[#allocation2 + $0x68] sm:$0xf]  ;;  %v4039_v15 = vshrl.u32 %v3890_v5, 16  ;;  %v4042_v17 = vshll.u32 %v3890_v5, 16 }
 0x25c   : > { %v4018_v22 = vrot.slane %v4017_v63, 4  ;;  %v4053_v13 = vshrl.u32 %v3892_v12, 16  ;;  %v4056_v36 = vshll.u32 %v3892_v12, 16  ;;  %v4292_v12 = vsel %vm12186_vm3, %v11123_v54, %v4291_v52 }
 0x25d   : > { %v4041_v62 = vrot.slane %v4039_v15, 4  ;;  %v4044_v53 = vrot.slane %v4042_v17, 5  ;;  %v4315_v15 = vunpack.c.l.b16 %v4292_v12  ;;  %v4594_v12 = vshll.u32 %v4550_v57, 16 }
 0x25e   : > { %v4023_v11 = vsel %vm12237_vm6, %v4018_v22, %v4022_v40  ;;  %v4055_v34 = vrot.slane %v4053_v13, 4  ;;  %v4058_v24 = vrot.slane %v4056_v36, 5  ;;  %v3894_v22 = vld [vmem:[#allocation2 + $0x70] sm:$0xf]  ;;  %v5360_v36 = vld [vmem:[#allocation2 + $0x18] sm:$0xf] }
 0x25f   : > { %v4067_v40 = vshrl.u32 %v3894_v22, 16  ;;  %v4070_v20 = vshll.u32 %v3894_v22, 16  ;;  %v4323_v50 = vpack.c.b16 %v4315_v15, %v4314_v7  ;;  %v13373_v22 = vld [vmem:[#allocation2 + $0x24] sm:$0x1] }
 0x260   : > { %v13279_v47 = vpop.f32.mrf.mxu1  ;;  %v4059_v45 = vor.u32 %v4058_v24, %v4055_v34  ;;  %v4580_v24 = vshll.u32 %v4548_v10, 16 }
 0x261   : > { %v3170_v41 = vadd.f32 %v13295_v35, %v13279_v47  ;;  %v357_v47 = vsel %vm12896_vm11, 0, %v356_v21  ;;  %v4069_v21 = vrot.slane %v4067_v40, 4  ;;  %v4072_v25 = vrot.slane %v4070_v20, 5 }
 0x262   : > { %11135 = vmatmul.msk.bf16.gmra.mxu3 %vm433_vm2, %v4321_v6  ;;  %v300_v6 = vld [vmem:[#allocation2 + $0x78] sm:$0x1]  ;;  %358 = vst [vmem:[#allocation2 + $0x7c] sm:$0x1] %v357_v47  ;;  %v4060_v17 = vrot.slane %v4059_v45, 4 }
 0x263   : > { %v301_v18 = vsel %vm12864_vm9, 0, %v300_v6  ;;  %v4064_v6 = vrot.slane %v4062_v46, 5  ;;  %v5369_v45 = vld [vmem:[#allocation2 + $0x24] sm:$0x1]  ;;  %v13358_v46 = vld [vmem:[#allocation2 + $0x74] sm:$0x1]  ;;  %v4073_v40 = vor.u32 %v4072_v25, %v4069_v21 }
 0x264   : > { %302 = vst [vmem:[#allocation2 + $0x78] sm:$0x1] %v301_v18  ;;  %v5370_v15 = vsel %vm12864_vm9, %v12931_v0, %v5369_v45  ;;  %v4076_v20 = vshll.u32 %v13358_v46, 16 }
 0x265   : > { %v13286_v27 = vpop.f32.mrf.mxu3  ;;  %v4065_v32 = vsel %vm12237_vm6, %v4060_v17, %v4064_v6  ;;  %5371 = vst [vmem:[#allocation2 + $0x24] sm:$0x1] %v5370_v15 }
 0x266   : > { %v4108_v49 = vunpack.c.l.b16 %v4065_v32 }
 0x268   : > { %v13297_v60 = vpop.f32.mrf.mxu1 }
 0x26a   : > { %11108 = vmatmul.msk.bf16.gmra.mxu2 %vm433_vm2, %v4114_v31  ;;  %v4105_v31 = vunpack.c.l.b16 %v4023_v11 }
 0x26b   : > { %11096 = vmatmul.msk.bf16.gmra.mxu1 %vm433_vm2, %v11079_v3  ;;  %v4045_v3 = vor.u32 %v4044_v53, %v4041_v62  ;;  %v3052_v63 = vld [vmem:[#allocation2 + $0x78] sm:$0xf]  ;;  %v3055_v62 = vld [vmem:[#allocation2 + $0x7c] sm:$0x1]  ;;  %v5366_v53 = vld [vmem:[#allocation2 + $0x20] sm:$0xf] }
 0x26c   : > { %v4115_v5 = vpack.c.b16 %v4106_v14, %v4105_v31  ;;  %v3056_v8 = vsel %vm12864_vm9, %v12931_v0, %v3055_v62  ;;  %v5361_v14 = vsel %vm12906_vm13, %v12914_v19, %v5360_v36  ;;  %v5363_v31 = vld [vmem:[#allocation2 + $0x1c] sm:$0x1]  ;;  %v5367_v17 = vsel %vm12906_vm13, %v12914_v19, %v5366_v53 }
 0x26d   : > { %v13304_v28 = vpop.f32.mrf.mxu3  ;;  %v3486_v16 = vpop.f32.mrf.mxu2  ;;  %v4046_v55 = vrot.slane %v4045_v3, 4  ;;  %3057 = vst [vmem:[#allocation2 + $0x7c] sm:$0x1] %v3056_v8  ;;  %v11086_v3 = vld [vmem:[#allocation2 + $0x70] sm:$0xf]  ;;  %v4600_v8 = vshll.u32 %v13373_v22, 16 }
 0x26e   : > { %v13306_v23 = vadd.f32 %v3486_v16, %v3168_v38  ;;  %v4048_v16 = vshll.u32 %v3891_v30, 16  ;;  %v3173_v30 = vadd.f32 %v13295_v35, %v13297_v60  ;;  %v4577_v60 = vshrl.u32 %v4548_v10, 16 }
 0x270   : > { %v13310_v48 = vpop.f32.mrf.mxu1  ;;  %v4050_v13 = vrot.slane %v4048_v16, 5 }
 0x271   : > { %v3175_v42 = vadd.f32 %v13295_v35, %v13310_v48  ;;  %v5364_v48 = vsel %vm12864_vm9, %v12931_v0, %v5363_v31 }
 0x272   : > { %11136 = vmatmul.msk.bf16.gmra.mxu3 %vm433_vm2, %v4322_v2  ;;  %v3053_v2 = vsel %vm12906_vm13, %v12914_v19, %v3052_v63  ;;  %v4051_v37 = vsel %vm12237_vm6, %v4046_v55, %v4050_v13  ;;  %v4582_v55 = vrot.slane %v4580_v24, 5 }
 0x273   : > { %3054 = vst [vmem:[#allocation2 + $0x78] sm:$0xf] %v3053_v2  ;;  %v4107_v54 = vunpack.c.l.b16 %v4051_v37 }
 0x274   : > { %v13382_v32 = vld [vmem:[#allocation2 + $0x7c] sm:$0x1] }
 0x275   : > { %v13320_v44 = vpop.f32.mrf.mxu3  ;;  %v3488_v29 = vpop.f32.mrf.mxu2  ;;  %v4116_v36 = vpack.c.b16 %v4108_v49, %v4107_v54  ;;  %v13627_v43 = vld [vmem:[#allocation2 + $0x7c] sm:$0x1] }
 0x276   : > { %v13322_v56 = vadd.f32 %v3488_v29, %v3170_v41  ;;  %v4591_v41 = vshrl.u32 %v4550_v57, 16  ;;  %v13380_v57 = vld [vmem:[#allocation2 + $0x20] sm:$0xe] }
 0x277   : > { %5368 = vst [vmem:[#allocation2 + $0x20] sm:$0xf] %v5367_v17 }
 0x278   : > { %v13328_v38 = vpop.f32.mrf.mxu1  ;;  %v4593_v7 = vrot.slane %v4591_v41, 4  ;;  %v4074_v41 = vrot.slane %v4073_v40, 4 }
 0x279   : > { %v3178_v24 = vadd.f32 %v13295_v35, %v13328_v38 }
 0x27a   : > { %11109 = vmatmul.msk.bf16.gmra.mxu2 %vm433_vm2, %v4115_v5  ;;  %v3896_v34 = vld [vmem:[#allocation2 + $0x78] sm:$0xf]  ;;  %v4579_v5 = vrot.slane %v4577_v60, 4 }
 0x27b   : > { %11097 = vmatmul.msk.bf16.gmra.mxu1 %vm433_vm2, %v11083_v58  ;;  %v4081_v52 = vshrl.u32 %v3896_v34, 16  ;;  %v4084_v29 = vshll.u32 %v3896_v34, 16  ;;  %v11841_v2 = vld [vmem:[#allocation2 + $0x74] sm:$0xf0]  ;;  %v13362_v58 = vld [vmem:[#allocation2 + $0x1c] sm:$0x1] }
 0x27c   : > { %5365 = vst [vmem:[#allocation2 + $0x1c] sm:$0x1] %v5364_v48  ;;  %v11087_v37 = vor.u32 %v11841_v2, %v11086_v3  ;;  %v4583_v62 = vor.u32 %v4582_v55, %v4579_v5  ;;  %v4586_v60 = vshll.u32 %v13362_v58, 16  ;;  %v4090_v34 = vshll.u32 %v13382_v32, 16  ;;  %v4552_v2 = vld [vmem:[#allocation2 + $0x28] sm:$0xf] }
 0x27d   : > { %v13339_v1 = vpop.f32.mrf.mxu3  ;;  %v3491_v18 = vpop.f32.mrf.mxu2  ;;  %v4083_v63 = vrot.slane %v4081_v52, 4  ;;  %v4086_v47 = vrot.slane %v4084_v29, 5  ;;  %v4602_v3 = vrot.slane %v4600_v8, 5  ;;  %v4608_v40 = vshll.u32 %v4552_v2, 16 }
 0x27e   : > { %v13341_v39 = vadd.f32 %v3491_v18, %v3173_v30  ;;  %v4596_v30 = vrot.slane %v4594_v12, 5  ;;  %v13377_v18 = vld [vmem:[#allocation2 + $0x18] sm:$0xe]  ;;  %v4092_v52 = vrot.slane %v4090_v34, 5  ;;  %v4584_v31 = vrot.slane %v4583_v62, 4 }
 0x27f   : > { %v4087_v10 = vor.u32 %v4086_v47, %v4083_v63  ;;  %5362 = vst [vmem:[#allocation2 + $0x18] sm:$0xf] %v5361_v14  ;;  %v4078_v14 = vrot.slane %v4076_v20, 5  ;;  %v4554_v63 = vld [vmem:[#allocation2 + $0x30] sm:$0xf] }
 0x280   : > { %v13347_v11 = vpop.f32.mrf.mxu1  ;;  %v4597_v53 = vor.u32 %v4596_v30, %v4593_v7  ;;  %v4619_v48 = vshrl.u32 %v4554_v63, 16  ;;  %v4622_v15 = vshll.u32 %v4554_v63, 16 }
 0x281   : > { %v4088_v54 = vrot.slane %v4087_v10, 4  ;;  %v4079_v38 = vsel %vm12237_vm6, %v4074_v41, %v4078_v14  ;;  %v3180_v30 = vadd.f32 %v13295_v35, %v13347_v11  ;;  %v4610_v41 = vrot.slane %v4608_v40, 5  ;;  %v13409_v14 = vld [vmem:[#allocation2 + $0x34] sm:$0x1] }
 0x282   : > { %11137 = vmatmul.msk.bf16.gmra.mxu3 %vm433_vm2, %v4323_v50  ;;  %v4598_v49 = vrot.slane %v4597_v53, 4  ;;  %v4109_v55 = vunpack.c.l.b16 %v4079_v38  ;;  %v4624_v53 = vrot.slane %v4622_v15, 5 }
 0x283   : > { %v4093_v45 = vsel %vm12237_vm6, %v4088_v54, %v4092_v52  ;;  %v13412_v54 = vld [vmem:[#allocation2 + $0x2c] sm:$0x1]  ;;  %v11193_v52 = vrot.slane %v13377_v18, 9 }
 0x284   : > { %v4603_v12 = vsel %vm12237_vm6, %v4598_v49, %v4602_v3  ;;  %v4110_v7 = vunpack.c.l.b16 %v4093_v45  ;;  %v4929_v49 = vrot.slane %v13373_v22, 5  ;;  %v4628_v45 = vshll.u32 %v13409_v14, 16 }
 0x285   : > { %v13360_v16 = vpop.f32.mrf.mxu3  ;;  %v3493_v6 = vpop.f32.mrf.mxu2 }
 0x286   : > { %v13375_v13 = vadd.f32 %v3493_v6, %v3175_v42  ;;  %v4588_v42 = vrot.slane %v4586_v60, 5  ;;  %v4776_v6 = vunpack.c.l.b16 %v4603_v12  ;;  %v4117_v62 = vpack.c.b16 %v4110_v7, %v4109_v55  ;;  %v4556_v7 = vld [vmem:[#allocation2 + $0x38] sm:$0xf] }
 0x287   : > { %v4621_v60 = vrot.slane %v4619_v48, 4 }
 0x288   : > { %v3182_v50 = vpop.f32.mrf.mxu1  ;;  %v4589_v5 = vsel %vm12237_vm6, %v4584_v31, %v4588_v42  ;;  %v4925_v31 = vrot.slane %v13362_v58, 5  ;;  %v11194_v42 = vrot.slane %v13380_v57, 9 }
 0x289   : > { %v4775_v17 = vunpack.c.l.b16 %v4589_v5  ;;  %v4625_v11 = vor.u32 %v4624_v53, %v4621_v60  ;;  %v3183_v3 = vadd.f32 %v13295_v35, %v3182_v50  ;;  %v4630_v50 = vrot.slane %v4628_v45, 5  ;;  %v13440_v45 = vld [vmem:[#allocation2 + $0x3c] sm:$0x1] }
 0x28a   : > { %11110 = vmatmul.msk.bf16.gmra.mxu2 %vm433_vm2, %v4116_v36  ;;  %v4926_v58 = vsel %vm12186_vm3, %v11193_v52, %v4925_v31  ;;  %v4930_v18 = vsel %vm12186_vm3, %v11194_v42, %v4929_v49  ;;  %v13432_v49 = vld [vmem:[#allocation2 + $0x44] sm:$0x1] }
 0x28b   : > { %11098 = vmatmul.msk.bf16.gmra.mxu1 %vm433_vm2, %v11087_v37  ;;  %v4605_v37 = vshrl.u32 %v4552_v2, 16  ;;  %v4789_v8 = vpack.c.b16 %v4776_v6, %v4775_v17  ;;  %v4626_v12 = vrot.slane %v4625_v11, 4  ;;  %v4558_v2 = vld [vmem:[#allocation2 + $0x40] sm:$0xf]  ;;  %v4982_v15 = vunpack.c.l.b16 %v4926_v58 }
 0x28c   : > { %v4647_v48 = vshrl.u32 %v4558_v2, 16  ;;  %v4983_v17 = vunpack.c.l.b16 %v4930_v18  ;;  %v4656_v58 = vshll.u32 %v13432_v49, 16 }
 0x28d   : > { %v13391_v29 = vpop.f32.mrf.mxu3  ;;  %v3496_v21 = vpop.f32.mrf.mxu2  ;;  %v4631_v6 = vsel %vm12237_vm6, %v4626_v12, %v4630_v50  ;;  %v4883_v12 = vld [vmem:[#allocation2 + $0x28] sm:$0xe]  ;;  %v4642_v50 = vshll.u32 %v13440_v45, 16 }
 0x28e   : > { %v13393_v25 = vadd.f32 %v3496_v21, %v3178_v24  ;;  %v4607_v24 = vrot.slane %v4605_v37, 4  ;;  %v4778_v53 = vunpack.c.l.b16 %v4631_v6 }
 0x290   : > { %v3184_v47 = vpop.f32.mrf.mxu1  ;;  %v4611_v38 = vor.u32 %v4610_v41, %v4607_v24 }
 0x291   : > { %v4614_v47 = vshll.u32 %v13412_v54, 16 }
 0x292   : > { %v4612_v57 = vrot.slane %v4611_v38, 4  ;;  %v13437_v38 = vadd.f32 %v13286_v27, %v13306_v23  ;;  %v11195_v27 = vrot.slane %v4883_v12, 9  ;;  %v4933_v23 = vrot.slane %v13412_v54, 5 }
 0x293   : > { %v4616_v55 = vrot.slane %v4614_v47, 5 }
 0x295   : > { %v13405_v36 = vpop.f32.mrf.mxu3  ;;  %v3498_v20 = vpop.f32.mrf.mxu2  ;;  %v4617_v40 = vsel %vm12237_vm6, %v4612_v57, %v4616_v55  ;;  %v4937_v57 = vrot.slane %v13409_v14, 5 }
 0x296   : > { %v13407_v10 = vadd.f32 %v3498_v20, %v3180_v30  ;;  %v4650_v30 = vshll.u32 %v4558_v2, 16  ;;  %v4633_v20 = vshrl.u32 %v4556_v7, 16  ;;  %v4777_v41 = vunpack.c.l.b16 %v4617_v40 }
 0x298   : > { %v3187_v34 = vpop.f32.mrf.mxu1  ;;  %v4652_v24 = vrot.slane %v4650_v30, 5  ;;  %v4635_v52 = vrot.slane %v4633_v20, 4  ;;  %v4790_v42 = vpack.c.b16 %v4778_v53, %v4777_v41  ;;  %v4560_v30 = vld [vmem:[#allocation2 + $0x48] sm:$0xf] }
 0x299   : > { %v4649_v34 = vrot.slane %v4647_v48, 4 }
 0x29a   : > { %11111 = vmatmul.msk.bf16.gmra.mxu2 %vm433_vm2, %v4117_v62  ;;  %v4636_v62 = vshll.u32 %v4556_v7, 16  ;;  %v4562_v7 = vld [vmem:[#allocation2 + $0x50] sm:$0xf] }
 0x29b   : > { %11186 = vmatmul.msk.bf16.vlgmr.msra.gmra.mxu1 %vm433_vm2, %v4789_v8  ;;  %v4996_v8 = vpack.c.b16 %v4983_v17, %v4982_v15  ;;  %v4658_v17 = vrot.slane %v4656_v58, 5  ;;  %v4675_v20 = vshrl.u32 %v4562_v7, 16  ;;  %v4678_v14 = vshll.u32 %v4562_v7, 16 }
 0x29c   : > { %v4638_v31 = vrot.slane %v4636_v62, 5  ;;  %v4934_v62 = vsel %vm12186_vm3, %v11195_v27, %v4933_v23  ;;  %v4885_v23 = vld [vmem:[#allocation2 + $0x38] sm:$0xe] }
 0x29d   : > { %v3710_v21 = vpop.f32.mrf.mxu3  ;;  %v3501_v63 = vpop.f32.mrf.mxu2 }
 0x29e   : > { %v13422_v5 = vadd.f32 %v3501_v63, %v3183_v3  ;;  %v4884_v3 = vld [vmem:[#allocation2 + $0x30] sm:$0xe]  ;;  %v4653_v21 = vor.u32 %v4652_v24, %v4649_v34  ;;  %v13442_v63 = vpop.f32.mrf.mxu0  ;;  %v4639_v2 = vor.u32 %v4638_v31, %v4635_v52  ;;  %v4664_v34 = vshll.u32 %v4560_v30, 16 }
 0x29f   : > { %v4984_v52 = vunpack.c.l.b16 %v4934_v62  ;;  %v4677_v31 = vrot.slane %v4675_v20, 4 }
 0x2a0   : > { %v3189_v22 = vpop.f32.mrf.mxu1  ;;  %v4654_v55 = vrot.slane %v4653_v21, 4  ;;  %v4640_v15 = vrot.slane %v4639_v2, 4  ;;  %v4666_v2 = vrot.slane %v4664_v34, 5 }
 0x2a1   : > { %v11196_v22 = vrot.slane %v4884_v3, 9 }
 0x2a2   : > { %v4659_v40 = vsel %vm12237_vm6, %v4654_v55, %v4658_v17  ;;  %v13466_v55 = vld [vmem:[#allocation2 + $0x4c] sm:$0x1] }
 0x2a3   : > { %v4938_v6 = vsel %vm12186_vm3, %v11196_v22, %v4937_v57  ;;  %v4780_v41 = vunpack.c.l.b16 %v4659_v40  ;;  %v4886_v22 = vld [vmem:[#allocation2 + $0x40] sm:$0xe]  ;;  %v11197_v40 = vrot.slane %v4885_v23, 9 }
 0x2a4   : > { %v4985_v53 = vunpack.c.l.b16 %v4938_v6  ;;  %v11198_v17 = vrot.slane %v4886_v22, 9  ;;  %v4945_v6 = vrot.slane %v13432_v49, 5 }
 0x2a5   : > { %v3713_v37 = vpop.f32.mrf.mxu3  ;;  %v3503_v60 = vpop.f32.mrf.mxu2 }
 0x2a6   : > { %v4644_v37 = vrot.slane %v4642_v50, 5  ;;  %v4997_v21 = vpack.c.b16 %v4985_v53, %v4984_v52  ;;  %v13463_v50 = vadd.f32 %v13320_v44, %v13341_v39  ;;  %v4941_v44 = vrot.slane %v13440_v45, 5  ;;  %v4566_v39 = vld [vmem:[#allocation2 + $0x60] sm:$0xf]  ;;  %v4564_v53 = vld [vmem:[#allocation2 + $0x58] sm:$0xf] }
 0x2a7   : > { %v4946_v49 = vsel %vm12186_vm3, %v11198_v17, %v4945_v6  ;;  %v4703_v45 = vshrl.u32 %v4566_v39, 16  ;;  %v4689_v52 = vshrl.u32 %v4564_v53, 16 }
 0x2a8   : > { %v3821_v11 = vpop.f32.mrf.mxu1  ;;  %v4645_v54 = vsel %vm12237_vm6, %v4640_v15, %v4644_v37 }
 0x2a9   : > { %v13456_v11 = vpop.f32.mrf.mxu0  ;;  %v4779_v3 = vunpack.c.l.b16 %v4645_v54  ;;  %v11861_v54 = vld [vmem:[%s15174_s1 + $0x90] sm:$0xff] }
 0x2aa   : > { %11213 = vmatmul.msk.bf16.vlgmr.msra.gmra.mxu2 %vm433_vm2, %v4996_v8  ;;  %v4661_v8 = vshrl.u32 %v4560_v30, 16  ;;  %v4670_v30 = vshll.u32 %v13466_v55, 16  ;;  %5519 = vmatpush.bf16.msrb.mxu3 %v11861_v54 }
 0x2ab   : > { %11187 = vmatmul.msk.bf16.gmra.mxu1 %vm433_vm2, %v4790_v42  ;;  %v4680_v42 = vrot.slane %v4678_v14, 5  ;;  %v4791_v58 = vpack.c.b16 %v4780_v41, %v4779_v3  ;;  %v4942_v41 = vsel %vm12186_vm3, %v11197_v40, %v4941_v44  ;;  %v4987_v3 = vunpack.c.l.b16 %v4946_v49  ;;  %v13498_v44 = vld [vmem:[#allocation2 + $0x5c] sm:$0x1] }
 0x2ac   : > { %v4663_v12 = vrot.slane %v4661_v8, 4  ;;  %v4672_v8 = vrot.slane %v4670_v30, 5  ;;  %v4888_v30 = vld [vmem:[#allocation2 + $0x50] sm:$0xe] }
 0x2ad   : > { %v3715_v47 = vpop.f32.mrf.mxu3  ;;  %v3506_v18 = vpop.f32.mrf.mxu2  ;;  %v4681_v57 = vor.u32 %v4680_v42, %v4677_v31  ;;  %v4692_v31 = vshll.u32 %v4564_v53, 16  ;;  %v11200_v54 = vrot.slane %v4888_v30, 9 }
 0x2ae   : > { %v13458_v18 = vld [vmem:[#allocation2 + $0x54] sm:$0x1]  ;;  %v4667_v7 = vor.u32 %v4666_v2, %v4663_v12  ;;  %v4986_v2 = vunpack.c.l.b16 %v4942_v41  ;;  %v4949_v41 = vrot.slane %v13466_v55, 5 }
 0x2af   : > { %v4682_v37 = vrot.slane %v4681_v57, 4  ;;  %v4694_v23 = vrot.slane %v4692_v31, 5  ;;  %v4953_v49 = vrot.slane %v13458_v18, 5 }
 0x2b0   : > { %v3823_v48 = vpop.f32.mrf.mxu1  ;;  %v4668_v62 = vrot.slane %v4667_v7, 4  ;;  %v4998_v7 = vpack.c.b16 %v4987_v3, %v4986_v2  ;;  %v4568_v3 = vld [vmem:[#allocation2 + $0x68] sm:$0xf] }
 0x2b1   : > { %v4684_v48 = vshll.u32 %v13458_v18, 16  ;;  %v13472_v20 = vpop.f32.mrf.mxu0  ;;  %v4954_v31 = vsel %vm12186_vm3, %v11200_v54, %v4953_v49  ;;  %v4720_v2 = vshll.u32 %v4568_v3, 16 }
 0x2b3   : > { %v4722_v54 = vrot.slane %v4720_v2, 5  ;;  %v4891_v2 = vld [vmem:[#allocation2 + $0x68] sm:$0xe] }
 0x2b5   : > { %v4361_v60 = vpop.f32.mrf.mxu3  ;;  %v3508_v24 = vpop.f32.mrf.mxu2 }
 0x2b6   : > { %v4686_v60 = vrot.slane %v4684_v48, 5  ;;  %v4706_v24 = vshll.u32 %v4566_v39, 16 }
 0x2b8   : > { %v3826_v47 = vpop.f32.mrf.mxu1  ;;  %v4687_v34 = vsel %vm12237_vm6, %v4682_v37, %v4686_v60  ;;  %v4708_v22 = vrot.slane %v4706_v24, 5  ;;  %v13493_v37 = vld [vmem:[#allocation2 + $0x64] sm:$0x1] }
 0x2b9   : > { %v4782_v12 = vunpack.c.l.b16 %v4687_v34  ;;  %v13495_v40 = vpop.f32.mrf.mxu0 }
 0x2ba   : > { %11214 = vmatmul.msk.bf16.gmra.mxu2 %vm433_vm2, %v4997_v21  ;;  %v4673_v21 = vsel %vm12237_vm6, %v4668_v62, %v4672_v8  ;;  %v13502_v62 = vadd.f32 %v13360_v16, %v13393_v25  ;;  %v4712_v8 = vshll.u32 %v13493_v37, 16 }
 0x2bb   : > { %11188 = vmatmul.msk.bf16.gmra.mxu1 %vm433_vm2, %v4791_v58  ;;  %v4705_v58 = vrot.slane %v4703_v45, 4  ;;  %v4781_v57 = vunpack.c.l.b16 %v4673_v21  ;;  %v4698_v45 = vshll.u32 %v13498_v44, 16  ;;  %v4570_v21 = vld [vmem:[#allocation2 + $0x70] sm:$0xf] }
 0x2bd   : > { %v4363_v27 = vpop.f32.mrf.mxu3  ;;  %v4154_v15 = vpop.f32.mrf.mxu2  ;;  %v4792_v6 = vpack.c.b16 %v4782_v12, %v4781_v57  ;;  %v4709_v39 = vor.u32 %v4708_v22, %v4705_v58  ;;  %v4700_v18 = vrot.slane %v4698_v45, 5  ;;  %v4717_v12 = vshrl.u32 %v4568_v3, 16  ;;  %v13519_v22 = vld [vmem:[#allocation2 + $0x6c] sm:$0x1] }
 0x2be   : > { %v4691_v27 = vrot.slane %v4689_v52, 4  ;;  %v11862_v15 = vld [vmem:[%s15174_s1 + $0x98] sm:$0xff]  ;;  %v4731_v57 = vshrl.u32 %v4570_v21, 16 }
 0x2bf   : > { %5795 = vmatpush.bf16.msra.mxu0 %v11862_v15  ;;  %v4710_v52 = vrot.slane %v4709_v39, 4  ;;  %v13523_v15 = vld [vmem:[#allocation2 + $0x74] sm:$0x1] }
 0x2c0   : > { %v13474_v14 = vpop.f32.mrf.mxu1  ;;  %v4695_v60 = vor.u32 %v4694_v23, %v4691_v27  ;;  %v4734_v27 = vshll.u32 %v4570_v21, 16  ;;  %v5423_v23 = vld [vmem:[#allocation2 + $0x6c] sm:$0x1]  ;;  %v5429_v39 = vld [vmem:[#allocation2 + $0x74] sm:$0x1]  ;;  %v4733_v49 = vrot.slane %v4731_v57, 4 }
 0x2c1   : > { %v5424_v30 = vsel %vm12864_vm9, %v12931_v0, %v5423_v23  ;;  %v4726_v21 = vshll.u32 %v13519_v22, 16  ;;  %v4889_v23 = vld [vmem:[#allocation2 + $0x58] sm:$0xe] }
 0x2c2   : > { %v4696_v16 = vrot.slane %v4695_v60, 4  ;;  %5425 = vst [vmem:[#allocation2 + $0x6c] sm:$0x1] %v5424_v30 }
 0x2c5   : > { %v4366_v42 = vpop.f32.mrf.mxu3  ;;  %v4156_v47 = vpop.f32.mrf.mxu2 }
 0x2c6   : > { %v4714_v42 = vrot.slane %v4712_v8, 5  ;;  %v5420_v47 = vld [vmem:[#allocation2 + $0x68] sm:$0xf]  ;;  %v4736_v8 = vrot.slane %v4734_v27, 5 }
 0x2c8   : > { %v3831_v48 = vpop.f32.mrf.mxu1  ;;  %v4715_v55 = vsel %vm12237_vm6, %v4710_v52, %v4714_v42  ;;  %v5421_v52 = vsel %vm12906_vm13, %v12914_v19, %v5420_v47  ;;  %v3728_v47 = vadd.f32 %v13405_v36, %v13422_v5  ;;  %v4957_v36 = vrot.slane %v13498_v44, 5 }
 0x2c9   : > { %v13491_v17 = vadd.f32 %v3831_v48, %v13437_v38  ;;  %v4887_v38 = vld [vmem:[#allocation2 + $0x48] sm:$0xe]  ;;  %v4701_v48 = vsel %vm12237_vm6, %v4696_v16, %v4700_v18  ;;  %v4737_v18 = vor.u32 %v4736_v8, %v4733_v49  ;;  %5422 = vst [vmem:[#allocation2 + $0x68] sm:$0xf] %v5421_v52 }
 0x2ca   : > { %11215 = vmatmul.msk.bf16.gmra.mxu2 %vm433_vm2, %v4998_v7  ;;  %v11199_v24 = vrot.slane %v4887_v38, 9  ;;  %v4989_v7 = vunpack.c.l.b16 %v4954_v31  ;;  %v13528_v38 = vpop.f32.mrf.mxu0  ;;  %v4783_v31 = vunpack.c.l.b16 %v4701_v48  ;;  %v4728_v48 = vrot.slane %v4726_v21, 5 }
 0x2cb   : > { %11189 = vmatmul.msk.bf16.gmra.mxu1 %vm433_vm2, %v4792_v6  ;;  %v4719_v6 = vrot.slane %v4717_v12, 4  ;;  %v4740_v12 = vshll.u32 %v13523_v15, 16 }
 0x2cc   : > { %v4950_v58 = vsel %vm12186_vm3, %v11199_v24, %v4949_v41  ;;  %v4784_v41 = vunpack.c.l.b16 %v4715_v55 }
 0x2cd   : > { %v13505_v53 = vpop.f32.mrf.mxu3  ;;  %v4159_v34 = vpop.f32.mrf.mxu2  ;;  %v4988_v24 = vunpack.c.l.b16 %v4950_v58  ;;  %v4723_v3 = vor.u32 %v4722_v54, %v4719_v6  ;;  %v4890_v58 = vld [vmem:[#allocation2 + $0x60] sm:$0xe]  ;;  %v4738_v6 = vrot.slane %v4737_v18, 4  ;;  %v4742_v30 = vrot.slane %v4740_v12, 5 }
 0x2ce   : > { %v5430_v34 = vsel %vm12864_vm9, %v12931_v0, %v5429_v39  ;;  %v4793_v27 = vpack.c.b16 %v4784_v41, %v4783_v31  ;;  %v11202_v54 = vrot.slane %v4890_v58, 9  ;;  %v4892_v58 = vld [vmem:[#allocation2 + $0x70] sm:$0xe] }
 0x2cf   : > { %5431 = vst [vmem:[#allocation2 + $0x74] sm:$0x1] %v5430_v34  ;;  %v4999_v16 = vpack.c.b16 %v4989_v7, %v4988_v24  ;;  %v4724_v7 = vrot.slane %v4723_v3, 4  ;;  %v11201_v34 = vrot.slane %v4889_v23, 9  ;;  %v4743_v52 = vsel %vm12237_vm6, %v4738_v6, %v4742_v30 }
 0x2d0   : > { %v13511_v25 = vpop.f32.mrf.mxu1  ;;  %v4786_v31 = vunpack.c.l.b16 %v4743_v52  ;;  %v11204_v6 = vrot.slane %v4892_v58, 9  ;;  %v4969_v30 = vrot.slane %v13523_v15, 5 }
 0x2d1   : > { %v4729_v41 = vsel %vm12237_vm6, %v4724_v7, %v4728_v48  ;;  %v11203_v7 = vrot.slane %v4891_v2, 9  ;;  %v4965_v48 = vrot.slane %v13519_v22, 5 }
 0x2d2   : > { %v13548_v49 = vpop.f32.mrf.mxu0 }
 0x2d5   : > { %v4371_v60 = vpop.f32.mrf.mxu3  ;;  %v13533_v45 = vpop.f32.mrf.mxu2 }
 0x2d8   : > { %v3836_v42 = vpop.f32.mrf.mxu1 }
 0x2d9   : > { %v3862_v57 = vadd.f32 %v3836_v42, %v13463_v50  ;;  %v4961_v50 = vrot.slane %v13493_v37, 5 }
 0x2da   : > { %11216 = vmatmul.msk.bf16.gmra.mxu2 %vm433_vm2, %v4999_v16  ;;  %v4958_v16 = vsel %vm12186_vm3, %v11201_v34, %v4957_v36  ;;  %v13566_v18 = vpop.f32.mrf.mxu0 }
 0x2db   : > { %11190 = vmatmul.msk.bf16.gmra.mxu1 %vm433_vm2, %v4793_v27  ;;  %v4962_v37 = vsel %vm12186_vm3, %v11202_v54, %v4961_v50  ;;  %v4990_v3 = vunpack.c.l.b16 %v4958_v16 }
 0x2dc   : > { %v4991_v44 = vunpack.c.l.b16 %v4962_v37 }
 0x2dd   : > { %v13545_v55 = vpop.f32.mrf.mxu3  ;;  %v4164_v39 = vpop.f32.mrf.mxu2 }
 0x2de   : > { %v4193_v8 = vadd.f32 %v4164_v39, %v13491_v17  ;;  %v4785_v17 = vunpack.c.l.b16 %v4729_v41  ;;  %v5000_v12 = vpack.c.b16 %v4991_v44, %v4990_v3 }
 0x2e0   : > { %v13552_v5 = vadd.f32 %v4371_v60, %v4193_v8  ;;  %v13554_v24 = vpop.f32.mrf.mxu1  ;;  %v4794_v21 = vpack.c.b16 %v4786_v31, %v4785_v17  ;;  %v4966_v8 = vsel %vm12186_vm3, %v11203_v7, %v4965_v48 }
 0x2e1   : > { %v4992_v41 = vunpack.c.l.b16 %v4966_v8 }
 0x2e2   : > { %v4524_v2 = vpop.f32.mrf.mxu0 }
 0x2e5   : > { %v4376_v42 = vpop.f32.mrf.mxu3  ;;  %v13564_v60 = vpop.f32.mrf.mxu2 }
 0x2e8   : > { %v3841_v27 = vpop.f32.mrf.mxu1 }
 0x2e9   : > { %v3864_v23 = vadd.f32 %v3841_v27, %v13502_v62  ;;  %v4970_v62 = vsel %vm12186_vm3, %v11204_v6, %v4969_v30  ;;  %v5426_v30 = vld [vmem:[#allocation2 + $0x70] sm:$0xf] }
 0x2ea   : > { %11217 = vmatmul.msk.bf16.gmra.mxu2 %vm433_vm2, %v5000_v12  ;;  %v4993_v22 = vunpack.c.l.b16 %v4970_v62  ;;  %v4526_v17 = vpop.f32.mrf.mxu0  ;;  %v5427_v8 = vsel %vm12906_vm13, %v12914_v19, %v5426_v30  ;;  %v4215_v62 = vld [vmem:[#allocation2 + $0x70] sm:$0xe] }
 0x2eb   : > { %11191 = vmatmul.msk.bf16.gmra.mxu1 %vm433_vm2, %v4794_v21  ;;  %5428 = vst [vmem:[#allocation2 + $0x70] sm:$0xf] %v5427_v8  ;;  %v11167_v8 = vld [vmem:[#allocation2 + $0x78] sm:$0xf] }
 0x2ec   : > { %v5001_v15 = vpack.c.b16 %v4993_v22, %v4992_v41  ;;  %v4216_v41 = vld [vmem:[#allocation2 + $0x78] sm:$0xe]  ;;  %v4295_v22 = vrot.slane %v13358_v46, 5 }
 0x2ed   : > { %v13573_v39 = vpop.f32.mrf.mxu3  ;;  %v4169_v54 = vpop.f32.mrf.mxu2 }
 0x2ee   : > { %v4195_v50 = vadd.f32 %v4169_v54, %v3862_v57 }
 0x2f0   : > { %v13579_v34 = vadd.f32 %v4376_v42, %v4195_v50  ;;  %v13581_v36 = vpop.f32.mrf.mxu1 }
 0x2f5   : > { %v4381_v52 = vpop.f32.mrf.mxu3  ;;  %v13583_v37 = vpop.f32.mrf.mxu2 }
 0x2f8   : > { %v3846_v16 = vpop.f32.mrf.mxu1 }
 0x2f9   : > { %v3866_v57 = vadd.f32 %v3846_v16, %v3728_v47  ;;  %v11125_v16 = vrot.slane %v4216_v41, 9 }
 0x2fa   : > { %11218 = vmatmul.msk.bf16.gmra.mxu2 %vm433_vm2, %v5001_v15  ;;  %v11124_v15 = vrot.slane %v4215_v62, 9 }
 0x2fd   : > { %v13586_v31 = vpop.f32.mrf.mxu3  ;;  %v4174_v44 = vpop.f32.mrf.mxu2 }
 0x2fe   : > { %v4197_v3 = vadd.f32 %v4174_v44, %v3864_v23 }
 0x300   : > { %v13588_v42 = vadd.f32 %v4381_v52, %v4197_v3  ;;  %v3848_v21 = vpop.f32.mrf.mxu1  ;;  %v4299_v52 = vrot.slane %v13382_v32, 5 }
 0x305   : > { %v4386_v12 = vpop.f32.mrf.mxu3  ;;  %v13590_v27 = vpop.f32.mrf.mxu2 }
 0x308   : > { %v3851_v58 = vpop.f32.mrf.mxu1 }
 0x309   : > { %v303_v58 = vld [vmem:[#allocation2 + $0x80] sm:$0x1] }
 0x30a   : > { %v304_v46 = vsel %vm12864_vm9, 0, %v303_v58  ;;  %v13632_v58 = vld [vmem:[#allocation2 + $0x1c] sm:$0x1] }
 0x30b   : > { %305 = vst [vmem:[#allocation2 + $0x80] sm:$0x1] %v304_v46 }
 0x30d   : > { %v4388_v7 = vpop.f32.mrf.mxu3  ;;  %v4179_v48 = vpop.f32.mrf.mxu2 }
 0x30e   : > { %v4199_v6 = vadd.f32 %v4179_v48, %v3866_v57  ;;  %v4296_v57 = vsel %vm12186_vm3, %v11124_v15, %v4295_v22 }
 0x30f   : > { %v4316_v44 = vunpack.c.l.b16 %v4296_v57  ;;  %v359_v57 = vld [vmem:[#allocation2 + $0x84] sm:$0x1] }
 0x310   : > { %v4406_v54 = vadd.f32 %v4386_v12, %v4199_v6  ;;  %v3853_v50 = vpop.f32.mrf.mxu1 }
 0x312   : > { %v13592_v47 = vadd.f32 %v4524_v2, %v4406_v54  ;;  %v4300_v2 = vsel %vm12186_vm3, %v11125_v16, %v4299_v52  ;;  %v3058_v48 = vld [vmem:[#allocation2 + $0x80] sm:$0xf]  ;;  %v3165_v54 = vadd.f32 %v13295_v35, %v13264_v9  ;;  %v11225_v16 = vld [vmem:[#allocation2 + $0x10] sm:$0xf]  ;;  %v360_v9 = vsel %vm12896_vm11, 0, %v359_v57 }
 0x313   : > { %v4317_v3 = vunpack.c.l.b16 %v4300_v2  ;;  %v3059_v6 = vsel %vm12906_vm13, %v12914_v19, %v3058_v48  ;;  %v3723_v35 = vadd.f32 %v13304_v28, %v13322_v56  ;;  %361 = vst [vmem:[#allocation2 + $0x84] sm:$0x1] %v360_v9  ;;  %v3725_v56 = vadd.f32 %v13339_v1, %v13375_v13  ;;  %v4572_v48 = vld [vmem:[#allocation2 + $0x78] sm:$0xf]  ;;  %v11863_v1 = vld [vmem:[%s15174_s1 + $0xa0] sm:$0xff] }
 0x314   : > { %3060 = vst [vmem:[#allocation2 + $0x80] sm:$0xf] %v3059_v6  ;;  %5975 = vmatpush.bf16.msra.mxu3 %v11863_v1 }
 0x315   : > { %v4181_v23 = vpop.f32.mrf.mxu2  ;;  %v4324_v21 = vpack.c.b16 %v4317_v3, %v4316_v44  ;;  %v3861_v3 = vadd.f32 %v13511_v25, %v3723_v35  ;;  %v7428_v25 = vsel %vm12864_vm9, %v12931_v0, %v13632_v58  ;;  %v13643_v46 = vadd.f32 %v13554_v24, %v3725_v56 }
 0x316   : > { %v3514_v23 = vadd.f32 %v13288_v26, %v3165_v54  ;;  %v11871_v26 = vld [vmem:[%s15174_s1 + $0xb0] sm:$0xff]  ;;  %v4973_v35 = vrot.slane %v13627_v43, 5 }
 0x317   : > { %11138 = vmatmul.msk.bf16.gmra.mxu3 %vm433_vm2, %v4324_v21  ;;  %6383 = vmatpush.bf16.msrb.mxu1 %v11871_v26 }
 0x318   : > { %v4832_v17 = vpop.f32.mrf.mxu1  ;;  %v3721_v52 = vadd.f32 %v13274_v51, %v3514_v23  ;;  %v5551_v23 = vld [vmem:[#allocation2 + $0x10] sm:$0xf] }
 0x319   : > { %v11855_v17 = vld [vmem:[#allocation2 + $0x14] sm:$0xf0]  ;;  %v5579_v9 = vshll.u32 %v5551_v23, 16 }
 0x31a   : > { %v3859_v15 = vadd.f32 %v13474_v14, %v3721_v52  ;;  %v11226_v44 = vor.u32 %v11855_v17, %v11225_v16  ;;  %v5435_v14 = vld [vmem:[#allocation2 + $0x7c] sm:$0x1] }
 0x31b   : > { %v11851_v62 = vld [vmem:[#allocation2 + $0x7c] sm:$0xf0] }
 0x31c   : > { %v11168_v22 = vor.u32 %v11851_v62, %v11167_v8  ;;  %v4192_v51 = vadd.f32 %v13533_v45, %v3859_v15  ;;  %v4194_v45 = vadd.f32 %v13564_v60, %v3861_v3  ;;  %v4574_v6 = vld [vmem:[#allocation2 + $0x80] sm:$0xf]  ;;  %v4745_v60 = vshrl.u32 %v4572_v48, 16  ;;  %v5552_v62 = vld [vmem:[#allocation2 + $0x14] sm:$0x1] }
 0x31d   : > { %v4184_v12 = vpop.f32.mrf.mxu2  ;;  %v4759_v54 = vshrl.u32 %v4574_v6, 16  ;;  %v4894_v3 = vld [vmem:[#allocation2 + $0x80] sm:$0xe] }
 0x31e   : > { %11179 = vmatmul.msk.bf16.gmra.mxu0 %vm433_vm2, %v11168_v22  ;;  %v5436_v12 = vsel %vm12864_vm9, %v12931_v0, %v5435_v14  ;;  %v4399_v28 = vadd.f32 %v13505_v53, %v4192_v51  ;;  %v3061_v53 = vld [vmem:[#allocation2 + $0x84] sm:$0x1]  ;;  %v4401_v8 = vadd.f32 %v13545_v55, %v4194_v45  ;;  %v4747_v22 = vrot.slane %v4745_v60, 4 }
 0x31f   : > { %5437 = vst [vmem:[#allocation2 + $0x7c] sm:$0x1] %v5436_v12  ;;  %v4761_v15 = vrot.slane %v4759_v54, 4  ;;  %v5585_v14 = vshll.u32 %v5552_v62, 16  ;;  %v4538_v60 = vadd.f32 %v13456_v11, %v13552_v5 }
 0x320   : > { %v4834_v32 = vpop.f32.mrf.mxu1  ;;  %v4537_v24 = vadd.f32 %v13442_v63, %v4399_v28  ;;  %v5553_v63 = vld [vmem:[#allocation2 + $0x18] sm:$0xf]  ;;  %v5581_v28 = vrot.slane %v5579_v9, 5 }
 0x321   : > { %v3727_v32 = vadd.f32 %v13391_v29, %v13407_v10  ;;  %v3062_v29 = vsel %vm12864_vm9, %v12931_v0, %v3061_v53  ;;  %v4754_v10 = vshll.u32 %v13627_v43, 16  ;;  %v5590_v56 = vshrl.u32 %v5553_v63, 16  ;;  %v11872_v43 = vld [vmem:[%s15174_s1 + $0xb8] sm:$0xff] }
 0x322   : > { %3063 = vst [vmem:[#allocation2 + $0x84] sm:$0x1] %v3062_v29  ;;  %v5593_v45 = vshll.u32 %v5553_v63, 16  ;;  %v5587_v1 = vrot.slane %v5585_v14, 5  ;;  %6563 = vmatpush.bf16.msrb.mxu2 %v11872_v43  ;;  %v6427_v9 = vld [vmem:[#allocation2 + $0x18] sm:$0xe] }
 0x323   : > { %v13657_v17 = vadd.f32 %v13581_v36, %v3727_v32  ;;  %v4756_v32 = vrot.slane %v4754_v10, 5 }
 0x324   : > { %v5595_v53 = vrot.slane %v5593_v45, 5 }
 0x325   : > { %v4186_v7 = vpop.f32.mrf.mxu2 }
 0x326   : > { %v4893_v7 = vld [vmem:[#allocation2 + $0x78] sm:$0xe] }
 0x327   : > { %11251 = vmatmul.msk.bf16.vlgmr.msrb.gmra.mxu3 %vm433_vm2, %v11226_v44  ;;  %v5576_v44 = vshrl.u32 %v5551_v23, 16  ;;  %v11205_v26 = vrot.slane %v4893_v7, 9  ;;  %v11870_v7 = vld [vmem:[%s15174_s1 + $0xa8] sm:$0xff] }
 0x328   : > { %v4837_v30 = vpop.f32.mrf.mxu1  ;;  %6095 = vmatpush.bf16.msrb.mxu0 %v11870_v7 }
 0x329   : > { %v4748_v30 = vshll.u32 %v4572_v48, 16  ;;  %v5578_v12 = vrot.slane %v5576_v44, 4  ;;  %v4575_v10 = vld [vmem:[#allocation2 + $0x84] sm:$0x1] }
 0x32b   : > { %v4750_v52 = vrot.slane %v4748_v30, 5  ;;  %v13674_v30 = vadd.f32 %v13472_v20, %v4401_v8  ;;  %v4768_v20 = vshll.u32 %v4575_v10, 16 }
 0x32d   : > { %v5039_v50 = vpop.f32.mrf.mxu2  ;;  %v4751_v51 = vor.u32 %v4750_v52, %v4747_v22  ;;  %v6140_v52 = vld [vmem:[#allocation2 + $0x1c] sm:$0x1] }
 0x32e   : > { %v4762_v50 = vshll.u32 %v4574_v6, 16  ;;  %v5582_v6 = vor.u32 %v5581_v28, %v5578_v12 }
 0x32f   : > { %v4752_v36 = vrot.slane %v4751_v51, 4  ;;  %v4770_v51 = vrot.slane %v4768_v20, 5 }
 0x330   : > { %v4839_v41 = vpop.f32.mrf.mxu1  ;;  %v4764_v16 = vrot.slane %v4762_v50, 5  ;;  %v4974_v50 = vsel %vm12186_vm3, %v11205_v26, %v4973_v35  ;;  %v5583_v23 = vrot.slane %v5582_v6, 4 }
 0x331   : > { %v4870_v55 = vadd.f32 %v4839_v41, %v4537_v24  ;;  %v11206_v24 = vrot.slane %v4894_v3, 9  ;;  %v4757_v11 = vsel %vm12237_vm6, %v4752_v36, %v4756_v32  ;;  %v6428_v3 = vld [vmem:[#allocation2 + $0x20] sm:$0xe]  ;;  %v11341_v32 = vrot.slane %v6427_v9, 9  ;;  %v5375_v9 = vld [vmem:[#allocation2 + $0x2c] sm:$0x1] }
 0x332   : > { %v4765_v41 = vor.u32 %v4764_v16, %v4761_v15  ;;  %v4977_v15 = vrot.slane %v4575_v10, 5  ;;  %v4994_v16 = vunpack.c.l.b16 %v4974_v50  ;;  %v5588_v63 = vsel %vm12237_vm6, %v5583_v23, %v5587_v1 }
 0x333   : > { %v5746_v14 = vunpack.c.l.b16 %v5588_v63  ;;  %v11342_v1 = vrot.slane %v6428_v3, 9 }
 0x334   : > { %v4766_v5 = vrot.slane %v4765_v41, 4  ;;  %v4978_v35 = vsel %vm12186_vm3, %v11206_v24, %v4977_v15  ;;  %v6465_v41 = vrot.slane %v6140_v52, 5  ;;  %v6173_v15 = vshll.u32 %v6140_v52, 16 }
 0x335   : > { %v5041_v2 = vpop.f32.mrf.mxu2  ;;  %v4995_v58 = vunpack.c.l.b16 %v4978_v35 }
 0x336   : > { %v13661_v2 = vld [vmem:[#allocation2 + $0x1c] sm:$0x1]  ;;  %v4771_v45 = vsel %vm12237_vm6, %v4766_v5, %v4770_v51  ;;  %v6175_v35 = vrot.slane %v6173_v15, 5  ;;  %v4540_v15 = vadd.f32 %v13495_v40, %v13579_v34 }
 0x337   : > { %v5599_v48 = vshll.u32 %v13661_v2, 16  ;;  %7429 = vst [vmem:[#allocation2 + $0x1c] sm:$0x1] %v7428_v25  ;;  %v4787_v25 = vunpack.c.l.b16 %v4757_v11  ;;  %v4788_v6 = vunpack.c.l.b16 %v4771_v45 }
 0x338   : > { %v13625_v21 = vpop.f32.mrf.mxu1 }
 0x339   : > { %v5601_v22 = vrot.slane %v5599_v48, 5  ;;  %v4871_v26 = vadd.f32 %v13625_v21, %v4538_v60  ;;  %v5002_v48 = vpack.c.b16 %v4995_v58, %v4994_v16  ;;  %v4795_v10 = vpack.c.b16 %v4788_v6, %v4787_v25 }
 0x33a   : > { %v4196_v25 = vadd.f32 %v13583_v37, %v13643_v46 }
 0x33b   : > { %11219 = vmatmul.msk.bf16.gmra.mxu2 %vm433_vm2, %v5002_v48  ;;  %11192 = vmatmul.msk.bf16.gmra.mxu1 %vm433_vm2, %v4795_v10  ;;  %v5378_v10 = vld [vmem:[#allocation2 + $0x30] sm:$0xf] }
 0x33c   : > { %v4403_v40 = vadd.f32 %v13573_v39, %v4196_v25 }
 0x33d   : > { %v5044_v13 = vpop.f32.mrf.mxu2 }
 0x33e   : > { %v5592_v13 = vrot.slane %v5590_v56, 4  ;;  %v6142_v56 = vld [vmem:[#allocation2 + $0x24] sm:$0x1] }
 0x33f   : > { %v6469_v60 = vrot.slane %v6142_v56, 5 }
 0x340   : > { %v13659_v57 = vpop.f32.mrf.mxu1  ;;  %v5596_v62 = vor.u32 %v5595_v53, %v5592_v13  ;;  %v13696_v13 = vld [vmem:[#allocation2 + $0x18] sm:$0xf] }
 0x341   : > { %v6164_v50 = vshrl.u32 %v13696_v13, 16  ;;  %v6167_v23 = vshll.u32 %v13696_v13, 16 }
 0x342   : > { %v5597_v44 = vrot.slane %v5596_v62, 4  ;;  %v6466_v62 = vsel %vm12186_vm3, %v11341_v32, %v6465_v41  ;;  %v4872_v32 = vadd.f32 %v13659_v57, %v13674_v30 }
 0x344   : > { %v5602_v28 = vsel %vm12237_vm6, %v5597_v44, %v5601_v22  ;;  %v6166_v22 = vrot.slane %v6164_v50, 4  ;;  %v6169_v44 = vrot.slane %v6167_v23, 5 }
 0x345   : > { %v5046_v54 = vpop.f32.mrf.mxu2  ;;  %v5747_v36 = vunpack.c.l.b16 %v5602_v28  ;;  %v4198_v28 = vadd.f32 %v13590_v27, %v13657_v17  ;;  %v13721_v17 = vld [vmem:[#allocation2 + $0x24] sm:$0x1] }
 0x346   : > { %v5077_v29 = vadd.f32 %v5046_v54, %v4870_v55  ;;  %v6141_v54 = vld [vmem:[#allocation2 + $0x20] sm:$0xf]  ;;  %v6170_v58 = vor.u32 %v6169_v44, %v6166_v22  ;;  %v5613_v50 = vshll.u32 %v13721_v17, 16 }
 0x347   : > { %v5758_v7 = vpack.c.b16 %v5747_v36, %v5746_v14  ;;  %v6178_v11 = vshrl.u32 %v6141_v54, 16  ;;  %v6181_v14 = vshll.u32 %v6141_v54, 16  ;;  %v6187_v36 = vshll.u32 %v6142_v56, 16 }
 0x348   : > { %v5091_v8 = vmax.f32 %v5077_v29, 0.0  ;;  %v13685_v55 = vpop.f32.mrf.mxu1  ;;  %v6171_v48 = vrot.slane %v6170_v58, 4 }
 0x349   : > { %11263 = vmatmul.msk.bf16.vlgmr.msra.gmra.mxu0 %vm433_vm2, %v5758_v7  ;;  %v6180_v51 = vrot.slane %v6178_v11, 4  ;;  %v6183_v45 = vrot.slane %v6181_v14, 5  ;;  %v6189_v7 = vrot.slane %v6187_v36, 5  ;;  %v5381_v11 = vld [vmem:[#allocation2 + $0x34] sm:$0x1]  ;;  %v4873_v34 = vadd.f32 %v13685_v55, %v4540_v15 }
 0x34a   : > { %v5204_v12 = vpack.c.bf16 %v5091_v8, %v5091_v8  ;;  %v5372_v8 = vld [vmem:[#allocation2 + $0x28] sm:$0xf]  ;;  %v6176_v27 = vsel %vm12237_vm6, %v6171_v48, %v6175_v35 }
 0x34b   : > { %v6334_v57 = vunpack.c.l.b16 %v6176_v27 }
 0x34c   : > { %v5240_v21 = vshrl.u32 %v5204_v12, 16  ;;  %v5243_v53 = vshll.u32 %v5204_v12, 16 }
 0x34d   : > { %v5049_v43 = vpop.f32.mrf.mxu2 }
 0x34e   : > { %v5242_v24 = vrot.slane %v5240_v21, 7  ;;  %v5078_v29 = vadd.f32 %v5049_v43, %v4871_v26  ;;  %v6470_v26 = vsel %vm12186_vm3, %v11342_v1, %v6469_v60  ;;  %v6514_v21 = vunpack.c.l.b16 %v6466_v62  ;;  %v5555_v60 = vld [vmem:[#allocation2 + $0x20] sm:$0xf] }
 0x34f   : > { %v6184_v43 = vor.u32 %v6183_v45, %v6180_v51  ;;  %v5604_v56 = vshrl.u32 %v5555_v60, 16  ;;  %v5607_v30 = vshll.u32 %v5555_v60, 16 }
 0x350   : > { %v5245_v5 = vor.u32 %v5243_v53, %v5242_v24  ;;  %v5246_v20 = vrot.slane %v5242_v24, 4  ;;  %v5092_v16 = vmax.f32 %v5078_v29, 0.0  ;;  %v13705_v63 = vpop.f32.mrf.mxu1  ;;  %v6515_v53 = vunpack.c.l.b16 %v6470_v26 }
 0x351   : > { %v6185_v54 = vrot.slane %v6184_v43, 4  ;;  %v5606_v22 = vrot.slane %v5604_v56, 4 }
 0x352   : > { %v5373_v52 = vsel %vm12906_vm13, %v5245_v5, %v5372_v8  ;;  %v5376_v3 = vsel %vm12864_vm9, %v5246_v20, %v5375_v9  ;;  %v5205_v12 = vpack.c.bf16 %v5092_v16, %v5092_v16  ;;  %v6526_v5 = vpack.c.b16 %v6515_v53, %v6514_v21  ;;  %v11229_v20 = vld [vmem:[#allocation2 + $0x20] sm:$0xf] }
 0x353   : > { %5377 = vst [vmem:[#allocation2 + $0x2c] sm:$0x1] %v5376_v3  ;;  %v6190_v8 = vsel %vm12237_vm6, %v6185_v54, %v6189_v7  ;;  %v5609_v16 = vrot.slane %v5607_v30, 5  ;;  %v13741_v21 = vadd.f32 %v13586_v31, %v4198_v28  ;;  %v4541_v30 = vadd.f32 %v13528_v38, %v4403_v40 }
 0x354   : > { %5374 = vst [vmem:[#allocation2 + $0x28] sm:$0xf] %v5373_v52  ;;  %v5248_v41 = vshrl.u32 %v5205_v12, 16  ;;  %v5251_v6 = vshll.u32 %v5205_v12, 16  ;;  %v6335_v35 = vunpack.c.l.b16 %v6190_v8  ;;  %11359 = vmatmul.msk.bf16.vlgmr.msrb.gmra.mxu2 %vm433_vm2, %v6526_v5 }
 0x355   : > { %v5051_v1 = vpop.f32.mrf.mxu2  ;;  %v5610_v12 = vor.u32 %v5609_v16, %v5606_v22  ;;  %v4874_v8 = vadd.f32 %v13705_v63, %v4541_v30 }
 0x356   : > { %v5250_v37 = vrot.slane %v5248_v41, 7  ;;  %v5079_v46 = vadd.f32 %v5051_v1, %v4872_v32  ;;  %v6346_v36 = vpack.c.b16 %v6335_v35, %v6334_v57  ;;  %v5615_v32 = vrot.slane %v5613_v50, 5  ;;  %v5384_v50 = vld [vmem:[#allocation2 + $0x38] sm:$0xf] }
 0x358   : > { %v5253_v24 = vor.u32 %v5251_v6, %v5250_v37  ;;  %v5254_v29 = vrot.slane %v5250_v37, 4  ;;  %v5093_v23 = vmax.f32 %v5079_v46, 0.0  ;;  %v13724_v62 = vpop.f32.mrf.mxu1  ;;  %v5611_v6 = vrot.slane %v5610_v12, 4  ;;  %11335 = vmatmul.msk.bf16.vlgmr.msrb.gmra.mxu1 %vm433_vm2, %v6346_v36 }
 0x35a   : > { %v5379_v44 = vsel %vm12906_vm13, %v5253_v24, %v5378_v10  ;;  %v5382_v9 = vsel %vm12864_vm9, %v5254_v29, %v5381_v11  ;;  %v5206_v26 = vpack.c.bf16 %v5093_v23, %v5093_v23  ;;  %v13734_v51 = vld [vmem:[#allocation2 + $0x2c] sm:$0x1]  ;;  %v5616_v57 = vsel %vm12237_vm6, %v5611_v6, %v5615_v32  ;;  %v5387_v24 = vld [vmem:[#allocation2 + $0x3c] sm:$0x1] }
 0x35b   : > { %v13736_v14 = vld [vmem:[#allocation2 + $0x2c] sm:$0x1]  ;;  %5383 = vst [vmem:[#allocation2 + $0x34] sm:$0x1] %v5382_v9  ;;  %v11856_v52 = vld [vmem:[#allocation2 + $0x24] sm:$0xf0]  ;;  %v4542_v29 = vadd.f32 %v13548_v49, %v13588_v42  ;;  %v5748_v16 = vunpack.c.l.b16 %v5616_v57 }
 0x35c   : > { %v5557_v3 = vld [vmem:[#allocation2 + $0x28] sm:$0xf]  ;;  %5380 = vst [vmem:[#allocation2 + $0x30] sm:$0xf] %v5379_v44  ;;  %v5256_v58 = vshrl.u32 %v5206_v26, 16  ;;  %v11230_v45 = vor.u32 %v11856_v52, %v11229_v20  ;;  %v5259_v25 = vshll.u32 %v5206_v26, 16 }
 0x35d   : > { %v6429_v41 = vld [vmem:[#allocation2 + $0x28] sm:$0xe]  ;;  %v5054_v48 = vpop.f32.mrf.mxu2  ;;  %v5618_v1 = vshrl.u32 %v5557_v3, 16  ;;  %v5621_v53 = vshll.u32 %v5557_v3, 16  ;;  %v5627_v43 = vshll.u32 %v13734_v51, 16  ;;  %v6473_v31 = vrot.slane %v13736_v14, 5 }
 0x35e   : > { %v5258_v39 = vrot.slane %v5256_v58, 7  ;;  %v5080_v55 = vadd.f32 %v5054_v48, %v4873_v34  ;;  %11252 = vmatmul.msk.bf16.gmra.mxu3 %vm433_vm2, %v11230_v45  ;;  %v6143_v7 = vld [vmem:[#allocation2 + $0x28] sm:$0xf]  ;;  %v11343_v46 = vrot.slane %v6429_v41, 9  ;;  %v6201_v63 = vshll.u32 %v13736_v14, 16 }
 0x35f   : > { %v5620_v60 = vrot.slane %v5618_v1, 4  ;;  %v5623_v37 = vrot.slane %v5621_v53, 5  ;;  %v6192_v23 = vshrl.u32 %v6143_v7, 16  ;;  %v5629_v5 = vrot.slane %v5627_v43, 5 }
 0x360   : > { %v5261_v28 = vor.u32 %v5259_v25, %v5258_v39  ;;  %v5262_v27 = vrot.slane %v5258_v39, 4  ;;  %v5094_v56 = vmax.f32 %v5080_v55, 0.0  ;;  %v13748_v54 = vpop.f32.mrf.mxu1  ;;  %v6474_v26 = vsel %vm12186_vm3, %v11343_v46, %v6473_v31  ;;  %v5390_v25 = vld [vmem:[#allocation2 + $0x40] sm:$0xf] }
 0x361   : > { %v5624_v10 = vor.u32 %v5623_v37, %v5620_v60  ;;  %v6194_v3 = vrot.slane %v6192_v23, 4  ;;  %v6195_v12 = vshll.u32 %v6143_v7, 16  ;;  %v6516_v41 = vunpack.c.l.b16 %v6474_v26  ;;  %v5393_v7 = vld [vmem:[#allocation2 + $0x44] sm:$0x1] }
 0x362   : > { %v5385_v22 = vsel %vm12906_vm13, %v5261_v28, %v5384_v50  ;;  %v5388_v15 = vsel %vm12864_vm9, %v5262_v27, %v5387_v24  ;;  %v5207_v11 = vpack.c.bf16 %v5094_v56, %v5094_v56  ;;  %v6146_v20 = vld [vmem:[#allocation2 + $0x34] sm:$0x1]  ;;  %v6203_v31 = vrot.slane %v6201_v63, 5 }
 0x363   : > { %5389 = vst [vmem:[#allocation2 + $0x3c] sm:$0x1] %v5388_v15  ;;  %v5625_v38 = vrot.slane %v5624_v10, 4  ;;  %v6430_v44 = vld [vmem:[#allocation2 + $0x30] sm:$0xe]  ;;  %v6477_v9 = vrot.slane %v6146_v20, 5  ;;  %v4875_v10 = vadd.f32 %v13724_v62, %v4542_v29  ;;  %v4543_v23 = vadd.f32 %v13566_v18, %v13741_v21 }
 0x364   : > { %5386 = vst [vmem:[#allocation2 + $0x38] sm:$0xf] %v5385_v22  ;;  %v5264_v49 = vshrl.u32 %v5207_v11, 16  ;;  %v5267_v42 = vshll.u32 %v5207_v11, 16  ;;  %v11344_v35 = vrot.slane %v6430_v44, 9  ;;  %v6197_v6 = vrot.slane %v6195_v12, 5 }
 0x365   : > { %v5056_v40 = vpop.f32.mrf.mxu2  ;;  %v5630_v34 = vsel %vm12237_vm6, %v5625_v38, %v5629_v5  ;;  %v6145_v52 = vld [vmem:[#allocation2 + $0x30] sm:$0xf]  ;;  %v13774_v24 = vld [vmem:[#allocation2 + $0x34] sm:$0x1]  ;;  %v6215_v11 = vshll.u32 %v6146_v20, 16 }
 0x366   : > { %v5266_v58 = vrot.slane %v5264_v49, 7  ;;  %v5081_v45 = vadd.f32 %v5056_v40, %v4874_v8  ;;  %v5749_v36 = vunpack.c.l.b16 %v5630_v34  ;;  %v6478_v32 = vsel %vm12186_vm3, %v11344_v35, %v6477_v9  ;;  %v11233_v14 = vld [vmem:[#allocation2 + $0x30] sm:$0xf]  ;;  %v5396_v35 = vld [vmem:[#allocation2 + $0x48] sm:$0xf] }
 0x367   : > { %v6517_v48 = vunpack.c.l.b16 %v6478_v32  ;;  %v6206_v1 = vshrl.u32 %v6145_v52, 16  ;;  %v6198_v46 = vor.u32 %v6197_v6, %v6194_v3  ;;  %v6209_v30 = vshll.u32 %v6145_v52, 16  ;;  %v5559_v50 = vld [vmem:[#allocation2 + $0x30] sm:$0xf] }
 0x368   : > { %v5269_v53 = vor.u32 %v5267_v42, %v5266_v58  ;;  %v5270_v39 = vrot.slane %v5266_v58, 4  ;;  %v5095_v55 = vmax.f32 %v5081_v45, 0.0  ;;  %v5759_v43 = vpack.c.b16 %v5749_v36, %v5748_v16  ;;  %v13767_v60 = vpop.f32.mrf.mxu1 }
 0x369   : > { %v6527_v37 = vpack.c.b16 %v6517_v48, %v6516_v41  ;;  %v6208_v28 = vrot.slane %v6206_v1, 4  ;;  %v6199_v15 = vrot.slane %v6198_v46, 4  ;;  %v6211_v16 = vrot.slane %v6209_v30, 5  ;;  %v5399_v41 = vld [vmem:[#allocation2 + $0x4c] sm:$0x1] }
 0x36a   : > { %v5391_v27 = vsel %vm12906_vm13, %v5269_v53, %v5390_v25  ;;  %v5394_v56 = vsel %vm12864_vm9, %v5270_v39, %v5393_v7  ;;  %v5208_v57 = vpack.c.bf16 %v5095_v55, %v5095_v55  ;;  %11264 = vmatmul.msk.bf16.gmra.mxu0 %vm433_vm2, %v5759_v43  ;;  %v6217_v49 = vrot.slane %v6215_v11, 5  ;;  %v13784_v36 = vld [vmem:[#allocation2 + $0x3c] sm:$0x1] }
 0x36b   : > { %5395 = vst [vmem:[#allocation2 + $0x44] sm:$0x1] %v5394_v56  ;;  %v11857_v22 = vld [vmem:[#allocation2 + $0x34] sm:$0xf0]  ;;  %v6204_v9 = vsel %vm12237_vm6, %v6199_v15, %v6203_v31  ;;  %v5632_v26 = vshrl.u32 %v5559_v50, 16  ;;  %v5635_v62 = vshll.u32 %v5559_v50, 16  ;;  %11360 = vmatmul.msk.bf16.gmra.mxu2 %vm433_vm2, %v6527_v37  ;;  %v6212_v21 = vor.u32 %v6211_v16, %v6208_v28 }
 0x36c   : > { %5392 = vst [vmem:[#allocation2 + $0x40] sm:$0xf] %v5391_v27  ;;  %v5272_v5 = vshrl.u32 %v5208_v57, 16  ;;  %v5275_v8 = vshll.u32 %v5208_v57, 16  ;;  %v11234_v38 = vor.u32 %v11857_v22, %v11233_v14  ;;  %v5561_v42 = vld [vmem:[#allocation2 + $0x38] sm:$0xf]  ;;  %v6336_v20 = vunpack.c.l.b16 %v6204_v9 }
 0x36d   : > { %v5059_v44 = vpop.f32.mrf.mxu2  ;;  %v5634_v40 = vrot.slane %v5632_v26, 4  ;;  %v5637_v34 = vrot.slane %v5635_v62, 5  ;;  %v5641_v52 = vshll.u32 %v13774_v24, 16  ;;  %v5646_v3 = vshrl.u32 %v5561_v42, 16  ;;  %v13792_v7 = vld [vmem:[#allocation2 + $0x3c] sm:$0x1] }
 0x36e   : > { %v5274_v29 = vrot.slane %v5272_v5, 7  ;;  %v5082_v18 = vadd.f32 %v5059_v44, %v4875_v10  ;;  %11253 = vmatmul.msk.bf16.gmra.mxu3 %vm433_vm2, %v11234_v38  ;;  %v6213_v45 = vrot.slane %v6212_v21, 4  ;;  %v5649_v53 = vshll.u32 %v5561_v42, 16  ;;  %v6431_v14 = vld [vmem:[#allocation2 + $0x38] sm:$0xe] }
 0x36f   : > { %v5638_v48 = vor.u32 %v5637_v34, %v5634_v40  ;;  %v5643_v6 = vrot.slane %v5641_v52, 5  ;;  %v5648_v1 = vrot.slane %v5646_v3, 4  ;;  %v5655_v27 = vshll.u32 %v13784_v36, 16  ;;  %v6147_v38 = vld [vmem:[#allocation2 + $0x38] sm:$0xf] }
 0x370   : > { %v5277_v12 = vor.u32 %v5275_v8, %v5274_v29  ;;  %v5278_v63 = vrot.slane %v5274_v29, 4  ;;  %v5096_v58 = vmax.f32 %v5082_v18, 0.0  ;;  %v4859_v32 = vpop.f32.mrf.mxu1  ;;  %v6218_v43 = vsel %vm12237_vm6, %v6213_v45, %v6217_v49  ;;  %v5402_v18 = vld [vmem:[#allocation2 + $0x50] sm:$0xf]  ;;  %v5405_v21 = vld [vmem:[#allocation2 + $0x54] sm:$0x1] }
 0x371   : > { %v6337_v46 = vunpack.c.l.b16 %v6218_v43  ;;  %v5639_v31 = vrot.slane %v5638_v48, 4  ;;  %v5651_v28 = vrot.slane %v5649_v53, 5  ;;  %v4876_v56 = vadd.f32 %v13748_v54, %v4543_v23 }
 0x372   : > { %v5397_v39 = vsel %vm12906_vm13, %v5277_v12, %v5396_v35  ;;  %v5400_v25 = vsel %vm12864_vm9, %v5278_v63, %v5399_v41  ;;  %v5209_v55 = vpack.c.bf16 %v5096_v58, %v5096_v58  ;;  %v13794_v37 = vld [vmem:[#allocation2 + $0x44] sm:$0x1]  ;;  %v4877_v57 = vadd.f32 %v13767_v60, %v13592_v47 }
 0x373   : > { %5401 = vst [vmem:[#allocation2 + $0x4c] sm:$0x1] %v5400_v25  ;;  %v6432_v10 = vld [vmem:[#allocation2 + $0x40] sm:$0xe]  ;;  %v6347_v22 = vpack.c.b16 %v6337_v46, %v6336_v20  ;;  %v5644_v11 = vsel %vm12237_vm6, %v5639_v31, %v5643_v6  ;;  %v5652_v5 = vor.u32 %v5651_v28, %v5648_v1  ;;  %v5657_v8 = vrot.slane %v5655_v27, 5 }
 0x374   : > { %5398 = vst [vmem:[#allocation2 + $0x48] sm:$0xf] %v5397_v39  ;;  %v5280_v30 = vshrl.u32 %v5209_v55, 16  ;;  %v5283_v50 = vshll.u32 %v5209_v55, 16  ;;  %v5750_v9 = vunpack.c.l.b16 %v5644_v11  ;;  %v11345_v49 = vrot.slane %v6431_v14, 9 }
 0x375   : > { %v5061_v15 = vpop.f32.mrf.mxu2  ;;  %11336 = vmatmul.msk.bf16.gmra.mxu1 %vm433_vm2, %v6347_v22  ;;  %v5653_v54 = vrot.slane %v5652_v5, 4  ;;  %v6481_v47 = vrot.slane %v13792_v7, 5  ;;  %v11346_v60 = vrot.slane %v6432_v10, 9  ;;  %v6485_v23 = vrot.slane %v13794_v37, 5  ;;  %v11237_v58 = vld [vmem:[#allocation2 + $0x40] sm:$0xf] }
 0x376   : > { %v5282_v16 = vrot.slane %v5280_v30, 7  ;;  %v5083_v44 = vadd.f32 %v5061_v15, %v4876_v56  ;;  %v6220_v29 = vshrl.u32 %v6147_v38, 16  ;;  %v6223_v34 = vshll.u32 %v6147_v38, 16  ;;  %v6149_v45 = vld [vmem:[#allocation2 + $0x40] sm:$0xf] }
 0x377   : > { %v5658_v20 = vsel %vm12237_vm6, %v5653_v54, %v5657_v8  ;;  %v6482_v35 = vsel %vm12186_vm3, %v11345_v49, %v6481_v47  ;;  %v6486_v40 = vsel %vm12186_vm3, %v11346_v60, %v6485_v23  ;;  %v5563_v43 = vld [vmem:[#allocation2 + $0x40] sm:$0xf]  ;;  %v6229_v28 = vshll.u32 %v13792_v7, 16  ;;  %v5408_v22 = vld [vmem:[#allocation2 + $0x58] sm:$0xf] }
 0x378   : > { %v5285_v42 = vor.u32 %v5283_v50, %v5282_v16  ;;  %v5286_v26 = vrot.slane %v5282_v16, 4  ;;  %v5097_v62 = vmax.f32 %v5083_v44, 0.0  ;;  %v5751_v63 = vunpack.c.l.b16 %v5658_v20  ;;  %v13820_v8 = vld [vmem:[#allocation2 + $0x44] sm:$0x1] }
 0x379   : > { %v6518_v32 = vunpack.c.l.b16 %v6482_v35  ;;  %v6519_v41 = vunpack.c.l.b16 %v6486_v40  ;;  %v6222_v6 = vrot.slane %v6220_v29, 4  ;;  %v6225_v1 = vrot.slane %v6223_v34, 5 }
 0x37a   : > { %v5403_v52 = vsel %vm12906_vm13, %v5285_v42, %v5402_v18  ;;  %v5406_v3 = vsel %vm12864_vm9, %v5286_v26, %v5405_v21  ;;  %v5210_v12 = vpack.c.bf16 %v5097_v62, %v5097_v62  ;;  %v5760_v25 = vpack.c.b16 %v5751_v63, %v5750_v9  ;;  %v13828_v29 = vld [vmem:[#allocation2 + $0x4c] sm:$0x1] }
 0x37b   : > { %5407 = vst [vmem:[#allocation2 + $0x54] sm:$0x1] %v5406_v3  ;;  %v11858_v48 = vld [vmem:[#allocation2 + $0x44] sm:$0xf0]  ;;  %v6528_v14 = vpack.c.b16 %v6519_v41, %v6518_v32  ;;  %v6226_v31 = vor.u32 %v6225_v1, %v6222_v6  ;;  %v6234_v27 = vshrl.u32 %v6149_v45, 16  ;;  %v6237_v50 = vshll.u32 %v6149_v45, 16 }
 0x37c   : > { %5404 = vst [vmem:[#allocation2 + $0x50] sm:$0xf] %v5403_v52  ;;  %v5288_v53 = vshrl.u32 %v5210_v12, 16  ;;  %v5291_v39 = vshll.u32 %v5210_v12, 16  ;;  %v11238_v55 = vor.u32 %v11858_v48, %v11237_v58  ;;  %11265 = vmatmul.msk.bf16.gmra.mxu0 %vm433_vm2, %v5760_v25  ;;  %v6243_v10 = vshll.u32 %v13794_v37, 16 }
 0x37d   : > { %v5064_v46 = vpop.f32.mrf.mxu2  ;;  %11361 = vmatmul.msk.bf16.gmra.mxu2 %vm433_vm2, %v6528_v14  ;;  %v6227_v15 = vrot.slane %v6226_v31, 4  ;;  %v6231_v11 = vrot.slane %v6229_v28, 5  ;;  %v6236_v5 = vrot.slane %v6234_v27, 4  ;;  %v5660_v38 = vshrl.u32 %v5563_v43, 16  ;;  %v5565_v49 = vld [vmem:[#allocation2 + $0x48] sm:$0xf] }
 0x37e   : > { %v5290_v56 = vrot.slane %v5288_v53, 7  ;;  %v5084_v30 = vadd.f32 %v5064_v46, %v4877_v57  ;;  %11254 = vmatmul.msk.bf16.gmra.mxu3 %vm433_vm2, %v11238_v55  ;;  %v6239_v9 = vrot.slane %v6237_v50, 5  ;;  %v5411_v57 = vld [vmem:[#allocation2 + $0x5c] sm:$0x1]  ;;  %v6245_v47 = vrot.slane %v6243_v10, 5 }
 0x37f   : > { %v6232_v54 = vsel %vm12237_vm6, %v6227_v15, %v6231_v11  ;;  %v5662_v37 = vrot.slane %v5660_v38, 4  ;;  %v5663_v60 = vshll.u32 %v5563_v43, 16  ;;  %v13830_v18 = vld [vmem:[#allocation2 + $0x4c] sm:$0x1]  ;;  %v6433_v21 = vld [vmem:[#allocation2 + $0x48] sm:$0xe] }
 0x380   : > { %v5293_v7 = vor.u32 %v5291_v39, %v5290_v56  ;;  %v5294_v16 = vrot.slane %v5290_v56, 4  ;;  %v5098_v44 = vmax.f32 %v5084_v30, 0.0  ;;  %v6240_v62 = vor.u32 %v6239_v9, %v6236_v5  ;;  %v6151_v50 = vld [vmem:[#allocation2 + $0x48] sm:$0xf]  ;;  %v5414_v10 = vld [vmem:[#allocation2 + $0x60] sm:$0xf] }
 0x381   : > { %v6338_v20 = vunpack.c.l.b16 %v6232_v54  ;;  %v5665_v35 = vrot.slane %v5663_v60, 5  ;;  %v5669_v40 = vshll.u32 %v13820_v8, 16  ;;  %v5674_v34 = vshrl.u32 %v5565_v49, 16 }
 0x382   : > { %v5409_v23 = vsel %vm12906_vm13, %v5293_v7, %v5408_v22  ;;  %v5412_v42 = vsel %vm12864_vm9, %v5294_v16, %v5411_v57  ;;  %v5211_v26 = vpack.c.bf16 %v5098_v44, %v5098_v44  ;;  %v6241_v12 = vrot.slane %v6240_v62, 4  ;;  %v13836_v25 = vld [vmem:[#allocation2 + $0x54] sm:$0x1]  ;;  %v5417_v22 = vld [vmem:[#allocation2 + $0x64] sm:$0x1] }
 0x383   : > { %5413 = vst [vmem:[#allocation2 + $0x5c] sm:$0x1] %v5412_v42  ;;  %v5677_v63 = vshll.u32 %v5565_v49, 16  ;;  %v5666_v45 = vor.u32 %v5665_v35, %v5662_v37  ;;  %v5671_v32 = vrot.slane %v5669_v40, 5  ;;  %v5676_v41 = vrot.slane %v5674_v34, 4 }
 0x384   : > { %5410 = vst [vmem:[#allocation2 + $0x58] sm:$0xf] %v5409_v23  ;;  %v5296_v52 = vshrl.u32 %v5211_v26, 16  ;;  %v5299_v3 = vshll.u32 %v5211_v26, 16  ;;  %v5683_v48 = vshll.u32 %v13828_v29, 16  ;;  %v6246_v53 = vsel %vm12237_vm6, %v6241_v12, %v6245_v47 }
 0x385   : > { %v5066_v58 = vpop.f32.mrf.mxu2  ;;  %v6434_v6 = vld [vmem:[#allocation2 + $0x50] sm:$0xe]  ;;  %v5679_v39 = vrot.slane %v5677_v63, 5  ;;  %v11347_v55 = vrot.slane %v6433_v21, 9  ;;  %v6339_v43 = vunpack.c.l.b16 %v6246_v53  ;;  %v5667_v14 = vrot.slane %v5666_v45, 4 }
 0x386   : > { %v5298_v1 = vrot.slane %v5296_v52, 7  ;;  %v5685_v46 = vrot.slane %v5683_v48, 5  ;;  %v6489_v31 = vrot.slane %v13830_v18, 5  ;;  %v11348_v30 = vrot.slane %v6434_v6, 9  ;;  %v11241_v49 = vld [vmem:[#allocation2 + $0x50] sm:$0xf] }
 0x387   : > { %v5680_v56 = vor.u32 %v5679_v39, %v5676_v41  ;;  %v6348_v15 = vpack.c.b16 %v6339_v43, %v6338_v20  ;;  %v5672_v11 = vsel %vm12237_vm6, %v5667_v14, %v5671_v32  ;;  %v6493_v38 = vrot.slane %v13836_v25, 5  ;;  %v6153_v57 = vld [vmem:[#allocation2 + $0x50] sm:$0xf] }
 0x388   : > { %v5301_v28 = vor.u32 %v5299_v3, %v5298_v1  ;;  %v5302_v27 = vrot.slane %v5298_v1, 4  ;;  %v6490_v5 = vsel %vm12186_vm3, %v11347_v55, %v6489_v31  ;;  %v5752_v9 = vunpack.c.l.b16 %v5672_v11  ;;  %v5567_v20 = vld [vmem:[#allocation2 + $0x50] sm:$0xf]  ;;  %v13854_v3 = vld [vmem:[#allocation2 + $0x54] sm:$0x1] }
 0x389   : > { %v5681_v44 = vrot.slane %v5680_v56, 4  ;;  %11337 = vmatmul.msk.bf16.gmra.mxu1 %vm433_vm2, %v6348_v15  ;;  %v6494_v54 = vsel %vm12186_vm3, %v11348_v30, %v6493_v38  ;;  %v6520_v47 = vunpack.c.l.b16 %v6490_v5  ;;  %v6248_v60 = vshrl.u32 %v6151_v50, 16 }
 0x38a   : > { %v5415_v7 = vsel %vm12906_vm13, %v5301_v28, %v5414_v10  ;;  %v5418_v16 = vsel %vm12864_vm9, %v5302_v27, %v5417_v22  ;;  %v6251_v23 = vshll.u32 %v6151_v50, 16  ;;  %v6521_v26 = vunpack.c.l.b16 %v6494_v54  ;;  %v13857_v6 = vld [vmem:[#allocation2 + $0x5c] sm:$0x1] }
 0x38b   : > { %5419 = vst [vmem:[#allocation2 + $0x64] sm:$0x1] %v5418_v16  ;;  %v11859_v37 = vld [vmem:[#allocation2 + $0x54] sm:$0xf0]  ;;  %v5686_v42 = vsel %vm12237_vm6, %v5681_v44, %v5685_v46  ;;  %v6257_v21 = vshll.u32 %v13830_v18, 16  ;;  %v6250_v40 = vrot.slane %v6248_v60, 4 }
 0x38c   : > { %5416 = vst [vmem:[#allocation2 + $0x60] sm:$0xf] %v5415_v7  ;;  %v11242_v62 = vor.u32 %v11859_v37, %v11241_v49  ;;  %v5753_v35 = vunpack.c.l.b16 %v5686_v42  ;;  %v6253_v34 = vrot.slane %v6251_v23, 5  ;;  %v6262_v52 = vshrl.u32 %v6153_v57, 16  ;;  %v5569_v45 = vld [vmem:[#allocation2 + $0x58] sm:$0xf] }
 0x38d   : > { %v6529_v12 = vpack.c.b16 %v6521_v26, %v6520_v47  ;;  %v6259_v63 = vrot.slane %v6257_v21, 5  ;;  %v6265_v58 = vshll.u32 %v6153_v57, 16  ;;  %v5688_v1 = vshrl.u32 %v5567_v20, 16  ;;  %v6435_v43 = vld [vmem:[#allocation2 + $0x58] sm:$0xe] }
 0x38e   : > { %11255 = vmatmul.msk.bf16.gmra.mxu3 %vm433_vm2, %v11242_v62  ;;  %v5761_v32 = vpack.c.b16 %v5753_v35, %v5752_v9  ;;  %v6254_v41 = vor.u32 %v6253_v34, %v6250_v40  ;;  %v6264_v48 = vrot.slane %v6262_v52, 4  ;;  %v6271_v53 = vshll.u32 %v13836_v25, 16  ;;  %v13864_v50 = vld [vmem:[#allocation2 + $0x5c] sm:$0x1]  ;;  %v6155_v47 = vld [vmem:[#allocation2 + $0x58] sm:$0xf] }
 0x38f   : > { %11362 = vmatmul.msk.bf16.gmra.mxu2 %vm433_vm2, %v6529_v12  ;;  %v6267_v18 = vrot.slane %v6265_v58, 5  ;;  %v5691_v39 = vshll.u32 %v5567_v20, 16  ;;  %v5697_v55 = vshll.u32 %v13854_v3, 16  ;;  %v5690_v46 = vrot.slane %v5688_v1, 4  ;;  %v11860_v62 = vld [vmem:[#allocation2 + $0x64] sm:$0xf0] }
 0x390   : > { %11266 = vmatmul.msk.bf16.gmra.mxu0 %vm433_vm2, %v5761_v32  ;;  %v6255_v14 = vrot.slane %v6254_v41, 4  ;;  %v5702_v31 = vshrl.u32 %v5569_v45, 16  ;;  %v5705_v28 = vshll.u32 %v5569_v45, 16  ;;  %v5711_v30 = vshll.u32 %v13857_v6, 16 }
 0x391   : > { %v6268_v27 = vor.u32 %v6267_v18, %v6264_v48  ;;  %v5693_v56 = vrot.slane %v5691_v39, 5  ;;  %v11349_v5 = vrot.slane %v6435_v43, 9  ;;  %v6273_v7 = vrot.slane %v6271_v53, 5  ;;  %v13886_v18 = vld [vmem:[#allocation2 + $0x24] sm:$0x1] }
 0x392   : > { %v13866_v10 = vld [vmem:[#allocation2 + $0x64] sm:$0x1]  ;;  %v6260_v25 = vsel %vm12237_vm6, %v6255_v14, %v6259_v63  ;;  %v5704_v22 = vrot.slane %v5702_v31, 4  ;;  %v5707_v15 = vrot.slane %v5705_v28, 5  ;;  %v5699_v44 = vrot.slane %v5697_v55, 5 }
 0x393   : > { %v6436_v11 = vld [vmem:[#allocation2 + $0x60] sm:$0xe]  ;;  %v6269_v38 = vrot.slane %v6268_v27, 4  ;;  %v5694_v16 = vor.u32 %v5693_v56, %v5690_v46  ;;  %v6497_v49 = vrot.slane %v13864_v50, 5  ;;  %v6501_v54 = vrot.slane %v13866_v10, 5 }
 0x394   : > { %v5708_v9 = vor.u32 %v5707_v15, %v5704_v22  ;;  %v11350_v57 = vrot.slane %v6436_v11, 9  ;;  %v6340_v60 = vunpack.c.l.b16 %v6260_v25  ;;  %v5713_v42 = vrot.slane %v5711_v30, 5  ;;  %v11245_v26 = vld [vmem:[#allocation2 + $0x60] sm:$0xf]  ;;  %v5839_v27 = vld [vmem:[#allocation2 + $0x10] sm:$0xe] }
 0x395   : > { %v6274_v37 = vsel %vm12237_vm6, %v6269_v38, %v6273_v7  ;;  %v5695_v23 = vrot.slane %v5694_v16, 4  ;;  %v6498_v35 = vsel %vm12186_vm3, %v11349_v5, %v6497_v49  ;;  %v7425_v34 = vsel %vm12906_vm13, %v12914_v19, %v13696_v13  ;;  %v6157_v63 = vld [vmem:[#allocation2 + $0x60] sm:$0xf]  ;;  %v5573_v13 = vld [vmem:[#allocation2 + $0x68] sm:$0xf] }
 0x396   : > { %v6341_v21 = vunpack.c.l.b16 %v6274_v37  ;;  %v5709_v20 = vrot.slane %v5708_v9, 4  ;;  %v6502_v40 = vsel %vm12186_vm3, %v11350_v57, %v6501_v54  ;;  %v6276_v58 = vshrl.u32 %v6155_v47, 16  ;;  %v5571_v1 = vld [vmem:[#allocation2 + $0x60] sm:$0xf]  ;;  %v13891_v25 = vld [vmem:[#allocation2 + $0x64] sm:$0x1] }
 0x397   : > { %v5700_v52 = vsel %vm12237_vm6, %v5695_v23, %v5699_v44  ;;  %v6523_v12 = vunpack.c.l.b16 %v6502_v40  ;;  %v11246_v41 = vor.u32 %v11860_v62, %v11245_v26  ;;  %v6279_v48 = vshll.u32 %v6155_v47, 16  ;;  %v11879_v11 = vld [vmem:[%s15174_s1 + $0xc0] sm:$0xff]  ;;  %v5840_v44 = vld [vmem:[#allocation2 + $0x18] sm:$0xe] }
 0x398   : > { %v6349_v45 = vpack.c.b16 %v6341_v21, %v6340_v60  ;;  %v5714_v32 = vsel %vm12237_vm6, %v5709_v20, %v5713_v42  ;;  %v5754_v53 = vunpack.c.l.b16 %v5700_v52  ;;  %v6522_v55 = vunpack.c.l.b16 %v6498_v35  ;;  %v13903_v60 = vld [vmem:[#allocation2 + $0x6c] sm:$0x1]  ;;  %6684 = vmatpush.bf16.msrb.mxu3 %v11879_v11  ;;  %v6159_v20 = vld [vmem:[#allocation2 + $0x68] sm:$0xf]  ;;  %v7430_v11 = vld [vmem:[#allocation2 + $0x20] sm:$0xf] }
 0x399   : > { %v5755_v39 = vunpack.c.l.b16 %v5714_v32  ;;  %v6278_v43 = vrot.slane %v6276_v58, 4  ;;  %v6281_v14 = vrot.slane %v6279_v48, 5  ;;  %v6285_v46 = vshll.u32 %v13864_v50, 16  ;;  %v13896_v50 = vld [vmem:[#allocation2 + $0x18] sm:$0xf]  ;;  %v11881_v58 = vld [vmem:[%s15174_s1 + $0xd0] sm:$0xff] }
 0x39a   : > { %11338 = vmatmul.msk.bf16.gmra.mxu1 %vm433_vm2, %v6349_v45  ;;  %v6290_v31 = vshrl.u32 %v6157_v63, 16  ;;  %v6293_v28 = vshll.u32 %v6157_v63, 16  ;;  %v6530_v56 = vpack.c.b16 %v6523_v12, %v6522_v55  ;;  %v6299_v30 = vshll.u32 %v13866_v10, 16  ;;  %7426 = vst [vmem:[#allocation2 + $0x18] sm:$0xf] %v7425_v34  ;;  %v4391_v35 = vpop.f32.mrf.mxu3  ;;  %v11880_v63 = vld [vmem:[%s15174_s1 + $0xc8] sm:$0xff] }
 0x39b   : > { %v5716_v22 = vshrl.u32 %v5571_v1, 16  ;;  %v5719_v15 = vshll.u32 %v5571_v1, 16  ;;  %v5762_v5 = vpack.c.b16 %v5755_v39, %v5754_v53  ;;  %v6282_v38 = vor.u32 %v6281_v14, %v6278_v43  ;;  %v13920_v55 = vld [vmem:[#allocation2 + $0x6c] sm:$0x1]  ;;  %6972 = vmatpush.bf16.msra.mxu0 %v11880_v63  ;;  %7152 = vmatpush.bf16.msra.mxu1 %v11881_v58  ;;  %v5841_v35 = vld [vmem:[#allocation2 + $0x20] sm:$0xe] }
 0x39c   : > { %v6292_v7 = vrot.slane %v6290_v31, 4  ;;  %v6295_v16 = vrot.slane %v6293_v28, 5  ;;  %v7434_v10 = vsel %vm12864_vm9, %v12931_v0, %v13886_v18  ;;  %v5730_v57 = vshrl.u32 %v5573_v13, 16  ;;  %v6161_v31 = vld [vmem:[#allocation2 + $0x70] sm:$0xf] }
 0x39d   : > { %v5718_v9 = vrot.slane %v5716_v22, 4  ;;  %v5721_v49 = vrot.slane %v5719_v15, 5  ;;  %v6283_v54 = vrot.slane %v6282_v38, 4  ;;  %v6287_v47 = vrot.slane %v6285_v46, 5  ;;  %v13928_v15 = vld [vmem:[#allocation2 + $0x74] sm:$0x1] }
 0x39e   : > { %11256 = vmatmul.msk.bf16.gmra.mxu3 %vm433_vm2, %v11246_v41  ;;  %v6296_v37 = vor.u32 %v6295_v16, %v6292_v7  ;;  %v5733_v23 = vshll.u32 %v5573_v13, 16  ;;  %v5732_v26 = vrot.slane %v5730_v57, 4  ;;  %v5739_v62 = vshll.u32 %v13903_v60, 16  ;;  %v11994_v41 = vld [vmem:[#allocation2 + $0x14] sm:$0x1] }
 0x39f   : > { %11363 = vmatmul.msk.bf16.gmra.mxu2 %vm433_vm2, %v6530_v56  ;;  %v5722_v42 = vor.u32 %v5721_v49, %v5718_v9  ;;  %v11269_v21 = vrot.slane %v5839_v27, 9  ;;  %v6301_v34 = vrot.slane %v6299_v30, 5  ;;  %v5725_v52 = vshll.u32 %v13891_v25, 16  ;;  %v13924_v27 = vld [vmem:[#allocation2 + $0x24] sm:$0x1] }
 0x3a0   : > { %11267 = vmatmul.msk.bf16.gmra.mxu0 %vm433_vm2, %v5762_v5  ;;  %v6297_v40 = vrot.slane %v6296_v37, 4  ;;  %v5735_v12 = vrot.slane %v5733_v23, 5  ;;  %v6288_v45 = vsel %vm12237_vm6, %v6283_v54, %v6287_v47  ;;  %v5877_v48 = vrot.slane %v11994_v41, 5  ;;  %7435 = vst [vmem:[#allocation2 + $0x24] sm:$0x1] %v7434_v10 }
 0x3a1   : > { %v5723_v32 = vrot.slane %v5722_v42, 4  ;;  %v11270_v1 = vrot.slane %v5840_v44, 9  ;;  %v5881_v39 = vrot.slane %v13661_v2, 5  ;;  %v6304_v43 = vshrl.u32 %v6159_v20, 16  ;;  %v13940_v63 = vld [vmem:[#allocation2 + $0x20] sm:$0xf] }
 0x3a2   : > { %v6302_v18 = vsel %vm12237_vm6, %v6297_v40, %v6301_v34  ;;  %v5736_v53 = vor.u32 %v5735_v12, %v5732_v26  ;;  %v5741_v14 = vrot.slane %v5739_v62, 5  ;;  %v5878_v46 = vsel %vm12186_vm3, %v11269_v21, %v5877_v48  ;;  %v4393_v10 = vpop.f32.mrf.mxu3  ;;  %v7016_v12 = vld [vmem:[#allocation2 + $0x20] sm:$0xe] }
 0x3a3   : > { %v6343_v13 = vunpack.c.l.b16 %v6302_v18  ;;  %v6307_v28 = vshll.u32 %v6159_v20, 16  ;;  %v6342_v56 = vunpack.c.l.b16 %v6288_v45  ;;  %v5727_v30 = vrot.slane %v5725_v52, 5  ;;  %v11864_v20 = vld [vmem:[#allocation2 + $0x1c] sm:$0xf0] }
 0x3a4   : > { %v5737_v22 = vrot.slane %v5736_v53, 4  ;;  %v5882_v2 = vsel %vm12186_vm3, %v11270_v1, %v5881_v39  ;;  %v5926_v5 = vunpack.c.l.b16 %v5878_v46  ;;  %v6306_v7 = vrot.slane %v6304_v43, 4  ;;  %v13942_v58 = vld [vmem:[#allocation2 + $0x20] sm:$0xf]  ;;  %v5842_v1 = vld [vmem:[#allocation2 + $0x28] sm:$0xe]  ;;  %v4529_v53 = vpop.f32.mrf.mxu0 }
 0x3a5   : > { %v5927_v38 = vunpack.c.l.b16 %v5882_v2  ;;  %v6309_v16 = vrot.slane %v6307_v28, 5  ;;  %v6350_v44 = vpack.c.b16 %v6343_v13, %v6342_v56  ;;  %v5728_v9 = vsel %vm12237_vm6, %v5723_v32, %v5727_v30  ;;  %v7018_v53 = vld [vmem:[#allocation2 + $0x30] sm:$0xe] }
 0x3a6   : > { %v6318_v49 = vshrl.u32 %v6161_v31, 16  ;;  %v6321_v57 = vshll.u32 %v6161_v31, 16  ;;  %v5742_v54 = vsel %vm12237_vm6, %v5737_v22, %v5741_v14  ;;  %v6313_v37 = vshll.u32 %v13920_v55, 16 }
 0x3a7   : > { %v6310_v47 = vor.u32 %v6309_v16, %v6306_v7  ;;  %v6327_v23 = vshll.u32 %v13928_v15, 16  ;;  %v7431_v42 = vsel %vm12906_vm13, %v12914_v19, %v7430_v11  ;;  %v5938_v21 = vpack.c.b16 %v5927_v38, %v5926_v5  ;;  %v13957_v16 = vld [vmem:[#allocation2 + $0x2c] sm:$0x1] }
 0x3a8   : > { %v6320_v26 = vrot.slane %v6318_v49, 4  ;;  %v6323_v62 = vrot.slane %v6321_v57, 5  ;;  %v5756_v40 = vunpack.c.l.b16 %v5728_v9  ;;  %v5757_v34 = vunpack.c.l.b16 %v5742_v54  ;;  %7432 = vst [vmem:[#allocation2 + $0x20] sm:$0xf] %v7431_v42 }
 0x3a9   : > { %v6311_v45 = vrot.slane %v6310_v47, 4  ;;  %v6315_v32 = vrot.slane %v6313_v37, 5  ;;  %v6329_v41 = vrot.slane %v6327_v23, 5  ;;  %v11271_v13 = vrot.slane %v5841_v35, 9  ;;  %v5844_v47 = vld [vmem:[#allocation2 + $0x38] sm:$0xe] }
 0x3aa   : > { %11339 = vmatmul.msk.bf16.gmra.mxu1 %vm433_vm2, %v6350_v44  ;;  %v6324_v52 = vor.u32 %v6323_v62, %v6320_v26  ;;  %v5763_v18 = vpack.c.b16 %v5757_v34, %v5756_v40  ;;  %v5885_v14 = vrot.slane %v13721_v17, 5  ;;  %v11272_v46 = vrot.slane %v5842_v1, 9  ;;  %v5521_v7 = vpop.f32.mrf.mxu3  ;;  %v7017_v17 = vld [vmem:[#allocation2 + $0x28] sm:$0xe]  ;;  %v5843_v37 = vld [vmem:[#allocation2 + $0x30] sm:$0xe] }
 0x3ab   : > { %v6316_v39 = vsel %vm12237_vm6, %v6311_v45, %v6315_v32  ;;  %v5889_v31 = vrot.slane %v13734_v51, 5  ;;  %v11298_v51 = vor.u32 %v11864_v20, %v13896_v50  ;;  %v11413_v9 = vrot.slane %v7016_v12, 9  ;;  %v13975_v45 = vld [vmem:[#allocation2 + $0x3c] sm:$0x1]  ;;  %v7019_v32 = vld [vmem:[#allocation2 + $0x38] sm:$0xe] }
 0x3ac   : > { %v6325_v48 = vrot.slane %v6324_v52, 4  ;;  %v6344_v28 = vunpack.c.l.b16 %v6316_v39  ;;  %v5886_v30 = vsel %vm12186_vm3, %v11271_v13, %v5885_v14  ;;  %v4531_v11 = vpop.f32.mrf.mxu0  ;;  %v7054_v49 = vrot.slane %v13924_v27, 5  ;;  %v11301_v39 = vld [vmem:[#allocation2 + $0x28] sm:$0xf] }
 0x3ad   : > { %v5890_v22 = vsel %vm12186_vm3, %v11272_v46, %v5889_v31  ;;  %v5928_v5 = vunpack.c.l.b16 %v5886_v30  ;;  %v11414_v57 = vrot.slane %v7017_v17, 9  ;;  %v7058_v54 = vrot.slane %v13957_v16, 5  ;;  %v5846_v14 = vld [vmem:[#allocation2 + $0x48] sm:$0xe] }
 0x3ae   : > { %11287 = vmatmul.msk.bf16.vlgmr.msra.gmra.mxu3 %vm433_vm2, %v5938_v21  ;;  %v6330_v43 = vsel %vm12237_vm6, %v6325_v48, %v6329_v41  ;;  %v5929_v38 = vunpack.c.l.b16 %v5890_v22  ;;  %v11274_v23 = vrot.slane %v5844_v47, 9  ;;  %v5897_v10 = vrot.slane %v13784_v36, 5  ;;  %v11865_v41 = vld [vmem:[#allocation2 + $0x2c] sm:$0xf0] }
 0x3af   : > { %v6345_v56 = vunpack.c.l.b16 %v6330_v43  ;;  %v7055_v42 = vsel %vm12186_vm3, %v11413_v9, %v7054_v49  ;;  %v7059_v50 = vsel %vm12186_vm3, %v11414_v57, %v7058_v54  ;;  %v11273_v62 = vrot.slane %v5843_v37, 9 }
 0x3b0   : > { %11268 = vmatmul.msk.bf16.gmra.mxu0 %vm433_vm2, %v5763_v18  ;;  %v5939_v44 = vpack.c.b16 %v5929_v38, %v5928_v5  ;;  %v5893_v21 = vrot.slane %v13774_v24, 5  ;;  %v7103_v20 = vunpack.c.l.b16 %v7055_v42  ;;  %v7104_v35 = vunpack.c.l.b16 %v7059_v50  ;;  %v13977_v18 = vld [vmem:[#allocation2 + $0x34] sm:$0x1]  ;;  %v7487_v50 = vld [vmem:[#allocation2 + $0x6c] sm:$0x1] }
 0x3b1   : > { %v6351_v2 = vpack.c.b16 %v6345_v56, %v6344_v28  ;;  %v5898_v40 = vsel %vm12186_vm3, %v11274_v23, %v5897_v10  ;;  %v11416_v43 = vrot.slane %v7019_v32, 9  ;;  %v7066_v13 = vrot.slane %v13975_v45, 5  ;;  %v5845_v56 = vld [vmem:[#allocation2 + $0x40] sm:$0xe]  ;;  %v7021_v23 = vld [vmem:[#allocation2 + $0x48] sm:$0xe] }
 0x3b2   : > { %v5523_v26 = vpop.f32.mrf.mxu3  ;;  %v5894_v34 = vsel %vm12186_vm3, %v11273_v62, %v5893_v21  ;;  %v5931_v52 = vunpack.c.l.b16 %v5898_v40  ;;  %v7115_v36 = vpack.c.b16 %v7104_v35, %v7103_v20  ;;  %v11302_v46 = vor.u32 %v11865_v41, %v11301_v39  ;;  %v11866_v10 = vld [vmem:[#allocation2 + $0x3c] sm:$0xf0]  ;;  %v13996_v62 = vld [vmem:[#allocation2 + $0x44] sm:$0x1]  ;;  %v11305_v20 = vld [vmem:[#allocation2 + $0x38] sm:$0xf] }
 0x3b3   : > { %v5930_v12 = vunpack.c.l.b16 %v5894_v34  ;;  %v11415_v31 = vrot.slane %v7018_v53, 9  ;;  %v7062_v28 = vrot.slane %v13977_v18, 5  ;;  %v11276_v22 = vrot.slane %v5846_v14, 9  ;;  %v7020_v21 = vld [vmem:[#allocation2 + $0x40] sm:$0xe] }
 0x3b4   : > { %v7067_v11 = vsel %vm12186_vm3, %v11416_v43, %v7066_v13  ;;  %v11275_v5 = vrot.slane %v5845_v56, 9  ;;  %v5901_v38 = vrot.slane %v13820_v8, 5  ;;  %v13994_v8 = vld [vmem:[#allocation2 + $0x4c] sm:$0x1]  ;;  %v11418_v35 = vrot.slane %v7021_v23, 9 }
 0x3b5   : > { %v5940_v1 = vpack.c.b16 %v5931_v52, %v5930_v12  ;;  %v7063_v7 = vsel %vm12186_vm3, %v11415_v31, %v7062_v28  ;;  %v7074_v40 = vrot.slane %v13994_v8, 5  ;;  %v5848_v34 = vld [vmem:[#allocation2 + $0x58] sm:$0xe]  ;;  %v11306_v52 = vor.u32 %v11866_v10, %v11305_v20  ;;  %v5847_v41 = vld [vmem:[#allocation2 + $0x50] sm:$0xe] }
 0x3b6   : > { %v7105_v49 = vunpack.c.l.b16 %v7063_v7  ;;  %v5902_v57 = vsel %vm12186_vm3, %v11275_v5, %v5901_v38  ;;  %v11417_v12 = vrot.slane %v7020_v21, 9  ;;  %v7070_v32 = vrot.slane %v13996_v62, 5  ;;  %v14009_v39 = vld [vmem:[%s15175_s2 + $0x2] ss:$0 sm:$0xff]  ;;  %v14013_v13 = vld [vmem:[#allocation2 + $0x6c] sm:$0x1] }
 0x3b7   : > { %v5932_v37 = vunpack.c.l.b16 %v5902_v57  ;;  %v5913_v53 = vrot.slane %v13857_v6, 5  ;;  %v7075_v43 = vsel %vm12186_vm3, %v11418_v35, %v7074_v40  ;;  %v11277_v14 = vrot.slane %v5847_v41, 9  ;;  %v5849_v10 = vld [vmem:[#allocation2 + $0x60] sm:$0xe] }
 0x3b8   : > { %v4862_v24 = vpop.f32.mrf.mxu1  ;;  %v7071_v31 = vsel %vm12186_vm3, %v11417_v12, %v7070_v32  ;;  %v7108_v28 = vunpack.c.l.b16 %v7075_v43  ;;  %v11279_v40 = vrot.slane %v5849_v10, 9 }
 0x3b9   : > { %v11278_v24 = vrot.slane %v5848_v34, 9  ;;  %v5917_v34 = vrot.slane %v13891_v25, 5 }
 0x3ba   : > { %11340 = vmatmul.msk.bf16.gmra.mxu1 %vm433_vm2, %v6351_v2  ;;  %v5905_v2 = vrot.slane %v13828_v29, 5 }
 0x3bb   : > { %v5914_v6 = vsel %vm12186_vm3, %v11278_v24, %v5913_v53 }
 0x3bc   : > { %v5906_v9 = vsel %vm12186_vm3, %v11276_v22, %v5905_v2  ;;  %v7107_v22 = vunpack.c.l.b16 %v7071_v31  ;;  %v5935_v38 = vunpack.c.l.b16 %v5914_v6  ;;  %v7025_v6 = vld [vmem:[#allocation2 + $0x68] sm:$0xe] }
 0x3bd   : > { %v5933_v29 = vunpack.c.l.b16 %v5906_v9  ;;  %v7023_v9 = vld [vmem:[#allocation2 + $0x58] sm:$0xe] }
 0x3be   : > { %11288 = vmatmul.msk.bf16.gmra.mxu3 %vm433_vm2, %v5939_v44  ;;  %v5069_v30 = vpop.f32.mrf.mxu2  ;;  %v7106_v44 = vunpack.c.l.b16 %v7067_v11 }
 0x3bf   : > { %v5941_v42 = vpack.c.b16 %v5933_v29, %v5932_v37  ;;  %v11309_v29 = vld [vmem:[#allocation2 + $0x48] sm:$0xf]  ;;  %v11420_v37 = vrot.slane %v7023_v9, 9  ;;  %v7090_v9 = vrot.slane %v14013_v13, 5 }
 0x3c0   : > { %11323 = vmatmul.msk.bf16.vlgmr.msrb.gmra.mxu0 %vm433_vm2, %v11298_v51  ;;  %v4864_v51 = vpop.f32.mrf.mxu1  ;;  %v7116_v54 = vpack.c.b16 %v7106_v44, %v7105_v49  ;;  %v11867_v49 = vld [vmem:[#allocation2 + $0x4c] sm:$0xf0] }
 0x3c1   : > { %v14028_v51 = vld [vmem:[#allocation2 + $0x5c] sm:$0x1] }
 0x3c2   : > { %v7082_v23 = vrot.slane %v14028_v51, 5 }
 0x3c4   : > { %v7083_v12 = vsel %vm12186_vm3, %v11420_v37, %v7082_v23 }
 0x3c6   : > { %v5797_v48 = vpop.f32.mrf.mxu0  ;;  %v5071_v47 = vpop.f32.mrf.mxu2 }
 0x3c7   : > { %v7022_v47 = vld [vmem:[#allocation2 + $0x50] sm:$0xe] }
 0x3ca   : > { %11431 = vmatmul.msk.bf16.vlgmr.msra.gmra.mxu1 %vm433_vm2, %v7115_v36  ;;  %v7488_v36 = vsel %vm12864_vm9, %v12931_v0, %v7487_v50  ;;  %v11310_v50 = vor.u32 %v11867_v49, %v11309_v29 }
 0x3cb   : > { %7489 = vst [vmem:[#allocation2 + $0x6c] sm:$0x1] %v7488_v36  ;;  %v5921_v36 = vrot.slane %v13903_v60, 5 }
 0x3ce   : > { %11289 = vmatmul.msk.bf16.gmra.mxu3 %vm433_vm2, %v5940_v1  ;;  %v5799_v17 = vpop.f32.mrf.mxu0 }
 0x3d0   : > { %11324 = vmatmul.msk.bf16.gmra.mxu0 %vm433_vm2, %v11302_v46  ;;  %v5909_v46 = vrot.slane %v13854_v3, 5  ;;  %v7117_v3 = vpack.c.b16 %v7108_v28, %v7107_v22  ;;  %v14052_v28 = vld [vmem:[#allocation2 + $0x64] sm:$0x1]  ;;  %v11868_v22 = vld [vmem:[#allocation2 + $0x5c] sm:$0xf0] }
 0x3d2   : > { %v5910_v11 = vsel %vm12186_vm3, %v11277_v14, %v5909_v46 }
 0x3d3   : > { %v5934_v44 = vunpack.c.l.b16 %v5910_v11 }
 0x3d5   : > { %v6385_v26 = vpop.f32.mrf.mxu1  ;;  %v5942_v57 = vpack.c.b16 %v5935_v38, %v5934_v44  ;;  %v11313_v38 = vld [vmem:[#allocation2 + $0x58] sm:$0xf]  ;;  %v11422_v44 = vrot.slane %v7025_v6, 9 }
 0x3d6   : > { %v11419_v26 = vrot.slane %v7022_v47, 9  ;;  %v11314_v49 = vor.u32 %v11868_v22, %v11313_v38  ;;  %v6762_v22 = vshll.u32 %v13924_v27, 16  ;;  %v6776_v38 = vshll.u32 %v13957_v16, 16 }
 0x3d7   : > { %v6565_v48 = vpop.f32.mrf.mxu2  ;;  %v7091_v37 = vsel %vm12186_vm3, %v11422_v44, %v7090_v9 }
 0x3d8   : > { %v7110_v48 = vunpack.c.l.b16 %v7083_v12 }
 0x3da   : > { %11432 = vmatmul.msk.bf16.gmra.mxu1 %vm433_vm2, %v7116_v54  ;;  %v14030_v54 = vld [vmem:[#allocation2 + $0x54] sm:$0x1] }
 0x3db   : > { %v7078_v21 = vrot.slane %v14030_v54, 5 }
 0x3dd   : > { %v6387_v56 = vpop.f32.mrf.mxu1  ;;  %v7079_v41 = vsel %vm12186_vm3, %v11419_v26, %v7078_v21  ;;  %v6730_v26 = vld [vmem:[#allocation2 + $0x28] sm:$0xf] }
 0x3de   : > { %11290 = vmatmul.msk.bf16.gmra.mxu3 %vm433_vm2, %v5941_v42  ;;  %v5850_v42 = vld [vmem:[#allocation2 + $0x68] sm:$0xe]  ;;  %v7109_v53 = vunpack.c.l.b16 %v7079_v41  ;;  %v7024_v56 = vld [vmem:[#allocation2 + $0x60] sm:$0xe] }
 0x3df   : > { %v6567_v7 = vpop.f32.mrf.mxu2 }
 0x3e0   : > { %11325 = vmatmul.msk.bf16.gmra.mxu0 %vm433_vm2, %v11306_v52  ;;  %v11280_v52 = vrot.slane %v5850_v42, 9  ;;  %v7118_v14 = vpack.c.b16 %v7110_v48, %v7109_v53  ;;  %v7086_v7 = vrot.slane %v14052_v28, 5  ;;  %v11317_v48 = vld [vmem:[#allocation2 + $0x68] sm:$0xf] }
 0x3e1   : > { %v5526_v1 = vpop.f32.mrf.mxu3 }
 0x3e2   : > { %v5527_v30 = vadd.f32 %v14009_v39, %v5526_v1  ;;  %v5918_v1 = vsel %vm12186_vm3, %v11279_v40, %v5917_v34  ;;  %v5922_v24 = vsel %vm12186_vm3, %v11280_v52, %v5921_v36  ;;  %v6753_v40 = vshrl.u32 %v13942_v58, 16 }
 0x3e3   : > { %v5936_v25 = vunpack.c.l.b16 %v5918_v1  ;;  %v5937_v43 = vunpack.c.l.b16 %v5922_v24  ;;  %v6756_v34 = vshll.u32 %v13942_v58, 16  ;;  %v6767_v52 = vshrl.u32 %v6730_v26, 16  ;;  %v11869_v1 = vld [vmem:[#allocation2 + $0x6c] sm:$0xf0] }
 0x3e4   : > { %v6770_v36 = vshll.u32 %v6730_v26, 16  ;;  %v6755_v53 = vrot.slane %v6753_v40, 4 }
 0x3e7   : > { %v5802_v2 = vpop.f32.mrf.mxu0 }
 0x3e8   : > { %v14023_v5 = vadd.f32 %v5802_v2, %v5527_v30  ;;  %v5943_v2 = vpack.c.b16 %v5937_v43, %v5936_v25  ;;  %v6758_v25 = vrot.slane %v6756_v34, 5  ;;  %v6769_v43 = vrot.slane %v6767_v52, 4 }
 0x3e9   : > { %v14025_v17 = vpop.f32.mrf.mxu3 }
 0x3ea   : > { %11433 = vmatmul.msk.bf16.gmra.mxu1 %vm433_vm2, %v7117_v3  ;;  %v11421_v3 = vrot.slane %v7024_v56, 9  ;;  %v6759_v6 = vor.u32 %v6758_v25, %v6755_v53 }
 0x3ec   : > { %v7087_v47 = vsel %vm12186_vm3, %v11421_v3, %v7086_v7  ;;  %v6760_v3 = vrot.slane %v6759_v6, 4  ;;  %v6764_v7 = vrot.slane %v6762_v22, 5 }
 0x3ed   : > { %v7111_v42 = vunpack.c.l.b16 %v7087_v47 }
 0x3ee   : > { %11291 = vmatmul.msk.bf16.gmra.mxu3 %vm433_vm2, %v5942_v57  ;;  %v6765_v27 = vsel %vm12237_vm6, %v6760_v3, %v6764_v7  ;;  %v6738_v7 = vld [vmem:[#allocation2 + $0x48] sm:$0xf] }
 0x3ef   : > { %v14036_v20 = vpop.f32.mrf.mxu0  ;;  %v6923_v52 = vunpack.c.l.b16 %v6765_v27 }
 0x3f0   : > { %11326 = vmatmul.msk.bf16.gmra.mxu0 %vm433_vm2, %v11310_v50  ;;  %v7112_v50 = vunpack.c.l.b16 %v7091_v37  ;;  %v6732_v37 = vld [vmem:[#allocation2 + $0x30] sm:$0xf] }
 0x3f1   : > { %v5531_v35 = vpop.f32.mrf.mxu3  ;;  %v6781_v40 = vshrl.u32 %v6732_v37, 16  ;;  %v6784_v34 = vshll.u32 %v6732_v37, 16 }
 0x3f2   : > { %v14042_v32 = vpop.f32.mrf.mxu1  ;;  %v5532_v46 = vadd.f32 %v14009_v39, %v5531_v35  ;;  %v11873_v35 = vld [vmem:[#allocation2 + $0x24] sm:$0xf0]  ;;  %v7119_v12 = vpack.c.b16 %v7112_v50, %v7111_v42 }
 0x3f3   : > { %v11370_v24 = vor.u32 %v11873_v35, %v13940_v63  ;;  %v11874_v35 = vld [vmem:[#allocation2 + $0x34] sm:$0xf0]  ;;  %v6783_v25 = vrot.slane %v6781_v40, 4 }
 0x3f9   : > { %v5533_v60 = vpop.f32.mrf.mxu3  ;;  %v5807_v31 = vpop.f32.mrf.mxu0 }
 0x3fa   : > { %11434 = vmatmul.msk.bf16.gmra.mxu1 %vm433_vm2, %v7118_v14  ;;  %v14054_v30 = vadd.f32 %v5807_v31, %v5532_v46  ;;  %v14056_v11 = vpop.f32.mrf.mxu1  ;;  %v5534_v29 = vadd.f32 %v14009_v39, %v5533_v60  ;;  %v6772_v14 = vrot.slane %v6770_v36, 5  ;;  %v11318_v46 = vor.u32 %v11869_v1, %v11317_v48 }
 0x3fe   : > { %11292 = vmatmul.msk.bf16.gmra.mxu3 %vm433_vm2, %v5943_v2  ;;  %v6773_v2 = vor.u32 %v6772_v14, %v6769_v43  ;;  %v6786_v43 = vrot.slane %v6784_v34, 5 }
 0x400   : > { %11327 = vmatmul.msk.bf16.gmra.mxu0 %vm433_vm2, %v11314_v49  ;;  %v6774_v44 = vrot.slane %v6773_v2, 4  ;;  %v6734_v49 = vld [vmem:[#allocation2 + $0x38] sm:$0xf]  ;;  %v6787_v22 = vor.u32 %v6786_v43, %v6783_v25  ;;  %v6804_v2 = vshll.u32 %v13975_v45, 16  ;;  %v6826_v45 = vshll.u32 %v6738_v7, 16 }
 0x401   : > { %v5536_v57 = vpop.f32.mrf.mxu3  ;;  %v5809_v23 = vpop.f32.mrf.mxu0  ;;  %v6795_v16 = vshrl.u32 %v6734_v49, 16  ;;  %v6798_v50 = vshll.u32 %v6734_v49, 16 }
 0x402   : > { %v14067_v10 = vadd.f32 %v5809_v23, %v5534_v29  ;;  %v5537_v60 = vadd.f32 %v14009_v39, %v5536_v57  ;;  %v6778_v29 = vrot.slane %v6776_v38, 5  ;;  %v6790_v38 = vshll.u32 %v13977_v18, 16  ;;  %v11875_v18 = vld [vmem:[#allocation2 + $0x44] sm:$0xf0] }
 0x403   : > { %v6797_v48 = vrot.slane %v6795_v16, 4  ;;  %v6800_v1 = vrot.slane %v6798_v50, 5  ;;  %v6806_v49 = vrot.slane %v6804_v2, 5  ;;  %v6823_v16 = vshrl.u32 %v6738_v7, 16 }
 0x404   : > { %v6779_v42 = vsel %vm12237_vm6, %v6774_v44, %v6778_v29  ;;  %v6736_v29 = vld [vmem:[#allocation2 + $0x40] sm:$0xf]  ;;  %v6792_v27 = vrot.slane %v6790_v38, 5  ;;  %v6818_v2 = vshll.u32 %v13996_v62, 16 }
 0x405   : > { %v6924_v36 = vunpack.c.l.b16 %v6779_v42  ;;  %v6812_v40 = vshll.u32 %v6736_v29, 16 }
 0x406   : > { %v14069_v21 = vpop.f32.mrf.mxu1 }
 0x409   : > { %v5538_v41 = vpop.f32.mrf.mxu3 }
 0x40a   : > { %11435 = vmatmul.msk.bf16.gmra.mxu1 %vm433_vm2, %v7119_v12  ;;  %v5539_v9 = vadd.f32 %v14009_v39, %v5538_v41  ;;  %v11373_v12 = vld [vmem:[#allocation2 + $0x30] sm:$0xf] }
 0x40b   : > { %v11374_v41 = vor.u32 %v11874_v35, %v11373_v12  ;;  %v6809_v35 = vshrl.u32 %v6736_v29, 16  ;;  %v6825_v12 = vrot.slane %v6823_v16, 4  ;;  %v6820_v29 = vrot.slane %v6818_v2, 5 }
 0x40c   : > { %v6846_v2 = vshll.u32 %v14030_v54, 16 }
 0x40d   : > { %v5812_v31 = vpop.f32.mrf.mxu0 }
 0x40e   : > { %11395 = vmatmul.msk.bf16.vlgmr.msrb.gmra.mxu3 %vm433_vm2, %v11370_v24  ;;  %v14077_v58 = vadd.f32 %v5812_v31, %v5537_v60  ;;  %v14079_v56 = vpop.f32.mrf.mxu1  ;;  %v6935_v60 = vpack.c.b16 %v6924_v36, %v6923_v52  ;;  %v6801_v31 = vor.u32 %v6800_v1, %v6797_v48  ;;  %v11377_v52 = vld [vmem:[#allocation2 + $0x40] sm:$0xf] }
 0x40f   : > { %v11378_v36 = vor.u32 %v11875_v18, %v11377_v52 }
 0x410   : > { %11328 = vmatmul.msk.bf16.gmra.mxu0 %vm433_vm2, %v11318_v46 }
 0x411   : > { %v5541_v63 = vpop.f32.mrf.mxu3 }
 0x412   : > { %v5542_v24 = vadd.f32 %v14009_v39, %v5541_v63  ;;  %v6802_v63 = vrot.slane %v6801_v31, 4 }
 0x414   : > { %v6807_v42 = vsel %vm12237_vm6, %v6802_v63, %v6806_v49  ;;  %v6742_v63 = vld [vmem:[#allocation2 + $0x58] sm:$0xf] }
 0x415   : > { %v5814_v57 = vpop.f32.mrf.mxu0  ;;  %v6926_v34 = vunpack.c.l.b16 %v6807_v42  ;;  %v6851_v42 = vshrl.u32 %v6742_v63, 16  ;;  %v6854_v16 = vshll.u32 %v6742_v63, 16  ;;  %v6744_v63 = vld [vmem:[#allocation2 + $0x60] sm:$0xf] }
 0x416   : > { %v14085_v47 = vadd.f32 %v5814_v57, %v5539_v9  ;;  %v6788_v9 = vrot.slane %v6787_v22, 4  ;;  %v6832_v22 = vshll.u32 %v13994_v8, 16 }
 0x417   : > { %v14087_v23 = vpop.f32.mrf.mxu1  ;;  %v6856_v52 = vrot.slane %v6854_v16, 5 }
 0x419   : > { %v5543_v26 = vpop.f32.mrf.mxu3 }
 0x41a   : > { %v5544_v3 = vadd.f32 %v14009_v39, %v5543_v26  ;;  %v6793_v26 = vsel %vm12237_vm6, %v6788_v9, %v6792_v27  ;;  %v6740_v9 = vld [vmem:[#allocation2 + $0x50] sm:$0xf] }
 0x41b   : > { %v6925_v48 = vunpack.c.l.b16 %v6793_v26  ;;  %v6837_v18 = vshrl.u32 %v6740_v9, 16  ;;  %v6840_v62 = vshll.u32 %v6740_v9, 16 }
 0x41d   : > { %v5817_v53 = vpop.f32.mrf.mxu0  ;;  %v6936_v25 = vpack.c.b16 %v6926_v34, %v6925_v48  ;;  %v6853_v34 = vrot.slane %v6851_v42, 4  ;;  %v6842_v48 = vrot.slane %v6840_v62, 5 }
 0x41e   : > { %11396 = vmatmul.msk.bf16.gmra.mxu3 %vm433_vm2, %v11374_v41  ;;  %v14095_v14 = vadd.f32 %v5817_v53, %v5542_v24  ;;  %v6828_v41 = vrot.slane %v6826_v45, 5  ;;  %v6811_v24 = vrot.slane %v6809_v35, 4  ;;  %v6814_v53 = vrot.slane %v6812_v40, 5  ;;  %v11381_v35 = vld [vmem:[#allocation2 + $0x50] sm:$0xf] }
 0x41f   : > { %v14097_v46 = vpop.f32.mrf.mxu1 }
 0x420   : > { %11407 = vmatmul.msk.bf16.vlgmr.msra.gmra.mxu0 %vm433_vm2, %v6935_v60  ;;  %v6829_v60 = vor.u32 %v6828_v41, %v6825_v12  ;;  %v6839_v41 = vrot.slane %v6837_v18, 4 }
 0x421   : > { %v5546_v6 = vpop.f32.mrf.mxu3 }
 0x422   : > { %v6815_v6 = vor.u32 %v6814_v53, %v6811_v24  ;;  %v6830_v38 = vrot.slane %v6829_v60, 4  ;;  %v6857_v53 = vor.u32 %v6856_v52, %v6853_v34  ;;  %v11887_v60 = vld [vmem:[%s15174_s1 + $0xd8] sm:$0xff] }
 0x423   : > { %7567 = vmatpush.bf16.msra.mxu2 %v11887_v60 }
 0x424   : > { %v6816_v7 = vrot.slane %v6815_v6, 4  ;;  %v6843_v6 = vor.u32 %v6842_v48, %v6839_v41 }
 0x425   : > { %v5819_v44 = vpop.f32.mrf.mxu0 }
 0x426   : > { %v14103_v57 = vadd.f32 %v5819_v44, %v5544_v3  ;;  %v6834_v44 = vrot.slane %v6832_v22, 5  ;;  %v6821_v8 = vsel %vm12237_vm6, %v6816_v7, %v6820_v29  ;;  %v6860_v22 = vshll.u32 %v14028_v51, 16  ;;  %v11385_v29 = vld [vmem:[#allocation2 + $0x60] sm:$0xf] }
 0x427   : > { %v14105_v37 = vpop.f32.mrf.mxu1 }
 0x428   : > { %v6835_v27 = vsel %vm12237_vm6, %v6830_v38, %v6834_v44  ;;  %v6858_v38 = vrot.slane %v6857_v53, 4  ;;  %v6844_v44 = vrot.slane %v6843_v6, 4  ;;  %v6862_v9 = vrot.slane %v6860_v22, 5 }
 0x429   : > { %v5548_v50 = vpop.f32.mrf.mxu3  ;;  %v6928_v26 = vunpack.c.l.b16 %v6835_v27  ;;  %v6865_v27 = vshrl.u32 %v6744_v63, 16  ;;  %v6888_v53 = vshll.u32 %v14013_v13, 16  ;;  %v6874_v6 = vshll.u32 %v14052_v28, 16 }
 0x42a   : > { %v11876_v50 = vld [vmem:[#allocation2 + $0x54] sm:$0xf0]  ;;  %v6863_v16 = vsel %vm12237_vm6, %v6858_v38, %v6862_v9 }
 0x42b   : > { %v11382_v40 = vor.u32 %v11876_v50, %v11381_v35  ;;  %v6930_v18 = vunpack.c.l.b16 %v6863_v16  ;;  %v6890_v38 = vrot.slane %v6888_v53, 5 }
 0x42d   : > { %v5822_v1 = vpop.f32.mrf.mxu0 }
 0x42e   : > { %11397 = vmatmul.msk.bf16.gmra.mxu3 %vm433_vm2, %v11378_v36  ;;  %v6927_v36 = vunpack.c.l.b16 %v6821_v8 }
 0x42f   : > { %v14112_v43 = vpop.f32.mrf.mxu1 }
 0x430   : > { %11408 = vmatmul.msk.bf16.gmra.mxu0 %vm433_vm2, %v6936_v25  ;;  %v6937_v1 = vpack.c.b16 %v6928_v26, %v6927_v36  ;;  %v6867_v26 = vrot.slane %v6865_v27, 4 }
 0x431   : > { %v5977_v31 = vpop.f32.mrf.mxu3 }
 0x435   : > { %v5824_v3 = vpop.f32.mrf.mxu0 }
 0x436   : > { %v6746_v3 = vld [vmem:[#allocation2 + $0x68] sm:$0xf] }
 0x437   : > { %v6410_v49 = vpop.f32.mrf.mxu1  ;;  %v6879_v50 = vshrl.u32 %v6746_v3, 16  ;;  %v6882_v51 = vshll.u32 %v6746_v3, 16 }
 0x438   : > { %v6848_v49 = vrot.slane %v6846_v2, 5 }
 0x439   : > { %v5979_v45 = vpop.f32.mrf.mxu3  ;;  %v6884_v34 = vrot.slane %v6882_v51, 5 }
 0x43a   : > { %v6868_v45 = vshll.u32 %v6744_v63, 16  ;;  %v6849_v54 = vsel %vm12237_vm6, %v6844_v44, %v6848_v49 }
 0x43b   : > { %v6929_v52 = vunpack.c.l.b16 %v6849_v54 }
 0x43c   : > { %v6870_v35 = vrot.slane %v6868_v45, 5 }
 0x43d   : > { %v6097_v12 = vpop.f32.mrf.mxu0  ;;  %v6938_v41 = vpack.c.b16 %v6930_v18, %v6929_v52  ;;  %v6437_v52 = vld [vmem:[#allocation2 + $0x68] sm:$0xe] }
 0x43e   : > { %11398 = vmatmul.msk.bf16.gmra.mxu3 %vm433_vm2, %v11382_v40  ;;  %v6881_v40 = vrot.slane %v6879_v50, 4 }
 0x43f   : > { %v6412_v24 = vpop.f32.mrf.mxu1 }
 0x440   : > { %11409 = vmatmul.msk.bf16.gmra.mxu0 %vm433_vm2, %v6937_v1  ;;  %v6871_v1 = vor.u32 %v6870_v35, %v6867_v26  ;;  %v6885_v24 = vor.u32 %v6884_v34, %v6881_v40  ;;  %v7484_v35 = vld [vmem:[#allocation2 + $0x68] sm:$0xf] }
 0x441   : > { %v5982_v25 = vpop.f32.mrf.mxu3 }
 0x442   : > { %v6009_v31 = vadd.f32 %v5982_v25, %v14023_v5  ;;  %v11877_v5 = vld [vmem:[#allocation2 + $0x64] sm:$0xf0]  ;;  %v6872_v22 = vrot.slane %v6871_v1, 4  ;;  %v6886_v2 = vrot.slane %v6885_v24, 4 }
 0x443   : > { %v11386_v62 = vor.u32 %v11877_v5, %v11385_v29 }
 0x445   : > { %v6099_v7 = vpop.f32.mrf.mxu0 }
 0x446   : > { %v6891_v7 = vsel %vm12237_vm6, %v6886_v2, %v6890_v38 }
 0x447   : > { %v7154_v42 = vpop.f32.mrf.mxu1  ;;  %v6932_v9 = vunpack.c.l.b16 %v6891_v7  ;;  %v11889_v7 = vld [vmem:[%s15174_s1 + $0xe8] sm:$0xff] }
 0x448   : > { %7953 = vmatpush.bf16.msra.mxu3 %v11889_v7 }
 0x449   : > { %v14131_v8 = vpop.f32.mrf.mxu3 }
 0x44d   : > { %v6102_v36 = vpop.f32.mrf.mxu0 }
 0x44e   : > { %11399 = vmatmul.msk.bf16.gmra.mxu3 %vm433_vm2, %v11386_v62  ;;  %v14136_v12 = vadd.f32 %v6102_v36, %v6009_v31  ;;  %v6876_v31 = vrot.slane %v6874_v6, 5  ;;  %v6438_v36 = vld [vmem:[#allocation2 + $0x70] sm:$0xe] }
 0x44f   : > { %v7156_v48 = vpop.f32.mrf.mxu1  ;;  %v11352_v1 = vrot.slane %v6438_v36, 9  ;;  %v14197_v36 = vld [vmem:[#allocation2 + $0x7c] sm:$0x1] }
 0x450   : > { %11410 = vmatmul.msk.bf16.gmra.mxu0 %vm433_vm2, %v6938_v41  ;;  %v6877_v3 = vsel %vm12237_vm6, %v6872_v22, %v6876_v31  ;;  %v6505_v41 = vrot.slane %v13920_v55, 5  ;;  %v11351_v48 = vrot.slane %v6437_v52, 9  ;;  %v6570_v31 = vpop.f32.mrf.mxu2  ;;  %v14195_v52 = vld [vmem:[#allocation2 + $0x74] sm:$0x1] }
 0x451   : > { %v5987_v25 = vpop.f32.mrf.mxu3  ;;  %v6931_v44 = vunpack.c.l.b16 %v6877_v3 }
 0x452   : > { %v6011_v60 = vadd.f32 %v5987_v25, %v14054_v30  ;;  %v6506_v53 = vsel %vm12186_vm3, %v11351_v48, %v6505_v41  ;;  %v7490_v41 = vld [vmem:[#allocation2 + $0x70] sm:$0xf] }
 0x453   : > { %v6939_v28 = vpack.c.b16 %v6932_v9, %v6931_v44  ;;  %v5432_v44 = vld [vmem:[#allocation2 + $0x78] sm:$0xf] }
 0x454   : > { %v5433_v9 = vsel %vm12906_vm13, %v12914_v19, %v5432_v44  ;;  %v11882_v44 = vld [vmem:[#allocation2 + $0x1c] sm:$0xf0] }
 0x455   : > { %v14142_v63 = vpop.f32.mrf.mxu0  ;;  %5434 = vst [vmem:[#allocation2 + $0x78] sm:$0xf] %v5433_v9 }
 0x459   : > { %v14148_v13 = vpop.f32.mrf.mxu3 }
 0x45d   : > { %v6107_v49 = vpop.f32.mrf.mxu0 }
 0x45e   : > { %v14150_v30 = vadd.f32 %v6107_v49, %v6011_v60  ;;  %v6524_v60 = vunpack.c.l.b16 %v6506_v53  ;;  %v14185_v49 = vpop.f32.mrf.mxu2  ;;  %v6902_v53 = vshll.u32 %v14195_v52, 16 }
 0x460   : > { %11411 = vmatmul.msk.bf16.gmra.mxu0 %vm433_vm2, %v6939_v28 }
 0x461   : > { %v5992_v29 = vpop.f32.mrf.mxu3 }
 0x462   : > { %v6013_v27 = vadd.f32 %v5992_v29, %v14077_v58  ;;  %v7485_v58 = vsel %vm12906_vm13, %v12914_v19, %v7484_v35  ;;  %v7159_v29 = vpop.f32.mrf.mxu1  ;;  %v11389_v35 = vld [vmem:[#allocation2 + $0x70] sm:$0xf] }
 0x463   : > { %7486 = vst [vmem:[#allocation2 + $0x68] sm:$0xf] %v7485_v58  ;;  %v6748_v58 = vld [vmem:[#allocation2 + $0x70] sm:$0xf] }
 0x464   : > { %v6893_v48 = vshrl.u32 %v6748_v58, 16 }
 0x465   : > { %v14154_v42 = vpop.f32.mrf.mxu0 }
 0x469   : > { %v14156_v16 = vpop.f32.mrf.mxu3 }
 0x46a   : > { %v14214_v9 = vpop.f32.mrf.mxu1 }
 0x46d   : > { %v6112_v5 = vpop.f32.mrf.mxu0 }
 0x46e   : > { %v14158_v45 = vadd.f32 %v6112_v5, %v6013_v27  ;;  %v7493_v27 = vld [vmem:[#allocation2 + $0x74] sm:$0x1]  ;;  %v5529_v5 = vadd.f32 %v14009_v39, %v14025_v17  ;;  %v11878_v39 = vld [vmem:[#allocation2 + $0x74] sm:$0xf0] }
 0x46f   : > { %v6750_v17 = vld [vmem:[#allocation2 + $0x78] sm:$0xf] }
 0x471   : > { %v5997_v50 = vpop.f32.mrf.mxu3 }
 0x472   : > { %v6015_v51 = vadd.f32 %v5997_v50, %v14095_v14  ;;  %v6509_v14 = vrot.slane %v13928_v15, 5  ;;  %v7494_v50 = vsel %vm12864_vm9, %v12931_v0, %v7493_v27  ;;  %v6904_v27 = vrot.slane %v6902_v53, 5 }
 0x473   : > { %7495 = vst [vmem:[#allocation2 + $0x74] sm:$0x1] %v7494_v50  ;;  %v7491_v50 = vsel %vm12906_vm13, %v12914_v19, %v7490_v41 }
 0x474   : > { %v6510_v25 = vsel %vm12186_vm3, %v11352_v1, %v6509_v14  ;;  %v6896_v1 = vshll.u32 %v6748_v58, 16 }
 0x475   : > { %v14161_v54 = vpop.f32.mrf.mxu0  ;;  %v6525_v6 = vunpack.c.l.b16 %v6510_v25  ;;  %v6907_v25 = vshrl.u32 %v6750_v17, 16 }
 0x477   : > { %v6531_v22 = vpack.c.b16 %v6525_v6, %v6524_v60  ;;  %v6910_v60 = vshll.u32 %v6750_v17, 16  ;;  %v6895_v6 = vrot.slane %v6893_v48, 4  ;;  %v11888_v17 = vld [vmem:[%s15174_s1 + $0xe0] sm:$0xff]  ;;  %v7026_v48 = vld [vmem:[#allocation2 + $0x70] sm:$0xe] }
 0x478   : > { %7492 = vst [vmem:[#allocation2 + $0x70] sm:$0xf] %v7491_v50  ;;  %7800 = vmatpush.bf16.msrb.mxu2 %v11888_v17  ;;  %v6419_v17 = vadd.f32 %v14069_v21, %v14150_v30  ;;  %v9182_v30 = vld [vmem:[#allocation2 + $0x24] sm:$0x1] }
 0x479   : > { %v14163_v18 = vpop.f32.mrf.mxu3  ;;  %11364 = vmatmul.msk.bf16.gmra.mxu2 %vm433_vm2, %v6531_v22  ;;  %v6916_v22 = vshll.u32 %v14197_v36, 16  ;;  %v6912_v7 = vrot.slane %v6910_v60, 5 }
 0x47d   : > { %v6117_v62 = vpop.f32.mrf.mxu0 }
 0x47e   : > { %v14165_v26 = vadd.f32 %v6117_v62, %v6015_v51  ;;  %v5830_v51 = vadd.f32 %v14036_v20, %v5529_v5  ;;  %v11390_v20 = vor.u32 %v11878_v39, %v11389_v35  ;;  %v6918_v35 = vrot.slane %v6916_v22, 5 }
 0x480   : > { %v6010_v14 = vadd.f32 %v14131_v8, %v5830_v51  ;;  %v6898_v8 = vrot.slane %v6896_v1, 5  ;;  %11400 = vmatmul.msk.bf16.gmra.mxu3 %vm433_vm2, %v11390_v20  ;;  %v7027_v1 = vld [vmem:[#allocation2 + $0x78] sm:$0xe]  ;;  %v7094_v20 = vrot.slane %v14195_v52, 5 }
 0x481   : > { %v6002_v40 = vpop.f32.mrf.mxu3  ;;  %v11424_v53 = vrot.slane %v7027_v1, 9 }
 0x482   : > { %v6417_v40 = vadd.f32 %v14042_v32, %v14136_v12  ;;  %v11895_v32 = vld [vmem:[%s15174_s1 + $0xf0] sm:$0xff]  ;;  %v6130_v12 = vadd.f32 %v14142_v63, %v6010_v14  ;;  %v6899_v63 = vor.u32 %v6898_v8, %v6895_v6  ;;  %v14230_v6 = vld [vmem:[#allocation2 + $0x1c] sm:$0x1]  ;;  %v14232_v8 = vld [vmem:[#allocation2 + $0x24] sm:$0x1] }
 0x483   : > { %8056 = vmatpush.bf16.msrb.mxu0 %v11895_v32  ;;  %v7873_v50 = vrot.slane %v14232_v8, 5 }
 0x484   : > { %v6900_v58 = vrot.slane %v6899_v63, 4 }
 0x485   : > { %v14170_v34 = vpop.f32.mrf.mxu0 }
 0x486   : > { %v6905_v41 = vsel %vm12237_vm6, %v6900_v58, %v6904_v27 }
 0x487   : > { %v6933_v60 = vunpack.c.l.b16 %v6905_v41 }
 0x489   : > { %v6004_v24 = vpop.f32.mrf.mxu3 }
 0x48d   : > { %v6122_v2 = vpop.f32.mrf.mxu0 }
 0x48e   : > { %v11442_v2 = vld [vmem:[#allocation2 + $0x18] sm:$0xf] }
 0x48f   : > { %v11443_v5 = vor.u32 %v11882_v44, %v11442_v2 }
 0x491   : > { %v6686_v38 = vpop.f32.mrf.mxu3  ;;  %11464 = vmatmul.msk.bf16.vlgmr.msra.gmra.mxu2 %vm433_vm2, %v11443_v5 }
 0x492   : > { %v11896_v38 = vld [vmem:[%s15174_s1 + $0xf8] sm:$0xff] }
 0x493   : > { %8299 = vmatpush.bf16.msrb.mxu1 %v11896_v38  ;;  %v7837_v38 = vld [vmem:[#allocation2 + $0x18] sm:$0xe] }
 0x495   : > { %v6124_v55 = vpop.f32.mrf.mxu0 }
 0x496   : > { %v14211_v55 = vpop.f32.mrf.mxu2 }
 0x497   : > { %v6599_v21 = vadd.f32 %v14211_v55, %v6419_v17  ;;  %v9183_v55 = vsel %vm12864_vm9, %v12931_v0, %v9182_v30 }
 0x499   : > { %v6688_v15 = vpop.f32.mrf.mxu3 }
 0x49a   : > { %v6597_v15 = vadd.f32 %v6570_v31, %v6417_v40  ;;  %v6418_v31 = vadd.f32 %v14056_v11, %v6130_v12  ;;  %v7098_v12 = vrot.slane %v14197_v36, 5  ;;  %v11480_v36 = vrot.slane %v7837_v38, 9 }
 0x49c   : > { %v6598_v22 = vadd.f32 %v14185_v49, %v6418_v31  ;;  %v7164_v31 = vpop.f32.mrf.mxu1 }
 0x49d   : > { %v6974_v3 = vpop.f32.mrf.mxu0 }
 0x49e   : > { %v6909_v3 = vrot.slane %v6907_v25, 4  ;;  %v6577_v49 = vpop.f32.mrf.mxu2 }
 0x4a1   : > { %v6691_v28 = vpop.f32.mrf.mxu3 }
 0x4a2   : > { %v6718_v51 = vadd.f32 %v6691_v28, %v6597_v15  ;;  %v11423_v28 = vrot.slane %v7026_v48, 9  ;;  %v7869_v15 = vrot.slane %v14230_v6, 5 }
 0x4a4   : > { %v7095_v52 = vsel %vm12186_vm3, %v11423_v28, %v7094_v20 }
 0x4a5   : > { %v6976_v62 = vpop.f32.mrf.mxu0  ;;  %v7113_v44 = vunpack.c.l.b16 %v7095_v52  ;;  %v7436_v52 = vld [vmem:[#allocation2 + $0x28] sm:$0xf] }
 0x4a6   : > { %v6913_v62 = vor.u32 %v6912_v7, %v6909_v3  ;;  %v7099_v7 = vsel %vm12186_vm3, %v11424_v53, %v7098_v12 }
 0x4a7   : > { %v7114_v27 = vunpack.c.l.b16 %v7099_v7 }
 0x4a8   : > { %v6914_v39 = vrot.slane %v6913_v62, 4 }
 0x4a9   : > { %v14200_v24 = vpop.f32.mrf.mxu3  ;;  %v7120_v58 = vpack.c.b16 %v7114_v27, %v7113_v44  ;;  %v14266_v27 = vld [vmem:[#allocation2 + $0x24] sm:$0x1] }
 0x4aa   : > { %v6919_v25 = vsel %vm12237_vm6, %v6914_v39, %v6918_v35  ;;  %v6719_v62 = vadd.f32 %v14200_v24, %v6598_v22  ;;  %v7870_v35 = vsel %vm12186_vm3, %v11480_v36, %v7869_v15  ;;  %v6012_v24 = vadd.f32 %v14148_v13, %v14067_v10  ;;  %v7439_v10 = vld [vmem:[#allocation2 + $0x2c] sm:$0x1]  ;;  %v14264_v36 = vld [vmem:[#allocation2 + $0x20] sm:$0xf]  ;;  %9184 = vst [vmem:[#allocation2 + $0x24] sm:$0x1] %v9183_v55 }
 0x4ab   : > { %v6934_v2 = vunpack.c.l.b16 %v6919_v25  ;;  %v7910_v39 = vunpack.c.l.b16 %v7870_v35  ;;  %11436 = vmatmul.msk.bf16.gmra.mxu1 %vm433_vm2, %v7120_v58 }
 0x4ad   : > { %v6979_v40 = vpop.f32.mrf.mxu0  ;;  %v6940_v63 = vpack.c.b16 %v6934_v2, %v6933_v60  ;;  %v6132_v60 = vadd.f32 %v14154_v42, %v6012_v24  ;;  %v7442_v24 = vld [vmem:[#allocation2 + $0x30] sm:$0xf] }
 0x4ae   : > { %v7006_v14 = vadd.f32 %v6979_v40, %v6718_v51 }
 0x4af   : > { %11412 = vmatmul.msk.bf16.gmra.mxu0 %vm433_vm2, %v6940_v63  ;;  %v6420_v42 = vadd.f32 %v14079_v56, %v6132_v60  ;;  %v7166_v63 = vpop.f32.mrf.mxu1 }
 0x4b0   : > { %v7186_v11 = vadd.f32 %v7159_v29, %v7006_v14  ;;  %v7838_v29 = vld [vmem:[#allocation2 + $0x20] sm:$0xe] }
 0x4b1   : > { %v6696_v32 = vpop.f32.mrf.mxu3  ;;  %v11481_v5 = vrot.slane %v7838_v29, 9 }
 0x4b2   : > { %v7198_v3 = vmax.f32 %v7186_v11, 0.0  ;;  %v6720_v29 = vadd.f32 %v6696_v32, %v6599_v21  ;;  %v8117_v32 = vshll.u32 %v14264_v36, 16 }
 0x4b3   : > { %v7874_v14 = vsel %vm12186_vm3, %v11481_v5, %v7873_v50  ;;  %v8114_v5 = vshrl.u32 %v14264_v36, 16 }
 0x4b4   : > { %v7295_v51 = vpack.c.bf16 %v7198_v3, %v7198_v3  ;;  %v7911_v41 = vunpack.c.l.b16 %v7874_v14  ;;  %v6580_v3 = vpop.f32.mrf.mxu2 }
 0x4b5   : > { %v6981_v40 = vpop.f32.mrf.mxu0  ;;  %v8116_v35 = vrot.slane %v8114_v5, 4 }
 0x4b6   : > { %v7322_v48 = vshrl.u32 %v7295_v51, 16  ;;  %v7007_v1 = vadd.f32 %v6981_v40, %v6719_v62  ;;  %v7325_v20 = vshll.u32 %v7295_v51, 16  ;;  %v7920_v25 = vpack.c.b16 %v7911_v41, %v7910_v39 }
 0x4b7   : > { %v6600_v62 = vadd.f32 %v6577_v49, %v6420_v42  ;;  %v8119_v40 = vrot.slane %v8117_v32, 5  ;;  %v6014_v41 = vadd.f32 %v14156_v16, %v14085_v47 }
 0x4b8   : > { %v7324_v28 = vrot.slane %v7322_v48, 7  ;;  %v7187_v53 = vadd.f32 %v14214_v9, %v7007_v1  ;;  %11496 = vmatmul.msk.bf16.vlgmr.msra.gmra.mxu3 %vm433_vm2, %v7920_v25  ;;  %v8123_v48 = vshll.u32 %v14266_v27, 16  ;;  %v6421_v1 = vadd.f32 %v14087_v23, %v14158_v45 }
 0x4b9   : > { %v6698_v11 = vpop.f32.mrf.mxu3 }
 0x4ba   : > { %v7327_v12 = vor.u32 %v7325_v20, %v7324_v28  ;;  %v7328_v22 = vrot.slane %v7324_v28, 4  ;;  %v7199_v2 = vmax.f32 %v7187_v53, 0.0  ;;  %v7445_v28 = vld [vmem:[#allocation2 + $0x34] sm:$0x1]  ;;  %v11505_v20 = vld [vmem:[#allocation2 + $0x20] sm:$0xf]  ;;  %v6721_v60 = vadd.f32 %v6698_v11, %v6600_v62 }
 0x4bc   : > { %v7437_v13 = vsel %vm12906_vm13, %v7327_v12, %v7436_v52  ;;  %v7440_v9 = vsel %vm12864_vm9, %v7328_v22, %v7439_v10  ;;  %v7296_v38 = vpack.c.bf16 %v7199_v2, %v7199_v2  ;;  %v6134_v22 = vadd.f32 %v14161_v54, %v6014_v41  ;;  %v6582_v11 = vpop.f32.mrf.mxu2 }
 0x4bd   : > { %7441 = vst [vmem:[#allocation2 + $0x2c] sm:$0x1] %v7440_v9  ;;  %v6984_v15 = vpop.f32.mrf.mxu0  ;;  %v8125_v52 = vrot.slane %v8123_v48, 5  ;;  %v6601_v10 = vadd.f32 %v6580_v3, %v6421_v1 }
 0x4be   : > { %7438 = vst [vmem:[#allocation2 + $0x28] sm:$0xf] %v7437_v13  ;;  %v7330_v7 = vshrl.u32 %v7296_v38, 16  ;;  %v7008_v44 = vadd.f32 %v6984_v15, %v6720_v29  ;;  %v7333_v50 = vshll.u32 %v7296_v38, 16 }
 0x4c0   : > { %v7332_v56 = vrot.slane %v7330_v7, 7  ;;  %v7188_v51 = vadd.f32 %v7164_v31, %v7008_v44  ;;  %v8120_v31 = vor.u32 %v8119_v40, %v8116_v35  ;;  %v7169_v7 = vpop.f32.mrf.mxu1  ;;  %v6422_v35 = vadd.f32 %v14097_v46, %v6134_v22  ;;  %v7448_v40 = vld [vmem:[#allocation2 + $0x38] sm:$0xf] }
 0x4c1   : > { %v6701_v17 = vpop.f32.mrf.mxu3 }
 0x4c2   : > { %v7335_v58 = vor.u32 %v7333_v50, %v7332_v56  ;;  %v7336_v14 = vrot.slane %v7332_v56, 4  ;;  %v7200_v39 = vmax.f32 %v7188_v51, 0.0  ;;  %v8121_v13 = vrot.slane %v8120_v31, 4 }
 0x4c4   : > { %v7443_v49 = vsel %vm12906_vm13, %v7335_v58, %v7442_v24  ;;  %v7446_v53 = vsel %vm12864_vm9, %v7336_v14, %v7445_v28  ;;  %v7297_v25 = vpack.c.bf16 %v7200_v39, %v7200_v39  ;;  %v8096_v12 = vld [vmem:[#allocation2 + $0x2c] sm:$0x1]  ;;  %v8126_v62 = vsel %vm12237_vm6, %v8121_v13, %v8125_v52  ;;  %v7451_v58 = vld [vmem:[#allocation2 + $0x3c] sm:$0x1] }
 0x4c5   : > { %7444 = vst [vmem:[#allocation2 + $0x30] sm:$0xf] %v7443_v49  ;;  %v6986_v23 = vpop.f32.mrf.mxu0  ;;  %v11890_v45 = vld [vmem:[#allocation2 + $0x24] sm:$0xf0]  ;;  %v14280_v2 = vld [vmem:[#allocation2 + $0x2c] sm:$0x1]  ;;  %v6722_v14 = vadd.f32 %v6701_v17, %v6601_v10 }
 0x4c6   : > { %7447 = vst [vmem:[#allocation2 + $0x34] sm:$0x1] %v7446_v53  ;;  %v7338_v47 = vshrl.u32 %v7297_v25, 16  ;;  %v7009_v16 = vadd.f32 %v6986_v23, %v6721_v60  ;;  %v11506_v21 = vor.u32 %v11890_v45, %v11505_v20  ;;  %v8095_v30 = vld [vmem:[#allocation2 + $0x28] sm:$0xf]  ;;  %v7341_v15 = vshll.u32 %v7297_v25, 16 }
 0x4c7   : > { %v8128_v9 = vshrl.u32 %v8095_v30, 16  ;;  %v8131_v38 = vshll.u32 %v8095_v30, 16  ;;  %v7839_v29 = vld [vmem:[#allocation2 + $0x28] sm:$0xe]  ;;  %v8137_v55 = vshll.u32 %v8096_v12, 16  ;;  %v7877_v56 = vrot.slane %v14280_v2, 5 }
 0x4c8   : > { %v7340_v42 = vrot.slane %v7338_v47, 7  ;;  %v7189_v54 = vadd.f32 %v7166_v63, %v7009_v16  ;;  %11527 = vmatmul.msk.bf16.vlgmr.msrb.gmra.mxu0 %vm433_vm2, %v11506_v21  ;;  %v11482_v32 = vrot.slane %v7839_v29, 9  ;;  %v14289_v63 = vadd.f32 %v14163_v18, %v14103_v57  ;;  %v11446_v39 = vld [vmem:[#allocation2 + $0x28] sm:$0xf] }
 0x4c9   : > { %v8130_v44 = vrot.slane %v8128_v9, 4  ;;  %v8133_v5 = vrot.slane %v8131_v38, 5  ;;  %v6703_v20 = vpop.f32.mrf.mxu3  ;;  %v8139_v31 = vrot.slane %v8137_v55, 5  ;;  %v8256_v53 = vunpack.c.l.b16 %v8126_v62 }
 0x4ca   : > { %v7343_v50 = vor.u32 %v7341_v15, %v7340_v42  ;;  %v7344_v51 = vrot.slane %v7340_v42, 4  ;;  %v7201_v3 = vmax.f32 %v7189_v54, 0.0  ;;  %v7878_v22 = vsel %vm12186_vm3, %v11482_v32, %v7877_v56  ;;  %v7454_v32 = vld [vmem:[#allocation2 + $0x40] sm:$0xf]  ;;  %v7457_v56 = vld [vmem:[#allocation2 + $0x44] sm:$0x1] }
 0x4cb   : > { %v8134_v48 = vor.u32 %v8133_v5, %v8130_v44  ;;  %v6423_v45 = vadd.f32 %v14105_v37, %v14165_v26  ;;  %v6602_v16 = vadd.f32 %v6582_v11, %v6422_v35  ;;  %v7912_v38 = vunpack.c.l.b16 %v7878_v22  ;;  %v6585_v37 = vpop.f32.mrf.mxu2  ;;  %v7171_v5 = vpop.f32.mrf.mxu1 }
 0x4cc   : > { %v7449_v1 = vsel %vm12906_vm13, %v7343_v50, %v7448_v40  ;;  %v7452_v41 = vsel %vm12864_vm9, %v7344_v51, %v7451_v58  ;;  %v7298_v24 = vpack.c.bf16 %v7201_v3, %v7201_v3  ;;  %v11883_v28 = vld [vmem:[#allocation2 + $0x2c] sm:$0xf0] }
 0x4cd   : > { %v7840_v46 = vld [vmem:[#allocation2 + $0x30] sm:$0xe]  ;;  %7453 = vst [vmem:[#allocation2 + $0x3c] sm:$0x1] %v7452_v41  ;;  %v6989_v49 = vpop.f32.mrf.mxu0  ;;  %v11447_v57 = vor.u32 %v11883_v28, %v11446_v39  ;;  %v8135_v18 = vrot.slane %v8134_v48, 4  ;;  %v6723_v50 = vadd.f32 %v6703_v20, %v6602_v16 }
 0x4ce   : > { %v14295_v25 = vld [vmem:[#allocation2 + $0x34] sm:$0x1]  ;;  %v11483_v17 = vrot.slane %v7840_v46, 9  ;;  %7450 = vst [vmem:[#allocation2 + $0x38] sm:$0xf] %v7449_v1  ;;  %v7346_v60 = vshrl.u32 %v7298_v24, 16  ;;  %v7010_v12 = vadd.f32 %v6989_v49, %v6722_v14 }
 0x4cf   : > { %v7881_v23 = vrot.slane %v14295_v25, 5  ;;  %v7349_v47 = vshll.u32 %v7298_v24, 16  ;;  %11465 = vmatmul.msk.bf16.gmra.mxu2 %vm433_vm2, %v11447_v57  ;;  %v8140_v21 = vsel %vm12237_vm6, %v8135_v18, %v8139_v31  ;;  %v8097_v30 = vld [vmem:[#allocation2 + $0x30] sm:$0xf]  ;;  %v8098_v42 = vld [vmem:[#allocation2 + $0x34] sm:$0x1]  ;;  %v6136_v24 = vadd.f32 %v14170_v34, %v14289_v63 }
 0x4d0   : > { %v7348_v52 = vrot.slane %v7346_v60, 7  ;;  %v7190_v10 = vadd.f32 %v7169_v7, %v7010_v12  ;;  %v8257_v13 = vunpack.c.l.b16 %v8140_v21  ;;  %v8142_v15 = vshrl.u32 %v8097_v30, 16  ;;  %v11509_v58 = vld [vmem:[#allocation2 + $0x30] sm:$0xf] }
 0x4d1   : > { %v7882_v9 = vsel %vm12186_vm3, %v11483_v17, %v7881_v23  ;;  %v8145_v54 = vshll.u32 %v8097_v30, 16  ;;  %v8151_v14 = vshll.u32 %v8098_v42, 16  ;;  %v6706_v46 = vpop.f32.mrf.mxu3  ;;  %v6603_v57 = vadd.f32 %v6585_v37, %v6423_v45 }
 0x4d2   : > { %v7913_v29 = vunpack.c.l.b16 %v7882_v9  ;;  %v7351_v26 = vor.u32 %v7349_v47, %v7348_v52  ;;  %v7352_v55 = vrot.slane %v7348_v52, 4  ;;  %v7202_v44 = vmax.f32 %v7190_v10, 0.0 }
 0x4d3   : > { %v8266_v11 = vpack.c.b16 %v8257_v13, %v8256_v53  ;;  %v8144_v7 = vrot.slane %v8142_v15, 4  ;;  %v8147_v3 = vrot.slane %v8145_v54, 5  ;;  %v8153_v34 = vrot.slane %v8151_v14, 5  ;;  %v7460_v13 = vld [vmem:[#allocation2 + $0x48] sm:$0xf] }
 0x4d4   : > { %v7921_v51 = vpack.c.b16 %v7913_v29, %v7912_v38  ;;  %v7455_v62 = vsel %vm12906_vm13, %v7351_v26, %v7454_v32  ;;  %v7458_v35 = vsel %vm12864_vm9, %v7352_v55, %v7457_v56  ;;  %v7299_v40 = vpack.c.bf16 %v7202_v44, %v7202_v44  ;;  %v8100_v1 = vld [vmem:[#allocation2 + $0x3c] sm:$0x1]  ;;  %v7463_v38 = vld [vmem:[#allocation2 + $0x4c] sm:$0x1]  ;;  %v6587_v26 = vpop.f32.mrf.mxu2  ;;  %v7174_v56 = vpop.f32.mrf.mxu1 }
 0x4d5   : > { %11538 = vmatmul.msk.bf16.vlgmr.msrb.gmra.mxu1 %vm433_vm2, %v8266_v11  ;;  %7456 = vst [vmem:[#allocation2 + $0x40] sm:$0xf] %v7455_v62  ;;  %v6991_v39 = vpop.f32.mrf.mxu0  ;;  %v11891_v48 = vld [vmem:[#allocation2 + $0x34] sm:$0xf0]  ;;  %v8148_v41 = vor.u32 %v8147_v3, %v8144_v7  ;;  %v8165_v47 = vshll.u32 %v8100_v1, 16  ;;  %v6424_v52 = vadd.f32 %v14112_v43, %v6136_v24  ;;  %v6724_v29 = vadd.f32 %v6706_v46, %v6603_v57 }
 0x4d6   : > { %11497 = vmatmul.msk.bf16.gmra.mxu3 %vm433_vm2, %v7921_v51  ;;  %7459 = vst [vmem:[#allocation2 + $0x44] sm:$0x1] %v7458_v35  ;;  %v7354_v28 = vshrl.u32 %v7299_v40, 16  ;;  %v7011_v20 = vadd.f32 %v6991_v39, %v6723_v50  ;;  %v11510_v31 = vor.u32 %v11891_v48, %v11509_v58  ;;  %v8099_v49 = vld [vmem:[#allocation2 + $0x38] sm:$0xf]  ;;  %v7357_v22 = vshll.u32 %v7299_v40, 16 }
 0x4d7   : > { %v8149_v18 = vrot.slane %v8148_v41, 4  ;;  %v8156_v53 = vshrl.u32 %v8099_v49, 16  ;;  %v8159_v17 = vshll.u32 %v8099_v49, 16  ;;  %v7841_v60 = vld [vmem:[#allocation2 + $0x38] sm:$0xe]  ;;  %v6604_v14 = vadd.f32 %v6587_v26, %v6424_v52 }
 0x4d8   : > { %v7356_v12 = vrot.slane %v7354_v28, 7  ;;  %v7191_v23 = vadd.f32 %v7171_v5, %v7011_v20  ;;  %11528 = vmatmul.msk.bf16.gmra.mxu0 %vm433_vm2, %v11510_v31  ;;  %v14316_v16 = vld [vmem:[#allocation2 + $0x3c] sm:$0x1]  ;;  %v11484_v30 = vrot.slane %v7841_v60, 9  ;;  %v11450_v42 = vld [vmem:[#allocation2 + $0x38] sm:$0xf] }
 0x4d9   : > { %v8158_v63 = vrot.slane %v8156_v53, 4  ;;  %v8161_v21 = vrot.slane %v8159_v17, 5  ;;  %v8154_v15 = vsel %vm12237_vm6, %v8149_v18, %v8153_v34  ;;  %v7885_v37 = vrot.slane %v14316_v16, 5  ;;  %v6708_v49 = vpop.f32.mrf.mxu3 }
 0x4da   : > { %v7359_v10 = vor.u32 %v7357_v22, %v7356_v12  ;;  %v7360_v45 = vrot.slane %v7356_v12, 4  ;;  %v7203_v9 = vmax.f32 %v7191_v23, 0.0  ;;  %v8167_v5 = vrot.slane %v8165_v47, 5 }
 0x4db   : > { %v8162_v54 = vor.u32 %v8161_v21, %v8158_v63  ;;  %v7886_v62 = vsel %vm12186_vm3, %v11484_v30, %v7885_v37  ;;  %v8258_v41 = vunpack.c.l.b16 %v8154_v15  ;;  %v7466_v63 = vld [vmem:[#allocation2 + $0x50] sm:$0xf]  ;;  %v7469_v21 = vld [vmem:[#allocation2 + $0x54] sm:$0x1]  ;;  %v6725_v30 = vadd.f32 %v6708_v49, %v6604_v14  ;;  %v7475_v49 = vld [vmem:[#allocation2 + $0x5c] sm:$0x1] }
 0x4dc   : > { %v7461_v55 = vsel %vm12906_vm13, %v7359_v10, %v7460_v13  ;;  %v7464_v43 = vsel %vm12864_vm9, %v7360_v45, %v7463_v38  ;;  %v7300_v44 = vpack.c.bf16 %v7203_v9, %v7203_v9  ;;  %v11884_v11 = vld [vmem:[#allocation2 + $0x3c] sm:$0xf0]  ;;  %v7914_v24 = vunpack.c.l.b16 %v7886_v62 }
 0x4dd   : > { %v7842_v32 = vld [vmem:[#allocation2 + $0x40] sm:$0xe]  ;;  %7465 = vst [vmem:[#allocation2 + $0x4c] sm:$0x1] %v7464_v43  ;;  %v6994_v50 = vpop.f32.mrf.mxu0  ;;  %v11451_v51 = vor.u32 %v11884_v11, %v11450_v42  ;;  %v8163_v7 = vrot.slane %v8162_v54, 4 }
 0x4de   : > { %v14326_v3 = vld [vmem:[#allocation2 + $0x44] sm:$0x1]  ;;  %v11485_v35 = vrot.slane %v7842_v32, 9  ;;  %7462 = vst [vmem:[#allocation2 + $0x48] sm:$0xf] %v7461_v55  ;;  %v7362_v40 = vshrl.u32 %v7300_v44, 16  ;;  %v7012_v58 = vadd.f32 %v6994_v50, %v6724_v29 }
 0x4df   : > { %v7889_v39 = vrot.slane %v14326_v3, 5  ;;  %v7365_v48 = vshll.u32 %v7300_v44, 16  ;;  %11466 = vmatmul.msk.bf16.gmra.mxu2 %vm433_vm2, %v11451_v51  ;;  %v8168_v1 = vsel %vm12237_vm6, %v8163_v7, %v8167_v5  ;;  %v8101_v28 = vld [vmem:[#allocation2 + $0x40] sm:$0xf]  ;;  %v8102_v20 = vld [vmem:[#allocation2 + $0x44] sm:$0x1] }
 0x4e0   : > { %v7364_v31 = vrot.slane %v7362_v40, 7  ;;  %v7192_v46 = vadd.f32 %v7174_v56, %v7012_v58  ;;  %v8259_v57 = vunpack.c.l.b16 %v8168_v1  ;;  %v8170_v17 = vshrl.u32 %v8101_v28, 16  ;;  %v11513_v29 = vld [vmem:[#allocation2 + $0x40] sm:$0xf]  ;;  %v7176_v56 = vpop.f32.mrf.mxu1 }
 0x4e1   : > { %v7890_v18 = vsel %vm12186_vm3, %v11485_v35, %v7889_v39  ;;  %v8173_v60 = vshll.u32 %v8101_v28, 16  ;;  %v8179_v12 = vshll.u32 %v8102_v20, 16  ;;  %v7472_v20 = vld [vmem:[#allocation2 + $0x58] sm:$0xf] }
 0x4e2   : > { %v7915_v53 = vunpack.c.l.b16 %v7890_v18  ;;  %v7367_v22 = vor.u32 %v7365_v48, %v7364_v31  ;;  %v7368_v23 = vrot.slane %v7364_v31, 4  ;;  %v7204_v47 = vmax.f32 %v7192_v46, 0.0 }
 0x4e3   : > { %v8267_v34 = vpack.c.b16 %v8259_v57, %v8258_v41  ;;  %v8172_v10 = vrot.slane %v8170_v17, 4  ;;  %v8175_v45 = vrot.slane %v8173_v60, 5  ;;  %v8181_v15 = vrot.slane %v8179_v12, 5  ;;  %v7594_v41 = vld [vmem:[#allocation2 + $0x18] sm:$0xf] }
 0x4e4   : > { %v7922_v52 = vpack.c.b16 %v7915_v53, %v7914_v24  ;;  %v7467_v13 = vsel %vm12906_vm13, %v7367_v22, %v7466_v63  ;;  %v7470_v9 = vsel %vm12864_vm9, %v7368_v23, %v7469_v21  ;;  %v7301_v38 = vpack.c.bf16 %v7204_v47, %v7204_v47  ;;  %v14341_v42 = vld [vmem:[#allocation2 + $0x4c] sm:$0x1] }
 0x4e5   : > { %11539 = vmatmul.msk.bf16.gmra.mxu1 %vm433_vm2, %v8267_v34  ;;  %7468 = vst [vmem:[#allocation2 + $0x50] sm:$0xf] %v7467_v13  ;;  %v6996_v54 = vpop.f32.mrf.mxu0  ;;  %v11892_v37 = vld [vmem:[#allocation2 + $0x44] sm:$0xf0]  ;;  %v8176_v26 = vor.u32 %v8175_v45, %v8172_v10  ;;  %v14344_v55 = vld [vmem:[#allocation2 + $0x4c] sm:$0x1] }
 0x4e6   : > { %11498 = vmatmul.msk.bf16.gmra.mxu3 %vm433_vm2, %v7922_v52  ;;  %7471 = vst [vmem:[#allocation2 + $0x54] sm:$0x1] %v7470_v9  ;;  %v7370_v43 = vshrl.u32 %v7301_v38, 16  ;;  %v7373_v44 = vshll.u32 %v7301_v38, 16  ;;  %v7013_v11 = vadd.f32 %v6996_v54, %v6725_v30  ;;  %v11514_v5 = vor.u32 %v11892_v37, %v11513_v29  ;;  %v8103_v32 = vld [vmem:[#allocation2 + $0x48] sm:$0xf] }
 0x4e7   : > { %v8177_v50 = vrot.slane %v8176_v26, 4  ;;  %v8184_v51 = vshrl.u32 %v8103_v32, 16  ;;  %v8187_v7 = vshll.u32 %v8103_v32, 16  ;;  %v8193_v62 = vshll.u32 %v14341_v42, 16  ;;  %v7843_v35 = vld [vmem:[#allocation2 + $0x48] sm:$0xe] }
 0x4e8   : > { %v7372_v40 = vrot.slane %v7370_v43, 7  ;;  %v7193_v58 = vadd.f32 %v7176_v56, %v7013_v11  ;;  %11529 = vmatmul.msk.bf16.gmra.mxu0 %vm433_vm2, %v11514_v5  ;;  %v11486_v14 = vrot.slane %v7843_v35, 9  ;;  %v7893_v39 = vrot.slane %v14344_v55, 5  ;;  %v11454_v57 = vld [vmem:[#allocation2 + $0x48] sm:$0xf]  ;;  %v11897_v11 = vld [vmem:[%s15174_s1 + $0x100] sm:$0xff] }
 0x4e9   : > { %v8186_v48 = vrot.slane %v8184_v51, 4  ;;  %v8189_v1 = vrot.slane %v8187_v7, 5  ;;  %v8182_v46 = vsel %vm12237_vm6, %v8177_v50, %v8181_v15  ;;  %v8195_v53 = vrot.slane %v8193_v62, 5  ;;  %v11903_v5 = vld [vmem:[%s15174_s1 + $0x108] sm:$0xff]  ;;  %v7596_v50 = vld [vmem:[#allocation2 + $0x20] sm:$0xf]  ;;  %8452 = vmatpush.bf16.msra.mxu2 %v11897_v11 }
 0x4ea   : > { %v7375_v24 = vor.u32 %v7373_v44, %v7372_v40  ;;  %v7376_v28 = vrot.slane %v7372_v40, 4  ;;  %v7205_v31 = vmax.f32 %v7193_v58, 0.0  ;;  %v7894_v17 = vsel %vm12186_vm3, %v11486_v14, %v7893_v39  ;;  %8556 = vmatpush.bf16.msrb.mxu3 %v11903_v5  ;;  %v7478_v39 = vld [vmem:[#allocation2 + $0x60] sm:$0xf] }
 0x4eb   : > { %v8190_v18 = vor.u32 %v8189_v1, %v8186_v48  ;;  %v7615_v60 = vshrl.u32 %v7594_v41, 16  ;;  %v7618_v63 = vshll.u32 %v7594_v41, 16  ;;  %v8260_v29 = vunpack.c.l.b16 %v8182_v46  ;;  %v7481_v48 = vld [vmem:[#allocation2 + $0x64] sm:$0x1] }
 0x4ec   : > { %v7473_v12 = vsel %vm12906_vm13, %v7375_v24, %v7472_v20  ;;  %v7476_v22 = vsel %vm12864_vm9, %v7376_v28, %v7475_v49  ;;  %v7302_v23 = vpack.c.bf16 %v7205_v31, %v7205_v31  ;;  %v11885_v47 = vld [vmem:[#allocation2 + $0x4c] sm:$0xf0]  ;;  %v7916_v15 = vunpack.c.l.b16 %v7894_v17 }
 0x4ed   : > { %v7844_v34 = vld [vmem:[#allocation2 + $0x50] sm:$0xe]  ;;  %7477 = vst [vmem:[#allocation2 + $0x5c] sm:$0x1] %v7476_v22  ;;  %v11455_v21 = vor.u32 %v11885_v47, %v11454_v57  ;;  %v8191_v30 = vrot.slane %v8190_v18, 4  ;;  %v7617_v51 = vrot.slane %v7615_v60, 4 }
 0x4ee   : > { %v14357_v52 = vld [vmem:[#allocation2 + $0x54] sm:$0x1]  ;;  %v11487_v10 = vrot.slane %v7844_v34, 9  ;;  %7474 = vst [vmem:[#allocation2 + $0x58] sm:$0xf] %v7473_v12  ;;  %v7378_v45 = vshrl.u32 %v7302_v23, 16 }
 0x4ef   : > { %v7897_v13 = vrot.slane %v14357_v52, 5  ;;  %v7381_v9 = vshll.u32 %v7302_v23, 16  ;;  %11467 = vmatmul.msk.bf16.gmra.mxu2 %vm433_vm2, %v11455_v21  ;;  %v8196_v38 = vsel %vm12237_vm6, %v8191_v30, %v8195_v53  ;;  %v8105_v54 = vld [vmem:[#allocation2 + $0x50] sm:$0xf]  ;;  %v7620_v7 = vrot.slane %v7618_v63, 5 }
 0x4f0   : > { %v7380_v37 = vrot.slane %v7378_v45, 7  ;;  %v8261_v26 = vunpack.c.l.b16 %v8196_v38  ;;  %v8198_v44 = vshrl.u32 %v8105_v54, 16  ;;  %v8201_v56 = vshll.u32 %v8105_v54, 16  ;;  %v14371_v58 = vld [vmem:[#allocation2 + $0x54] sm:$0x1] }
 0x4f1   : > { %v7898_v43 = vsel %vm12186_vm3, %v11487_v10, %v7897_v13  ;;  %v11517_v20 = vld [vmem:[#allocation2 + $0x50] sm:$0xf]  ;;  %v7629_v46 = vshrl.u32 %v7596_v50, 16  ;;  %v8207_v18 = vshll.u32 %v14371_v58, 16  ;;  %v7621_v12 = vor.u32 %v7620_v7, %v7617_v51  ;;  %v8111_v13 = vld [vmem:[#allocation2 + $0x68] sm:$0xf] }
 0x4f2   : > { %v7917_v32 = vunpack.c.l.b16 %v7898_v43  ;;  %v7383_v62 = vor.u32 %v7381_v9, %v7380_v37  ;;  %v7384_v35 = vrot.slane %v7380_v37, 4  ;;  %v8268_v40 = vpack.c.b16 %v8261_v26, %v8260_v29  ;;  %v11905_v43 = vld [vmem:[%s15174_s1 + $0x118] sm:$0xff] }
 0x4f3   : > { %v8200_v14 = vrot.slane %v8198_v44, 4  ;;  %v8203_v41 = vrot.slane %v8201_v56, 5  ;;  %v7624_v63 = vshll.u32 %v14230_v6, 16  ;;  %v7631_v30 = vrot.slane %v7629_v46, 4  ;;  %v11904_v6 = vld [vmem:[%s15174_s1 + $0x110] sm:$0xff]  ;;  %8952 = vmatpush.bf16.msra.mxu1 %v11905_v43 }
 0x4f4   : > { %v7923_v1 = vpack.c.b16 %v7917_v32, %v7916_v15  ;;  %v7479_v24 = vsel %vm12906_vm13, %v7383_v62, %v7478_v39  ;;  %v7482_v28 = vsel %vm12864_vm9, %v7384_v35, %v7481_v48  ;;  %v14378_v31 = vld [vmem:[#allocation2 + $0x5c] sm:$0x1]  ;;  %v7632_v10 = vshll.u32 %v7596_v50, 16  ;;  %8799 = vmatpush.bf16.msra.mxu0 %v11904_v6 }
 0x4f5   : > { %11540 = vmatmul.msk.bf16.gmra.mxu1 %vm433_vm2, %v8268_v40  ;;  %7480 = vst [vmem:[#allocation2 + $0x60] sm:$0xf] %v7479_v24  ;;  %v11893_v49 = vld [vmem:[#allocation2 + $0x54] sm:$0xf0]  ;;  %v8204_v57 = vor.u32 %v8203_v41, %v8200_v14  ;;  %v14382_v60 = vld [vmem:[#allocation2 + $0x5c] sm:$0x1] }
 0x4f6   : > { %11499 = vmatmul.msk.bf16.gmra.mxu3 %vm433_vm2, %v7923_v1  ;;  %7483 = vst [vmem:[#allocation2 + $0x64] sm:$0x1] %v7482_v28  ;;  %v11518_v53 = vor.u32 %v11893_v49, %v11517_v20  ;;  %v8107_v17 = vld [vmem:[#allocation2 + $0x58] sm:$0xf]  ;;  %v8221_v47 = vshll.u32 %v14378_v31, 16  ;;  %v7638_v45 = vshll.u32 %v14232_v8, 16 }
 0x4f7   : > { %v8212_v22 = vshrl.u32 %v8107_v17, 16  ;;  %v8215_v23 = vshll.u32 %v8107_v17, 16  ;;  %v7845_v34 = vld [vmem:[#allocation2 + $0x58] sm:$0xe]  ;;  %v8205_v21 = vrot.slane %v8204_v57, 4  ;;  %v7901_v15 = vrot.slane %v14382_v60, 5 }
 0x4f8   : > { %11530 = vmatmul.msk.bf16.gmra.mxu0 %vm433_vm2, %v11518_v53  ;;  %v11488_v29 = vrot.slane %v7845_v34, 9  ;;  %v8209_v54 = vrot.slane %v8207_v18, 5  ;;  %v7622_v37 = vrot.slane %v7621_v12, 4  ;;  %v7634_v26 = vrot.slane %v7632_v10, 5  ;;  %v11458_v44 = vld [vmem:[#allocation2 + $0x58] sm:$0xf] }
 0x4f9   : > { %v8214_v9 = vrot.slane %v8212_v22, 4  ;;  %v8217_v38 = vrot.slane %v8215_v23, 5  ;;  %v7626_v8 = vrot.slane %v7624_v63, 5  ;;  %v8240_v5 = vshrl.u32 %v8111_v13, 16  ;;  %v8593_v53 = vld [vmem:[#allocation2 + $0x28] sm:$0xf] }
 0x4fa   : > { %v8243_v32 = vshll.u32 %v8111_v13, 16  ;;  %v8210_v50 = vsel %vm12237_vm6, %v8205_v21, %v8209_v54  ;;  %v8223_v51 = vrot.slane %v8221_v47, 5  ;;  %v7635_v62 = vor.u32 %v7634_v26, %v7631_v30  ;;  %v14413_v13 = vld [vmem:[#allocation2 + $0x6c] sm:$0x1]  ;;  %v11894_v26 = vld [vmem:[#allocation2 + $0x64] sm:$0xf0] }
 0x4fb   : > { %v8218_v11 = vor.u32 %v8217_v38, %v8214_v9  ;;  %v7640_v35 = vrot.slane %v7638_v45, 5  ;;  %v7902_v48 = vsel %vm12186_vm3, %v11488_v29, %v7901_v15  ;;  %v8242_v57 = vrot.slane %v8240_v5, 4  ;;  %v8595_v38 = vld [vmem:[#allocation2 + $0x30] sm:$0xf] }
 0x4fc   : > { %v11886_v56 = vld [vmem:[#allocation2 + $0x5c] sm:$0xf0]  ;;  %v7636_v28 = vrot.slane %v7635_v62, 4  ;;  %v8245_v18 = vrot.slane %v8243_v32, 5  ;;  %v8262_v17 = vunpack.c.l.b16 %v8210_v50  ;;  %v7918_v47 = vunpack.c.l.b16 %v7902_v48  ;;  %v14419_v62 = vld [vmem:[#allocation2 + $0x34] sm:$0x1] }
 0x4fd   : > { %v7846_v7 = vld [vmem:[#allocation2 + $0x60] sm:$0xe]  ;;  %v11459_v40 = vor.u32 %v11886_v56, %v11458_v44  ;;  %v8219_v14 = vrot.slane %v8218_v11, 4  ;;  %v14397_v39 = vld [vmem:[#allocation2 + $0x64] sm:$0x1]  ;;  %v7627_v63 = vsel %vm12237_vm6, %v7622_v37, %v7626_v8  ;;  %v8614_v29 = vshrl.u32 %v8593_v53, 16 }
 0x4fe   : > { %v11489_v1 = vrot.slane %v7846_v7, 9  ;;  %v8109_v41 = vld [vmem:[#allocation2 + $0x60] sm:$0xf]  ;;  %v7905_v24 = vrot.slane %v14397_v39, 5  ;;  %v14409_v21 = vld [vmem:[#allocation2 + $0x64] sm:$0x1]  ;;  %v7641_v45 = vsel %vm12237_vm6, %v7636_v28, %v7640_v35  ;;  %v8246_v9 = vor.u32 %v8245_v18, %v8242_v57 }
 0x4ff   : > { %v8226_v20 = vshrl.u32 %v8109_v41, 16  ;;  %v8229_v46 = vshll.u32 %v8109_v41, 16  ;;  %11468 = vmatmul.msk.bf16.gmra.mxu2 %vm433_vm2, %v11459_v40  ;;  %v8224_v49 = vsel %vm12237_vm6, %v8219_v14, %v8223_v51  ;;  %v11521_v54 = vld [vmem:[#allocation2 + $0x60] sm:$0xf]  ;;  %v8249_v43 = vshll.u32 %v14413_v13, 16 }
 0x500   : > { %v8263_v12 = vunpack.c.l.b16 %v8224_v49  ;;  %v7906_v22 = vsel %vm12186_vm3, %v11489_v1, %v7905_v24  ;;  %v8617_v44 = vshll.u32 %v8593_v53, 16  ;;  %v8235_v37 = vshll.u32 %v14409_v21, 16  ;;  %v7598_v56 = vld [vmem:[#allocation2 + $0x28] sm:$0xf]  ;;  %v7600_v35 = vld [vmem:[#allocation2 + $0x30] sm:$0xf] }
 0x501   : > { %v8228_v23 = vrot.slane %v8226_v20, 4  ;;  %v7919_v34 = vunpack.c.l.b16 %v7906_v22  ;;  %v8231_v30 = vrot.slane %v8229_v46, 5  ;;  %v8616_v11 = vrot.slane %v8614_v29, 4  ;;  %v14426_v28 = vld [vmem:[#allocation2 + $0x2c] sm:$0x1] }
 0x502   : > { %v8269_v10 = vpack.c.b16 %v8263_v12, %v8262_v17  ;;  %v8619_v8 = vrot.slane %v8617_v44, 5  ;;  %v8628_v5 = vshrl.u32 %v8595_v38, 16  ;;  %v8631_v32 = vshll.u32 %v8595_v38, 16 }
 0x503   : > { %v7924_v15 = vpack.c.b16 %v7919_v34, %v7918_v47  ;;  %v8232_v6 = vor.u32 %v8231_v30, %v8228_v23  ;;  %v11522_v50 = vor.u32 %v11894_v26, %v11521_v54  ;;  %v7757_v51 = vunpack.c.l.b16 %v7627_v63  ;;  %v14434_v63 = vld [vmem:[#allocation2 + $0x20] sm:$0xe] }
 0x504   : > { %v7758_v7 = vunpack.c.l.b16 %v7641_v45  ;;  %v8247_v14 = vrot.slane %v8246_v9, 4  ;;  %v8251_v48 = vrot.slane %v8249_v43, 5  ;;  %v8630_v1 = vrot.slane %v8628_v5, 4  ;;  %v8599_v5 = vld [vmem:[#allocation2 + $0x40] sm:$0xf] }
 0x505   : > { %11541 = vmatmul.msk.bf16.gmra.mxu1 %vm433_vm2, %v8269_v10  ;;  %v8233_v40 = vrot.slane %v8232_v6, 4  ;;  %v9180_v41 = vsel %vm12906_vm13, %v12914_v19, %v14264_v36  ;;  %v8237_v24 = vrot.slane %v8235_v37, 5  ;;  %v8633_v20 = vrot.slane %v8631_v32, 5  ;;  %v8597_v6 = vld [vmem:[#allocation2 + $0x38] sm:$0xf]  ;;  %v6590_v32 = vpop.f32.mrf.mxu2 }
 0x506   : > { %11500 = vmatmul.msk.bf16.gmra.mxu3 %vm433_vm2, %v7924_v15  ;;  %v7643_v46 = vshrl.u32 %v7598_v56, 16  ;;  %v8620_v49 = vor.u32 %v8619_v8, %v8616_v11  ;;  %v8637_v57 = vshll.u32 %v14419_v62, 16  ;;  %v7646_v18 = vshll.u32 %v7598_v56, 16  ;;  %9181 = vst [vmem:[#allocation2 + $0x20] sm:$0xf] %v9180_v41 }
 0x507   : > { %v7657_v53 = vshrl.u32 %v7600_v35, 16  ;;  %v7767_v17 = vpack.c.b16 %v7758_v7, %v7757_v51  ;;  %v8634_v12 = vor.u32 %v8633_v20, %v8630_v1  ;;  %v7660_v22 = vshll.u32 %v7600_v35, 16  ;;  %v11898_v37 = vld [vmem:[#allocation2 + $0x2c] sm:$0xf0]  ;;  %v11568_v35 = vld [vmem:[#allocation2 + $0x28] sm:$0xf] }
 0x508   : > { %11531 = vmatmul.msk.bf16.gmra.mxu0 %vm433_vm2, %v11522_v50  ;;  %v8238_v23 = vsel %vm12237_vm6, %v8233_v40, %v8237_v24  ;;  %v8252_v36 = vsel %vm12237_vm6, %v8247_v14, %v8251_v48  ;;  %v8623_v47 = vshll.u32 %v14426_v28, 16  ;;  %v7645_v10 = vrot.slane %v7643_v46, 4  ;;  %v8837_v41 = vld [vmem:[#allocation2 + $0x30] sm:$0xe] }
 0x509   : > { %v7659_v34 = vrot.slane %v7657_v53, 4  ;;  %v8635_v30 = vrot.slane %v8634_v12, 4  ;;  %v7648_v45 = vrot.slane %v7646_v18, 5  ;;  %v7662_v9 = vrot.slane %v7660_v22, 5  ;;  %v7604_v18 = vld [vmem:[#allocation2 + $0x40] sm:$0xf] }
 0x50a   : > { %v8621_v38 = vrot.slane %v8620_v49, 4  ;;  %v8639_v29 = vrot.slane %v8637_v57, 5  ;;  %v8264_v15 = vunpack.c.l.b16 %v8238_v23  ;;  %v8265_v54 = vunpack.c.l.b16 %v8252_v36  ;;  %v8836_v57 = vld [vmem:[#allocation2 + $0x28] sm:$0xe]  ;;  %v7602_v23 = vld [vmem:[#allocation2 + $0x38] sm:$0xf] }
 0x50b   : > { %v7663_v26 = vor.u32 %v7662_v9, %v7659_v34  ;;  %v8625_v43 = vrot.slane %v8623_v47, 5  ;;  %v7649_v11 = vor.u32 %v7648_v45, %v7645_v10  ;;  %v7666_v8 = vshll.u32 %v14295_v25, 16 }
 0x50c   : > { %v8640_v44 = vsel %vm12237_vm6, %v8635_v30, %v8639_v29  ;;  %v8642_v50 = vshrl.u32 %v8597_v6, 16  ;;  %v8645_v51 = vshll.u32 %v8597_v6, 16  ;;  %v8270_v7 = vpack.c.b16 %v8265_v54, %v8264_v15  ;;  %v14447_v30 = vld [vmem:[#allocation2 + $0x44] sm:$0x1]  ;;  %v14453_v54 = vld [vmem:[#allocation2 + $0x3c] sm:$0x1] }
 0x50d   : > { %v8626_v56 = vsel %vm12237_vm6, %v8621_v38, %v8625_v43  ;;  %v8757_v40 = vunpack.c.l.b16 %v8640_v44  ;;  %v7652_v14 = vshll.u32 %v14280_v2, 16  ;;  %v7664_v48 = vrot.slane %v7663_v26, 4  ;;  %v6592_v43 = vpop.f32.mrf.mxu2 }
 0x50e   : > { %v11569_v1 = vor.u32 %v11898_v37, %v11568_v35  ;;  %v8656_v24 = vshrl.u32 %v8599_v5, 16  ;;  %v8659_v20 = vshll.u32 %v8599_v5, 16  ;;  %v8756_v25 = vunpack.c.l.b16 %v8626_v56  ;;  %v8838_v43 = vld [vmem:[#allocation2 + $0x38] sm:$0xe] }
 0x50f   : > { %11475 = vmatmul.msk.bf16.vlgmr.msrb.gmra.mxu2 %vm433_vm2, %v7767_v17  ;;  %v7650_v46 = vrot.slane %v7649_v11, 4  ;;  %v7668_v49 = vrot.slane %v7666_v8, 5  ;;  %v8644_v53 = vrot.slane %v8642_v50, 4  ;;  %v8647_v17 = vrot.slane %v8645_v51, 5 }
 0x510   : > { %v8658_v12 = vrot.slane %v8656_v24, 4  ;;  %v8661_v22 = vrot.slane %v8659_v20, 5  ;;  %v8766_v2 = vpack.c.b16 %v8757_v40, %v8756_v25  ;;  %v7654_v36 = vrot.slane %v7652_v14, 5  ;;  %v8603_v40 = vld [vmem:[#allocation2 + $0x50] sm:$0xf] }
 0x511   : > { %v7669_v47 = vsel %vm12237_vm6, %v7664_v48, %v7668_v49  ;;  %v11607_v34 = vrot.slane %v8837_v41, 9  ;;  %v8872_v10 = vrot.slane %v14419_v62, 5  ;;  %v7685_v9 = vshrl.u32 %v7604_v18, 16  ;;  %v8601_v20 = vld [vmem:[#allocation2 + $0x48] sm:$0xf] }
 0x512   : > { %v8662_v45 = vor.u32 %v8661_v22, %v8658_v12  ;;  %v7688_v38 = vshll.u32 %v7604_v18, 16  ;;  %v7655_v29 = vsel %vm12237_vm6, %v7650_v46, %v7654_v36  ;;  %v11606_v15 = vrot.slane %v8836_v57, 9  ;;  %v11899_v18 = vld [vmem:[#allocation2 + $0x3c] sm:$0xf0] }
 0x513   : > { %v7671_v26 = vshrl.u32 %v7602_v23, 16  ;;  %v7674_v6 = vshll.u32 %v7602_v23, 16  ;;  %v7760_v44 = vunpack.c.l.b16 %v7669_v47  ;;  %v8868_v37 = vrot.slane %v14426_v28, 5 }
 0x514   : > { %v8648_v11 = vor.u32 %v8647_v17, %v8644_v53  ;;  %v8665_v62 = vshll.u32 %v14447_v30, 16  ;;  %v7687_v8 = vrot.slane %v7685_v9, 4  ;;  %v7690_v5 = vrot.slane %v7688_v38, 5 }
 0x515   : > { %11542 = vmatmul.msk.bf16.gmra.mxu1 %vm433_vm2, %v8270_v7  ;;  %v7759_v32 = vunpack.c.l.b16 %v7655_v29  ;;  %v8873_v56 = vsel %vm12186_vm3, %v11607_v34, %v8872_v10  ;;  %v8651_v50 = vshll.u32 %v14453_v54, 16  ;;  %v8663_v51 = vrot.slane %v8662_v45, 4  ;;  %v11572_v34 = vld [vmem:[#allocation2 + $0x38] sm:$0xf] }
 0x516   : > { %11590 = vmatmul.msk.bf16.vlgmr.msrb.gmra.mxu3 %vm433_vm2, %v11569_v1  ;;  %v7673_v7 = vrot.slane %v7671_v26, 4  ;;  %v7676_v35 = vrot.slane %v7674_v6, 5  ;;  %v8869_v48 = vsel %vm12186_vm3, %v11606_v15, %v8868_v37  ;;  %v8649_v28 = vrot.slane %v8648_v11, 4  ;;  %v7608_v15 = vld [vmem:[#allocation2 + $0x50] sm:$0xf] }
 0x517   : > { %v7768_v14 = vpack.c.b16 %v7760_v44, %v7759_v32  ;;  %v8667_v1 = vrot.slane %v8665_v62, 5  ;;  %v8910_v41 = vunpack.c.l.b16 %v8873_v56  ;;  %v7691_v24 = vor.u32 %v7690_v5, %v7687_v8  ;;  %v8839_v44 = vld [vmem:[#allocation2 + $0x40] sm:$0xe]  ;;  %v7606_v62 = vld [vmem:[#allocation2 + $0x48] sm:$0xf] }
 0x518   : > { %11601 = vmatmul.msk.bf16.vlgmr.msra.gmra.mxu0 %vm433_vm2, %v8766_v2  ;;  %v8653_v25 = vrot.slane %v8651_v50, 5  ;;  %v8684_v49 = vshrl.u32 %v8603_v40, 16  ;;  %v8909_v57 = vunpack.c.l.b16 %v8869_v48  ;;  %v7677_v53 = vor.u32 %v7676_v35, %v7673_v7  ;;  %v14473_v32 = vld [vmem:[#allocation2 + $0x54] sm:$0x1]  ;;  %v14479_v48 = vld [vmem:[#allocation2 + $0x4c] sm:$0x1] }
 0x519   : > { %v8668_v46 = vsel %vm12237_vm6, %v8663_v51, %v8667_v1  ;;  %v7694_v17 = vshll.u32 %v14326_v3, 16  ;;  %v8687_v12 = vshll.u32 %v8603_v40, 16  ;;  %v7680_v23 = vshll.u32 %v14316_v16, 16 }
 0x51a   : > { %v8654_v22 = vsel %vm12237_vm6, %v8649_v28, %v8653_v25  ;;  %v8670_v2 = vshrl.u32 %v8601_v20, 16  ;;  %v8673_v36 = vshll.u32 %v8601_v20, 16  ;;  %v8919_v47 = vpack.c.b16 %v8910_v41, %v8909_v57 }
 0x51b   : > { %v8759_v10 = vunpack.c.l.b16 %v8668_v46  ;;  %v7692_v45 = vrot.slane %v7691_v24, 4  ;;  %v11573_v9 = vor.u32 %v11899_v18, %v11572_v34  ;;  %v8686_v38 = vrot.slane %v8684_v49, 4 }
 0x51c   : > { %v8689_v29 = vrot.slane %v8687_v12, 5  ;;  %v8758_v26 = vunpack.c.l.b16 %v8654_v22  ;;  %v7678_v3 = vrot.slane %v7677_v53, 4  ;;  %v7696_v6 = vrot.slane %v7694_v17, 5  ;;  %v8607_v22 = vld [vmem:[#allocation2 + $0x60] sm:$0xf] }
 0x51d   : > { %v7682_v16 = vrot.slane %v7680_v23, 5  ;;  %v8672_v37 = vrot.slane %v8670_v2, 4  ;;  %v8675_v11 = vrot.slane %v8673_v36, 5  ;;  %v7713_v56 = vshrl.u32 %v7608_v15, 16 }
 0x51e   : > { %v8767_v8 = vpack.c.b16 %v8759_v10, %v8758_v26  ;;  %v7697_v5 = vsel %vm12237_vm6, %v7692_v45, %v7696_v6  ;;  %v7716_v50 = vshll.u32 %v7608_v15, 16  ;;  %v11609_v51 = vrot.slane %v8839_v44, 9  ;;  %v8605_v45 = vld [vmem:[#allocation2 + $0x58] sm:$0xf]  ;;  %v7569_v6 = vpop.f32.mrf.mxu2 }
 0x51f   : > { %11476 = vmatmul.msk.bf16.gmra.mxu2 %vm433_vm2, %v7768_v14  ;;  %v8880_v7 = vrot.slane %v14447_v30, 5  ;;  %v8690_v35 = vor.u32 %v8689_v29, %v8686_v38  ;;  %v7683_v40 = vsel %vm12237_vm6, %v7678_v3, %v7682_v16  ;;  %v11608_v14 = vrot.slane %v8838_v43, 9  ;;  %v11900_v3 = vld [vmem:[#allocation2 + $0x4c] sm:$0xf0] }
 0x520   : > { %v7699_v28 = vshrl.u32 %v7606_v62, 16  ;;  %v7702_v1 = vshll.u32 %v7606_v62, 16  ;;  %v7762_v41 = vunpack.c.l.b16 %v7697_v5  ;;  %v8876_v24 = vrot.slane %v14453_v54, 5  ;;  %v6711_v54 = vpop.f32.mrf.mxu3 }
 0x521   : > { %v8676_v20 = vor.u32 %v8675_v11, %v8672_v37  ;;  %v8693_v25 = vshll.u32 %v14473_v32, 16  ;;  %v7715_v46 = vrot.slane %v7713_v56, 4  ;;  %v7718_v49 = vrot.slane %v7716_v50, 5  ;;  %v11576_v56 = vld [vmem:[#allocation2 + $0x48] sm:$0xf] }
 0x522   : > { %v7761_v30 = vunpack.c.l.b16 %v7683_v40  ;;  %v8881_v57 = vsel %vm12186_vm3, %v11609_v51, %v8880_v7  ;;  %v8679_v18 = vshll.u32 %v14479_v48, 16  ;;  %v8691_v53 = vrot.slane %v8690_v35, 4 }
 0x523   : > { %v7701_v17 = vrot.slane %v7699_v28, 4  ;;  %v7704_v12 = vrot.slane %v7702_v1, 5  ;;  %v8877_v2 = vsel %vm12186_vm3, %v11608_v14, %v8876_v24  ;;  %v8677_v36 = vrot.slane %v8676_v20, 4  ;;  %v7612_v14 = vld [vmem:[#allocation2 + $0x60] sm:$0xf] }
 0x524   : > { %v7769_v23 = vpack.c.b16 %v7762_v41, %v7761_v30  ;;  %v8912_v34 = vunpack.c.l.b16 %v8881_v57  ;;  %v7719_v10 = vor.u32 %v7718_v49, %v7715_v46  ;;  %v8712_v29 = vshrl.u32 %v8607_v22, 16  ;;  %v8840_v24 = vld [vmem:[#allocation2 + $0x48] sm:$0xe]  ;;  %v8841_v20 = vld [vmem:[#allocation2 + $0x50] sm:$0xe] }
 0x525   : > { %11622 = vmatmul.msk.bf16.vlgmr.msra.gmra.mxu1 %vm433_vm2, %v8919_v47  ;;  %v8695_v47 = vrot.slane %v8693_v25, 5  ;;  %v8715_v15 = vshll.u32 %v8607_v22, 16  ;;  %v8911_v26 = vunpack.c.l.b16 %v8877_v2  ;;  %v7705_v43 = vor.u32 %v7704_v12, %v7701_v17  ;;  %v7610_v30 = vld [vmem:[#allocation2 + $0x58] sm:$0xf] }
 0x526   : > { %11591 = vmatmul.msk.bf16.gmra.mxu3 %vm433_vm2, %v11573_v9  ;;  %v8681_v9 = vrot.slane %v8679_v18, 5  ;;  %v7722_v44 = vshll.u32 %v14357_v52, 16  ;;  %v7708_v37 = vshll.u32 %v14344_v55, 16  ;;  %v8698_v11 = vshrl.u32 %v8605_v45, 16 }
 0x527   : > { %v8696_v38 = vsel %vm12237_vm6, %v8691_v53, %v8695_v47  ;;  %v8701_v62 = vshll.u32 %v8605_v45, 16  ;;  %v7720_v51 = vrot.slane %v7719_v10, 4  ;;  %v11577_v7 = vor.u32 %v11900_v3, %v11576_v56  ;;  %v14499_v53 = vld [vmem:[#allocation2 + $0x64] sm:$0x1]  ;;  %v14505_v47 = vld [vmem:[#allocation2 + $0x5c] sm:$0x1] }
 0x528   : > { %11602 = vmatmul.msk.bf16.gmra.mxu0 %vm433_vm2, %v8767_v8  ;;  %v8682_v16 = vsel %vm12237_vm6, %v8677_v36, %v8681_v9  ;;  %v8920_v8 = vpack.c.b16 %v8912_v34, %v8911_v26  ;;  %v8761_v50 = vunpack.c.l.b16 %v8696_v38  ;;  %v8714_v35 = vrot.slane %v8712_v29, 4  ;;  %v7179_v52 = vpop.f32.mrf.mxu1  ;;  %v6713_v55 = vpop.f32.mrf.mxu3 }
 0x529   : > { %v8717_v40 = vrot.slane %v8715_v15, 5  ;;  %v8760_v28 = vunpack.c.l.b16 %v8682_v16  ;;  %v7706_v1 = vrot.slane %v7705_v43, 4  ;;  %v7724_v41 = vrot.slane %v7722_v44, 5 }
 0x52a   : > { %v7710_v25 = vrot.slane %v7708_v37, 5  ;;  %v8700_v46 = vrot.slane %v8698_v11, 4  ;;  %v8703_v49 = vrot.slane %v8701_v62, 5  ;;  %v7741_v17 = vshrl.u32 %v7612_v14, 16 }
 0x52b   : > { %v8768_v57 = vpack.c.b16 %v8761_v50, %v8760_v28  ;;  %v7725_v18 = vsel %vm12237_vm6, %v7720_v51, %v7724_v41  ;;  %v7744_v12 = vshll.u32 %v7612_v14, 16  ;;  %v11611_v22 = vrot.slane %v8841_v20, 9  ;;  %v11901_v14 = vld [vmem:[#allocation2 + $0x5c] sm:$0xf0] }
 0x52c   : > { %v6999_v5 = vpop.f32.mrf.mxu0  ;;  %v8718_v2 = vor.u32 %v8717_v40, %v8714_v35  ;;  %v7711_v54 = vsel %vm12237_vm6, %v7706_v1, %v7710_v25  ;;  %v11610_v36 = vrot.slane %v8840_v24, 9  ;;  %v7727_v34 = vshrl.u32 %v7610_v30, 16  ;;  %v11580_v24 = vld [vmem:[#allocation2 + $0x58] sm:$0xf] }
 0x52d   : > { %v7730_v10 = vshll.u32 %v7610_v30, 16  ;;  %v7764_v45 = vunpack.c.l.b16 %v7725_v18  ;;  %v8884_v9 = vrot.slane %v14479_v48, 5  ;;  %v8704_v38 = vor.u32 %v8703_v49, %v8700_v46  ;;  %v8843_v18 = vld [vmem:[#allocation2 + $0x60] sm:$0xe] }
 0x52e   : > { %v8721_v29 = vshll.u32 %v14499_v53, 16  ;;  %v7743_v26 = vrot.slane %v7741_v17, 4  ;;  %v7763_v3 = vunpack.c.l.b16 %v7711_v54  ;;  %v8707_v43 = vshll.u32 %v14505_v47, 16 }
 0x52f   : > { %11477 = vmatmul.msk.bf16.gmra.mxu2 %vm433_vm2, %v7769_v23  ;;  %v8888_v23 = vrot.slane %v14473_v32, 5  ;;  %v7746_v32 = vrot.slane %v7744_v12, 5  ;;  %v8719_v44 = vrot.slane %v8718_v2, 4  ;;  %v7729_v37 = vrot.slane %v7727_v34, 4 }
 0x530   : > { %v7181_v16 = vpop.f32.mrf.mxu1  ;;  %v7732_v11 = vrot.slane %v7730_v10, 5  ;;  %v7770_v62 = vpack.c.b16 %v7764_v45, %v7763_v3  ;;  %v8885_v48 = vsel %vm12186_vm3, %v11610_v36, %v8884_v9  ;;  %v8705_v5 = vrot.slane %v8704_v38, 4  ;;  %v14530_v45 = vpop.f32.mrf.mxu2  ;;  %v8337_v3 = vld [vmem:[#allocation2 + $0x28] sm:$0xe] }
 0x531   : > { %v8889_v6 = vsel %vm12186_vm3, %v11611_v22, %v8888_v23  ;;  %v8723_v56 = vrot.slane %v8721_v29, 5  ;;  %v7747_v51 = vor.u32 %v7746_v32, %v7743_v26  ;;  %v8913_v40 = vunpack.c.l.b16 %v8885_v48  ;;  %v8842_v23 = vld [vmem:[#allocation2 + $0x58] sm:$0xe] }
 0x532   : > { %v8914_v50 = vunpack.c.l.b16 %v8889_v6  ;;  %v7733_v28 = vor.u32 %v7732_v11, %v7729_v37  ;;  %v7750_v52 = vshll.u32 %v14397_v39, 16  ;;  %v7736_v55 = vshll.u32 %v14382_v60, 16 }
 0x533   : > { %v8724_v35 = vsel %vm12237_vm6, %v8719_v44, %v8723_v56  ;;  %v7748_v25 = vrot.slane %v7747_v51, 4  ;;  %v11581_v46 = vor.u32 %v11901_v14, %v11580_v24  ;;  %v11613_v2 = vrot.slane %v8843_v18, 9  ;;  %v8339_v14 = vld [vmem:[#allocation2 + $0x38] sm:$0xe] }
 0x534   : > { %v7001_v15 = vpop.f32.mrf.mxu0  ;;  %v8921_v41 = vpack.c.b16 %v8914_v50, %v8913_v40  ;;  %v8763_v20 = vunpack.c.l.b16 %v8724_v35  ;;  %v7734_v30 = vrot.slane %v7733_v28, 4  ;;  %v7738_v12 = vrot.slane %v7736_v55, 5 }
 0x535   : > { %11623 = vmatmul.msk.bf16.gmra.mxu1 %vm433_vm2, %v8920_v8  ;;  %v8896_v60 = vrot.slane %v14499_v53, 5  ;;  %v11612_v34 = vrot.slane %v8842_v23, 9  ;;  %v8892_v10 = vrot.slane %v14505_v47, 5  ;;  %v8368_v37 = vrot.slane %v14266_v27, 5 }
 0x536   : > { %11592 = vmatmul.msk.bf16.gmra.mxu3 %vm433_vm2, %v11577_v7  ;;  %v8709_v7 = vrot.slane %v8707_v43, 5  ;;  %v7739_v54 = vsel %vm12237_vm6, %v7734_v30, %v7738_v12  ;;  %v11543_v43 = vrot.slane %v14434_v63, 9  ;;  %v11544_v11 = vrot.slane %v8337_v3, 9 }
 0x537   : > { %v7765_v9 = vunpack.c.l.b16 %v7739_v54  ;;  %v8897_v38 = vsel %vm12186_vm3, %v11613_v2, %v8896_v60  ;;  %v8893_v53 = vsel %vm12186_vm3, %v11612_v34, %v8892_v10  ;;  %v11546_v24 = vrot.slane %v8339_v14, 9  ;;  %v8341_v54 = vld [vmem:[#allocation2 + $0x48] sm:$0xe]  ;;  %v8340_v10 = vld [vmem:[#allocation2 + $0x40] sm:$0xe] }
 0x538   : > { %11603 = vmatmul.msk.bf16.gmra.mxu0 %vm433_vm2, %v8768_v57  ;;  %v8710_v1 = vsel %vm12237_vm6, %v8705_v5, %v8709_v7  ;;  %v7752_v57 = vrot.slane %v7750_v52, 5  ;;  %v8916_v32 = vunpack.c.l.b16 %v8897_v38  ;;  %v8915_v6 = vunpack.c.l.b16 %v8893_v53  ;;  %v11584_v14 = vld [vmem:[#allocation2 + $0x68] sm:$0xf] }
 0x539   : > { %v8762_v49 = vunpack.c.l.b16 %v8710_v1  ;;  %v8369_v5 = vsel %vm12186_vm3, %v11543_v43, %v8368_v37  ;;  %v8338_v1 = vld [vmem:[#allocation2 + $0x30] sm:$0xe]  ;;  %v11548_v38 = vrot.slane %v8341_v54, 9  ;;  %v11547_v53 = vrot.slane %v8340_v10, 9 }
 0x53a   : > { %v7753_v22 = vsel %vm12237_vm6, %v7748_v25, %v7752_v57  ;;  %v8922_v16 = vpack.c.b16 %v8916_v32, %v8915_v6  ;;  %v8409_v51 = vunpack.c.l.b16 %v8369_v5  ;;  %v11545_v25 = vrot.slane %v8338_v1, 9  ;;  %v11998_v32 = vld [vmem:[#allocation2 + $0x44] sm:$0x1]  ;;  %v11902_v1 = vld [vmem:[#allocation2 + $0x6c] sm:$0xf0] }
 0x53b   : > { %v7955_v8 = vpop.f32.mrf.mxu3  ;;  %v8769_v39 = vpack.c.b16 %v8763_v20, %v8762_v49  ;;  %v7766_v36 = vunpack.c.l.b16 %v7753_v22  ;;  %v11996_v20 = vld [vmem:[#allocation2 + $0x3c] sm:$0x1]  ;;  %v8384_v3 = vrot.slane %v11998_v32, 5 }
 0x53c   : > { %v8380_v55 = vrot.slane %v11996_v20, 5 }
 0x53d   : > { %v7771_v15 = vpack.c.b16 %v7766_v36, %v7765_v9 }
 0x53e   : > { %v8381_v57 = vsel %vm12186_vm3, %v11546_v24, %v8380_v55  ;;  %v8396_v55 = vrot.slane %v14378_v31, 5 }
 0x53f   : > { %11478 = vmatmul.msk.bf16.gmra.mxu2 %vm433_vm2, %v7770_v62  ;;  %v11995_v62 = vld [vmem:[#allocation2 + $0x2c] sm:$0x1]  ;;  %v8412_v12 = vunpack.c.l.b16 %v8381_v57 }
 0x540   : > { %v8372_v48 = vrot.slane %v11995_v62, 5  ;;  %v9236_v57 = vld [vmem:[#allocation2 + $0x6c] sm:$0x1] }
 0x542   : > { %v8373_v56 = vsel %vm12186_vm3, %v11544_v11, %v8372_v48 }
 0x543   : > { %v14538_v26 = vpop.f32.mrf.mxu3  ;;  %v8410_v7 = vunpack.c.l.b16 %v8373_v56  ;;  %v8343_v56 = vld [vmem:[#allocation2 + $0x58] sm:$0xe] }
 0x544   : > { %v11550_v20 = vrot.slane %v8343_v56, 9  ;;  %v8344_v56 = vld [vmem:[#allocation2 + $0x60] sm:$0xe] }
 0x545   : > { %11624 = vmatmul.msk.bf16.gmra.mxu1 %vm433_vm2, %v8921_v41  ;;  %v8058_v17 = vpop.f32.mrf.mxu0  ;;  %v8419_v40 = vpack.c.b16 %v8410_v7, %v8409_v51 }
 0x546   : > { %11593 = vmatmul.msk.bf16.gmra.mxu3 %vm433_vm2, %v11581_v46  ;;  %v11997_v46 = vld [vmem:[#allocation2 + $0x34] sm:$0x1] }
 0x547   : > { %v8376_v49 = vrot.slane %v11997_v46, 5 }
 0x548   : > { %11604 = vmatmul.msk.bf16.gmra.mxu0 %vm433_vm2, %v8769_v39 }
 0x549   : > { %v8377_v17 = vsel %vm12186_vm3, %v11545_v25, %v8376_v49  ;;  %v11585_v25 = vor.u32 %v11902_v1, %v11584_v14  ;;  %v8392_v49 = vrot.slane %v14371_v58, 5  ;;  %v8345_v1 = vld [vmem:[#allocation2 + $0x68] sm:$0xe] }
 0x54a   : > { %v8411_v23 = vunpack.c.l.b16 %v8377_v17 }
 0x54c   : > { %v8420_v60 = vpack.c.b16 %v8412_v12, %v8411_v23  ;;  %v8397_v12 = vsel %vm12186_vm3, %v11550_v20, %v8396_v55  ;;  %v9233_v23 = vld [vmem:[#allocation2 + $0x68] sm:$0xf] }
 0x54d   : > { %v14534_v29 = vpop.f32.mrf.mxu0  ;;  %v8416_v58 = vunpack.c.l.b16 %v8397_v12 }
 0x54f   : > { %11479 = vmatmul.msk.bf16.gmra.mxu2 %vm433_vm2, %v7771_v15  ;;  %v8388_v15 = vrot.slane %v14341_v42, 5 }
 0x552   : > { %v8301_v47 = vpop.f32.mrf.mxu1  ;;  %v14542_v44 = vpop.f32.mrf.mxu2 }
 0x553   : > { %v8389_v47 = vsel %vm12186_vm3, %v11548_v38, %v8388_v15  ;;  %v8609_v38 = vld [vmem:[#allocation2 + $0x68] sm:$0xf]  ;;  %v8610_v15 = vld [vmem:[#allocation2 + $0x6c] sm:$0x1] }
 0x554   : > { %v8414_v11 = vunpack.c.l.b16 %v8389_v47  ;;  %v8726_v47 = vshrl.u32 %v8609_v38, 16 }
 0x555   : > { %11625 = vmatmul.msk.bf16.gmra.mxu1 %vm433_vm2, %v8922_v16  ;;  %v14546_v8 = vpop.f32.mrf.mxu0  ;;  %v8385_v16 = vsel %vm12186_vm3, %v11547_v53, %v8384_v3  ;;  %v8611_v53 = vld [vmem:[#allocation2 + $0x70] sm:$0xf]  ;;  %v8612_v3 = vld [vmem:[#allocation2 + $0x74] sm:$0x1] }
 0x556   : > { %v8413_v48 = vunpack.c.l.b16 %v8385_v16  ;;  %11594 = vmatmul.msk.bf16.gmra.mxu3 %vm433_vm2, %v11585_v25  ;;  %v8729_v16 = vshll.u32 %v8609_v38, 16  ;;  %v8749_v14 = vshll.u32 %v8612_v3, 16  ;;  %v8728_v20 = vrot.slane %v8726_v47, 4  ;;  %v8844_v38 = vld [vmem:[#allocation2 + $0x68] sm:$0xe] }
 0x558   : > { %v8421_v5 = vpack.c.b16 %v8414_v11, %v8413_v48  ;;  %v8735_v11 = vshll.u32 %v8610_v15, 16  ;;  %v8740_v48 = vshrl.u32 %v8611_v53, 16  ;;  %v8731_v55 = vrot.slane %v8729_v16, 5 }
 0x559   : > { %v14552_v50 = vpop.f32.mrf.mxu3 }
 0x55a   : > { %v14554_v63 = vpop.f32.mrf.mxu1  ;;  %v14556_v27 = vpop.f32.mrf.mxu2  ;;  %v8742_v25 = vrot.slane %v8740_v48, 4 }
 0x55d   : > { %v14558_v35 = vpop.f32.mrf.mxu0 }
 0x55f   : > { %11559 = vmatmul.msk.bf16.vlgmr.msra.gmra.mxu2 %vm433_vm2, %v8419_v40  ;;  %v8342_v40 = vld [vmem:[#allocation2 + $0x50] sm:$0xe] }
 0x560   : > { %v11549_v46 = vrot.slane %v8342_v40, 9  ;;  %v8743_v40 = vshll.u32 %v8611_v53, 16  ;;  %v11551_v53 = vrot.slane %v8344_v56, 9 }
 0x561   : > { %v14561_v28 = vpop.f32.mrf.mxu3 }
 0x562   : > { %v14563_v52 = vpop.f32.mrf.mxu1  ;;  %v14565_v41 = vpop.f32.mrf.mxu2  ;;  %v8393_v31 = vsel %vm12186_vm3, %v11549_v46, %v8392_v49  ;;  %v8745_v12 = vrot.slane %v8743_v40, 5  ;;  %v11552_v40 = vrot.slane %v8345_v1, 9 }
 0x565   : > { %v14567_v30 = vpop.f32.mrf.mxu0 }
 0x569   : > { %v14571_v18 = vpop.f32.mrf.mxu3 }
 0x56a   : > { %v14575_v39 = vpop.f32.mrf.mxu1  ;;  %v14577_v22 = vpop.f32.mrf.mxu2 }
 0x56d   : > { %v14579_v2 = vpop.f32.mrf.mxu0 }
 0x56f   : > { %11560 = vmatmul.msk.bf16.gmra.mxu2 %vm433_vm2, %v8420_v60  ;;  %v9237_v60 = vsel %vm12864_vm9, %v12931_v0, %v9236_v57  ;;  %v9234_v0 = vsel %vm12906_vm13, %v12914_v19, %v9233_v23  ;;  %v8737_v57 = vrot.slane %v8735_v11, 5  ;;  %v8746_v19 = vor.u32 %v8745_v12, %v8742_v25 }
 0x570   : > { %9238 = vst [vmem:[#allocation2 + $0x6c] sm:$0x1] %v9237_v60  ;;  %v8751_v23 = vrot.slane %v8749_v14, 5  ;;  %v8904_v60 = vrot.slane %v8612_v3, 5  ;;  %v8400_v11 = vrot.slane %v14409_v21, 5  ;;  %v8404_v14 = vrot.slane %v14413_v13, 5 }
 0x571   : > { %v14582_v36 = vpop.f32.mrf.mxu3  ;;  %9235 = vst [vmem:[#allocation2 + $0x68] sm:$0xf] %v9234_v0  ;;  %v8747_v48 = vrot.slane %v8746_v19, 4 }
 0x572   : > { %v14584_v34 = vpop.f32.mrf.mxu1  ;;  %v14586_v9 = vpop.f32.mrf.mxu2 }
 0x575   : > { %v14589_v6 = vpop.f32.mrf.mxu0 }
 0x579   : > { %v14593_v43 = vpop.f32.mrf.mxu3 }
 0x57a   : > { %v14597_v37 = vpop.f32.mrf.mxu1  ;;  %v14599_v62 = vpop.f32.mrf.mxu2 }
 0x57d   : > { %v14601_v42 = vpop.f32.mrf.mxu0 }
 0x57f   : > { %11561 = vmatmul.msk.bf16.gmra.mxu2 %vm433_vm2, %v8421_v5  ;;  %v8415_v5 = vunpack.c.l.b16 %v8393_v31 }
 0x581   : > { %v14604_v51 = vpop.f32.mrf.mxu3  ;;  %v8422_v49 = vpack.c.b16 %v8416_v58, %v8415_v5 }
 0x582   : > { %v14606_v7 = vpop.f32.mrf.mxu1  ;;  %v14608_v24 = vpop.f32.mrf.mxu2 }
 0x583   : > { %15191 = vst [vmem:[#allocation6_spill] sm:$0xff] %v14606_v7  ;;  %v8900_v7 = vrot.slane %v8610_v15, 5 }
 0x585   : > { %v14613_v17 = vpop.f32.mrf.mxu0 }
 0x586   : > { %15192 = vst [vmem:[#allocation7_spill] sm:$0xff] %v14613_v17  ;;  %v8732_v17 = vor.u32 %v8731_v55, %v8728_v20  ;;  %v8401_v55 = vsel %vm12186_vm3, %v11551_v53, %v8400_v11 }
 0x588   : > { %v8733_v47 = vrot.slane %v8732_v17, 4 }
 0x589   : > { %v14620_v54 = vpop.f32.mrf.mxu3 }
 0x58a   : > { %15193 = vst [vmem:[#allocation8_spill] sm:$0xff] %v14620_v54  ;;  %v14624_v10 = vpop.f32.mrf.mxu1  ;;  %v7591_v32 = vpop.f32.mrf.mxu2  ;;  %v8738_v3 = vsel %vm12237_vm6, %v8733_v47, %v8737_v57  ;;  %v11910_v57 = vld [vmem:[%s15176_s3] sm:$0xff] }
 0x58b   : > { %15194 = vst [vmem:[#allocation9_spill] sm:$0xff] %v14624_v10  ;;  %v8845_v32 = vld [vmem:[#allocation2 + $0x70] sm:$0xe]  ;;  %v11614_v10 = vrot.slane %v8844_v38, 9  ;;  %9298 = vmatpush.bf16.msrb.mxu2 %v11910_v57 }
 0x58c   : > { %v11615_v54 = vrot.slane %v8845_v32, 9  ;;  %v14654_v32 = vld [vmem:[%s15175_s2 + $0x3] ss:$0 sm:$0xff] }
 0x58d   : > { %v8080_v46 = vpop.f32.mrf.mxu0  ;;  %v8901_v58 = vsel %vm12186_vm3, %v11614_v10, %v8900_v7  ;;  %v8752_v7 = vsel %vm12237_vm6, %v8747_v48, %v8751_v23  ;;  %v8764_v10 = vunpack.c.l.b16 %v8738_v3  ;;  %v7575_v19 = vadd.f32 %v14654_v32, %v14542_v44 }
 0x58e   : > { %v8905_v15 = vsel %vm12186_vm3, %v11615_v54, %v8904_v60  ;;  %v8917_v0 = vunpack.c.l.b16 %v8901_v58  ;;  %v8765_v56 = vunpack.c.l.b16 %v8752_v7  ;;  %v8405_v54 = vsel %vm12186_vm3, %v11552_v40, %v8404_v14 }
 0x58f   : > { %11562 = vmatmul.msk.bf16.gmra.mxu2 %vm433_vm2, %v8422_v49  ;;  %v8918_v17 = vunpack.c.l.b16 %v8905_v15  ;;  %v8417_v46 = vunpack.c.l.b16 %v8401_v55  ;;  %v8418_v49 = vunpack.c.l.b16 %v8405_v54  ;;  %v7580_v47 = vadd.f32 %v14654_v32, %v14565_v41 }
 0x590   : > { %v8770_v1 = vpack.c.b16 %v8765_v56, %v8764_v10  ;;  %v7585_v15 = vadd.f32 %v14654_v32, %v14586_v9  ;;  %v7590_v3 = vadd.f32 %v14654_v32, %v14608_v24  ;;  %v7572_v9 = vadd.f32 %v14654_v32, %v14530_v45 }
 0x591   : > { %v7977_v31 = vpop.f32.mrf.mxu3  ;;  %v8923_v20 = vpack.c.b16 %v8918_v17, %v8917_v0  ;;  %v8423_v38 = vpack.c.b16 %v8418_v49, %v8417_v46  ;;  %v11911_v49 = vld [vmem:[%s15176_s3 + $0x8] sm:$0xff] }
 0x592   : > { %v14632_v16 = vpop.f32.mrf.mxu1  ;;  %v7802_v5 = vpop.f32.mrf.mxu2  ;;  %11605 = vmatmul.msk.bf16.gmra.mxu0 %vm433_vm2, %v8770_v1  ;;  %9488 = vmatpush.bf16.msra.mxu3 %v11911_v49 }
 0x593   : > { %11626 = vmatmul.msk.bf16.gmra.mxu1 %vm433_vm2, %v8923_v20 }
 0x595   : > { %v8801_v21 = vpop.f32.mrf.mxu0 }
 0x599   : > { %v8558_v13 = vpop.f32.mrf.mxu3 }
 0x59a   : > { %v8323_v25 = vpop.f32.mrf.mxu1  ;;  %v7804_v12 = vpop.f32.mrf.mxu2 }
 0x59b   : > { %v7828_v55 = vadd.f32 %v7804_v12, %v7572_v9 }
 0x59d   : > { %v8803_v17 = vpop.f32.mrf.mxu0  ;;  %v7981_v1 = vadd.f32 %v14538_v26, %v7828_v55  ;;  %v7577_v26 = vadd.f32 %v14654_v32, %v14556_v27 }
 0x59f   : > { %11563 = vmatmul.msk.bf16.gmra.mxu2 %vm433_vm2, %v8423_v38  ;;  %v8084_v24 = vadd.f32 %v14534_v29, %v7981_v1 }
 0x5a1   : > { %v8560_v44 = vpop.f32.mrf.mxu3  ;;  %v8327_v45 = vadd.f32 %v14554_v63, %v8084_v24  ;;  %v11917_v63 = vld [vmem:[%s15176_s3 + $0x18] sm:$0xff] }
 0x5a2   : > { %v8954_v23 = vpop.f32.mrf.mxu1  ;;  %v7807_v60 = vpop.f32.mrf.mxu2  ;;  %9700 = vmatpush.bf16.msrb.mxu1 %v11917_v63  ;;  %v14724_v63 = vld [vmem:[#allocation2 + $0x24] sm:$0x1] }
 0x5a3   : > { %v7829_v31 = vadd.f32 %v7807_v60, %v7575_v19 }
 0x5a5   : > { %v8806_v21 = vpop.f32.mrf.mxu0  ;;  %v7982_v57 = vadd.f32 %v14552_v50, %v7829_v31  ;;  %v11912_v50 = vld [vmem:[%s15176_s3 + $0x10] sm:$0xff] }
 0x5a6   : > { %9614 = vmatpush.bf16.msrb.mxu0 %v11912_v50 }
 0x5a9   : > { %v8563_v10 = vpop.f32.mrf.mxu3 }
 0x5aa   : > { %v7809_v53 = vpop.f32.mrf.mxu2  ;;  %v8956_v14 = vpop.f32.mrf.mxu1 }
 0x5ab   : > { %v7830_v23 = vadd.f32 %v7809_v53, %v7577_v26 }
 0x5ad   : > { %v8808_v46 = vpop.f32.mrf.mxu0  ;;  %v7983_v27 = vadd.f32 %v14561_v28, %v7830_v23  ;;  %v11918_v28 = vld [vmem:[%s15176_s3 + $0x20] sm:$0xff]  ;;  %v9185_v23 = vld [vmem:[#allocation2 + $0x28] sm:$0xf] }
 0x5ae   : > { %9898 = vmatpush.bf16.msra.mxu2 %v11918_v28 }
 0x5b1   : > { %v8565_v54 = vpop.f32.mrf.mxu3 }
 0x5b2   : > { %v7812_v58 = vpop.f32.mrf.mxu2  ;;  %v8959_v56 = vpop.f32.mrf.mxu1 }
 0x5b3   : > { %v7831_v11 = vadd.f32 %v7812_v58, %v7580_v47  ;;  %v8085_v47 = vadd.f32 %v14546_v8, %v7982_v57 }
 0x5b5   : > { %v14691_v58 = vpop.f32.mrf.mxu0  ;;  %v8328_v53 = vadd.f32 %v14563_v52, %v8085_v47  ;;  %v7582_v52 = vadd.f32 %v14654_v32, %v14577_v22 }
 0x5b9   : > { %v14683_v38 = vpop.f32.mrf.mxu3 }
 0x5ba   : > { %v14661_v48 = vpop.f32.mrf.mxu2  ;;  %v14676_v25 = vpop.f32.mrf.mxu1 }
 0x5bb   : > { %v7832_v57 = vadd.f32 %v14661_v48, %v7582_v52  ;;  %v9191_v52 = vld [vmem:[#allocation2 + $0x30] sm:$0xf] }
 0x5bd   : > { %v7985_v48 = vadd.f32 %v14582_v36, %v7832_v57 }
 0x5c1   : > { %v14701_v8 = vpop.f32.mrf.mxu3 }
 0x5c2   : > { %v7817_v0 = vpop.f32.mrf.mxu2  ;;  %v14688_v60 = vpop.f32.mrf.mxu1 }
 0x5c3   : > { %v14665_v5 = vadd.f32 %v7817_v0, %v7585_v15 }
 0x5c5   : > { %v7986_v28 = vadd.f32 %v14593_v43, %v14665_v5 }
 0x5ca   : > { %v14667_v40 = vpop.f32.mrf.mxu2  ;;  %v14704_v9 = vpop.f32.mrf.mxu1 }
 0x5d2   : > { %v7822_v7 = vpop.f32.mrf.mxu2 }
 0x5d3   : > { %v14671_v41 = vadd.f32 %v7822_v7, %v7590_v3 }
 0x5da   : > { %v7824_v20 = vpop.f32.mrf.mxu2 }
 0x5db   : > { %v8086_v20 = vadd.f32 %v14558_v35, %v7983_v27 }
 0x5dd   : > { %v8329_v35 = vadd.f32 %v14575_v39, %v8086_v20 }
 0x5e2   : > { %v8454_v13 = vpop.f32.mrf.mxu2 }
 0x5e3   : > { %v14712_v13 = vpop.f32.mrf.mxu0 }
 0x5ea   : > { %v8456_v12 = vpop.f32.mrf.mxu2 }
 0x5eb   : > { %v8480_v19 = vadd.f32 %v8456_v12, %v8327_v45  ;;  %v14735_v20 = vpop.f32.mrf.mxu0 }
 0x5ed   : > { %v8584_v29 = vadd.f32 %v8560_v44, %v8480_v19 }
 0x5ef   : > { %v8827_v15 = vadd.f32 %v8803_v17, %v8584_v29  ;;  %v9188_v29 = vld [vmem:[#allocation2 + $0x2c] sm:$0x1] }
 0x5f1   : > { %v8980_v31 = vadd.f32 %v8956_v14, %v8827_v15  ;;  %v7984_v14 = vadd.f32 %v14571_v18, %v7831_v11  ;;  %v14717_v18 = vpop.f32.mrf.mxu3 }
 0x5f2   : > { %v8459_v0 = vpop.f32.mrf.mxu2 }
 0x5f3   : > { %v8990_v44 = vmax.f32 %v8980_v31, 0.0  ;;  %v8481_v3 = vadd.f32 %v8459_v0, %v8328_v53  ;;  %v8087_v22 = vadd.f32 %v14567_v30, %v7984_v14  ;;  %v7587_v30 = vadd.f32 %v14654_v32, %v14599_v62  ;;  %v9518_v31 = vld [vmem:[#allocation2 + $0x20] sm:$0xe]  ;;  %v14730_v0 = vpop.f32.mrf.mxu1  ;;  %v9194_v14 = vld [vmem:[#allocation2 + $0x34] sm:$0x1] }
 0x5f4   : > { %v9544_v53 = vrot.slane %v14724_v63, 5 }
 0x5f5   : > { %v9071_v17 = vpack.c.bf16 %v8990_v44, %v8990_v44  ;;  %v8585_v7 = vadd.f32 %v8563_v10, %v8481_v3  ;;  %v8330_v27 = vadd.f32 %v14584_v34, %v8087_v22  ;;  %v11661_v3 = vrot.slane %v9518_v31, 9 }
 0x5f6   : > { %v8089_v22 = vadd.f32 %v14589_v6, %v7986_v28 }
 0x5f7   : > { %v9089_v55 = vshrl.u32 %v9071_v17, 16  ;;  %v8828_v1 = vadd.f32 %v8806_v21, %v8585_v7  ;;  %v9092_v49 = vshll.u32 %v9071_v17, 16  ;;  %v7834_v17 = vadd.f32 %v14667_v40, %v7587_v30 }
 0x5f8   : > { %v8088_v7 = vadd.f32 %v14579_v2, %v7985_v48 }
 0x5f9   : > { %v9091_v24 = vrot.slane %v9089_v55, 7  ;;  %v8981_v10 = vadd.f32 %v8959_v56, %v8828_v1  ;;  %v11629_v1 = vld [vmem:[#allocation2 + $0x20] sm:$0xf]  ;;  %v7987_v57 = vadd.f32 %v14604_v51, %v7834_v17 }
 0x5fa   : > { %v8461_v21 = vpop.f32.mrf.mxu2  ;;  %v8331_v5 = vadd.f32 %v14597_v37, %v8088_v7  ;;  %v9320_v51 = vld [vmem:[#allocation2 + $0x20] sm:$0xf] }
 0x5fb   : > { %v9094_v45 = vor.u32 %v9092_v49, %v9091_v24  ;;  %v9095_v12 = vrot.slane %v9091_v24, 4  ;;  %v8991_v26 = vmax.f32 %v8981_v10, 0.0  ;;  %v8482_v19 = vadd.f32 %v8461_v21, %v8329_v35 }
 0x5fc   : > { %v9340_v30 = vshll.u32 %v9320_v51, 16  ;;  %v8090_v31 = vadd.f32 %v14601_v42, %v7987_v57 }
 0x5fd   : > { %v9186_v11 = vsel %vm12906_vm13, %v9094_v45, %v9185_v23  ;;  %v9189_v39 = vsel %vm12864_vm9, %v9095_v12, %v9188_v29  ;;  %v9072_v56 = vpack.c.bf16 %v8991_v26, %v8991_v26  ;;  %v8586_v47 = vadd.f32 %v8565_v54, %v8482_v19  ;;  %v14748_v12 = vpop.f32.mrf.mxu3 }
 0x5fe   : > { %9187 = vst [vmem:[#allocation2 + $0x28] sm:$0xf] %v9186_v11 }
 0x5ff   : > { %9190 = vst [vmem:[#allocation2 + $0x2c] sm:$0x1] %v9189_v39  ;;  %v9097_v15 = vshrl.u32 %v9072_v56, 16  ;;  %v8829_v50 = vadd.f32 %v8808_v46, %v8586_v47  ;;  %v9100_v54 = vshll.u32 %v9072_v56, 16  ;;  %v9346_v39 = vshll.u32 %v14724_v63, 16 }
 0x601   : > { %v9099_v44 = vrot.slane %v9097_v15, 7  ;;  %v8982_v36 = vadd.f32 %v14676_v25, %v8829_v50  ;;  %v9545_v25 = vsel %vm12186_vm3, %v11661_v3, %v9544_v53  ;;  %v9337_v15 = vshrl.u32 %v9320_v51, 16  ;;  %v14758_v53 = vpop.f32.mrf.mxu1  ;;  %v9200_v3 = vld [vmem:[#allocation2 + $0x3c] sm:$0x1] }
 0x602   : > { %v8464_v46 = vpop.f32.mrf.mxu2  ;;  %v9348_v7 = vrot.slane %v9346_v39, 5 }
 0x603   : > { %v9102_v62 = vor.u32 %v9100_v54, %v9099_v44  ;;  %v9103_v32 = vrot.slane %v9099_v44, 4  ;;  %v8992_v34 = vmax.f32 %v8982_v36, 0.0  ;;  %v8483_v55 = vadd.f32 %v8464_v46, %v8330_v27  ;;  %v9197_v54 = vld [vmem:[#allocation2 + $0x38] sm:$0xf] }
 0x604   : > { %v9342_v46 = vrot.slane %v9340_v30, 5  ;;  %v9203_v30 = vld [vmem:[#allocation2 + $0x40] sm:$0xf] }
 0x605   : > { %v9192_v40 = vsel %vm12906_vm13, %v9102_v62, %v9191_v52  ;;  %v9195_v2 = vsel %vm12864_vm9, %v9103_v32, %v9194_v14  ;;  %v9073_v24 = vpack.c.bf16 %v8992_v34, %v8992_v34  ;;  %v8587_v49 = vadd.f32 %v14683_v38, %v8483_v55  ;;  %v11906_v10 = vld [vmem:[#allocation2 + $0x24] sm:$0xf0]  ;;  %v14760_v62 = vpop.f32.mrf.mxu0 }
 0x606   : > { %v9519_v35 = vld [vmem:[#allocation2 + $0x28] sm:$0xe]  ;;  %9193 = vst [vmem:[#allocation2 + $0x30] sm:$0xf] %v9192_v40  ;;  %v11630_v43 = vor.u32 %v11906_v10, %v11629_v1  ;;  %v9323_v21 = vld [vmem:[#allocation2 + $0x2c] sm:$0x1]  ;;  %v9577_v38 = vunpack.c.l.b16 %v9545_v25 }
 0x607   : > { %v11662_v45 = vrot.slane %v9519_v35, 9  ;;  %9196 = vst [vmem:[#allocation2 + $0x34] sm:$0x1] %v9195_v2  ;;  %v9105_v26 = vshrl.u32 %v9073_v24, 16  ;;  %v9108_v19 = vshll.u32 %v9073_v24, 16  ;;  %v8830_v23 = vadd.f32 %v14691_v58, %v8587_v49  ;;  %v15195_v2 = vld [vmem:[#allocation8_spill] sm:$0xff] }
 0x608   : > { %v9548_v29 = vrot.slane %v9323_v21, 5  ;;  %11647 = vmatmul.msk.bf16.vlgmr.msrb.gmra.mxu2 %vm433_vm2, %v11630_v43  ;;  %v9322_v11 = vld [vmem:[#allocation2 + $0x28] sm:$0xf]  ;;  %v9360_v37 = vshll.u32 %v9323_v21, 16  ;;  %v7988_v24 = vadd.f32 %v15195_v2, %v14671_v41  ;;  %v15196_v35 = vld [vmem:[#allocation6_spill] sm:$0xff] }
 0x609   : > { %v9107_v56 = vrot.slane %v9105_v26, 7  ;;  %v8983_v47 = vadd.f32 %v14688_v60, %v8830_v23  ;;  %v9351_v27 = vshrl.u32 %v9322_v11, 16  ;;  %v9339_v60 = vrot.slane %v9337_v15, 4  ;;  %v11683_v1 = vld [vmem:[#allocation2 + $0x28] sm:$0xf] }
 0x60a   : > { %v9549_v48 = vsel %vm12186_vm3, %v11662_v45, %v9548_v29  ;;  %v8466_v50 = vpop.f32.mrf.mxu2  ;;  %v9354_v40 = vshll.u32 %v9322_v11, 16  ;;  %v8332_v57 = vadd.f32 %v15196_v35, %v8089_v22  ;;  %v9362_v26 = vrot.slane %v9360_v37, 5  ;;  %v15197_v29 = vld [vmem:[#allocation9_spill] sm:$0xff] }
 0x60b   : > { %v9578_v58 = vunpack.c.l.b16 %v9549_v48  ;;  %v9110_v6 = vor.u32 %v9108_v19, %v9107_v56  ;;  %v9111_v44 = vrot.slane %v9107_v56, 4  ;;  %v8993_v63 = vmax.f32 %v8983_v47, 0.0 }
 0x60c   : > { %v8484_v36 = vadd.f32 %v8466_v50, %v8331_v5  ;;  %v9343_v14 = vor.u32 %v9342_v46, %v9339_v60  ;;  %v9353_v25 = vrot.slane %v9351_v27, 4  ;;  %v9356_v45 = vrot.slane %v9354_v40, 5 }
 0x60d   : > { %v9585_v17 = vpack.c.b16 %v9578_v58, %v9577_v38  ;;  %v9198_v32 = vsel %vm12906_vm13, %v9110_v6, %v9197_v54  ;;  %v9201_v42 = vsel %vm12864_vm9, %v9111_v44, %v9200_v3  ;;  %v9074_v34 = vpack.c.bf16 %v8993_v63, %v8993_v63  ;;  %v11913_v28 = vld [vmem:[#allocation2 + $0x2c] sm:$0xf0]  ;;  %v15198_v6 = vld [vmem:[#allocation7_spill] sm:$0xff] }
 0x60e   : > { %v8588_v55 = vadd.f32 %v14701_v8, %v8484_v36  ;;  %9199 = vst [vmem:[#allocation2 + $0x38] sm:$0xf] %v9198_v32  ;;  %v11684_v52 = vor.u32 %v11913_v28, %v11683_v1  ;;  %v14772_v43 = vld [vmem:[#allocation2 + $0x34] sm:$0x1]  ;;  %v14774_v8 = vpop.f32.mrf.mxu3  ;;  %v9344_v21 = vrot.slane %v9343_v14, 4  ;;  %v8333_v38 = vadd.f32 %v15197_v29, %v8090_v31 }
 0x60f   : > { %11675 = vmatmul.msk.bf16.vlgmr.msrb.gmra.mxu0 %vm433_vm2, %v9585_v17  ;;  %9202 = vst [vmem:[#allocation2 + $0x3c] sm:$0x1] %v9201_v42  ;;  %v9113_v49 = vshrl.u32 %v9074_v34, 16  ;;  %v9116_v5 = vshll.u32 %v9074_v34, 16  ;;  %v9520_v19 = vld [vmem:[#allocation2 + $0x30] sm:$0xe]  ;;  %v9357_v39 = vor.u32 %v9356_v45, %v9353_v25  ;;  %v14785_v44 = vadd.f32 %v15198_v6, %v7988_v24  ;;  %v14793_v32 = vpop.f32.mrf.mxu0 }
 0x610   : > { %v8831_v10 = vadd.f32 %v14712_v13, %v8588_v55  ;;  %11701 = vmatmul.msk.bf16.vlgmr.msrb.gmra.mxu1 %vm433_vm2, %v11684_v52  ;;  %v9552_v13 = vrot.slane %v14772_v43, 5  ;;  %v9324_v51 = vld [vmem:[#allocation2 + $0x30] sm:$0xf]  ;;  %v9349_v11 = vsel %vm12237_vm6, %v9344_v21, %v9348_v7  ;;  %v11663_v56 = vrot.slane %v9520_v19, 9  ;;  %v14782_v58 = vpop.f32.mrf.mxu1 }
 0x611   : > { %v9115_v23 = vrot.slane %v9113_v49, 7  ;;  %v9365_v47 = vshrl.u32 %v9324_v51, 16  ;;  %v9358_v27 = vrot.slane %v9357_v39, 4  ;;  %v9451_v31 = vunpack.c.l.b16 %v9349_v11  ;;  %v11633_v60 = vld [vmem:[#allocation2 + $0x30] sm:$0xf] }
 0x612   : > { %v8984_v41 = vadd.f32 %v14704_v9, %v8831_v10  ;;  %v8469_v22 = vpop.f32.mrf.mxu2  ;;  %v9206_v9 = vld [vmem:[#allocation2 + $0x44] sm:$0x1]  ;;  %v9374_v54 = vshll.u32 %v14772_v43, 16  ;;  %v9553_v1 = vsel %vm12186_vm3, %v11663_v56, %v9552_v13  ;;  %v9368_v10 = vshll.u32 %v9324_v51, 16  ;;  %v9209_v39 = vld [vmem:[#allocation2 + $0x48] sm:$0xf] }
 0x613   : > { %v9118_v48 = vor.u32 %v9116_v5, %v9115_v23  ;;  %v9119_v15 = vrot.slane %v9115_v23, 4  ;;  %v8485_v37 = vadd.f32 %v8469_v22, %v8332_v57  ;;  %v9363_v42 = vsel %vm12237_vm6, %v9358_v27, %v9362_v26  ;;  %v9212_v56 = vld [vmem:[#allocation2 + $0x4c] sm:$0x1] }
 0x614   : > { %v8994_v50 = vmax.f32 %v8984_v41, 0.0  ;;  %v9367_v40 = vrot.slane %v9365_v47, 4  ;;  %v9370_v23 = vrot.slane %v9368_v10, 5 }
 0x615   : > { %v9204_v63 = vsel %vm12906_vm13, %v9118_v48, %v9203_v30  ;;  %v9207_v36 = vsel %vm12864_vm9, %v9119_v15, %v9206_v9  ;;  %v8589_v17 = vadd.f32 %v14717_v18, %v8485_v37  ;;  %v11907_v46 = vld [vmem:[#allocation2 + $0x34] sm:$0xf0]  ;;  %v9452_v18 = vunpack.c.l.b16 %v9363_v42 }
 0x616   : > { %v9075_v3 = vpack.c.bf16 %v8994_v50, %v8994_v50  ;;  %v9521_v7 = vld [vmem:[#allocation2 + $0x38] sm:$0xe]  ;;  %9205 = vst [vmem:[#allocation2 + $0x40] sm:$0xf] %v9204_v63  ;;  %v11634_v34 = vor.u32 %v11907_v46, %v11633_v60  ;;  %v9327_v55 = vld [vmem:[#allocation2 + $0x3c] sm:$0x1]  ;;  %v8580_v2 = vpop.f32.mrf.mxu3 }
 0x617   : > { %v11664_v28 = vrot.slane %v9521_v7, 9  ;;  %9208 = vst [vmem:[#allocation2 + $0x44] sm:$0x1] %v9207_v36  ;;  %v8832_v14 = vadd.f32 %v14735_v20, %v8589_v17  ;;  %v9326_v25 = vld [vmem:[#allocation2 + $0x38] sm:$0xf]  ;;  %v9556_v49 = vrot.slane %v9327_v55, 5  ;;  %v9459_v21 = vpack.c.b16 %v9452_v18, %v9451_v31  ;;  %v8823_v6 = vpop.f32.mrf.mxu0 }
 0x618   : > { %v9121_v52 = vshrl.u32 %v9075_v3, 16  ;;  %v9124_v24 = vshll.u32 %v9075_v3, 16  ;;  %11648 = vmatmul.msk.bf16.gmra.mxu2 %vm433_vm2, %v11634_v34  ;;  %v9379_v35 = vshrl.u32 %v9326_v25, 16  ;;  %v9382_v45 = vshll.u32 %v9326_v25, 16  ;;  %v8976_v51 = vpop.f32.mrf.mxu1  ;;  %v11687_v27 = vld [vmem:[#allocation2 + $0x38] sm:$0xf] }
 0x619   : > { %v8985_v5 = vadd.f32 %v14730_v0, %v8832_v14  ;;  %v9557_v19 = vsel %vm12186_vm3, %v11664_v28, %v9556_v49  ;;  %v9579_v20 = vunpack.c.l.b16 %v9553_v1  ;;  %11657 = vmatmul.msk.bf16.vlgmr.msra.gmra.mxu3 %vm433_vm2, %v9459_v21  ;;  %v9371_v0 = vor.u32 %v9370_v23, %v9367_v40 }
 0x61a   : > { %v9123_v57 = vrot.slane %v9121_v52, 7  ;;  %v8471_v26 = vpop.f32.mrf.mxu2  ;;  %v9381_v41 = vrot.slane %v9379_v35, 4  ;;  %v9580_v47 = vunpack.c.l.b16 %v9557_v19  ;;  %v9384_v48 = vrot.slane %v9382_v45, 5  ;;  %v9215_v35 = vld [vmem:[#allocation2 + $0x50] sm:$0xf] }
 0x61b   : > { %v8995_v22 = vmax.f32 %v8985_v5, 0.0  ;;  %v8486_v11 = vadd.f32 %v8471_v26, %v8333_v38  ;;  %v9388_v15 = vshll.u32 %v9327_v55, 16  ;;  %v9372_v36 = vrot.slane %v9371_v0, 4 }
 0x61c   : > { %v9126_v29 = vor.u32 %v9124_v24, %v9123_v57  ;;  %v9127_v13 = vrot.slane %v9123_v57, 4  ;;  %v9586_v38 = vpack.c.b16 %v9580_v47, %v9579_v20  ;;  %v9385_v3 = vor.u32 %v9384_v48, %v9381_v41  ;;  %v9218_v57 = vld [vmem:[#allocation2 + $0x54] sm:$0x1] }
 0x61d   : > { %v9076_v30 = vpack.c.bf16 %v8995_v22, %v8995_v22  ;;  %v8590_v9 = vadd.f32 %v14748_v12, %v8486_v11  ;;  %v11914_v31 = vld [vmem:[#allocation2 + $0x3c] sm:$0xf0]  ;;  %v9376_v7 = vrot.slane %v9374_v54, 5  ;;  %v8334_v12 = vadd.f32 %v14632_v16, %v14785_v44 }
 0x61e   : > { %v9210_v50 = vsel %vm12906_vm13, %v9126_v29, %v9209_v39  ;;  %v9213_v37 = vsel %vm12864_vm9, %v9127_v13, %v9212_v56  ;;  %v11688_v63 = vor.u32 %v11914_v31, %v11687_v27  ;;  %v9522_v17 = vld [vmem:[#allocation2 + $0x40] sm:$0xe]  ;;  %v14813_v42 = vld [vmem:[#allocation2 + $0x44] sm:$0x1]  ;;  %v9386_v55 = vrot.slane %v9385_v3, 4 }
 0x61f   : > { %9211 = vst [vmem:[#allocation2 + $0x48] sm:$0xf] %v9210_v50  ;;  %v9129_v60 = vshrl.u32 %v9076_v30, 16  ;;  %v8833_v46 = vadd.f32 %v14760_v62, %v8590_v9  ;;  %v9132_v34 = vshll.u32 %v9076_v30, 16  ;;  %11676 = vmatmul.msk.bf16.gmra.mxu0 %vm433_vm2, %v9586_v38  ;;  %v9390_v1 = vrot.slane %v9388_v15, 5  ;;  %v11919_v62 = vld [vmem:[%s15176_s3 + $0x28] sm:$0xff] }
 0x620   : > { %9214 = vst [vmem:[#allocation2 + $0x4c] sm:$0x1] %v9213_v37  ;;  %11702 = vmatmul.msk.bf16.gmra.mxu1 %vm433_vm2, %v11688_v63  ;;  %v9328_v28 = vld [vmem:[#allocation2 + $0x40] sm:$0xf]  ;;  %v9377_v54 = vsel %vm12237_vm6, %v9372_v36, %v9376_v7  ;;  %v11665_v40 = vrot.slane %v9522_v17, 9  ;;  %v9560_v16 = vrot.slane %v14813_v42, 5  ;;  %10024 = vmatpush.bf16.msrb.mxu3 %v11919_v62 }
 0x621   : > { %v9131_v52 = vrot.slane %v9129_v60, 7  ;;  %v8986_v43 = vadd.f32 %v14758_v53, %v8833_v46  ;;  %v9393_v14 = vshrl.u32 %v9328_v28, 16  ;;  %v9391_v25 = vsel %vm12237_vm6, %v9386_v55, %v9390_v1  ;;  %v11637_v41 = vld [vmem:[#allocation2 + $0x40] sm:$0xf]  ;;  %v9221_v31 = vld [vmem:[#allocation2 + $0x58] sm:$0xf] }
 0x622   : > { %v8474_v18 = vpop.f32.mrf.mxu2  ;;  %v9396_v44 = vshll.u32 %v9328_v28, 16  ;;  %v9453_v53 = vunpack.c.l.b16 %v9377_v54  ;;  %v9454_v5 = vunpack.c.l.b16 %v9391_v25  ;;  %v9561_v51 = vsel %vm12186_vm3, %v11665_v40, %v9560_v16  ;;  %v9730_v7 = vld [vmem:[#allocation2 + $0x28] sm:$0xf] }
 0x623   : > { %v9134_v2 = vor.u32 %v9132_v34, %v9131_v52  ;;  %v9135_v24 = vrot.slane %v9131_v52, 4  ;;  %v8996_v49 = vmax.f32 %v8986_v43, 0.0  ;;  %v8487_v10 = vadd.f32 %v8474_v18, %v8334_v12  ;;  %v9224_v34 = vld [vmem:[#allocation2 + $0x5c] sm:$0x1] }
 0x624   : > { %v9395_v21 = vrot.slane %v9393_v14, 4  ;;  %v9398_v45 = vrot.slane %v9396_v44, 5  ;;  %v9460_v47 = vpack.c.b16 %v9454_v5, %v9453_v53  ;;  %v9581_v38 = vunpack.c.l.b16 %v9561_v51  ;;  %v9227_v51 = vld [vmem:[#allocation2 + $0x60] sm:$0xf] }
 0x625   : > { %v9216_v26 = vsel %vm12906_vm13, %v9134_v2, %v9215_v35  ;;  %v9219_v19 = vsel %vm12864_vm9, %v9135_v24, %v9218_v57  ;;  %v9077_v20 = vpack.c.bf16 %v8996_v49, %v8996_v49  ;;  %v8591_v23 = vadd.f32 %v14774_v8, %v8487_v10 }
 0x626   : > { %v11908_v29 = vld [vmem:[#allocation2 + $0x44] sm:$0xf0]  ;;  %9217 = vst [vmem:[#allocation2 + $0x50] sm:$0xf] %v9216_v26  ;;  %v9399_v50 = vor.u32 %v9398_v45, %v9395_v21  ;;  %v9402_v36 = vshll.u32 %v14813_v42, 16  ;;  %v9747_v16 = vshrl.u32 %v9730_v7, 16 }
 0x627   : > { %v9523_v13 = vld [vmem:[#allocation2 + $0x48] sm:$0xe]  ;;  %v11638_v22 = vor.u32 %v11908_v29, %v11637_v41  ;;  %v9331_v11 = vld [vmem:[#allocation2 + $0x4c] sm:$0x1]  ;;  %9220 = vst [vmem:[#allocation2 + $0x54] sm:$0x1] %v9219_v19  ;;  %v8834_v0 = vadd.f32 %v14793_v32, %v8591_v23 }
 0x628   : > { %v11666_v39 = vrot.slane %v9523_v13, 9  ;;  %v9137_v56 = vshrl.u32 %v9077_v20, 16  ;;  %v9564_v48 = vrot.slane %v9331_v11, 5  ;;  %v9140_v15 = vshll.u32 %v9077_v20, 16  ;;  %v9330_v8 = vld [vmem:[#allocation2 + $0x48] sm:$0xf] }
 0x629   : > { %11649 = vmatmul.msk.bf16.gmra.mxu2 %vm433_vm2, %v11638_v22  ;;  %v8987_v30 = vadd.f32 %v14782_v58, %v8834_v0  ;;  %v9407_v27 = vshrl.u32 %v9330_v8, 16  ;;  %v9410_v32 = vshll.u32 %v9330_v8, 16  ;;  %11658 = vmatmul.msk.bf16.gmra.mxu3 %vm433_vm2, %v9460_v47  ;;  %v11926_v58 = vld [vmem:[%s15176_s3 + $0x40] sm:$0xff]  ;;  %v9400_v55 = vrot.slane %v9399_v50, 4  ;;  %v11691_v43 = vld [vmem:[#allocation2 + $0x48] sm:$0xf] }
 0x62a   : > { %v9139_v37 = vrot.slane %v9137_v56, 7  ;;  %v9565_v9 = vsel %vm12186_vm3, %v11666_v39, %v9564_v48  ;;  %v8476_v6 = vpop.f32.mrf.mxu2  ;;  %v9416_v28 = vshll.u32 %v9331_v11, 16  ;;  %10435 = vmatpush.bf16.msrb.mxu2 %v11926_v58  ;;  %v9404_v18 = vrot.slane %v9402_v36, 5  ;;  %v11924_v26 = vld [vmem:[%s15176_s3 + $0x30] sm:$0xff]  ;;  %v11925_v19 = vld [vmem:[%s15176_s3 + $0x38] sm:$0xff] }
 0x62b   : > { %v9582_v63 = vunpack.c.l.b16 %v9565_v9  ;;  %v8997_v60 = vmax.f32 %v8987_v30, 0.0  ;;  %v9409_v46 = vrot.slane %v9407_v27, 4  ;;  %v9412_v1 = vrot.slane %v9410_v32, 5  ;;  %v9732_v29 = vld [vmem:[#allocation2 + $0x30] sm:$0xf]  ;;  %10111 = vmatpush.bf16.msra.mxu0 %v11924_v26  ;;  %10309 = vmatpush.bf16.msra.mxu1 %v11925_v19 }
 0x62c   : > { %v9142_v3 = vor.u32 %v9140_v15, %v9139_v37  ;;  %v9143_v17 = vrot.slane %v9139_v37, 4  ;;  %v9405_v24 = vsel %vm12237_vm6, %v9400_v55, %v9404_v18  ;;  %v9418_v10 = vrot.slane %v9416_v28, 5  ;;  %v9230_v39 = vld [vmem:[#allocation2 + $0x64] sm:$0x1]  ;;  %v14864_v8 = vld [vmem:[#allocation2 + $0x2c] sm:$0x1] }
 0x62d   : > { %v9587_v12 = vpack.c.b16 %v9582_v63, %v9581_v38  ;;  %v9078_v52 = vpack.c.bf16 %v8997_v60, %v8997_v60  ;;  %v11915_v54 = vld [vmem:[#allocation2 + $0x4c] sm:$0xf0]  ;;  %v9413_v25 = vor.u32 %v9412_v1, %v9409_v46  ;;  %v9750_v57 = vshll.u32 %v9730_v7, 16  ;;  %v14873_v7 = vld [vmem:[#allocation2 + $0x34] sm:$0x1] }
 0x62e   : > { %v9222_v42 = vsel %vm12906_vm13, %v9142_v3, %v9221_v31  ;;  %v9225_v62 = vsel %vm12864_vm9, %v9143_v17, %v9224_v34  ;;  %v11692_v14 = vor.u32 %v11915_v54, %v11691_v43  ;;  %v9524_v40 = vld [vmem:[#allocation2 + $0x50] sm:$0xe]  ;;  %v14849_v2 = vld [vmem:[#allocation2 + $0x54] sm:$0x1]  ;;  %v9749_v13 = vrot.slane %v9747_v16, 4 }
 0x62f   : > { %9223 = vst [vmem:[#allocation2 + $0x58] sm:$0xf] %v9222_v42  ;;  %v9145_v44 = vshrl.u32 %v9078_v52, 16  ;;  %11677 = vmatmul.msk.bf16.gmra.mxu0 %vm433_vm2, %v9587_v12  ;;  %v9414_v49 = vrot.slane %v9413_v25, 4  ;;  %v9332_v35 = vld [vmem:[#allocation2 + $0x50] sm:$0xf]  ;;  %v9455_v30 = vunpack.c.l.b16 %v9405_v24 }
 0x630   : > { %9226 = vst [vmem:[#allocation2 + $0x5c] sm:$0x1] %v9225_v62  ;;  %11703 = vmatmul.msk.bf16.gmra.mxu1 %vm433_vm2, %v11692_v14  ;;  %v9148_v5 = vshll.u32 %v9078_v52, 16  ;;  %v9421_v21 = vshrl.u32 %v9332_v35, 16  ;;  %v9424_v45 = vshll.u32 %v9332_v35, 16  ;;  %v11667_v23 = vrot.slane %v9524_v40, 9 }
 0x631   : > { %v9147_v53 = vrot.slane %v9145_v44, 7  ;;  %v9419_v20 = vsel %vm12237_vm6, %v9414_v49, %v9418_v10  ;;  %v9568_v41 = vrot.slane %v14849_v2, 5  ;;  %v9752_v47 = vrot.slane %v9750_v57, 5  ;;  %v11641_v0 = vld [vmem:[#allocation2 + $0x50] sm:$0xf] }
 0x632   : > { %v9456_v56 = vunpack.c.l.b16 %v9419_v20  ;;  %v9423_v48 = vrot.slane %v9421_v21, 4  ;;  %v9426_v15 = vrot.slane %v9424_v45, 5  ;;  %v9761_v31 = vshrl.u32 %v9732_v29, 16  ;;  %v10141_v28 = vld [vmem:[#allocation2 + $0x30] sm:$0xf] }
 0x633   : > { %v9150_v22 = vor.u32 %v9148_v5, %v9147_v53  ;;  %v9151_v11 = vrot.slane %v9147_v53, 4  ;;  %v9569_v32 = vsel %vm12186_vm3, %v11667_v23, %v9568_v41  ;;  %v9753_v33 = vor.u32 %v9752_v47, %v9749_v13  ;;  %v10143_v40 = vld [vmem:[#allocation2 + $0x38] sm:$0xf]  ;;  %v14881_v19 = vld [vmem:[#allocation2 + $0x3c] sm:$0x1] }
 0x634   : > { %v9461_v36 = vpack.c.b16 %v9456_v56, %v9455_v30  ;;  %v9427_v61 = vor.u32 %v9426_v15, %v9423_v48  ;;  %v9756_v58 = vshll.u32 %v14864_v8, 16  ;;  %v9763_v55 = vrot.slane %v9761_v31, 4  ;;  %v11920_v31 = vld [vmem:[#allocation2 + $0x34] sm:$0xf0] }
 0x635   : > { %v9228_v50 = vsel %vm12906_vm13, %v9150_v22, %v9227_v51  ;;  %v9231_v37 = vsel %vm12864_vm9, %v9151_v11, %v9230_v39  ;;  %v9764_v1 = vshll.u32 %v9732_v29, 16  ;;  %v9583_v42 = vunpack.c.l.b16 %v9569_v32  ;;  %v14883_v29 = vld [vmem:[#allocation2 + $0x34] sm:$0x1] }
 0x636   : > { %v11909_v9 = vld [vmem:[#allocation2 + $0x54] sm:$0xf0]  ;;  %9229 = vst [vmem:[#allocation2 + $0x60] sm:$0xf] %v9228_v50  ;;  %v9430_v54 = vshll.u32 %v14849_v2, 16  ;;  %v9754_v14 = vrot.slane %v9753_v33, 4 }
 0x637   : > { %v9525_v27 = vld [vmem:[#allocation2 + $0x58] sm:$0xe]  ;;  %v11642_v6 = vor.u32 %v11909_v9, %v11641_v0  ;;  %v9335_v38 = vld [vmem:[#allocation2 + $0x5c] sm:$0x1]  ;;  %9232 = vst [vmem:[#allocation2 + $0x64] sm:$0x1] %v9231_v37 }
 0x638   : > { %v11668_v63 = vrot.slane %v9525_v27, 9  ;;  %v9572_v3 = vrot.slane %v9335_v38, 5  ;;  %v9334_v17 = vld [vmem:[#allocation2 + $0x58] sm:$0xf]  ;;  %v9444_v12 = vshll.u32 %v9335_v38, 16  ;;  %v9766_v18 = vrot.slane %v9764_v1, 5 }
 0x639   : > { %11650 = vmatmul.msk.bf16.gmra.mxu2 %vm433_vm2, %v11642_v6  ;;  %v9435_v60 = vshrl.u32 %v9334_v17, 16  ;;  %v9438_v46 = vshll.u32 %v9334_v17, 16  ;;  %11659 = vmatmul.msk.bf16.gmra.mxu3 %vm433_vm2, %v9461_v36  ;;  %v9770_v25 = vshll.u32 %v14873_v7, 16  ;;  %v11695_v44 = vld [vmem:[#allocation2 + $0x58] sm:$0xf]  ;;  %v9428_v24 = vrot.slane %v9427_v61, 4 }
 0x63a   : > { %v9573_v34 = vsel %vm12186_vm3, %v11668_v63, %v9572_v3  ;;  %v10158_v10 = vshrl.u32 %v10141_v28, 16  ;;  %v9446_v57 = vrot.slane %v9444_v12, 5  ;;  %v9758_v53 = vrot.slane %v9756_v58, 5  ;;  %v9734_v50 = vld [vmem:[#allocation2 + $0x38] sm:$0xf] }
 0x63b   : > { %v9584_v62 = vunpack.c.l.b16 %v9573_v34  ;;  %v9437_v52 = vrot.slane %v9435_v60, 4  ;;  %v9440_v43 = vrot.slane %v9438_v46, 5  ;;  %v9767_v5 = vor.u32 %v9766_v18, %v9763_v55  ;;  %v14897_v63 = vld [vmem:[#allocation2 + $0x28] sm:$0xe]  ;;  %v9736_v36 = vld [vmem:[#allocation2 + $0x40] sm:$0xf] }
 0x63c   : > { %v10161_v21 = vshll.u32 %v10141_v28, 16  ;;  %v10160_v2 = vrot.slane %v10158_v10, 4  ;;  %v10172_v20 = vshrl.u32 %v10143_v40, 16  ;;  %v9772_v41 = vrot.slane %v9770_v25, 5  ;;  %v11737_v33 = vld [vmem:[#allocation2 + $0x30] sm:$0xf] }
 0x63d   : > { %v9588_v16 = vpack.c.b16 %v9584_v62, %v9583_v42  ;;  %v9441_v49 = vor.u32 %v9440_v43, %v9437_v52  ;;  %v11916_v35 = vld [vmem:[#allocation2 + $0x5c] sm:$0xf0]  ;;  %v9768_v23 = vrot.slane %v9767_v5, 4  ;;  %v10175_v22 = vshll.u32 %v10143_v40, 16  ;;  %v9929_v58 = vld [vmem:[#allocation2 + $0x30] sm:$0xe] }
 0x63e   : > { %v11696_v45 = vor.u32 %v11916_v35, %v11695_v44  ;;  %v10163_v13 = vrot.slane %v10161_v21, 5  ;;  %v9432_v11 = vrot.slane %v9430_v54, 5  ;;  %v9759_v39 = vsel %vm12237_vm6, %v9754_v14, %v9758_v53  ;;  %v14899_v55 = vld [vmem:[#allocation2 + $0x44] sm:$0x1]  ;;  %v14903_v52 = vld [vmem:[#allocation2 + $0x3c] sm:$0x1] }
 0x63f   : > { %v9442_v26 = vrot.slane %v9441_v49, 4  ;;  %11678 = vmatmul.msk.bf16.gmra.mxu0 %vm433_vm2, %v9588_v16  ;;  %v10174_v56 = vrot.slane %v10172_v20, 4  ;;  %v9773_v47 = vsel %vm12237_vm6, %v9768_v23, %v9772_v41  ;;  %v10177_v48 = vrot.slane %v10175_v22, 5  ;;  %v10145_v14 = vld [vmem:[#allocation2 + $0x40] sm:$0xf] }
 0x640   : > { %11704 = vmatmul.msk.bf16.gmra.mxu1 %vm433_vm2, %v11696_v45  ;;  %v10164_v0 = vor.u32 %v10163_v13, %v10160_v2  ;;  %v10181_v15 = vshll.u32 %v14881_v19, 16  ;;  %v9433_v37 = vsel %vm12237_vm6, %v9428_v24, %v9432_v11  ;;  %v9862_v30 = vunpack.c.l.b16 %v9773_v47  ;;  %v10147_v16 = vld [vmem:[#allocation2 + $0x48] sm:$0xf] }
 0x641   : > { %v9447_v51 = vsel %vm12237_vm6, %v9442_v26, %v9446_v57  ;;  %v10167_v9 = vshll.u32 %v14883_v29, 16  ;;  %v10178_v6 = vor.u32 %v10177_v48, %v10174_v56  ;;  %v9861_v38 = vunpack.c.l.b16 %v9759_v39  ;;  %v9738_v56 = vld [vmem:[#allocation2 + $0x48] sm:$0xf]  ;;  %v14914_v48 = vld [vmem:[#allocation2 + $0x4c] sm:$0x1] }
 0x642   : > { %v9458_v27 = vunpack.c.l.b16 %v9447_v51  ;;  %v9775_v32 = vshrl.u32 %v9734_v50, 16  ;;  %v9778_v3 = vshll.u32 %v9734_v50, 16  ;;  %v9457_v17 = vunpack.c.l.b16 %v9433_v37 }
 0x643   : > { %v10165_v61 = vrot.slane %v10164_v0, 4  ;;  %v10179_v60 = vrot.slane %v10178_v6, 4  ;;  %v10183_v46 = vrot.slane %v10181_v15, 5  ;;  %v9869_v34 = vpack.c.b16 %v9862_v30, %v9861_v38  ;;  %v14920_v30 = vld [vmem:[#allocation2 + $0x44] sm:$0x1] }
 0x644   : > { %v10169_v12 = vrot.slane %v10167_v9, 5  ;;  %v9777_v1 = vrot.slane %v9775_v32, 4  ;;  %v9780_v28 = vrot.slane %v9778_v3, 5  ;;  %v9462_v42 = vpack.c.b16 %v9458_v27, %v9457_v17  ;;  %v9740_v38 = vld [vmem:[#allocation2 + $0x50] sm:$0xf] }
 0x645   : > { %v10184_v62 = vsel %vm12237_vm6, %v10179_v60, %v10183_v46  ;;  %v9789_v43 = vshrl.u32 %v9736_v36, 16  ;;  %v9792_v54 = vshll.u32 %v9736_v36, 16  ;;  %v11738_v18 = vor.u32 %v11920_v31, %v11737_v33 }
 0x646   : > { %v11715_v25 = vrot.slane %v14897_v63, 9  ;;  %v9781_v40 = vor.u32 %v9780_v28, %v9777_v1  ;;  %v10170_v44 = vsel %vm12237_vm6, %v10165_v61, %v10169_v12  ;;  %v9798_v10 = vshll.u32 %v14899_v55, 16  ;;  %v14930_v28 = vld [vmem:[#allocation2 + $0x54] sm:$0x1] }
 0x647   : > { %v9791_v24 = vrot.slane %v9789_v43, 4  ;;  %v9794_v49 = vrot.slane %v9792_v54, 5  ;;  %v10273_v35 = vunpack.c.l.b16 %v10184_v62  ;;  %v11716_v57 = vrot.slane %v9929_v58, 9  ;;  %v10151_v62 = vld [vmem:[#allocation2 + $0x58] sm:$0xf] }
 0x648   : > { %v9784_v53 = vshll.u32 %v14903_v52, 16  ;;  %v10186_v5 = vshrl.u32 %v10145_v14, 16  ;;  %v9958_v21 = vrot.slane %v14873_v7, 5  ;;  %v10189_v26 = vshll.u32 %v10145_v14, 16 }
 0x649   : > { %11711 = vmatmul.msk.bf16.vlgmr.msra.gmra.mxu2 %vm433_vm2, %v9869_v34  ;;  %11660 = vmatmul.msk.bf16.gmra.mxu3 %vm433_vm2, %v9462_v42  ;;  %v9795_v45 = vor.u32 %v9794_v49, %v9791_v24  ;;  %v10200_v2 = vshrl.u32 %v10147_v16, 16  ;;  %v10272_v20 = vunpack.c.l.b16 %v10170_v44  ;;  %v9782_v23 = vrot.slane %v9781_v40, 4  ;;  %v9930_v49 = vld [vmem:[#allocation2 + $0x38] sm:$0xe] }
 0x64a   : > { %v10188_v41 = vrot.slane %v10186_v5, 4  ;;  %v10203_v13 = vshll.u32 %v10147_v16, 16  ;;  %v9954_v22 = vrot.slane %v14864_v8, 5  ;;  %v9800_v51 = vrot.slane %v9798_v10, 5  ;;  %v14934_v16 = vld [vmem:[#allocation2 + $0x4c] sm:$0x1] }
 0x64b   : > { %v9796_v11 = vrot.slane %v9795_v45, 4  ;;  %v10191_v39 = vrot.slane %v10189_v26, 5  ;;  %v10280_v47 = vpack.c.b16 %v10273_v35, %v10272_v20  ;;  %v9786_v0 = vrot.slane %v9784_v53, 5  ;;  %v9931_v53 = vld [vmem:[#allocation2 + $0x40] sm:$0xe] }
 0x64c   : > { %v10202_v15 = vrot.slane %v10200_v2, 4  ;;  %v10205_v50 = vrot.slane %v10203_v13, 5  ;;  %v9959_v7 = vsel %vm12186_vm3, %v11716_v57, %v9958_v21  ;;  %v9803_v31 = vshrl.u32 %v9738_v56, 16 }
 0x64d   : > { %v9801_v37 = vsel %vm12237_vm6, %v9796_v11, %v9800_v51  ;;  %v9787_v8 = vsel %vm12237_vm6, %v9782_v23, %v9786_v0  ;;  %v10192_v9 = vor.u32 %v10191_v39, %v10188_v41  ;;  %v10209_v6 = vshll.u32 %v14914_v48, 16  ;;  %v11921_v41 = vld [vmem:[#allocation2 + $0x44] sm:$0xf0]  ;;  %v11741_v39 = vld [vmem:[#allocation2 + $0x40] sm:$0xf] }
 0x64e   : > { %v10206_v27 = vor.u32 %v10205_v50, %v10202_v15  ;;  %v9806_v63 = vshll.u32 %v9738_v56, 16  ;;  %v9955_v36 = vsel %vm12186_vm3, %v11715_v25, %v9954_v22  ;;  %v9864_v32 = vunpack.c.l.b16 %v9801_v37 }
 0x64f   : > { %11755 = vmatmul.msk.bf16.vlgmr.msra.gmra.mxu0 %vm433_vm2, %v11738_v18  ;;  %v10195_v3 = vshll.u32 %v14920_v30, 16  ;;  %v9988_v17 = vunpack.c.l.b16 %v9959_v7  ;;  %v9863_v33 = vunpack.c.l.b16 %v9787_v8  ;;  %v10193_v60 = vrot.slane %v10192_v9, 4  ;;  %v10149_v18 = vld [vmem:[#allocation2 + $0x50] sm:$0xf]  ;;  %v14944_v7 = vld [vmem:[#allocation2 + $0x5c] sm:$0x1] }
 0x650   : > { %11765 = vmatmul.msk.bf16.vlgmr.msra.gmra.mxu1 %vm433_vm2, %v10280_v47  ;;  %v10207_v61 = vrot.slane %v10206_v27, 4  ;;  %v9805_v46 = vrot.slane %v9803_v31, 4  ;;  %v9808_v58 = vrot.slane %v9806_v63, 5  ;;  %v9817_v34 = vshrl.u32 %v9740_v38, 16  ;;  %v9744_v63 = vld [vmem:[#allocation2 + $0x60] sm:$0xf] }
 0x651   : > { %v9987_v12 = vunpack.c.l.b16 %v9955_v36  ;;  %v10211_v1 = vrot.slane %v10209_v6, 5  ;;  %v9820_v42 = vshll.u32 %v9740_v38, 16  ;;  %v9870_v43 = vpack.c.b16 %v9864_v32, %v9863_v33  ;;  %v9742_v38 = vld [vmem:[#allocation2 + $0x58] sm:$0xf]  ;;  %v14948_v36 = vld [vmem:[#allocation2 + $0x54] sm:$0x1] }
 0x652   : > { %v10197_v54 = vrot.slane %v10195_v3, 5  ;;  %v9819_v14 = vrot.slane %v9817_v34, 4  ;;  %v9809_v10 = vor.u32 %v9808_v58, %v9805_v46  ;;  %v9826_v35 = vshll.u32 %v14930_v28, 16 }
 0x653   : > { %v9995_v25 = vpack.c.b16 %v9988_v17, %v9987_v12  ;;  %v10212_v40 = vsel %vm12237_vm6, %v10207_v61, %v10211_v1  ;;  %v9822_v44 = vrot.slane %v9820_v42, 5  ;;  %v10228_v57 = vshrl.u32 %v10151_v62, 16 }
 0x654   : > { %v10198_v24 = vsel %vm12237_vm6, %v10193_v60, %v10197_v54  ;;  %v10214_v21 = vshrl.u32 %v10149_v18, 16  ;;  %v10217_v45 = vshll.u32 %v10149_v18, 16  ;;  %v10231_v26 = vshll.u32 %v10151_v62, 16  ;;  %v10153_v62 = vld [vmem:[#allocation2 + $0x60] sm:$0xf] }
 0x655   : > { %v9823_v5 = vor.u32 %v9822_v44, %v9819_v14  ;;  %v10275_v2 = vunpack.c.l.b16 %v10212_v40  ;;  %v9812_v20 = vshll.u32 %v14934_v16, 16  ;;  %v10230_v23 = vrot.slane %v10228_v57, 4 }
 0x656   : > { %v11717_v13 = vrot.slane %v9930_v49, 9  ;;  %v9962_v22 = vrot.slane %v14903_v52, 5  ;;  %v10233_v51 = vrot.slane %v10231_v26, 5  ;;  %v10274_v56 = vunpack.c.l.b16 %v10198_v24 }
 0x657   : > { %v9824_v11 = vrot.slane %v9823_v5, 4  ;;  %v11718_v47 = vrot.slane %v9931_v53, 9  ;;  %v9966_v0 = vrot.slane %v14899_v55, 5  ;;  %v9810_v15 = vrot.slane %v9809_v10, 4  ;;  %v14962_v53 = vld [vmem:[#allocation2 + $0x64] sm:$0x1] }
 0x658   : > { %v9828_v50 = vrot.slane %v9826_v35, 5  ;;  %v10216_v37 = vrot.slane %v10214_v21, 4  ;;  %v10219_v8 = vrot.slane %v10217_v45, 5  ;;  %v11742_v9 = vor.u32 %v11921_v41, %v11741_v39  ;;  %v14964_v21 = vld [vmem:[#allocation2 + $0x5c] sm:$0x1] }
 0x659   : > { %11712 = vmatmul.msk.bf16.gmra.mxu2 %vm433_vm2, %v9870_v43  ;;  %11729 = vmatmul.msk.bf16.vlgmr.msrb.gmra.mxu3 %vm433_vm2, %v9995_v25  ;;  %v10281_v27 = vpack.c.b16 %v10275_v2, %v10274_v56  ;;  %v9814_v31 = vrot.slane %v9812_v20, 5  ;;  %v10234_v6 = vor.u32 %v10233_v51, %v10230_v23  ;;  %v9963_v55 = vsel %vm12186_vm3, %v11717_v13, %v9962_v22  ;;  %v10155_v25 = vld [vmem:[#allocation2 + $0x68] sm:$0xf]  ;;  %v9933_v51 = vld [vmem:[#allocation2 + $0x50] sm:$0xe] }
 0x65a   : > { %v9829_v52 = vsel %vm12237_vm6, %v9824_v11, %v9828_v50  ;;  %v9967_v32 = vsel %vm12186_vm3, %v11718_v47, %v9966_v0  ;;  %v10237_v17 = vshll.u32 %v14944_v7, 16  ;;  %v10220_v33 = vor.u32 %v10219_v8, %v10216_v37  ;;  %v11922_v47 = vld [vmem:[#allocation2 + $0x54] sm:$0xf0]  ;;  %v11745_v8 = vld [vmem:[#allocation2 + $0x50] sm:$0xf] }
 0x65b   : > { %v9815_v3 = vsel %vm12237_vm6, %v9810_v15, %v9814_v31  ;;  %v9831_v61 = vshrl.u32 %v9742_v38, 16  ;;  %v9834_v60 = vshll.u32 %v9742_v38, 16  ;;  %v9845_v46 = vshrl.u32 %v9744_v63, 16 }
 0x65c   : > { %v9866_v58 = vunpack.c.l.b16 %v9829_v52  ;;  %v10223_v34 = vshll.u32 %v14948_v36, 16  ;;  %v10235_v12 = vrot.slane %v10234_v6, 4  ;;  %v9848_v1 = vshll.u32 %v9744_v63, 16 }
 0x65d   : > { %v9847_v42 = vrot.slane %v9845_v46, 4  ;;  %v9989_v43 = vunpack.c.l.b16 %v9963_v55  ;;  %v9865_v54 = vunpack.c.l.b16 %v9815_v3  ;;  %v10239_v14 = vrot.slane %v10237_v17, 5  ;;  %v14973_v3 = vld [vmem:[#allocation2 + $0x64] sm:$0x1]  ;;  %v14975_v17 = vld [vmem:[#allocation2 + $0x6c] sm:$0x1] }
 0x65e   : > { %v9850_v18 = vrot.slane %v9848_v1, 5  ;;  %v9990_v40 = vunpack.c.l.b16 %v9967_v32  ;;  %v10221_v44 = vrot.slane %v10220_v33, 4  ;;  %v9833_v24 = vrot.slane %v9831_v61, 4 }
 0x65f   : > { %11756 = vmatmul.msk.bf16.gmra.mxu0 %vm433_vm2, %v11742_v9  ;;  %v9836_v49 = vrot.slane %v9834_v60, 5  ;;  %v9871_v10 = vpack.c.b16 %v9866_v58, %v9865_v54  ;;  %v10225_v35 = vrot.slane %v10223_v34, 5  ;;  %v10240_v57 = vsel %vm12237_vm6, %v10235_v12, %v10239_v14 }
 0x660   : > { %11766 = vmatmul.msk.bf16.gmra.mxu1 %vm433_vm2, %v10281_v27  ;;  %v10242_v5 = vshrl.u32 %v10153_v62, 16  ;;  %v9851_v45 = vor.u32 %v9850_v18, %v9847_v42  ;;  %v10245_v26 = vshll.u32 %v10153_v62, 16  ;;  %v10256_v2 = vshrl.u32 %v10155_v25, 16  ;;  %v9932_v27 = vld [vmem:[#allocation2 + $0x48] sm:$0xe] }
 0x661   : > { %v10259_v20 = vshll.u32 %v10155_v25, 16  ;;  %v9996_v23 = vpack.c.b16 %v9990_v40, %v9989_v43  ;;  %v10226_v41 = vsel %vm12237_vm6, %v10221_v44, %v10225_v35  ;;  %v9837_v13 = vor.u32 %v9836_v49, %v9833_v24 }
 0x662   : > { %v9854_v22 = vshll.u32 %v14962_v53, 16  ;;  %v10277_v11 = vunpack.c.l.b16 %v10240_v57  ;;  %v9840_v39 = vshll.u32 %v14964_v21, 16  ;;  %v10244_v56 = vrot.slane %v10242_v5, 4  ;;  %v11749_v57 = vld [vmem:[#allocation2 + $0x60] sm:$0xf] }
 0x663   : > { %v9852_v0 = vrot.slane %v9851_v45, 4  ;;  %v10247_v15 = vrot.slane %v10245_v26, 5  ;;  %v10258_v50 = vrot.slane %v10256_v2, 4  ;;  %v10261_v37 = vrot.slane %v10259_v20, 5  ;;  %v10339_v26 = vld [vmem:[#allocation2 + $0x30] sm:$0xe] }
 0x664   : > { %v10276_v9 = vunpack.c.l.b16 %v10226_v41  ;;  %v11720_v31 = vrot.slane %v9933_v51, 9  ;;  %v9838_v6 = vrot.slane %v9837_v13, 4  ;;  %v9856_v38 = vrot.slane %v9854_v22, 5  ;;  %v11923_v2 = vld [vmem:[#allocation2 + $0x64] sm:$0xf0] }
 0x665   : > { %v11746_v63 = vor.u32 %v11922_v47, %v11745_v8  ;;  %v9974_v55 = vrot.slane %v14930_v28, 5  ;;  %v9842_v32 = vrot.slane %v9840_v39, 5  ;;  %v10248_v61 = vor.u32 %v10247_v15, %v10244_v56  ;;  %v9935_v20 = vld [vmem:[#allocation2 + $0x60] sm:$0xe]  ;;  %v9934_v13 = vld [vmem:[#allocation2 + $0x58] sm:$0xe] }
 0x666   : > { %v10282_v52 = vpack.c.b16 %v10277_v11, %v10276_v9  ;;  %v9857_v33 = vsel %vm12237_vm6, %v9852_v0, %v9856_v38  ;;  %v10262_v60 = vor.u32 %v10261_v37, %v10258_v50  ;;  %v10265_v46 = vshll.u32 %v14975_v17, 16  ;;  %v10341_v38 = vld [vmem:[#allocation2 + $0x40] sm:$0xe] }
 0x667   : > { %v11719_v58 = vrot.slane %v9932_v27, 9  ;;  %v9970_v34 = vrot.slane %v14934_v16, 5  ;;  %v9843_v28 = vsel %vm12237_vm6, %v9838_v6, %v9842_v32  ;;  %v10251_v12 = vshll.u32 %v14973_v3, 16 }
 0x668   : > { %v9975_v1 = vsel %vm12186_vm3, %v11720_v31, %v9974_v55  ;;  %v9868_v42 = vunpack.c.l.b16 %v9857_v33  ;;  %v10249_v62 = vrot.slane %v10248_v61, 4  ;;  %v10263_v43 = vrot.slane %v10262_v60, 4  ;;  %v10342_v31 = vld [vmem:[#allocation2 + $0x48] sm:$0xe] }
 0x669   : > { %11713 = vmatmul.msk.bf16.gmra.mxu2 %vm433_vm2, %v9871_v10  ;;  %11730 = vmatmul.msk.bf16.gmra.mxu3 %vm433_vm2, %v9996_v23  ;;  %v10267_v54 = vrot.slane %v10265_v46, 5  ;;  %v9971_v14 = vsel %vm12186_vm3, %v11719_v58, %v9970_v34  ;;  %v9867_v18 = vunpack.c.l.b16 %v9843_v28  ;;  %v9992_v25 = vunpack.c.l.b16 %v9975_v1  ;;  %v10340_v10 = vld [vmem:[#allocation2 + $0x38] sm:$0xe] }
 0x66a   : > { %v10253_v40 = vrot.slane %v10251_v12, 5  ;;  %v9991_v16 = vunpack.c.l.b16 %v9971_v14  ;;  %v11770_v23 = vrot.slane %v10340_v10, 9  ;;  %v10369_v41 = vrot.slane %v14881_v19, 5  ;;  %v10344_v28 = vld [vmem:[#allocation2 + $0x58] sm:$0xe] }
 0x66b   : > { %v9872_v44 = vpack.c.b16 %v9868_v42, %v9867_v18  ;;  %v10268_v49 = vsel %vm12237_vm6, %v10263_v43, %v10267_v54  ;;  %v11769_v22 = vrot.slane %v10339_v26, 9  ;;  %v10365_v59 = vrot.slane %v14883_v29, 5  ;;  %v10343_v12 = vld [vmem:[#allocation2 + $0x50] sm:$0xe] }
 0x66c   : > { %v10254_v24 = vsel %vm12237_vm6, %v10249_v62, %v10253_v40  ;;  %v9997_v35 = vpack.c.b16 %v9992_v25, %v9991_v16  ;;  %v10279_v45 = vunpack.c.l.b16 %v10268_v49  ;;  %v11750_v11 = vor.u32 %v11923_v2, %v11749_v57 }
 0x66d   : > { %v10278_v5 = vunpack.c.l.b16 %v10254_v24  ;;  %v11722_v39 = vrot.slane %v9935_v20, 9  ;;  %v9982_v56 = vrot.slane %v14962_v53, 5  ;;  %v10370_v47 = vsel %vm12186_vm3, %v11770_v23, %v10369_v41  ;;  %v10345_v24 = vld [vmem:[#allocation2 + $0x60] sm:$0xe] }
 0x66e   : > { %v11721_v0 = vrot.slane %v9934_v13, 9  ;;  %v9978_v15 = vrot.slane %v14964_v21, 5  ;;  %v10366_v19 = vsel %vm12186_vm3, %v11769_v22, %v10365_v59  ;;  %v10399_v50 = vunpack.c.l.b16 %v10370_v47 }
 0x66f   : > { %11757 = vmatmul.msk.bf16.gmra.mxu0 %vm433_vm2, %v11746_v63  ;;  %v10283_v51 = vpack.c.b16 %v10279_v45, %v10278_v5  ;;  %v9983_v29 = vsel %vm12186_vm3, %v11722_v39, %v9982_v56  ;;  %v10398_v37 = vunpack.c.l.b16 %v10366_v19  ;;  %v11772_v63 = vrot.slane %v10342_v31, 9 }
 0x670   : > { %11767 = vmatmul.msk.bf16.gmra.mxu1 %vm433_vm2, %v10282_v52  ;;  %v9979_v53 = vsel %vm12186_vm3, %v11721_v0, %v9978_v15  ;;  %v9994_v8 = vunpack.c.l.b16 %v9983_v29  ;;  %v10377_v52 = vrot.slane %v14914_v48, 5  ;;  %v11771_v55 = vrot.slane %v10341_v38, 9 }
 0x671   : > { %v10406_v9 = vpack.c.b16 %v10399_v50, %v10398_v37  ;;  %v9993_v27 = vunpack.c.l.b16 %v9979_v53  ;;  %v10373_v32 = vrot.slane %v14920_v30, 5  ;;  %v11774_v48 = vrot.slane %v10344_v28, 9 }
 0x672   : > { %v10378_v33 = vsel %vm12186_vm3, %v11772_v63, %v10377_v52  ;;  %v10385_v30 = vrot.slane %v14944_v7, 5  ;;  %v11773_v42 = vrot.slane %v10343_v12, 9  ;;  %v10381_v62 = vrot.slane %v14948_v36, 5  ;;  %v10346_v7 = vld [vmem:[#allocation2 + $0x68] sm:$0xe] }
 0x673   : > { %v9998_v6 = vpack.c.b16 %v9994_v8, %v9993_v27  ;;  %v10374_v61 = vsel %vm12186_vm3, %v11771_v55, %v10373_v32  ;;  %v10401_v60 = vunpack.c.l.b16 %v10378_v33  ;;  %v10389_v57 = vrot.slane %v14973_v3, 5  ;;  %v15078_v32 = vld [vmem:[%s15177_s4] ss:$0 sm:$0xff] }
 0x674   : > { %v10400_v58 = vunpack.c.l.b16 %v10374_v61  ;;  %v10386_v43 = vsel %vm12186_vm3, %v11774_v48, %v10385_v30  ;;  %v10382_v14 = vsel %vm12186_vm3, %v11773_v42, %v10381_v62  ;;  %v11776_v5 = vrot.slane %v10346_v7, 9 }
 0x675   : > { %v10403_v18 = vunpack.c.l.b16 %v10386_v43  ;;  %v10402_v40 = vunpack.c.l.b16 %v10382_v14  ;;  %v10393_v45 = vrot.slane %v14975_v17, 5 }
 0x676   : > { %v10407_v34 = vpack.c.b16 %v10401_v60, %v10400_v58 }
 0x677   : > { %v10394_v2 = vsel %vm12186_vm3, %v11776_v5, %v10393_v45 }
 0x678   : > { %v10405_v41 = vunpack.c.l.b16 %v10394_v2 }
 0x679   : > { %11714 = vmatmul.msk.bf16.gmra.mxu2 %vm433_vm2, %v9872_v44  ;;  %11731 = vmatmul.msk.bf16.gmra.mxu3 %vm433_vm2, %v9997_v35  ;;  %v10408_v44 = vpack.c.b16 %v10403_v18, %v10402_v40  ;;  %v11775_v35 = vrot.slane %v10345_v24, 9 }
 0x67b   : > { %v10390_v26 = vsel %vm12186_vm3, %v11775_v35, %v10389_v57 }
 0x67c   : > { %v10404_v23 = vunpack.c.l.b16 %v10390_v26 }
 0x67f   : > { %11758 = vmatmul.msk.bf16.gmra.mxu0 %vm433_vm2, %v11750_v11  ;;  %v10409_v11 = vpack.c.b16 %v10405_v41, %v10404_v23 }
 0x680   : > { %11768 = vmatmul.msk.bf16.gmra.mxu1 %vm433_vm2, %v10283_v51 }
 0x689   : > { %11783 = vmatmul.msk.bf16.vlgmr.msrb.gmra.mxu2 %vm433_vm2, %v10406_v9  ;;  %11732 = vmatmul.msk.bf16.gmra.mxu3 %vm433_vm2, %v9998_v6 }
 0x68b   : > { %v15012_v21 = vpop.f32.mrf.mxu2 }
 0x68c   : > { %v9616_v16 = vpop.f32.mrf.mxu0  ;;  %v9301_v58 = vadd.f32 %v15078_v32, %v15012_v21 }
 0x68d   : > { %v9702_v49 = vpop.f32.mrf.mxu1 }
 0x693   : > { %v15020_v46 = vpop.f32.mrf.mxu2 }
 0x694   : > { %v9618_v20 = vpop.f32.mrf.mxu0  ;;  %v9303_v62 = vadd.f32 %v15078_v32, %v15020_v46 }
 0x695   : > { %v9704_v22 = vpop.f32.mrf.mxu1 }
 0x699   : > { %11784 = vmatmul.msk.bf16.gmra.mxu2 %vm433_vm2, %v10407_v34 }
 0x69b   : > { %v15023_v1 = vpop.f32.mrf.mxu2 }
 0x69c   : > { %v9490_v54 = vpop.f32.mrf.mxu3  ;;  %v9621_v3 = vpop.f32.mrf.mxu0  ;;  %v9306_v21 = vadd.f32 %v15078_v32, %v15023_v1 }
 0x69d   : > { %v9707_v17 = vpop.f32.mrf.mxu1  ;;  %v9510_v34 = vadd.f32 %v9490_v54, %v9301_v58 }
 0x69f   : > { %v9636_v12 = vadd.f32 %v9616_v16, %v9510_v34 }
 0x6a1   : > { %v9722_v14 = vadd.f32 %v9702_v49, %v9636_v12 }
 0x6a3   : > { %v15031_v25 = vpop.f32.mrf.mxu2 }
 0x6a4   : > { %v9492_v10 = vpop.f32.mrf.mxu3  ;;  %v9623_v47 = vpop.f32.mrf.mxu0 }
 0x6a5   : > { %v15049_v4 = vpop.f32.mrf.mxu1  ;;  %v9511_v43 = vadd.f32 %v9492_v10, %v9303_v62 }
 0x6a9   : > { %11785 = vmatmul.msk.bf16.gmra.mxu2 %vm433_vm2, %v10408_v44  ;;  %v9637_v44 = vadd.f32 %v9618_v20, %v9511_v43  ;;  %v9308_v20 = vadd.f32 %v15078_v32, %v15031_v25 }
 0x6ab   : > { %v9723_v57 = vadd.f32 %v9704_v22, %v9637_v44 }
 0x6ac   : > { %v15034_v36 = vpop.f32.mrf.mxu2  ;;  %v9495_v59 = vpop.f32.mrf.mxu3 }
 0x6ad   : > { %v15053_v19 = vpop.f32.mrf.mxu0  ;;  %v15055_v29 = vpop.f32.mrf.mxu1  ;;  %v9512_v35 = vadd.f32 %v9495_v59, %v9306_v21  ;;  %v9311_v34 = vadd.f32 %v15078_v32, %v15034_v36 }
 0x6af   : > { %v9638_v46 = vadd.f32 %v9621_v3, %v9512_v35 }
 0x6b1   : > { %v9724_v1 = vadd.f32 %v9707_v17, %v9638_v46 }
 0x6b4   : > { %v15042_v13 = vpop.f32.mrf.mxu2  ;;  %v9497_v39 = vpop.f32.mrf.mxu3 }
 0x6b5   : > { %v15059_v37 = vpop.f32.mrf.mxu0  ;;  %v15061_v9 = vpop.f32.mrf.mxu1  ;;  %v9513_v41 = vadd.f32 %v9497_v39, %v9308_v20  ;;  %v9313_v36 = vadd.f32 %v15078_v32, %v15042_v13 }
 0x6b7   : > { %v9639_v3 = vadd.f32 %v9623_v47, %v9513_v41 }
 0x6b9   : > { %11786 = vmatmul.msk.bf16.gmra.mxu2 %vm433_vm2, %v10409_v11  ;;  %v9725_v39 = vadd.f32 %v15049_v4, %v9639_v3 }
 0x6bc   : > { %v15045_v51 = vpop.f32.mrf.mxu2  ;;  %v15051_v0 = vpop.f32.mrf.mxu3 }
 0x6bd   : > { %v15065_v31 = vpop.f32.mrf.mxu0  ;;  %v15067_v38 = vpop.f32.mrf.mxu1  ;;  %v9514_v17 = vadd.f32 %v15051_v0, %v9311_v34  ;;  %v9316_v13 = vadd.f32 %v15078_v32, %v15045_v51 }
 0x6bf   : > { %v9640_v47 = vadd.f32 %v15053_v19, %v9514_v17 }
 0x6c1   : > { %v9726_v0 = vadd.f32 %v15055_v29, %v9640_v47 }
 0x6c4   : > { %v15047_v56 = vpop.f32.mrf.mxu2  ;;  %v15057_v50 = vpop.f32.mrf.mxu3 }
 0x6c5   : > { %v15073_v55 = vpop.f32.mrf.mxu0  ;;  %v15080_v33 = vpop.f32.mrf.mxu1 }
 0x6cc   : > { %v9900_v15 = vpop.f32.mrf.mxu2  ;;  %v15063_v27 = vpop.f32.mrf.mxu3 }
 0x6cd   : > { %v10113_v28 = vpop.f32.mrf.mxu0  ;;  %v10311_v48 = vpop.f32.mrf.mxu1  ;;  %v9920_v18 = vadd.f32 %v9900_v15, %v9722_v14 }
 0x6d4   : > { %v9902_v53 = vpop.f32.mrf.mxu2  ;;  %v15069_v63 = vpop.f32.mrf.mxu3 }
 0x6d5   : > { %v10115_v40 = vpop.f32.mrf.mxu0  ;;  %v10313_v54 = vpop.f32.mrf.mxu1  ;;  %v9921_v45 = vadd.f32 %v9902_v53, %v9723_v57 }
 0x6dc   : > { %v9905_v8 = vpop.f32.mrf.mxu2  ;;  %v10026_v61 = vpop.f32.mrf.mxu3 }
 0x6dd   : > { %v10046_v24 = vadd.f32 %v10026_v61, %v9920_v18  ;;  %v10118_v26 = vpop.f32.mrf.mxu0  ;;  %v10316_v11 = vpop.f32.mrf.mxu1  ;;  %v9922_v59 = vadd.f32 %v9905_v8, %v9724_v1 }
 0x6df   : > { %v10133_v5 = vadd.f32 %v10113_v28, %v10046_v24 }
 0x6e1   : > { %v10331_v10 = vadd.f32 %v10311_v48, %v10133_v5 }
 0x6e4   : > { %v9907_v6 = vpop.f32.mrf.mxu2  ;;  %v10028_v30 = vpop.f32.mrf.mxu3 }
 0x6e5   : > { %v10047_v49 = vadd.f32 %v10028_v30, %v9921_v45  ;;  %v10120_v28 = vpop.f32.mrf.mxu0  ;;  %v9923_v48 = vadd.f32 %v9907_v6, %v9725_v39  ;;  %v10318_v30 = vpop.f32.mrf.mxu1 }
 0x6e7   : > { %v10134_v15 = vadd.f32 %v10115_v40, %v10047_v49  ;;  %v9515_v40 = vadd.f32 %v15057_v50, %v9313_v36  ;;  %v9516_v50 = vadd.f32 %v15063_v27, %v9316_v13 }
 0x6e9   : > { %v10332_v61 = vadd.f32 %v10313_v54, %v10134_v15  ;;  %v9641_v24 = vadd.f32 %v15059_v37, %v9515_v40  ;;  %v9642_v37 = vadd.f32 %v15065_v31, %v9516_v50 }
 0x6eb   : > { %v9727_v29 = vadd.f32 %v15061_v9, %v9641_v24  ;;  %v9728_v20 = vadd.f32 %v15067_v38, %v9642_v37 }
 0x6ec   : > { %v15071_v52 = vpop.f32.mrf.mxu2  ;;  %v10031_v16 = vpop.f32.mrf.mxu3 }
 0x6ed   : > { %v10048_v53 = vadd.f32 %v10031_v16, %v9922_v59  ;;  %v10123_v44 = vpop.f32.mrf.mxu0  ;;  %v9924_v6 = vadd.f32 %v15071_v52, %v9726_v0  ;;  %v10321_v19 = vpop.f32.mrf.mxu1 }
 0x6ef   : > { %v10135_v12 = vadd.f32 %v10118_v26, %v10048_v53  ;;  %v9318_v26 = vadd.f32 %v15078_v32, %v15047_v56 }
 0x6f1   : > { %v10333_v43 = vadd.f32 %v10316_v11, %v10135_v12  ;;  %v9517_v9 = vadd.f32 %v15069_v63, %v9318_v26 }
 0x6f3   : > { %v9643_v31 = vadd.f32 %v15073_v55, %v9517_v9 }
 0x6f4   : > { %v15082_v60 = vpop.f32.mrf.mxu2  ;;  %v10033_v22 = vpop.f32.mrf.mxu3 }
 0x6f5   : > { %v10049_v8 = vadd.f32 %v10033_v22, %v9923_v48  ;;  %v9925_v52 = vadd.f32 %v15082_v60, %v9727_v29  ;;  %v10125_v45 = vpop.f32.mrf.mxu0  ;;  %v9729_v15 = vadd.f32 %v15080_v33, %v9643_v31 }
 0x6f7   : > { %v10136_v4 = vadd.f32 %v10120_v28, %v10049_v8 }
 0x6f9   : > { %v10334_v54 = vadd.f32 %v10318_v30, %v10136_v4 }
 0x6fc   : > { %v15086_v42 = vpop.f32.mrf.mxu2  ;;  %v10036_v62 = vpop.f32.mrf.mxu3 }
 0x6fd   : > { %v10050_v21 = vadd.f32 %v10036_v62, %v9924_v6  ;;  %v9926_v60 = vadd.f32 %v15086_v42, %v9728_v20  ;;  %v10128_v11 = vpop.f32.mrf.mxu0 }
 0x6ff   : > { %v10137_v5 = vadd.f32 %v10123_v44, %v10050_v21 }
 0x701   : > { %v10335_v49 = vadd.f32 %v10321_v19, %v10137_v5 }
 0x704   : > { %v15090_v7 = vpop.f32.mrf.mxu2  ;;  %v10038_v16 = vpop.f32.mrf.mxu3 }
 0x705   : > { %v10051_v46 = vadd.f32 %v10038_v16, %v9925_v52  ;;  %v9927_v59 = vadd.f32 %v15090_v7, %v9729_v15 }
 0x70c   : > { %v10437_v2 = vpop.f32.mrf.mxu2  ;;  %v10041_v27 = vpop.f32.mrf.mxu3 }
 0x70d   : > { %v10457_v23 = vadd.f32 %v10437_v2, %v10331_v10  ;;  %v10323_v2 = vpop.f32.mrf.mxu1  ;;  %v10052_v41 = vadd.f32 %v10041_v27, %v9926_v60 }
 0x70f   : > { %10465 = vst [vmem:[%s15099_s11] sm:$0xff] %v10457_v23  ;;  %v10138_v23 = vadd.f32 %v10125_v45, %v10051_v46  ;;  %v10139_v22 = vadd.f32 %v10128_v11, %v10052_v41 }
 0x711   : > { %v10336_v1 = vadd.f32 %v10323_v2, %v10138_v23 }
 0x714   : > { %v10439_v58 = vpop.f32.mrf.mxu2  ;;  %v10043_v38 = vpop.f32.mrf.mxu3 }
 0x715   : > { %v10458_v25 = vadd.f32 %v10439_v58, %v10332_v61  ;;  %v10326_v63 = vpop.f32.mrf.mxu1  ;;  %v10053_v3 = vadd.f32 %v10043_v38, %v9927_v59  ;;  %v10130_v61 = vpop.f32.mrf.mxu0 }
 0x716   : > { %v10337_v42 = vadd.f32 %v10326_v63, %v10139_v22 }
 0x717   : > { %10466 = vst [vmem:[%s15099_s11 + $0x8] sm:$0xff] %v10458_v25  ;;  %v10140_v58 = vadd.f32 %v10130_v61, %v10053_v3 }
 0x71c   : > { %v10442_v14 = vpop.f32.mrf.mxu2 }
 0x71d   : > { %v10459_v18 = vadd.f32 %v10442_v14, %v10333_v43  ;;  %v10328_v33 = vpop.f32.mrf.mxu1 }
 0x71e   : > { %v10338_v34 = vadd.f32 %v10328_v33, %v10140_v58 }
 0x71f   : > { %10467 = vst [vmem:[%s15099_s11 + $0x10] sm:$0xff] %v10459_v18 }
 0x724   : > { %v10444_v35 = vpop.f32.mrf.mxu2 }
 0x725   : > { %v10460_v57 = vadd.f32 %v10444_v35, %v10334_v54 }
 0x727   : > { %10468 = vst [vmem:[%s15099_s11 + $0x18] sm:$0xff] %v10460_v57 }
 0x72c   : > { %v10447_v10 = vpop.f32.mrf.mxu2 }
 0x72d   : > { %v10461_v51 = vadd.f32 %v10447_v10, %v10335_v49 }
 0x72f   : > { %10469 = vst [vmem:[%s15099_s11 + $0x20] sm:$0xff] %v10461_v51 }
 0x734   : > { %v10449_v56 = vpop.f32.mrf.mxu2 }
 0x735   : > { %v10462_v32 = vadd.f32 %v10449_v56, %v10336_v1 }
 0x737   : > { %10470 = vst [vmem:[%s15099_s11 + $0x28] sm:$0xff] %v10462_v32 }
 0x73c   : > { %v10452_v53 = vpop.f32.mrf.mxu2 }
 0x73d   : > { %v10463_v55 = vadd.f32 %v10452_v53, %v10337_v42 }
 0x73f   : > { %10471 = vst [vmem:[%s15099_s11 + $0x30] sm:$0xff] %v10463_v55 }
 0x744   : > { %v10454_v7 = vpop.f32.mrf.mxu2 }
 0x745   : > { %v10464_v25 = vadd.f32 %v10454_v7, %v10338_v34 }
 0x747   : > { %10472 = vst [vmem:[%s15099_s11 + $0x38] sm:$0xff] %v10464_v25 }
 0x748   : > { %12026 = shalt.err (!%p12023_p5)
}
 0x749   : > { %s12080_s9 = smov 128   ;;  %s12081_s11 = smov 8  }
 0x74a   : > { %11930 = dma.vmem_to_hbm [thread:$0]  (%p12152_p4), %s10489_s16, 1024, %s10491_s17, %s10474_s21, %s12080_s9, %s12080_s9, %s12081_s11  }
 0x74b PF: > { %p11936_p6 = scmp.ge.s32.totalorder %s12077_s23, 2  ;;  %s10505_s12 = sand.u32 1, %s12057_s18  }
 0x74c   : > { %s10506_s13 = scalar_lea.sflag [#allocation4], %s10505_s12 }
 0x74d   : > { %p11933_p7 = pnand %p11936_p6, %p12159_p8 }
 0x74f   : > { %p11934_p9 = pneg %p11933_p7 }
 0x751   : > { %12052 = dma.done.wait (%p11934_p9), %s10506_s13, 1024  }
 0x752   : > { %12054 = vsyncadd (%p11934_p9), %s10506_s13, 4294966272  ;;  %s18_s23 = sadd.s32 1, %s12077_s23   ;;  %s15199_s18 = smov %s12061_s19 }
 0x753   : > { %p15_p10 = scmp.ge.s32.totalorder %s18_s23, 4   ;;  %s15200_s19 = smov %s12065_s20 }
 0x754   : > { %s15201_s20 = smov %s12165_s6  ;;  %s15202_s21 = smov %s12073_s22 }
 0x755   : > { %s15203_s22 = smov %s15205_s26  ;;  %17 = sbr.rel (!%p15_p10) target bundleno = 4 (0x4), region = 129 }
 0x75a   :  { %10512 = vsyncpa [#allocation4], 1 }
 0x75b   :  { %10514 = vsyncpa [#allocation4 + $0x1], 1 }

</bundles_post_ra>
